<compile_context>
chip_gen: v5e
topology: v5e:2x2
jax: 0.10.0
libtpu: 0.0.40
codegen_flags: <defaults>
</compile_context>

<pallas_src>
import jax
import jax.numpy as jnp
from jax import lax
from jax.experimental import pallas as pl
from jax.experimental.pallas import tpu as pltpu

N = 23              # graph size, hard-coded in the reference module
NN = N * N          # 529
BATCH_TILE = 2048   # ~24 MB VMEM per step (double buffered); amortizes step overhead


# ---------------------------------------------------------------------------
# Kernel 1: batch-independent normalized attention (runs once per forward).
# ---------------------------------------------------------------------------
def attention_kernel(w_ref, adj_ref, att_ref):
    W = w_ref[...]                                    # (N, N, N) f32
    adj = adj_ref[...]                                # (N, N)    f32

    # adj[i, i] = 1  (functional self-loop insertion)
    ri = lax.broadcasted_iota(jnp.int32, (N, N), 0)
    ci = lax.broadcasted_iota(jnp.int32, (N, N), 1)
    adj = jnp.where(ri == ci, jnp.float32(1.0), adj)

    # min over last dim, clamp positive minima to zero, subtract
    min_value = jnp.min(W, axis=-1, keepdims=True)             # (N, N, 1)
    min_value = jnp.where(min_value > 0.0, jnp.float32(0.0), min_value)
    att = W - min_value                                        # (N, N, N)

    # attention[:, i, j] = 0 where adj[i, j] == 0
    att = jnp.where((adj != 0.0)[None, :, :], att, jnp.float32(0.0))

    # Row-normalize with one (N,N,1) reciprocal + an (N,N,N) multiply.
    # NOTE: like the PyTorch reference, a row whose unmasked entries are all
    # zero divides by zero (unreachable for torch.rand-style W > 0).
    row_sum = jnp.sum(att, axis=-1, keepdims=True)             # (N, N, 1)
    att_ref[...] = att * pl.reciprocal(row_sum, approx=False)


def _build_attention(W, adj):
    return pl.pallas_call(
        attention_kernel,
        out_shape=jax.ShapeDtypeStruct((N, N, N), jnp.float32),
        in_specs=[
            pl.BlockSpec(memory_space=pltpu.MemorySpace.VMEM),
            pl.BlockSpec(memory_space=pltpu.MemorySpace.VMEM),
        ],
        out_specs=pl.BlockSpec(memory_space=pltpu.MemorySpace.VMEM),
    )(W.astype(jnp.float32), adj.astype(jnp.float32))


# ---------------------------------------------------------------------------
# Kernel 2: hot loop — one plain lane-dense MXU matmul per batch tile,
# bf16x3 (3 MXU passes) instead of f32-HIGHEST (~6 passes).
# ---------------------------------------------------------------------------
def gat_matmul_kernel(h_hi_ref, h_lo_ref, x_ref, o_ref):
    # x_ref:   (tb, 529) f32 with x2[b, k*N + i] = data[b, k, i]   (NO transpose)
    # h_*_ref: (529, 529) bf16 hi/lo halves of
    #          H_T[k*N + i, i*N + m] = att[i, m, k]                (block diag)
    # o_ref:   (tb, 529) f32 with o[b, i*N + m] = sum_k att[i,m,k]*data[b,k,i]
    x = x_ref[...]
    x_hi = x.astype(jnp.bfloat16)
    x_lo = (x - x_hi.astype(jnp.float32)).astype(jnp.bfloat16)
    h_hi = h_hi_ref[...]
    h_lo = h_lo_ref[...]

    acc = jnp.dot(x_hi, h_hi, preferred_element_type=jnp.float32)
    acc = acc + jnp.dot(x_lo, h_hi, preferred_element_type=jnp.float32)
    acc = acc + jnp.dot(x_hi, h_lo, preferred_element_type=jnp.float32)
    o_ref[...] = acc


def _choose_batch_tile(B):
    """Batch tile: multiple of 8 (or == B), >=2 tiles when possible (v7x 2 TCs)."""
    if B <= 16:
        return B                       # single tile; block dims == full dims
    if B >= 2 * BATCH_TILE:
        return BATCH_TILE
    half = -(-B // 2)                  # ceil(B/2): guarantees >= 2 grid steps
    return min(BATCH_TILE, ((half + 7) // 8) * 8)


@jax.jit
def my_gat_forward(flow_x, adj, W):
    """flow_x: (B, N, N, C), adj: (N, N), W: (N, N, N) -> (B, N, N, 1) f32."""
    B = flow_x.shape[0]

    # ---- batch-independent attention, computed once in Pallas -------------
    att = _build_attention(W, adj)                              # (i, m, k)

    # Batch-independent layout glue (~1.1 MB, once per forward, plain JAX):
    # H_T[k*N + i, i2*N + m] = att[i, m, k] * (i == i2).  Contraction dim is
    # leading (plain MK x KN matmul) and the data transpose is folded into the
    # column indexing, so the wrapper never transposes the full batch.
    att_t = jnp.transpose(att, (2, 0, 1))                       # (k, i, m)
    eye = jnp.eye(N, dtype=jnp.float32)                         # (i, i2)
    h_t = (att_t[:, :, None, :] * eye[None, :, :, None]).reshape(NN, NN)
    # bf16x3 split of the (batch-invariant) weight, done once.
    h_hi = h_t.astype(jnp.bfloat16)
    h_lo = (h_t - h_hi.astype(jnp.float32)).astype(jnp.bfloat16)

    # ---- channel select only (no transpose!): one fused XLA copy ----------
    # x2[b, k*N + i] = flow_x[b, k, i, -1]; the reshape is a contiguous view.
    x2 = flow_x[..., -1].astype(jnp.float32).reshape(B, NN)     # (B, 529)

    tb = _choose_batch_tile(B)
    grid = (pl.cdiv(B, tb),)

    out2 = pl.pallas_call(
        gat_matmul_kernel,
        out_shape=jax.ShapeDtypeStruct((B, NN), jnp.float32),
        grid=grid,
        in_specs=[
            pl.BlockSpec((NN, NN), lambda b: (0, 0)),   # H hi, resident across grid
            pl.BlockSpec((NN, NN), lambda b: (0, 0)),   # H lo, resident across grid
            pl.BlockSpec((tb, NN), lambda b: (b, 0)),   # batch tile of x2
        ],
        out_specs=pl.BlockSpec((tb, NN), lambda b: (b, 0)),
        compiler_params=pltpu.CompilerParams(
            dimension_semantics=("parallel",),          # shard batch tiles across TCs
            vmem_limit_bytes=48 * 1024 * 1024,          # < 64 MiB (v7x physical)
        ),
    )(h_hi, h_lo, x2)

    # out2[b, i*N + m] == out[b, i, m]; reshape is a free contiguous view.
    return out2.reshape(B, N, N)[..., None]


# ---------------------------------------------------------------------------
# Pure-JAX reference of the PyTorch forward (exact f32 elementwise math).
# ---------------------------------------------------------------------------
def my_gat_reference(flow_x, adj, W):
    data = flow_x[..., -1].astype(jnp.float32)                       # (B, k, i)
    adj = adj.at[jnp.arange(N), jnp.arange(N)].set(1.0)
    min_value = jnp.min(W, axis=-1, keepdims=True)
    min_value = jnp.where(min_value > 0.0, 0.0, min_value)
    att = W - min_value
    att = jnp.where((adj != 0.0)[None, :, :], att, 0.0)
    att = att / jnp.sum(att, axis=-1, keepdims=True)
    data_t = jnp.transpose(data, (0, 2, 1))                          # (B, i, k)
    out = jnp.sum(att[None, :, :, :] * data_t[:, :, None, :], axis=-1)
    return out[..., None]


if __name__ == "__main__":
    key = jax.random.PRNGKey(0)
    k_w, k_x, k_adj = jax.random.split(key, 3)

    batch = 2
    channels = 3

    # torch.rand-style parameter and small example inputs
    W_param = jax.random.uniform(k_w, (N, N, N), dtype=jnp.float32)
    flow_x = jax.random.uniform(k_x, (batch, N, N, channels), dtype=jnp.float32)
    adj = (jax.random.uniform(k_adj, (N, N)) > 0.5).astype(jnp.float32)

    out = my_gat_forward(flow_x, adj, W_param)
    out = jax.block_until_ready(out)

    ref = my_gat_reference(flow_x, adj, W_param)
    assert out.shape == (batch, N, N, 1), out.shape
    err = float(jnp.max(jnp.abs(out - ref)))
    assert jnp.allclose(out, ref, rtol=1e-4, atol=1e-5), f"mismatch vs reference, max abs err={err}"

    print("KERNEL_OK")
</pallas_src>

<mosaic_0001>
module attributes {stable_mosaic.version = 11 : i64} {
  func.func @attention_kernel(%arg0: memref<23x23x23xf32, #tpu.memory_space<vmem>>, %arg1: memref<23x23xf32, #tpu.memory_space<vmem>>, %arg2: memref<23x23x23xf32, #tpu.memory_space<vmem>>) attributes {dimension_semantics = [], scalar_prefetch = 0 : i64, scratch_operands = 0 : i64, tpu.core_type = #tpu.core_type<tc>} {
    %c0 = arith.constant 0 : index
    %c0_0 = arith.constant 0 : index
    %c0_1 = arith.constant 0 : index
    %0 = vector.load %arg0[%c0, %c0_0, %c0_1] : memref<23x23x23xf32, #tpu.memory_space<vmem>>, vector<23x23x23xf32>
    %c0_2 = arith.constant 0 : index
    %c0_3 = arith.constant 0 : index
    %1 = vector.load %arg1[%c0_2, %c0_3] : memref<23x23xf32, #tpu.memory_space<vmem>>, vector<23x23xf32>
    %2 = tpu.iota {dimensions = array<i32: 0>} : vector<23x23xi32>
    %3 = tpu.iota {dimensions = array<i32: 1>} : vector<23x23xi32>
    %4 = arith.cmpi eq, %2, %3 : vector<23x23xi32>
    %cst = arith.constant 1.000000e+00 : f32
    %5 = vector.broadcast %cst : f32 to vector<23x23xf32>
    %6 = arith.select %4, %5, %1 : vector<23x23xi1>, vector<23x23xf32>
    %cst_4 = arith.constant dense<0x7F800000> : vector<23x23xf32>
    %7 = vector.multi_reduction <minimumf>, %0, %cst_4 [2] : vector<23x23x23xf32> to vector<23x23xf32>
    %8 = vector.shape_cast %7 : vector<23x23xf32> to vector<23x23x1xf32>
    %cst_5 = arith.constant 0.000000e+00 : f32
    %9 = vector.broadcast %cst_5 : f32 to vector<23x23x1xf32>
    %10 = arith.cmpf ogt, %8, %9 : vector<23x23x1xf32>
    %cst_6 = arith.constant 0.000000e+00 : f32
    %11 = vector.broadcast %cst_6 : f32 to vector<23x23x1xf32>
    %12 = arith.select %10, %11, %8 : vector<23x23x1xi1>, vector<23x23x1xf32>
    %13 = vector.broadcast %12 : vector<23x23x1xf32> to vector<23x23x23xf32>
    %14 = arith.subf %0, %13 : vector<23x23x23xf32>
    %cst_7 = arith.constant 0.000000e+00 : f32
    %15 = vector.broadcast %cst_7 : f32 to vector<23x23xf32>
    %16 = arith.cmpf one, %6, %15 : vector<23x23xf32>
    %17 = vector.shape_cast %16 : vector<23x23xi1> to vector<1x23x23xi1>
    %cst_8 = arith.constant 0.000000e+00 : f32
    %18 = vector.shape_cast %17 : vector<1x23x23xi1> to vector<1x23x23xi1>
    %19 = vector.broadcast %18 : vector<1x23x23xi1> to vector<23x23x23xi1>
    %20 = vector.broadcast %cst_8 : f32 to vector<23x23x23xf32>
    %21 = arith.select %19, %14, %20 : vector<23x23x23xi1>, vector<23x23x23xf32>
    %cst_9 = arith.constant dense<0.000000e+00> : vector<23x23xf32>
    %22 = vector.multi_reduction <add>, %21, %cst_9 [2] : vector<23x23x23xf32> to vector<23x23xf32>
    %23 = vector.shape_cast %22 : vector<23x23xf32> to vector<23x23x1xf32>
    %24 = tpu.reciprocal %23 : vector<23x23x1xf32> -> vector<23x23x1xf32>
    %25 = vector.broadcast %24 : vector<23x23x1xf32> to vector<23x23x23xf32>
    %26 = arith.mulf %21, %25 : vector<23x23x23xf32>
    %c0_10 = arith.constant 0 : index
    %c0_11 = arith.constant 0 : index
    %c0_12 = arith.constant 0 : index
    %27 = vector.load %arg2[%c0_10, %c0_11, %c0_12] : memref<23x23x23xf32, #tpu.memory_space<vmem>>, vector<23x23x23xf32>
    tpu.vector_store %arg2[%c0_10, %c0_11, %c0_12], %26 {strides = array<i32>} : memref<23x23x23xf32, #tpu.memory_space<vmem>>, vector<23x23x23xf32>,
    return
  }
}

module attributes {stable_mosaic.version = 11 : i64} {
  func.func @gat_matmul_kernel(%arg0: i32, %arg1: memref<529x529xbf16, #tpu.memory_space<vmem>>, %arg2: memref<529x529xbf16, #tpu.memory_space<vmem>>, %arg3: memref<2x529xf32, #tpu.memory_space<vmem>>, %arg4: memref<2x529xf32, #tpu.memory_space<vmem>>) attributes {dimension_semantics = [#tpu.dimension_semantics<parallel>], iteration_bounds = array<i64: 1>, scalar_prefetch = 0 : i64, scratch_operands = 0 : i64, tpu.core_type = #tpu.core_type<tc>, window_params = [{pipeline_mode = #tpu.pipeline_mode<synchronous>, transform_indices = @transform_0, window_bounds = array<i64: 529, 529>}, {pipeline_mode = #tpu.pipeline_mode<synchronous>, transform_indices = @transform_1, window_bounds = array<i64: 529, 529>}, {transform_indices = @transform_2, window_bounds = array<i64: 2, 529>}, {transform_indices = @transform_3, window_bounds = array<i64: 2, 529>}]} {
    %c0 = arith.constant 0 : index
    %c0_0 = arith.constant 0 : index
    %0 = vector.load %arg3[%c0, %c0_0] : memref<2x529xf32, #tpu.memory_space<vmem>>, vector<2x529xf32>
    %1 = arith.truncf %0 : vector<2x529xf32> to vector<2x529xbf16>
    %2 = arith.extf %1 : vector<2x529xbf16> to vector<2x529xf32>
    %3 = arith.subf %0, %2 : vector<2x529xf32>
    %4 = arith.truncf %3 : vector<2x529xf32> to vector<2x529xbf16>
    %c0_1 = arith.constant 0 : index
    %c0_2 = arith.constant 0 : index
    %5 = vector.load %arg1[%c0_1, %c0_2] : memref<529x529xbf16, #tpu.memory_space<vmem>>, vector<529x529xbf16>
    %c0_3 = arith.constant 0 : index
    %c0_4 = arith.constant 0 : index
    %6 = vector.load %arg2[%c0_3, %c0_4] : memref<529x529xbf16, #tpu.memory_space<vmem>>, vector<529x529xbf16>
    %cst = arith.constant dense<0.000000e+00> : vector<2x529xf32>
    %7 = tpu.matmul %1, %5, %cst {dimension_numbers = #tpu.dot_dimension_numbers<[1], [0], [0], [1], [0, 0, 1, 1], [], []>} : vector<2x529xbf16>, vector<529x529xbf16>, vector<2x529xf32> -> vector<2x529xf32>
    %cst_5 = arith.constant dense<0.000000e+00> : vector<2x529xf32>
    %8 = tpu.matmul %4, %5, %cst_5 {dimension_numbers = #tpu.dot_dimension_numbers<[1], [0], [0], [1], [0, 0, 1, 1], [], []>} : vector<2x529xbf16>, vector<529x529xbf16>, vector<2x529xf32> -> vector<2x529xf32>
    %9 = arith.addf %7, %8 : vector<2x529xf32>
    %cst_6 = arith.constant dense<0.000000e+00> : vector<2x529xf32>
    %10 = tpu.matmul %1, %6, %cst_6 {dimension_numbers = #tpu.dot_dimension_numbers<[1], [0], [0], [1], [0, 0, 1, 1], [], []>} : vector<2x529xbf16>, vector<529x529xbf16>, vector<2x529xf32> -> vector<2x529xf32>
    %11 = arith.addf %9, %10 : vector<2x529xf32>
    %c0_7 = arith.constant 0 : index
    %c0_8 = arith.constant 0 : index
    %12 = vector.load %arg4[%c0_7, %c0_8] : memref<2x529xf32, #tpu.memory_space<vmem>>, vector<2x529xf32>
    tpu.vector_store %arg4[%c0_7, %c0_8], %11 {strides = array<i32>} : memref<2x529xf32, #tpu.memory_space<vmem>>, vector<2x529xf32>,
    return
  }
  func.func @transform_0(%arg0: i32) -> (i32, i32) {
    %c0_i32 = arith.constant 0 : i32
    %c0_i32_0 = arith.constant 0 : i32
    %c0_i32_1 = arith.constant 0 : i32
    return %c0_i32, %c0_i32_0 : i32, i32
  }
  func.func @transform_1(%arg0: i32) -> (i32, i32) {
    %c0_i32 = arith.constant 0 : i32
    %c0_i32_0 = arith.constant 0 : i32
    %c0_i32_1 = arith.constant 0 : i32
    return %c0_i32, %c0_i32_0 : i32, i32
  }
  func.func @transform_2(%arg0: i32) -> (i32, i32) {
    %c0_i32 = arith.constant 0 : i32
    %c0_i32_0 = arith.constant 0 : i32
    return %arg0, %c0_i32 : i32, i32
  }
  func.func @transform_3(%arg0: i32) -> (i32, i32) {
    %c0_i32 = arith.constant 0 : i32
    %c0_i32_0 = arith.constant 0 : i32
    return %arg0, %c0_i32 : i32, i32
  }
}

</mosaic_0001>

<bundles_post_ra>
// kernel: my_gat_forward.2
= control target key start
LH: loop header
LB: loop body
LE: loop exit
PB: predicated region body
PF: predicated region fallthrough
CT: control target
= control target key end

     0   :  { %7 = vsyncpa [#allocation3], 0  ;;  %s4601_s0 = inlined_call_operand.hbm [shape: f32[23,23,23], index: 0, kind: input, shape index: {}]   ;;  %s4602_s1 = inlined_call_operand.hbm [shape: f32[23,23], index: 1, kind: input, shape index: {}]   ;;  %s4603_s2 = inlined_call_operand.vmem [shape: f32[23,23,23], index: 2, kind: output, shape index: {}]  }
   0x1   :  { %s13_s11 = sshll.u32 %s4601_s0, 4  ;;  %s14_s11 = int_to_ptr.hbm [resolvable:$true] %s13_s11 }
   0x2   :  { %8 = vsyncpa [#allocation5], 0  ;;  %s2132_s12 = smov [#allocation2]   ;;  %s26_s16 = sshll.u32 %s4602_s1, 4  ;;  %s27_s16 = int_to_ptr.hbm [resolvable:$true] %s26_s16 }
   0x3   :  { %s15_s13 = sshll.u32 %s2132_s12, 4  ;;  %s2133_s17 = smov 128   ;;  %s16_s13 = int_to_ptr.vmem [resolvable:$true] %s15_s13 }
   0x4   :  { %s2134_s18 = smov 8   ;;  %s2135_s19 = smov [#allocation4]  }
   0x5   :  { %21 = dma.hbm_to_vmem [thread:$0]  %s14_s11, 8832, %s16_s13, [#allocation3], %s2133_s17, %s2133_s17, %s2134_s18  }
   0x6   :  { %s28_s20 = sshll.u32 %s2135_s19, 4  ;;  %s29_s20 = int_to_ptr.vmem [resolvable:$true] %s28_s20 }
   0x7   :  { %34 = dma.hbm_to_vmem [thread:$0]  %s27_s16, 384, %s29_s20, [#allocation5], %s2133_s17, %s2133_s17, %s2134_s18  }
   0x8   :  { %2128 = dma.done.wait [#allocation3], 8832  }
   0x9   :  { %2129 = vsyncadd [#allocation3], 4294958464 }
   0xa   :  { %2130 = dma.done.wait [#allocation5], 384  }
   0xb   :  { %2131 = vsyncadd [#allocation5], 4294966912  ;;  %vm127_vm0 = vcmask 187392   ;;  %vm134_vm1 = vcmask 186368   ;;  %v2157_v0 = vld [vmem:[#allocation2 + $0x20] sm:$0xff]  ;;  %v2171_v7 = vld [vmem:[#allocation2 + $0x18] sm:$0xff] }
   0xc   :  { %v2159_v1 = vld [vmem:[#allocation2 + $0x10] sm:$0x7f]  ;;  %v2161_v2 = vld [vmem:[#allocation2] sm:$0xff]  ;;  %v141_v3 = vsel %vm127_vm0, %v2157_v0, inf  ;;  %v2169_v6 = vld [vmem:[#allocation2 + $0x28] sm:$0x7f] }
   0xd   :  { %v135_v4 = vsel %vm134_vm1, %v2159_v1, inf  ;;  %v128_v5 = vsel %vm127_vm0, %v2161_v2, inf  ;;  %142 = vmin.xlane.f32.xlu2 %v141_v3  ;;  %v2173_v8 = vld [vmem:[#allocation2 + $0x8] sm:$0xff]  ;;  %v144_v9 = vsel %vm134_vm1, %v2169_v6, inf  ;;  %v138_v10 = vsel %vm127_vm0, %v2171_v7, inf  ;;  %v2183_v13 = vld [vmem:[#allocation2 + $0x38] sm:$0xff] }
   0xe   :  { %136 = vmin.xlane.f32.xlu1 %v135_v4  ;;  %129 = vmin.xlane.f32.xlu0 %v128_v5  ;;  %v131_v11 = vsel %vm127_vm0, %v2173_v8, inf  ;;  %v2181_v12 = vld [vmem:[#allocation2 + $0x40] sm:$0x7f]  ;;  %v2185_v14 = vld [vmem:[#allocation2 + $0x30] sm:$0xff]  ;;  %v150_v16 = vsel %vm127_vm0, %v2183_v13, inf  ;;  %v2197_v20 = vld [vmem:[#allocation2 + $0x48] sm:$0xff] }
   0xf   :  { %v153_v15 = vsel %vm134_vm1, %v2181_v12, inf  ;;  %v147_v17 = vsel %vm127_vm0, %v2185_v14, inf  ;;  %v2193_v18 = vld [vmem:[#allocation2 + $0x58] sm:$0x7f]  ;;  %v2195_v19 = vld [vmem:[#allocation2 + $0x50] sm:$0xff]  ;;  %v156_v23 = vsel %vm127_vm0, %v2197_v20, inf }
  0x10   :  { %v162_v21 = vsel %vm134_vm1, %v2193_v18, inf  ;;  %v159_v22 = vsel %vm127_vm0, %v2195_v19, inf  ;;  %v2205_v24 = vld [vmem:[#allocation2 + $0x70] sm:$0x7f]  ;;  %v2207_v25 = vld [vmem:[#allocation2 + $0x68] sm:$0xff]  ;;  %v2209_v26 = vld [vmem:[#allocation2 + $0x60] sm:$0xff] }
  0x11   :  { %v171_v27 = vsel %vm134_vm1, %v2205_v24, inf  ;;  %v168_v28 = vsel %vm127_vm0, %v2207_v25, inf  ;;  %v165_v29 = vsel %vm127_vm0, %v2209_v26, inf  ;;  %v2217_v30 = vld [vmem:[#allocation2 + $0x88] sm:$0x7f]  ;;  %v2219_v31 = vld [vmem:[#allocation2 + $0x80] sm:$0xff] }
  0x12   :  { %v2221_v32 = vld [vmem:[#allocation2 + $0x78] sm:$0xff]  ;;  %v180_v33 = vsel %vm134_vm1, %v2217_v30, inf  ;;  %v177_v34 = vsel %vm127_vm0, %v2219_v31, inf  ;;  %v2229_v36 = vld [vmem:[#allocation2 + $0xa0] sm:$0x7f]  ;;  %v2233_v38 = vld [vmem:[#allocation2 + $0x90] sm:$0xff] }
  0x13   :  { %v174_v35 = vsel %vm127_vm0, %v2221_v32, inf  ;;  %v2231_v37 = vld [vmem:[#allocation2 + $0x98] sm:$0xff]  ;;  %v189_v39 = vsel %vm134_vm1, %v2229_v36, inf  ;;  %v183_v41 = vsel %vm127_vm0, %v2233_v38, inf  ;;  %v2243_v43 = vld [vmem:[#allocation2 + $0xb0] sm:$0xff]  ;;  %v2245_v44 = vld [vmem:[#allocation2 + $0xa8] sm:$0xff] }
  0x14   :  { %v186_v40 = vsel %vm127_vm0, %v2231_v37, inf  ;;  %v2241_v42 = vld [vmem:[#allocation2 + $0xb8] sm:$0x7f]  ;;  %v195_v46 = vsel %vm127_vm0, %v2243_v43, inf  ;;  %v192_v47 = vsel %vm127_vm0, %v2245_v44, inf  ;;  %v2255_v49 = vld [vmem:[#allocation2 + $0xc8] sm:$0xff] }
  0x15   :  { %145 = vmin.xlane.f32.xlu2 %v144_v9  ;;  %v198_v45 = vsel %vm134_vm1, %v2241_v42, inf  ;;  %v2253_v48 = vld [vmem:[#allocation2 + $0xd0] sm:$0x7f]  ;;  %4699 = vst [vmem:[#allocation9_spill] sm:$0xff] %v2255_v49  ;;  %v2257_v50 = vld [vmem:[#allocation2 + $0xc0] sm:$0xff]  ;;  %v204_v52 = vsel %vm127_vm0, %v2255_v49, inf }
  0x16   :  { %139 = vmin.xlane.f32.xlu1 %v138_v10  ;;  %132 = vmin.xlane.f32.xlu0 %v131_v11  ;;  %4698 = vst [vmem:[#allocation8_spill] sm:$0xff] %v2253_v48  ;;  %v207_v51 = vsel %vm134_vm1, %v2253_v48, inf  ;;  %v201_v53 = vsel %vm127_vm0, %v2257_v50, inf  ;;  %v2265_v54 = vld [vmem:[#allocation2 + $0xe8] sm:$0x7f]  ;;  %v2267_v55 = vld [vmem:[#allocation2 + $0xe0] sm:$0xff] }
  0x17   :  { %4700 = vst [vmem:[#allocation10_spill] sm:$0xff] %v2257_v50  ;;  %v2269_v56 = vld [vmem:[#allocation2 + $0xd8] sm:$0xff]  ;;  %v216_v57 = vsel %vm134_vm1, %v2265_v54, inf  ;;  %v213_v58 = vsel %vm127_vm0, %v2267_v55, inf  ;;  %v2277_v60 = vld [vmem:[#allocation2 + $0x100] sm:$0x7f] }
  0x18   :  { %4701 = vst [vmem:[#allocation11_spill] sm:$0xff] %v2265_v54  ;;  %v210_v59 = vsel %vm127_vm0, %v2269_v56, inf  ;;  %v2279_v61 = vld [vmem:[#allocation2 + $0xf8] sm:$0xff]  ;;  %v2281_v62 = vld [vmem:[#allocation2 + $0xf0] sm:$0xff]  ;;  %v225_v63 = vsel %vm134_vm1, %v2277_v60, inf  ;;  %v2293_v10 = vld [vmem:[#allocation2 + $0x108] sm:$0xff] }
  0x19   :  { %4702 = vst [vmem:[#allocation12_spill] sm:$0xff] %v2267_v55  ;;  %v222_v3 = vsel %vm127_vm0, %v2279_v61, inf  ;;  %v219_v4 = vsel %vm127_vm0, %v2281_v62, inf  ;;  %v2289_v5 = vld [vmem:[#allocation2 + $0x118] sm:$0x7f]  ;;  %v2291_v9 = vld [vmem:[#allocation2 + $0x110] sm:$0xff] }
  0x1a   :  { %4703 = vst [vmem:[#allocation13_spill] sm:$0xff] %v2269_v56  ;;  %v234_v11 = vsel %vm134_vm1, %v2289_v5, inf  ;;  %v113_v50 = vld [vmem:[#allocation4 + $0x8] sm:$0xff] }
  0x1b   :  { %4704 = vst [vmem:[#allocation14_spill] sm:$0xff] %v2277_v60  ;;  %v2467_v60 = vld [vmem:[#allocation2 + $0x218] sm:$0xff] }
  0x1c   :  { %4705 = vst [vmem:[#allocation15_spill] sm:$0xff] %v2279_v61  ;;  %v2465_v61 = vld [vmem:[#allocation2 + $0x220] sm:$0x7f]  ;;  %v330_v54 = vsel %vm127_vm0, %v2467_v60, inf }
  0x1d   :  { %154 = vmin.xlane.f32.xlu2 %v153_v15  ;;  %4706 = vst [vmem:[#allocation16_spill] sm:$0xff] %v2281_v62  ;;  %v231_v15 = vsel %vm127_vm0, %v2291_v9, inf  ;;  %v333_v55 = vsel %vm134_vm1, %v2465_v61, inf }
  0x1e   :  { %151 = vmin.xlane.f32.xlu1 %v150_v16  ;;  %148 = vmin.xlane.f32.xlu0 %v147_v17  ;;  %4707 = vst [vmem:[#allocation17_spill] sm:$0xff] %v2289_v5  ;;  %v228_v16 = vsel %vm127_vm0, %v2293_v10, inf  ;;  %v2301_v17 = vld [vmem:[#allocation2 + $0x130] sm:$0x7f] }
  0x1f   :  { %4708 = vst [vmem:[#allocation18_spill] sm:$0xff] %v2291_v9  ;;  %v2453_v9 = vld [vmem:[#allocation2 + $0x1f8] sm:$0xff] }
  0x20   :  { %4709 = vst [vmem:[#allocation19_spill] sm:$0xff] %v2293_v10 }
  0x21   :  { %4710 = vst [vmem:[#allocation20_spill] sm:$0xff] %v2301_v17 }
  0x22   :  { %4739 = vst [vmem:[#allocation49_spill] sm:$0xff] %v2453_v9 }
  0x25   :  { %163 = vmin.xlane.f32.xlu2 %v162_v21  ;;  %v2303_v21 = vld [vmem:[#allocation2 + $0x128] sm:$0xff] }
  0x26   :  { %160 = vmin.xlane.f32.xlu1 %v159_v22  ;;  %157 = vmin.xlane.f32.xlu0 %v156_v23  ;;  %4711 = vst [vmem:[#allocation21_spill] sm:$0xff] %v2303_v21  ;;  %v2305_v22 = vld [vmem:[#allocation2 + $0x120] sm:$0xff]  ;;  %v243_v23 = vsel %vm134_vm1, %v2301_v17, inf }
  0x27   :  { %4712 = vst [vmem:[#allocation22_spill] sm:$0xff] %v2305_v22 }
  0x2d   :  { %172 = vmin.xlane.f32.xlu2 %v171_v27  ;;  %v240_v27 = vsel %vm127_vm0, %v2303_v21, inf  ;;  %v2447_v21 = vld [vmem:[#allocation2 + $0x200] sm:$0xff] }
  0x2e   :  { %169 = vmin.xlane.f32.xlu1 %v168_v28  ;;  %166 = vmin.xlane.f32.xlu0 %v165_v29  ;;  %v237_v28 = vsel %vm127_vm0, %v2305_v22, inf  ;;  %v2313_v29 = vld [vmem:[#allocation2 + $0x148] sm:$0x7f]  ;;  %v2435_v22 = vld [vmem:[#allocation2 + $0x1e0] sm:$0xff]  ;;  %4738 = vst [vmem:[#allocation48_spill] sm:$0xff] %v2447_v21 }
  0x2f   :  { %4713 = vst [vmem:[#allocation23_spill] sm:$0xff] %v2313_v29 }
  0x30   :  { %4736 = vst [vmem:[#allocation46_spill] sm:$0xff] %v2435_v22 }
  0x35   :  { %181 = vmin.xlane.f32.xlu2 %v180_v33  ;;  %v2315_v33 = vld [vmem:[#allocation2 + $0x140] sm:$0xff] }
  0x36   :  { %178 = vmin.xlane.f32.xlu1 %v177_v34  ;;  %175 = vmin.xlane.f32.xlu0 %v174_v35  ;;  %4714 = vst [vmem:[#allocation24_spill] sm:$0xff] %v2315_v33  ;;  %v2317_v34 = vld [vmem:[#allocation2 + $0x138] sm:$0xff]  ;;  %v252_v35 = vsel %vm134_vm1, %v2313_v29, inf }
  0x37   :  { %4715 = vst [vmem:[#allocation25_spill] sm:$0xff] %v2317_v34 }
  0x3d   :  { %190 = vmin.xlane.f32.xlu2 %v189_v39  ;;  %v249_v39 = vsel %vm127_vm0, %v2315_v33, inf }
  0x3e   :  { %187 = vmin.xlane.f32.xlu1 %v186_v40  ;;  %184 = vmin.xlane.f32.xlu0 %v183_v41  ;;  %v246_v40 = vsel %vm127_vm0, %v2317_v34, inf  ;;  %v2325_v41 = vld [vmem:[#allocation2 + $0x160] sm:$0x7f]  ;;  %v2417_v34 = vld [vmem:[#allocation2 + $0x1c8] sm:$0xff] }
  0x3f   :  { %4716 = vst [vmem:[#allocation26_spill] sm:$0xff] %v2325_v41 }
  0x40   :  { %4733 = vst [vmem:[#allocation43_spill] sm:$0xff] %v2417_v34 }
  0x45   :  { %199 = vmin.xlane.f32.xlu2 %v198_v45  ;;  %v2327_v45 = vld [vmem:[#allocation2 + $0x158] sm:$0xff] }
  0x46   :  { %196 = vmin.xlane.f32.xlu1 %v195_v46  ;;  %193 = vmin.xlane.f32.xlu0 %v192_v47  ;;  %4717 = vst [vmem:[#allocation27_spill] sm:$0xff] %v2327_v45  ;;  %v2329_v46 = vld [vmem:[#allocation2 + $0x150] sm:$0xff]  ;;  %v261_v47 = vsel %vm134_vm1, %v2325_v41, inf }
  0x47   :  { %4718 = vst [vmem:[#allocation28_spill] sm:$0xff] %v2329_v46 }
  0x4d   :  { %208 = vmin.xlane.f32.xlu2 %v207_v51  ;;  %v258_v51 = vsel %vm127_vm0, %v2327_v45, inf }
  0x4e   :  { %205 = vmin.xlane.f32.xlu1 %v204_v52  ;;  %202 = vmin.xlane.f32.xlu0 %v201_v53  ;;  %v255_v52 = vsel %vm127_vm0, %v2329_v46, inf  ;;  %v2337_v53 = vld [vmem:[#allocation2 + $0x178] sm:$0x7f]  ;;  %v2399_v46 = vld [vmem:[#allocation2 + $0x1b0] sm:$0xff] }
  0x4f   :  { %4719 = vst [vmem:[#allocation29_spill] sm:$0xff] %v2337_v53 }
  0x50   :  { %4730 = vst [vmem:[#allocation40_spill] sm:$0xff] %v2399_v46 }
  0x55   :  { %217 = vmin.xlane.f32.xlu2 %v216_v57  ;;  %v2339_v57 = vld [vmem:[#allocation2 + $0x170] sm:$0xff] }
  0x56   :  { %214 = vmin.xlane.f32.xlu1 %v213_v58  ;;  %211 = vmin.xlane.f32.xlu0 %v210_v59  ;;  %4720 = vst [vmem:[#allocation30_spill] sm:$0xff] %v2339_v57 }
  0x5d   :  { %226 = vmin.xlane.f32.xlu2 %v225_v63  ;;  %v2345_v63 = vld [vmem:[#allocation2 + $0x168] sm:$0xff] }
  0x5e   :  { %223 = vmin.xlane.f32.xlu1 %v222_v3  ;;  %220 = vmin.xlane.f32.xlu0 %v219_v4  ;;  %4721 = vst [vmem:[#allocation31_spill] sm:$0xff] %v2345_v63  ;;  %v270_v4 = vsel %vm134_vm1, %v2337_v53, inf }
  0x65   :  { %235 = vmin.xlane.f32.xlu2 %v234_v11  ;;  %v267_v11 = vsel %vm127_vm0, %v2339_v57, inf }
  0x66   :  { %232 = vmin.xlane.f32.xlu1 %v231_v15  ;;  %229 = vmin.xlane.f32.xlu0 %v228_v16  ;;  %v264_v15 = vsel %vm127_vm0, %v2345_v63, inf  ;;  %v2355_v16 = vld [vmem:[#allocation2 + $0x190] sm:$0x7f]  ;;  %v2381_v63 = vld [vmem:[#allocation2 + $0x198] sm:$0xff] }
  0x67   :  { %4722 = vst [vmem:[#allocation32_spill] sm:$0xff] %v2355_v16 }
  0x68   :  { %4727 = vst [vmem:[#allocation37_spill] sm:$0xff] %v2381_v63 }
  0x6d   :  { %244 = vmin.xlane.f32.xlu2 %v243_v23  ;;  %v2357_v23 = vld [vmem:[#allocation2 + $0x188] sm:$0xff] }
  0x6e   :  { %241 = vmin.xlane.f32.xlu1 %v240_v27  ;;  %238 = vmin.xlane.f32.xlu0 %v237_v28  ;;  %4723 = vst [vmem:[#allocation33_spill] sm:$0xff] %v2357_v23 }
  0x75   :  { %253 = vmin.xlane.f32.xlu2 %v252_v35  ;;  %v2363_v35 = vld [vmem:[#allocation2 + $0x180] sm:$0xff] }
  0x76   :  { %250 = vmin.xlane.f32.xlu1 %v249_v39  ;;  %247 = vmin.xlane.f32.xlu0 %v246_v40  ;;  %4724 = vst [vmem:[#allocation34_spill] sm:$0xff] %v2363_v35  ;;  %v279_v40 = vsel %vm134_vm1, %v2355_v16, inf }
  0x7d   :  { %262 = vmin.xlane.f32.xlu2 %v261_v47  ;;  %v276_v47 = vsel %vm127_vm0, %v2357_v23, inf }
  0x7e   :  { %259 = vmin.xlane.f32.xlu1 %v258_v51  ;;  %256 = vmin.xlane.f32.xlu0 %v255_v52  ;;  %v273_v51 = vsel %vm127_vm0, %v2363_v35, inf  ;;  %v2373_v52 = vld [vmem:[#allocation2 + $0x1a8] sm:$0x7f]  ;;  %v2393_v35 = vld [vmem:[#allocation2 + $0x1b8] sm:$0xff] }
  0x7f   :  { %4725 = vst [vmem:[#allocation35_spill] sm:$0xff] %v2373_v52  ;;  %v288_v23 = vsel %vm134_vm1, %v2373_v52, inf }
  0x80   :  { %v2341_v58 = vpop.xlane.xlu2 %142  ;;  %4729 = vst [vmem:[#allocation39_spill] sm:$0xff] %v2393_v35 }
  0x81   :  { %v2343_v59 = vpop.xlane.xlu1 %136  ;;  %v2347_v3 = vpop.xlane.xlu0 %129  ;;  %vm340_vm9 = vcmp.gt.f32.partialorder %v2341_v58, 0.0 }
  0x82   :  { %vm338_vm2 = vcmp.gt.f32.partialorder %v2343_v59, 0.0  ;;  %vm336_vm4 = vcmp.gt.f32.partialorder %v2347_v3, 0.0 }
  0x83   :  { %v405_v49 = vsel %vm336_vm4, 0.0, %v2347_v3 }
  0x85   :  { %271 = vmin.xlane.f32.xlu2 %v270_v4  ;;  %v2375_v4 = vld [vmem:[#allocation2 + $0x1a0] sm:$0xff] }
  0x86   :  { %268 = vmin.xlane.f32.xlu1 %v267_v11  ;;  %265 = vmin.xlane.f32.xlu0 %v264_v15  ;;  %4726 = vst [vmem:[#allocation36_spill] sm:$0xff] %v2375_v4 }
  0x88   :  { %v2359_v27 = vpop.xlane.xlu2 %145 }
  0x89   :  { %v2361_v28 = vpop.xlane.xlu1 %139  ;;  %v2365_v39 = vpop.xlane.xlu0 %132  ;;  %vm341_vm10 = vcmp.gt.f32.partialorder %v2359_v27, 0.0 }
  0x8a   :  { %vm337_vm3 = vcmp.gt.f32.partialorder %v2365_v39, 0.0  ;;  %vm339_vm12 = vcmp.gt.f32.partialorder %v2361_v28, 0.0 }
  0x8b   :  { %v406_v56 = vsel %vm337_vm3, 0.0, %v2365_v39  ;;  %v474_v39 = vsub.f32 %v2161_v2, %v405_v49  ;;  %v408_v3 = vsel %vm339_vm12, 0.0, %v2361_v28 }
  0x8d   :  { %280 = vmin.xlane.f32.xlu2 %v279_v40  ;;  %v285_v40 = vsel %vm127_vm0, %v2375_v4, inf }
  0x8e   :  { %277 = vmin.xlane.f32.xlu1 %v276_v47  ;;  %274 = vmin.xlane.f32.xlu0 %v273_v51  ;;  %v282_v47 = vsel %vm127_vm0, %v2381_v63, inf  ;;  %v2391_v51 = vld [vmem:[#allocation2 + $0x1c0] sm:$0x7f]  ;;  %v2411_v63 = vld [vmem:[#allocation2 + $0x1d0] sm:$0xff] }
  0x8f   :  { %4728 = vst [vmem:[#allocation38_spill] sm:$0xff] %v2391_v51  ;;  %v297_v4 = vsel %vm134_vm1, %v2391_v51, inf }
  0x90   :  { %v2377_v11 = vpop.xlane.xlu2 %154  ;;  %4732 = vst [vmem:[#allocation42_spill] sm:$0xff] %v2411_v63 }
  0x91   :  { %v2379_v15 = vpop.xlane.xlu1 %151  ;;  %v2383_v16 = vpop.xlane.xlu0 %148  ;;  %vm344_vm14 = vcmp.gt.f32.partialorder %v2377_v11, 0.0 }
  0x92   :  { %vm343_vm15 = vcmp.gt.f32.partialorder %v2379_v15, 0.0 }
  0x95   :  { %289 = vmin.xlane.f32.xlu2 %v288_v23  ;;  %v294_v23 = vsel %vm127_vm0, %v2393_v35, inf }
  0x96   :  { %286 = vmin.xlane.f32.xlu1 %v285_v40  ;;  %283 = vmin.xlane.f32.xlu0 %v282_v47  ;;  %v291_v40 = vsel %vm127_vm0, %v2399_v46, inf  ;;  %v2409_v47 = vld [vmem:[#allocation2 + $0x1d8] sm:$0x7f]  ;;  %v2429_v46 = vld [vmem:[#allocation2 + $0x1e8] sm:$0xff] }
  0x97   :  { %4731 = vst [vmem:[#allocation41_spill] sm:$0xff] %v2409_v47  ;;  %v306_v35 = vsel %vm134_vm1, %v2409_v47, inf }
  0x98   :  { %v2395_v57 = vpop.xlane.xlu2 %163  ;;  %4735 = vst [vmem:[#allocation45_spill] sm:$0xff] %v2429_v46 }
  0x99   :  { %v2397_v53 = vpop.xlane.xlu1 %160  ;;  %v2401_v52 = vpop.xlane.xlu0 %157  ;;  %vm347_vm3 = vcmp.gt.f32.partialorder %v2395_v57, 0.0 }
  0x9a   :  { %vm346_vm4 = vcmp.gt.f32.partialorder %v2397_v53, 0.0 }
  0x9d   :  { %298 = vmin.xlane.f32.xlu2 %v297_v4  ;;  %v303_v4 = vsel %vm127_vm0, %v2411_v63, inf }
  0x9e   :  { %295 = vmin.xlane.f32.xlu1 %v294_v23  ;;  %292 = vmin.xlane.f32.xlu0 %v291_v40  ;;  %v300_v23 = vsel %vm127_vm0, %v2417_v34, inf  ;;  %v2427_v40 = vld [vmem:[#allocation2 + $0x1f0] sm:$0x7f]  ;;  %v2445_v34 = vld [vmem:[#allocation2 + $0x208] sm:$0x7f] }
  0x9f   :  { %4734 = vst [vmem:[#allocation44_spill] sm:$0xff] %v2427_v40  ;;  %v315_v63 = vsel %vm134_vm1, %v2427_v40, inf }
  0xa0   :  { %v2413_v45 = vpop.xlane.xlu2 %172  ;;  %4737 = vst [vmem:[#allocation47_spill] sm:$0xff] %v2445_v34 }
  0xa1   :  { %v2415_v41 = vpop.xlane.xlu1 %169  ;;  %v2419_v51 = vpop.xlane.xlu0 %166 }
  0xa5   :  { %307 = vmin.xlane.f32.xlu2 %v306_v35  ;;  %v312_v35 = vsel %vm127_vm0, %v2429_v46, inf }
  0xa6   :  { %304 = vmin.xlane.f32.xlu1 %v303_v4  ;;  %301 = vmin.xlane.f32.xlu0 %v300_v23  ;;  %v309_v4 = vsel %vm127_vm0, %v2435_v22, inf  ;;  %v115_v23 = vlaneseq  ;;  %v324_v22 = vsel %vm134_vm1, %v2445_v34, inf }
  0xa8   :  { %v2431_v33 = vpop.xlane.xlu2 %181  ;;  %v116_v40 = vshrl.u32 %v115_v23, 7  ;;  %v120_v46 = vand.u32 127, %v115_v23 }
  0xa9   :  { %v2433_v29 = vpop.xlane.xlu1 %178  ;;  %v2437_v47 = vpop.xlane.xlu0 %175 }
  0xaa   :  { %v117_v62 = vadd.s32 8, %v116_v40  ;;  %vm121_vm6 = vcmp.eq.s32.totalorder %v116_v40, %v120_v46  ;;  %vm352_vm12 = vcmp.gt.f32.partialorder %v2433_v29, 0.0 }
  0xac   :  { %vm122_vm7 = vcmp.eq.s32.totalorder %v117_v62, %v120_v46 }
  0xad   :  { %316 = vmin.xlane.f32.xlu2 %v315_v63  ;;  %v321_v63 = vsel %vm127_vm0, %v2447_v21, inf }
  0xae   :  { %313 = vmin.xlane.f32.xlu1 %v312_v35  ;;  %310 = vmin.xlane.f32.xlu0 %v309_v4  ;;  %v318_v35 = vsel %vm127_vm0, %v2453_v9, inf  ;;  %v118_v4 = vadd.s32 16, %v116_v40  ;;  %v2474_v9 = vld [vmem:[#allocation2 + $0x210] sm:$0xff] }
  0xb0   :  { %v2449_v17 = vpop.xlane.xlu2 %190  ;;  %vm123_vm5 = vcmp.eq.s32.totalorder %v118_v4, %v120_v46  ;;  %v327_v4 = vsel %vm127_vm0, %v2474_v9, inf  ;;  %v475_v46 = vsub.f32 %v2173_v8, %v406_v56 }
  0xb1   :  { %v2451_v10 = vpop.xlane.xlu1 %187  ;;  %v2455_v5 = vpop.xlane.xlu0 %184 }
  0xb5   :  { %325 = vmin.xlane.f32.xlu2 %v324_v22  ;;  %v114_v22 = vld [vmem:[#allocation4 + $0x10] sm:$0x7f] }
  0xb6   :  { %322 = vmin.xlane.f32.xlu1 %v321_v63  ;;  %319 = vmin.xlane.f32.xlu0 %v318_v35  ;;  %v112_v63 = vld [vmem:[#allocation4] sm:$0xff]  ;;  %v407_v35 = vsel %vm338_vm2, 0.0, %v2343_v59  ;;  %v2487_v48 = vsel %vm123_vm5, 1.0, %v114_v22  ;;  %v2493_v59 = vsel %vm122_vm7, 1.0, %v113_v50  ;;  %vm342_vm2 = vcmp.gt.f32.partialorder %v2383_v16, 0.0 }
  0xb7   :  { %v2489_v40 = vsel %vm121_vm6, 1.0, %v112_v63  ;;  %v476_v62 = vsub.f32 %v2159_v1, %v407_v35  ;;  %vm545_vm8 = vcmp.ne.f32.partialorder %v2487_v48, 0.0  ;;  %vm544_vm13 = vcmp.ne.f32.partialorder %v2493_v59, 0.0 }
  0xb8   :  { %v2470_v21 = vpop.xlane.xlu2 %199  ;;  %vm543_vm11 = vcmp.ne.f32.partialorder %v2489_v40, 0.0  ;;  %v2514_v49 = vsel %vm544_vm13, %v475_v46, 0.0  ;;  %v413_v46 = vsel %vm344_vm14, 0.0, %v2377_v11  ;;  %vm345_vm5 = vcmp.gt.f32.partialorder %v2401_v52, 0.0 }
  0xb9   :  { %v2472_v34 = vpop.xlane.xlu1 %196  ;;  %v2476_v23 = vpop.xlane.xlu0 %193  ;;  %v2510_v2 = vsel %vm545_vm8, %v476_v62, 0.0  ;;  %v2520_v56 = vsel %vm543_vm11, %v474_v39, 0.0  ;;  %v624_v63 = vsel %vm127_vm0, %v2514_v49, 0.0  ;;  %v412_v39 = vsel %vm343_vm15, 0.0, %v2379_v15 }
  0xba   :  { %v627_v22 = vsel %vm134_vm1, %v2510_v2, 0.0  ;;  %vm350_vm6 = vcmp.gt.f32.partialorder %v2413_v45, 0.0  ;;  %vm349_vm7 = vcmp.gt.f32.partialorder %v2415_v41, 0.0  ;;  %vm351_vm14 = vcmp.gt.f32.partialorder %v2437_v47, 0.0 }
  0xbb   :  { %vm356_vm15 = vcmp.gt.f32.partialorder %v2449_v17, 0.0 }
  0xbd   :  { %334 = vmin.xlane.f32.xlu2 %v333_v55  ;;  %v410_v55 = vsel %vm341_vm10, 0.0, %v2359_v27  ;;  %v477_v27 = vsub.f32 %v2171_v7, %v408_v3  ;;  %vm353_vm10 = vcmp.gt.f32.partialorder %v2431_v33, 0.0 }
  0xbe   :  { %331 = vmin.xlane.f32.xlu1 %v330_v54  ;;  %328 = vmin.xlane.f32.xlu0 %v327_v4  ;;  %v409_v54 = vsel %vm340_vm9, 0.0, %v2341_v58  ;;  %v479_v4 = vsub.f32 %v2169_v6, %v410_v55  ;;  %v621_v58 = vsel %vm127_vm0, %v2520_v56, 0.0  ;;  %v411_v55 = vsel %vm342_vm2, 0.0, %v2383_v16 }
  0xbf   :  { %v478_v35 = vsub.f32 %v2157_v0, %v409_v54  ;;  %v2553_v54 = vsel %vm543_vm11, %v477_v27, 0.0  ;;  %v480_v15 = vsub.f32 %v2185_v14, %v411_v55  ;;  %v415_v27 = vsel %vm346_vm4, 0.0, %v2397_v53 }
  0xc0   :  { %v2501_v1 = vpop.xlane.xlu2 %208  ;;  %v2543_v6 = vsel %vm545_vm8, %v479_v4, 0.0  ;;  %v630_v11 = vsel %vm127_vm0, %v2553_v54, 0.0  ;;  %vm348_vm9 = vcmp.gt.f32.partialorder %v2419_v51, 0.0  ;;  %vm355_vm2 = vcmp.gt.f32.partialorder %v2451_v10, 0.0 }
  0xc1   :  { %v2503_v8 = vpop.xlane.xlu1 %205  ;;  %v2506_v50 = vpop.xlane.xlu0 %202  ;;  %v2547_v7 = vsel %vm544_vm13, %v478_v35, 0.0  ;;  %v636_v3 = vsel %vm134_vm1, %v2543_v6, 0.0  ;;  %v481_v35 = vsub.f32 %v2183_v13, %v412_v39  ;;  %v414_v39 = vsel %vm345_vm5, 0.0, %v2401_v52 }
  0xc2   :  { %vm359_vm4 = vcmp.gt.f32.partialorder %v2470_v21, 0.0  ;;  %vm358_vm5 = vcmp.gt.f32.partialorder %v2472_v34, 0.0 }
  0xc3   :  { %v2580_v14 = vsel %vm544_vm13, %v481_v35, 0.0 }
  0xc5   :  { %628 = vadd.xlane.f32.xlu2 %v627_v22  ;;  %v633_v22 = vsel %vm127_vm0, %v2547_v7, 0.0 }
  0xc6   :  { %625 = vadd.xlane.f32.xlu1 %v624_v63  ;;  %622 = vadd.xlane.f32.xlu0 %v621_v58  ;;  %v482_v63 = vsub.f32 %v2181_v12, %v413_v46  ;;  %v416_v58 = vsel %vm347_vm3, 0.0, %v2395_v57  ;;  %v2586_v46 = vsel %vm543_vm11, %v480_v15, 0.0  ;;  %v483_v57 = vsub.f32 %v2197_v20, %v414_v39 }
  0xc7   :  { %v639_v53 = vsel %vm127_vm0, %v2586_v46, 0.0  ;;  %v418_v15 = vsel %vm349_vm7, 0.0, %v2415_v41  ;;  %vm354_vm3 = vcmp.gt.f32.partialorder %v2455_v5, 0.0  ;;  %vm362_vm7 = vcmp.gt.f32.partialorder %v2501_v1, 0.0 }
  0xc8   :  { %v2535_v28 = vpop.xlane.xlu2 %217  ;;  %v2576_v13 = vsel %vm545_vm8, %v482_v63, 0.0  ;;  %v484_v63 = vsub.f32 %v2195_v19, %v415_v27  ;;  %v417_v27 = vsel %vm348_vm9, 0.0, %v2419_v51  ;;  %vm361_vm9 = vcmp.gt.f32.partialorder %v2503_v8, 0.0 }
  0xc9   :  { %v2537_v62 = vpop.xlane.xlu1 %214  ;;  %v2539_v0 = vpop.xlane.xlu0 %211  ;;  %v645_v55 = vsel %vm134_vm1, %v2576_v13, 0.0 }
  0xca   :  { %v2613_v20 = vsel %vm544_vm13, %v484_v63, 0.0 }
  0xcd   :  { %637 = vadd.xlane.f32.xlu2 %v636_v3  ;;  %v642_v3 = vsel %vm127_vm0, %v2580_v14, 0.0 }
  0xce   :  { %634 = vadd.xlane.f32.xlu1 %v633_v22  ;;  %631 = vadd.xlane.f32.xlu0 %v630_v11  ;;  %v485_v22 = vsub.f32 %v2193_v18, %v416_v58  ;;  %v419_v11 = vsel %vm350_vm6, 0.0, %v2413_v45  ;;  %v2619_v58 = vsel %vm543_vm11, %v483_v57, 0.0  ;;  %v486_v45 = vsub.f32 %v2209_v26, %v417_v27 }
  0xcf   :  { %v648_v41 = vsel %vm127_vm0, %v2619_v58, 0.0  ;;  %v421_v57 = vsel %vm352_vm12, 0.0, %v2433_v29  ;;  %vm357_vm6 = vcmp.gt.f32.partialorder %v2476_v23, 0.0  ;;  %vm365_vm12 = vcmp.gt.f32.partialorder %v2535_v28, 0.0 }
  0xd0   :  { %v2568_v16 = vpop.xlane.xlu2 %226  ;;  %v2609_v19 = vsel %vm545_vm8, %v485_v22, 0.0  ;;  %v487_v22 = vsub.f32 %v2207_v25, %v418_v15  ;;  %v420_v15 = vsel %vm351_vm14, 0.0, %v2437_v47  ;;  %vm364_vm14 = vcmp.gt.f32.partialorder %v2537_v62, 0.0 }
  0xd1   :  { %v2570_v4 = vpop.xlane.xlu1 %223  ;;  %v2572_v12 = vpop.xlane.xlu0 %220  ;;  %v654_v39 = vsel %vm134_vm1, %v2609_v19, 0.0 }
  0xd2   :  { %v2646_v26 = vsel %vm544_vm13, %v487_v22, 0.0 }
  0xd5   :  { %646 = vadd.xlane.f32.xlu2 %v645_v55  ;;  %v651_v55 = vsel %vm127_vm0, %v2613_v20, 0.0 }
  0xd6   :  { %643 = vadd.xlane.f32.xlu1 %v642_v3  ;;  %640 = vadd.xlane.f32.xlu0 %v639_v53  ;;  %v488_v3 = vsub.f32 %v2205_v24, %v419_v11  ;;  %v422_v53 = vsel %vm353_vm10, 0.0, %v2431_v33  ;;  %v2652_v11 = vsel %vm543_vm11, %v486_v45, 0.0  ;;  %v489_v33 = vsub.f32 %v2221_v32, %v420_v15 }
  0xd7   :  { %v657_v29 = vsel %vm127_vm0, %v2652_v11, 0.0  ;;  %v424_v45 = vsel %vm355_vm2, 0.0, %v2451_v10  ;;  %vm360_vm10 = vcmp.gt.f32.partialorder %v2506_v50, 0.0  ;;  %vm368_vm2 = vcmp.gt.f32.partialorder %v2568_v16, 0.0 }
  0xd8   :  { %v2601_v52 = vpop.xlane.xlu2 %235  ;;  %v2642_v25 = vsel %vm545_vm8, %v488_v3, 0.0  ;;  %v490_v3 = vsub.f32 %v2219_v31, %v421_v57  ;;  %v423_v57 = vsel %vm354_vm3, 0.0, %v2455_v5  ;;  %vm367_vm3 = vcmp.gt.f32.partialorder %v2570_v4, 0.0 }
  0xd9   :  { %v2603_v35 = vpop.xlane.xlu1 %232  ;;  %v2605_v18 = vpop.xlane.xlu0 %229  ;;  %v663_v27 = vsel %vm134_vm1, %v2642_v25, 0.0 }
  0xda   :  { %v2679_v32 = vsel %vm544_vm13, %v490_v3, 0.0 }
  0xdd   :  { %655 = vadd.xlane.f32.xlu2 %v654_v39  ;;  %v660_v39 = vsel %vm127_vm0, %v2646_v26, 0.0 }
  0xde   :  { %652 = vadd.xlane.f32.xlu1 %v651_v55  ;;  %649 = vadd.xlane.f32.xlu0 %v648_v41  ;;  %v491_v55 = vsub.f32 %v2217_v30, %v422_v53  ;;  %v425_v41 = vsel %vm356_vm15, 0.0, %v2449_v17  ;;  %v2685_v53 = vsel %vm543_vm11, %v489_v33, 0.0  ;;  %v492_v17 = vsub.f32 %v2233_v38, %v423_v57 }
  0xdf   :  { %4740 = vst [vmem:[#allocation50_spill] sm:$0xff] %v2685_v53  ;;  %v666_v10 = vsel %vm127_vm0, %v2685_v53, 0.0  ;;  %v427_v33 = vsel %vm358_vm5, 0.0, %v2472_v34  ;;  %vm363_vm15 = vcmp.gt.f32.partialorder %v2539_v0, 0.0  ;;  %vm371_vm5 = vcmp.gt.f32.partialorder %v2601_v52, 0.0 }
  0xe0   :  { %v2634_v51 = vpop.xlane.xlu2 %244  ;;  %v2675_v31 = vsel %vm545_vm8, %v491_v55, 0.0  ;;  %v493_v55 = vsub.f32 %v2231_v37, %v424_v45  ;;  %v426_v45 = vsel %vm357_vm6, 0.0, %v2476_v23  ;;  %vm370_vm6 = vcmp.gt.f32.partialorder %v2603_v35, 0.0 }
  0xe1   :  { %v2636_v63 = vpop.xlane.xlu1 %241  ;;  %v2638_v24 = vpop.xlane.xlu0 %238  ;;  %v672_v15 = vsel %vm134_vm1, %v2675_v31, 0.0  ;;  %v495_v34 = vsub.f32 %v2245_v44, %v426_v45 }
  0xe2   :  { %v2712_v38 = vsel %vm544_vm13, %v493_v55, 0.0 }
  0xe3   :  { %4742 = vst [vmem:[#allocation52_spill] sm:$0xff] %v2712_v38 }
  0xe5   :  { %664 = vadd.xlane.f32.xlu2 %v663_v27  ;;  %v669_v27 = vsel %vm127_vm0, %v2679_v32, 0.0 }
  0xe6   :  { %661 = vadd.xlane.f32.xlu1 %v660_v39  ;;  %658 = vadd.xlane.f32.xlu0 %v657_v29  ;;  %v494_v39 = vsub.f32 %v2229_v36, %v425_v41  ;;  %v428_v29 = vsel %vm359_vm4, 0.0, %v2470_v21  ;;  %v2718_v41 = vsel %vm543_vm11, %v492_v17, 0.0  ;;  %v430_v17 = vsel %vm361_vm9, 0.0, %v2503_v8 }
  0xe7   :  { %4743 = vst [vmem:[#allocation53_spill] sm:$0xff] %v2718_v41  ;;  %v675_v21 = vsel %vm127_vm0, %v2718_v41, 0.0  ;;  %v4749_v41 = vld [vmem:[#allocation10_spill] sm:$0xff]  ;;  %vm366_vm4 = vcmp.gt.f32.partialorder %v2572_v12, 0.0  ;;  %vm374_vm9 = vcmp.gt.f32.partialorder %v2634_v51, 0.0 }
  0xe8   :  { %v2667_v47 = vpop.xlane.xlu2 %253  ;;  %v2708_v37 = vsel %vm545_vm8, %v494_v39, 0.0  ;;  %v496_v39 = vsub.f32 %v2243_v43, %v427_v33  ;;  %v2752_v33 = vsel %vm543_vm11, %v495_v34, 0.0 }
  0xe9   :  { %v2669_v22 = vpop.xlane.xlu1 %250  ;;  %v2671_v30 = vpop.xlane.xlu0 %247  ;;  %4741 = vst [vmem:[#allocation51_spill] sm:$0xff] %v2708_v37  ;;  %v681_v57 = vsel %vm134_vm1, %v2708_v37, 0.0  ;;  %v684_v8 = vsel %vm127_vm0, %v2752_v33, 0.0 }
  0xea   :  { %v2745_v44 = vsel %vm544_vm13, %v496_v39, 0.0  ;;  %4746 = vst [vmem:[#allocation56_spill] sm:$0xff] %v2752_v33  ;;  %v4748_v39 = vld [vmem:[#allocation9_spill] sm:$0xff] }
  0xeb   :  { %4745 = vst [vmem:[#allocation55_spill] sm:$0xff] %v2745_v44 }
  0xed   :  { %673 = vadd.xlane.f32.xlu2 %v672_v15  ;;  %v678_v15 = vsel %vm127_vm0, %v2712_v38, 0.0 }
  0xee   :  { %670 = vadd.xlane.f32.xlu1 %v669_v27  ;;  %667 = vadd.xlane.f32.xlu0 %v666_v10  ;;  %v497_v27 = vsub.f32 %v2241_v42, %v428_v29  ;;  %v431_v10 = vsel %vm362_vm7, 0.0, %v2501_v1  ;;  %v429_v29 = vsel %vm360_vm10, 0.0, %v2506_v50  ;;  %vm369_vm7 = vcmp.gt.f32.partialorder %v2605_v18, 0.0 }
  0xef   :  { %v498_v1 = vsub.f32 %v4749_v41, %v429_v29  ;;  %vm373_vm10 = vcmp.gt.f32.partialorder %v2636_v63, 0.0 }
  0xf0   :  { %v2700_v5 = vpop.xlane.xlu2 %262  ;;  %v2741_v43 = vsel %vm545_vm8, %v497_v27, 0.0 }
  0xf1   :  { %v2702_v3 = vpop.xlane.xlu1 %259  ;;  %v2704_v36 = vpop.xlane.xlu0 %256  ;;  %4744 = vst [vmem:[#allocation54_spill] sm:$0xff] %v2741_v43  ;;  %v690_v45 = vsel %vm134_vm1, %v2741_v43, 0.0  ;;  %v2782_v29 = vsel %vm543_vm11, %v498_v1, 0.0 }
  0xf2   :  { %4752 = vst [vmem:[#allocation10_spill] sm:$0xff] %v2782_v29 }
  0xf5   :  { %682 = vadd.xlane.f32.xlu2 %v681_v57  ;;  %v687_v57 = vsel %vm127_vm0, %v2745_v44, 0.0  ;;  %v4754_v44 = vld [vmem:[#allocation12_spill] sm:$0xff] }
  0xf6   :  { %679 = vadd.xlane.f32.xlu1 %v678_v15  ;;  %676 = vadd.xlane.f32.xlu0 %v675_v21  ;;  %v4747_v15 = vld [vmem:[#allocation8_spill] sm:$0xff]  ;;  %v499_v21 = vsub.f32 %v4748_v39, %v430_v17 }
  0xf7   :  { %v500_v27 = vsub.f32 %v4747_v15, %v431_v10  ;;  %v432_v15 = vsel %vm363_vm15, 0.0, %v2539_v0  ;;  %v437_v0 = vsel %vm368_vm2, 0.0, %v2568_v16  ;;  %vm376_vm15 = vcmp.gt.f32.partialorder %v2669_v22, 0.0 }
  0xf8   :  { %v2733_v23 = vpop.xlane.xlu2 %271  ;;  %v2778_v17 = vsel %vm544_vm13, %v499_v21, 0.0  ;;  %v693_v21 = vsel %vm127_vm0, %v2782_v29, 0.0  ;;  %vm375_vm2 = vcmp.gt.f32.partialorder %v2671_v30, 0.0  ;;  %v445_v37 = vsel %vm376_vm15, 0.0, %v2669_v22 }
  0xf9   :  { %v2735_v55 = vpop.xlane.xlu1 %268  ;;  %v2737_v42 = vpop.xlane.xlu0 %265  ;;  %v2774_v41 = vsel %vm545_vm8, %v500_v27, 0.0  ;;  %4751 = vst [vmem:[#allocation9_spill] sm:$0xff] %v2778_v17  ;;  %v696_v27 = vsel %vm127_vm0, %v2778_v17, 0.0  ;;  %v436_v17 = vsel %vm367_vm3, 0.0, %v2570_v4  ;;  %v4759_v4 = vld [vmem:[#allocation14_spill] sm:$0xff]  ;;  %v444_v53 = vsel %vm375_vm2, 0.0, %v2671_v30 }
  0xfa   :  { %4750 = vst [vmem:[#allocation8_spill] sm:$0xff] %v2774_v41  ;;  %v699_v39 = vsel %vm134_vm1, %v2774_v41, 0.0  ;;  %vm380_vm3 = vcmp.gt.f32.partialorder %v2700_v5, 0.0 }
  0xfd   :  { %691 = vadd.xlane.f32.xlu2 %v690_v45  ;;  %v434_v45 = vsel %vm365_vm12, 0.0, %v2535_v28  ;;  %v4755_v28 = vld [vmem:[#allocation13_spill] sm:$0xff]  ;;  %vm372_vm12 = vcmp.gt.f32.partialorder %v2638_v24, 0.0 }
  0xfe   :  { %688 = vadd.xlane.f32.xlu1 %v687_v57  ;;  %685 = vadd.xlane.f32.xlu0 %v684_v8  ;;  %v433_v57 = vsel %vm364_vm14, 0.0, %v2537_v62  ;;  %v4753_v8 = vld [vmem:[#allocation11_spill] sm:$0xff]  ;;  %v501_v62 = vsub.f32 %v4755_v28, %v432_v15  ;;  %vm377_vm14 = vcmp.gt.f32.partialorder %v2667_v47, 0.0 }
  0xff   :  { %v503_v33 = vsub.f32 %v4753_v8, %v434_v45  ;;  %v502_v1 = vsub.f32 %v4754_v44, %v433_v57  ;;  %v435_v8 = vsel %vm366_vm4, 0.0, %v2572_v12  ;;  %v440_v12 = vsel %vm371_vm5, 0.0, %v2601_v52 }
 0x100   :  { %v2766_v50 = vpop.xlane.xlu2 %280  ;;  %v2817_v16 = vsel %vm543_vm11, %v501_v62, 0.0  ;;  %v4761_v62 = vld [vmem:[#allocation16_spill] sm:$0xff]  ;;  %v438_v52 = vsel %vm369_vm7, 0.0, %v2605_v18  ;;  %v441_v18 = vsel %vm372_vm12, 0.0, %v2638_v24  ;;  %v4770_v24 = vld [vmem:[#allocation22_spill] sm:$0xff]  ;;  %vm379_vm4 = vcmp.gt.f32.partialorder %v2702_v3, 0.0 }
 0x101   :  { %v2768_v34 = vpop.xlane.xlu1 %277  ;;  %v2770_v10 = vpop.xlane.xlu0 %274  ;;  %v2809_v57 = vsel %vm545_vm8, %v503_v33, 0.0  ;;  %v2813_v15 = vsel %vm544_vm13, %v502_v1, 0.0  ;;  %4758 = vst [vmem:[#allocation13_spill] sm:$0xff] %v2817_v16  ;;  %v702_v1 = vsel %vm127_vm0, %v2817_v16, 0.0  ;;  %v504_v41 = vsub.f32 %v4761_v62, %v435_v8 }
 0x102   :  { %4756 = vst [vmem:[#allocation11_spill] sm:$0xff] %v2809_v57  ;;  %v708_v33 = vsel %vm134_vm1, %v2809_v57, 0.0  ;;  %v705_v28 = vsel %vm127_vm0, %v2813_v15, 0.0  ;;  %v439_v8 = vsel %vm370_vm6, 0.0, %v2603_v35  ;;  %v442_v35 = vsel %vm373_vm10, 0.0, %v2636_v63  ;;  %v4769_v63 = vld [vmem:[#allocation21_spill] sm:$0xff] }
 0x103   :  { %4757 = vst [vmem:[#allocation12_spill] sm:$0xff] %v2813_v15  ;;  %v2861_v16 = vsel %vm543_vm11, %v504_v41, 0.0  ;;  %v511_v43 = vsub.f32 %v4769_v63, %v442_v35  ;;  %v510_v38 = vsub.f32 %v4770_v24, %v441_v18  ;;  %vm378_vm5 = vcmp.gt.f32.partialorder %v2704_v36, 0.0 }
 0x104   :  { %4765 = vst [vmem:[#allocation16_spill] sm:$0xff] %v2861_v16  ;;  %v711_v41 = vsel %vm127_vm0, %v2861_v16, 0.0  ;;  %vm383_vm6 = vcmp.gt.f32.partialorder %v2733_v23, 0.0  ;;  %vm382_vm7 = vcmp.gt.f32.partialorder %v2735_v55, 0.0  ;;  %vm386_vm10 = vcmp.gt.f32.partialorder %v2766_v50, 0.0 }
 0x105   :  { %700 = vadd.xlane.f32.xlu2 %v699_v39  ;;  %v506_v39 = vsub.f32 %v4759_v4, %v437_v0  ;;  %vm385_vm12 = vcmp.gt.f32.partialorder %v2768_v34, 0.0 }
 0x106   :  { %697 = vadd.xlane.f32.xlu1 %v696_v27  ;;  %694 = vadd.xlane.f32.xlu0 %v693_v21  ;;  %v4760_v27 = vld [vmem:[#allocation15_spill] sm:$0xff] }
 0x107   :  { %v505_v21 = vsub.f32 %v4760_v27, %v436_v17  ;;  %v2836_v17 = vsel %vm545_vm8, %v506_v39, 0.0 }
 0x108   :  { %v2801_v29 = vpop.xlane.xlu2 %289  ;;  %4762 = vst [vmem:[#allocation14_spill] sm:$0xff] %v2836_v17 }
 0x109   :  { %v2803_v45 = vpop.xlane.xlu1 %286  ;;  %v2805_v44 = vpop.xlane.xlu0 %283  ;;  %v2840_v0 = vsel %vm544_vm13, %v505_v21, 0.0  ;;  %v4764_v21 = vld [vmem:[#allocation17_spill] sm:$0xff]  ;;  %vm389_vm15 = vcmp.gt.f32.partialorder %v2801_v29, 0.0 }
 0x10a   :  { %4763 = vst [vmem:[#allocation15_spill] sm:$0xff] %v2840_v0  ;;  %v714_v62 = vsel %vm127_vm0, %v2840_v0, 0.0  ;;  %v446_v0 = vsel %vm377_vm14, 0.0, %v2667_v47  ;;  %vm384_vm14 = vcmp.gt.f32.partialorder %v2770_v10, 0.0  ;;  %vm388_vm2 = vcmp.gt.f32.partialorder %v2803_v45, 0.0 }
 0x10d   :  { %709 = vadd.xlane.f32.xlu2 %v708_v33  ;;  %v443_v33 = vsel %vm374_vm9, 0.0, %v2634_v51  ;;  %v4766_v51 = vld [vmem:[#allocation18_spill] sm:$0xff]  ;;  %vm381_vm9 = vcmp.gt.f32.partialorder %v2737_v42, 0.0 }
 0x10e   :  { %706 = vadd.xlane.f32.xlu1 %v705_v28  ;;  %703 = vadd.xlane.f32.xlu0 %v702_v1  ;;  %v509_v28 = vsub.f32 %v4764_v21, %v440_v12  ;;  %v717_v1 = vsel %vm134_vm1, %v2836_v17, 0.0  ;;  %v508_v12 = vsub.f32 %v4766_v51, %v439_v8  ;;  %v4767_v21 = vld [vmem:[#allocation19_spill] sm:$0xff]  ;;  %v4768_v17 = vld [vmem:[#allocation20_spill] sm:$0xff] }
 0x10f   :  { %v507_v15 = vsub.f32 %v4767_v21, %v438_v52  ;;  %v512_v57 = vsub.f32 %v4768_v17, %v443_v33  ;;  %v4771_v8 = vld [vmem:[#allocation23_spill] sm:$0xff] }
 0x110   :  { %v2844_v4 = vpop.xlane.xlu2 %298  ;;  %v515_v52 = vsub.f32 %v4771_v8, %v446_v0  ;;  %v2880_v17 = vsel %vm545_vm8, %v509_v28, 0.0  ;;  %v4776_v0 = vld [vmem:[#allocation24_spill] sm:$0xff] }
 0x111   :  { %v2846_v27 = vpop.xlane.xlu1 %295  ;;  %v2852_v39 = vpop.xlane.xlu0 %292  ;;  %4772 = vst [vmem:[#allocation17_spill] sm:$0xff] %v2880_v17  ;;  %v2893_v22 = vsel %vm543_vm11, %v507_v15, 0.0  ;;  %v2897_v30 = vsel %vm545_vm8, %v512_v57, 0.0  ;;  %v514_v28 = vsub.f32 %v4776_v0, %v445_v37  ;;  %v726_v51 = vsel %vm134_vm1, %v2880_v17, 0.0  ;;  %v4784_v0 = vld [vmem:[#allocation27_spill] sm:$0xff]  ;;  %v4817_v17 = vld [vmem:[#allocation45_spill] sm:$0xff] }
 0x112   :  { %4774 = vst [vmem:[#allocation19_spill] sm:$0xff] %v2893_v22  ;;  %v2909_v15 = vsel %vm544_vm13, %v511_v43, 0.0  ;;  %v2913_v57 = vsel %vm543_vm11, %v510_v38, 0.0  ;;  %v449_v37 = vsel %vm380_vm3, 0.0, %v2700_v5  ;;  %v2922_v21 = vsel %vm545_vm8, %v515_v52, 0.0 }
 0x113   :  { %4775 = vst [vmem:[#allocation20_spill] sm:$0xff] %v2897_v30  ;;  %v447_v43 = vsel %vm378_vm5, 0.0, %v2704_v36  ;;  %v735_v38 = vsel %vm134_vm1, %v2897_v30, 0.0  ;;  %v732_v5 = vsel %vm127_vm0, %v2909_v15, 0.0  ;;  %v729_v63 = vsel %vm127_vm0, %v2913_v57, 0.0  ;;  %v4783_v36 = vld [vmem:[#allocation26_spill] sm:$0xff] }
 0x114   :  { %4778 = vst [vmem:[#allocation21_spill] sm:$0xff] %v2909_v15  ;;  %v2935_v24 = vsel %vm544_vm13, %v514_v28, 0.0  ;;  %v518_v8 = vsub.f32 %v4783_v36, %v449_v37  ;;  %v2946_v52 = vsel %vm134_vm1, %v2922_v21, 0.0  ;;  %vm387_vm3 = vcmp.gt.f32.partialorder %v2805_v44, 0.0 }
 0x115   :  { %718 = vadd.xlane.f32.xlu2 %v717_v1  ;;  %v2889_v1 = vsel %vm544_vm13, %v508_v12, 0.0  ;;  %4779 = vst [vmem:[#allocation22_spill] sm:$0xff] %v2913_v57  ;;  %v720_v12 = vsel %vm127_vm0, %v2893_v22, 0.0  ;;  %v458_v30 = vsel %vm389_vm15, 0.0, %v2801_v29  ;;  %v4792_v22 = vld [vmem:[#allocation32_spill] sm:$0xff]  ;;  %vm391_vm5 = vcmp.gt.f32.partialorder %v2846_v27, 0.0 }
 0x116   :  { %715 = vadd.xlane.f32.xlu1 %v714_v62  ;;  %712 = vadd.xlane.f32.xlu0 %v711_v41  ;;  %4773 = vst [vmem:[#allocation18_spill] sm:$0xff] %v2889_v1  ;;  %v4777_v62 = vld [vmem:[#allocation25_spill] sm:$0xff]  ;;  %v448_v41 = vsel %vm379_vm4, 0.0, %v2702_v3  ;;  %vm392_vm4 = vcmp.gt.f32.partialorder %v2844_v4, 0.0 }
 0x117   :  { %v513_v35 = vsub.f32 %v4777_v62, %v444_v53  ;;  %v723_v53 = vsel %vm127_vm0, %v2889_v1, 0.0  ;;  %4780 = vst [vmem:[#allocation23_spill] sm:$0xff] %v2922_v21  ;;  %v517_v62 = vsub.f32 %v4784_v0, %v448_v41  ;;  %v4786_v0 = vld [vmem:[#allocation29_spill] sm:$0xff]  ;;  %v455_v21 = vsel %vm386_vm10, 0.0, %v2766_v50  ;;  %v4794_v1 = vld [vmem:[#allocation34_spill] sm:$0xff] }
 0x118   :  { %v2883_v47 = vpop.xlane.xlu2 %307  ;;  %4781 = vst [vmem:[#allocation24_spill] sm:$0xff] %v2935_v24 }
 0x119   :  { %v2885_v33 = vpop.xlane.xlu1 %304  ;;  %v2903_v18 = vpop.xlane.xlu0 %301  ;;  %v2939_v3 = vsel %vm543_vm11, %v513_v35, 0.0 }
 0x11a   :  { %4782 = vst [vmem:[#allocation25_spill] sm:$0xff] %v2939_v3  ;;  %v738_v41 = vsel %vm127_vm0, %v2939_v3, 0.0  ;;  %v2979_v3 = vsel %vm544_vm13, %v517_v62, 0.0  ;;  %v4793_v62 = vld [vmem:[#allocation33_spill] sm:$0xff]  ;;  %vm393_vm10 = vcmp.gt.f32.partialorder %v2903_v18, 0.0 }
 0x11b   :  { %4788 = vst [vmem:[#allocation27_spill] sm:$0xff] %v2979_v3 }
 0x11d   :  { %727 = vadd.xlane.f32.xlu2 %v726_v51  ;;  %v4785_v51 = vld [vmem:[#allocation28_spill] sm:$0xff] }
 0x11e   :  { %724 = vadd.xlane.f32.xlu1 %v723_v53  ;;  %721 = vadd.xlane.f32.xlu0 %v720_v12  ;;  %v516_v28 = vsub.f32 %v4785_v51, %v447_v43  ;;  %v452_v53 = vsel %vm383_vm6, 0.0, %v2733_v23  ;;  %v741_v12 = vsel %vm127_vm0, %v2935_v24, 0.0  ;;  %v451_v43 = vsel %vm382_vm7, 0.0, %v2735_v55 }
 0x11f   :  { %v450_v23 = vsel %vm381_vm9, 0.0, %v2737_v42  ;;  %v521_v51 = vsub.f32 %v4786_v0, %v452_v53  ;;  %v2973_v24 = vsel %vm545_vm8, %v518_v8, 0.0  ;;  %v454_v55 = vsel %vm385_vm12, 0.0, %v2768_v34  ;;  %v4790_v53 = vld [vmem:[#allocation30_spill] sm:$0xff]  ;;  %v4791_v0 = vld [vmem:[#allocation31_spill] sm:$0xff] }
 0x120   :  { %v2954_v35 = vpop.xlane.xlu2 %316  ;;  %4787 = vst [vmem:[#allocation26_spill] sm:$0xff] %v2973_v24  ;;  %v453_v42 = vsel %vm384_vm14, 0.0, %v2770_v10  ;;  %v2983_v57 = vsel %vm543_vm11, %v516_v28, 0.0  ;;  %v520_v50 = vsub.f32 %v4790_v53, %v451_v43  ;;  %v519_v15 = vsub.f32 %v4791_v0, %v450_v23 }
 0x121   :  { %v2956_v37 = vpop.xlane.xlu1 %313  ;;  %v2966_v36 = vpop.xlane.xlu0 %310  ;;  %4789 = vst [vmem:[#allocation28_spill] sm:$0xff] %v2983_v57  ;;  %v457_v8 = vsel %vm388_vm2, 0.0, %v2803_v45  ;;  %v524_v34 = vsub.f32 %v4792_v22, %v455_v21  ;;  %v456_v10 = vsel %vm387_vm3, 0.0, %v2805_v44  ;;  %v523_v28 = vsub.f32 %v4793_v62, %v454_v55  ;;  %v4796_v44 = vld [vmem:[#allocation35_spill] sm:$0xff]  ;;  %v4797_v21 = vld [vmem:[#allocation36_spill] sm:$0xff]  ;;  %v4804_v62 = vld [vmem:[#allocation38_spill] sm:$0xff] }
 0x122   :  { %v522_v43 = vsub.f32 %v4794_v1, %v453_v42  ;;  %v2997_v29 = vsel %vm134_vm1, %v2973_v24, 0.0  ;;  %v3001_v45 = vsel %vm545_vm8, %v521_v51, 0.0  ;;  %v527_v22 = vsub.f32 %v4796_v44, %v458_v30 }
 0x123   :  { %4795 = vst [vmem:[#allocation29_spill] sm:$0xff] %v3001_v45  ;;  %v526_v23 = vsub.f32 %v4797_v21, %v457_v8  ;;  %v3011_v1 = vsel %vm127_vm0, %v2983_v57, 0.0  ;;  %v461_v55 = vsel %vm392_vm4, 0.0, %v2844_v4  ;;  %v460_v42 = vsel %vm391_vm5, 0.0, %v2846_v27 }
 0x124   :  { %v3018_v30 = vsel %vm544_vm13, %v520_v50, 0.0  ;;  %vm390_vm6 = vcmp.gt.f32.partialorder %v2852_v39, 0.0  ;;  %v3023_v8 = vsel %vm134_vm1, %v3001_v45, 0.0  ;;  %v3031_v4 = vsel %vm545_vm8, %v524_v34, 0.0 }
 0x125   :  { %736 = vadd.xlane.f32.xlu2 %v735_v38  ;;  %v3007_v38 = vsel %vm127_vm0, %v2979_v3, 0.0  ;;  %4799 = vst [vmem:[#allocation30_spill] sm:$0xff] %v3018_v30  ;;  %vm395_vm7 = vcmp.gt.f32.partialorder %v2883_v47, 0.0  ;;  %vm394_vm9 = vcmp.gt.f32.partialorder %v2885_v33, 0.0  ;;  %v3037_v27 = vsel %vm544_vm13, %v523_v28, 0.0 }
 0x126   :  { %733 = vadd.xlane.f32.xlu1 %v732_v5  ;;  %730 = vadd.xlane.f32.xlu0 %v729_v63  ;;  %v4798_v5 = vld [vmem:[#allocation37_spill] sm:$0xff]  ;;  %4801 = vst [vmem:[#allocation32_spill] sm:$0xff] %v3031_v4  ;;  %v3041_v50 = vsel %vm543_vm11, %v522_v43, 0.0  ;;  %v530_v44 = vsub.f32 %v4804_v62, %v461_v55  ;;  %v3047_v34 = vsel %vm545_vm8, %v527_v22, 0.0  ;;  %v459_v45 = vsel %vm390_vm6, 0.0, %v2852_v39 }
 0x127   :  { %v525_v63 = vsub.f32 %v4798_v5, %v456_v10  ;;  %v3027_v10 = vsel %vm543_vm11, %v519_v15, 0.0  ;;  %4802 = vst [vmem:[#allocation33_spill] sm:$0xff] %v3037_v27  ;;  %v4805_v15 = vld [vmem:[#allocation39_spill] sm:$0xff]  ;;  %v3051_v5 = vsel %vm544_vm13, %v526_v23, 0.0  ;;  %v3056_v28 = vsel %vm127_vm0, %v3018_v30, 0.0 }
 0x128   :  { %v326_v51 = vpop.xlane.xlu2 %325  ;;  %4800 = vst [vmem:[#allocation31_spill] sm:$0xff] %v3027_v10  ;;  %v529_v21 = vsub.f32 %v4805_v15, %v460_v42  ;;  %v3060_v43 = vsel %vm127_vm0, %v3027_v10, 0.0  ;;  %v464_v22 = vsel %vm395_vm7, 0.0, %v2883_v47  ;;  %v463_v42 = vsel %vm394_vm9, 0.0, %v2885_v33 }
 0x129   :  { %v323_v53 = vpop.xlane.xlu1 %322  ;;  %v320_v0 = vpop.xlane.xlu0 %319  ;;  %4803 = vst [vmem:[#allocation34_spill] sm:$0xff] %v3041_v50  ;;  %v3064_v55 = vsel %vm543_vm11, %v525_v63, 0.0  ;;  %v3071_v39 = vsel %vm134_vm1, %v3031_v4, 0.0  ;;  %v3075_v23 = vsel %vm127_vm0, %v3037_v27, 0.0  ;;  %v3080_v63 = vsel %vm127_vm0, %v3041_v50, 0.0  ;;  %v4813_v27 = vld [vmem:[#allocation42_spill] sm:$0xff] }
 0x12a   :  { %4806 = vst [vmem:[#allocation35_spill] sm:$0xff] %v3047_v34  ;;  %v3084_v47 = vsel %vm134_vm1, %v3047_v34, 0.0  ;;  %v3088_v33 = vsel %vm127_vm0, %v3051_v5, 0.0  ;;  %v3093_v62 = vsel %vm127_vm0, %v3064_v55, 0.0  ;;  %v3101_v15 = vsel %vm544_vm13, %v529_v21, 0.0  ;;  %v4812_v34 = vld [vmem:[#allocation41_spill] sm:$0xff] }
 0x12b   :  { %4807 = vst [vmem:[#allocation36_spill] sm:$0xff] %v3051_v5  ;;  %v533_v50 = vsub.f32 %v4812_v34, %v464_v22  ;;  %v532_v4 = vsub.f32 %v4813_v27, %v463_v42  ;;  %vm398_vm12 = vcmp.gt.f32.partialorder %v2954_v35, 0.0  ;;  %vm397_vm14 = vcmp.gt.f32.partialorder %v2956_v37, 0.0  ;;  %v4815_v22 = vld [vmem:[#allocation43_spill] sm:$0xff] }
 0x12c   :  { %4808 = vst [vmem:[#allocation37_spill] sm:$0xff] %v3064_v55  ;;  %v462_v55 = vsel %vm393_vm10, 0.0, %v2903_v18  ;;  %vm396_vm15 = vcmp.gt.f32.partialorder %v2966_v36, 0.0  ;;  %vm401_vm2 = vcmp.gt.f32.partialorder %v326_v51, 0.0  ;;  %vm400_vm3 = vcmp.gt.f32.partialorder %v323_v53, 0.0 }
 0x12d   :  { %745 = vadd.xlane.f32.xlu2 %v2946_v52  ;;  %v4809_v52 = vld [vmem:[#allocation40_spill] sm:$0xff]  ;;  %4811 = vst [vmem:[#allocation39_spill] sm:$0xff] %v3101_v15  ;;  %vm399_vm4 = vcmp.gt.f32.partialorder %v320_v0, 0.0  ;;  %v467_v21 = vsel %vm398_vm12, 0.0, %v2954_v35  ;;  %v466_v27 = vsel %vm397_vm14, 0.0, %v2956_v37  ;;  %v531_v42 = vsub.f32 %v4815_v22, %v462_v55 }
 0x12e   :  { %742 = vadd.xlane.f32.xlu1 %v741_v12  ;;  %739 = vadd.xlane.f32.xlu0 %v738_v41  ;;  %v528_v12 = vsub.f32 %v4809_v52, %v459_v45  ;;  %v3097_v41 = vsel %vm545_vm8, %v530_v44, 0.0  ;;  %v465_v5 = vsel %vm396_vm15, 0.0, %v2966_v36  ;;  %v470_v10 = vsel %vm401_vm2, 0.0, %v326_v51  ;;  %v4816_v37 = vld [vmem:[#allocation44_spill] sm:$0xff]  ;;  %v4820_v51 = vld [vmem:[#allocation46_spill] sm:$0xff] }
 0x12f   :  { %4810 = vst [vmem:[#allocation38_spill] sm:$0xff] %v3097_v41  ;;  %v3113_v34 = vsel %vm134_vm1, %v3097_v41, 0.0  ;;  %v469_v30 = vsel %vm400_vm3, 0.0, %v323_v53  ;;  %v468_v57 = vsel %vm399_vm4, 0.0, %v320_v0  ;;  %v536_v41 = vsub.f32 %v4816_v37, %v467_v21  ;;  %v4821_v0 = vld [vmem:[#allocation47_spill] sm:$0xff] }
 0x130   :  { %v335_v45 = vpop.xlane.xlu2 %334  ;;  %v3117_v18 = vsel %vm543_vm11, %v528_v12, 0.0  ;;  %v535_v16 = vsub.f32 %v4817_v17, %v466_v27  ;;  %v3128_v55 = vsel %vm545_vm8, %v533_v50, 0.0  ;;  %v3132_v36 = vsel %vm544_vm13, %v532_v4, 0.0  ;;  %v4822_v12 = vld [vmem:[#allocation48_spill] sm:$0xff]  ;;  %v4823_v17 = vld [vmem:[#allocation49_spill] sm:$0xff] }
 0x131   :  { %v332_v52 = vpop.xlane.xlu1 %331  ;;  %v329_v44 = vpop.xlane.xlu0 %328  ;;  %vm404_vm5 = vcmp.gt.f32.partialorder %v335_v45, 0.0  ;;  %4814 = vst [vmem:[#allocation40_spill] sm:$0xff] %v3117_v18  ;;  %v534_v53 = vsub.f32 %v4820_v51, %v465_v5 }
 0x132   :  { %vm403_vm6 = vcmp.gt.f32.partialorder %v332_v52, 0.0  ;;  %vm402_vm7 = vcmp.gt.f32.partialorder %v329_v44, 0.0  ;;  %v473_v3 = vsel %vm404_vm5, 0.0, %v335_v45  ;;  %4818 = vst [vmem:[#allocation41_spill] sm:$0xff] %v3128_v55  ;;  %v3139_v45 = vsel %vm127_vm0, %v3101_v15, 0.0 }
 0x133   :  { %v472_v24 = vsel %vm403_vm6, 0.0, %v332_v52  ;;  %v471_v35 = vsel %vm402_vm7, 0.0, %v329_v44  ;;  %4819 = vst [vmem:[#allocation42_spill] sm:$0xff] %v3132_v36  ;;  %v542_v52 = vsub.f32 %v2465_v61, %v473_v3  ;;  %v3167_v61 = vsel %vm543_vm11, %v531_v42, 0.0 }
 0x134   :  { %v541_v50 = vsub.f32 %v2467_v60, %v472_v24  ;;  %v540_v44 = vsub.f32 %v2474_v9, %v471_v35  ;;  %v3162_v60 = vsel %vm127_vm0, %v3132_v36, 0.0  ;;  %4824 = vst [vmem:[#allocation43_spill] sm:$0xff] %v3167_v61  ;;  %v3171_v9 = vsel %vm545_vm8, %v536_v41, 0.0 }
 0x135   :  { %754 = vadd.xlane.f32.xlu2 %v2997_v29  ;;  %v539_v29 = vsub.f32 %v4821_v0, %v470_v10  ;;  %4825 = vst [vmem:[#allocation44_spill] sm:$0xff] %v3171_v9  ;;  %v3175_v24 = vsel %vm544_vm13, %v535_v16, 0.0  ;;  %v3180_v3 = vsel %vm543_vm11, %v534_v53, 0.0  ;;  %v3196_v16 = vsel %vm545_vm8, %v542_v52, 0.0 }
 0x136   :  { %751 = vadd.xlane.f32.xlu1 %v3007_v38  ;;  %748 = vadd.xlane.f32.xlu0 %v3011_v1  ;;  %v538_v38 = vsub.f32 %v4822_v12, %v469_v30  ;;  %v537_v1 = vsub.f32 %v4823_v17, %v468_v57  ;;  %v3154_v30 = vsel %vm127_vm0, %v3117_v18, 0.0  ;;  %v3158_v57 = vsel %vm134_vm1, %v3128_v55, 0.0  ;;  %4826 = vst [vmem:[#allocation45_spill] sm:$0xff] %v3175_v24 }
 0x137   :  { %4827 = vst [vmem:[#allocation46_spill] sm:$0xff] %v3180_v3  ;;  %v3184_v5 = vsel %vm545_vm8, %v539_v29, 0.0  ;;  %v3200_v22 = vsel %vm544_vm13, %v541_v50, 0.0  ;;  %v3204_v42 = vsel %vm543_vm11, %v540_v44, 0.0  ;;  %v3211_v37 = vsel %vm127_vm0, %v3167_v61, 0.0 }
 0x138   :  { %v3145_v4 = vpop.xlane.xlu2 %628  ;;  %4828 = vst [vmem:[#allocation47_spill] sm:$0xff] %v3184_v5  ;;  %v3188_v27 = vsel %vm544_vm13, %v538_v38, 0.0  ;;  %v3192_v41 = vsel %vm543_vm11, %v537_v1, 0.0  ;;  %v3215_v48 = vsel %vm134_vm1, %v3171_v9, 0.0  ;;  %v3219_v59 = vsel %vm127_vm0, %v3175_v24, 0.0 }
 0x139   :  { %v3147_v21 = vpop.xlane.xlu1 %625  ;;  %1942 = vrcp.f32 %v3145_v4  ;;  %v3150_v10 = vpop.xlane.xlu0 %622  ;;  %4829 = vst [vmem:[#allocation48_spill] sm:$0xff] %v3188_v27  ;;  %v865_v35 = vand.u32 2147483647, %v3145_v4  ;;  %v867_v40 = vand.u32 2147483648, %v3145_v4  ;;  %v3233_v51 = vsel %vm127_vm0, %v3188_v27, 0.0 }
 0x13a   :  { %1944 = vrcp.f32 %v3147_v21  ;;  %4830 = vst [vmem:[#allocation49_spill] sm:$0xff] %v3192_v41  ;;  %v3237_v0 = vsel %vm127_vm0, %v3192_v41, 0.0  ;;  %v3245_v29 = vsel %vm127_vm0, %v3200_v22, 0.0  ;;  %v3249_v12 = vsel %vm127_vm0, %v3204_v42, 0.0 }
 0x13b   :  { %1946 = vrcp.f32 %v3150_v10  ;;  %4831 = vst [vmem:[#allocation57_spill] sm:$0xff] %v3196_v16  ;;  %vm861_vm8 = vweird.f32 %v3145_v4  ;;  %vm847_vm11 = vweird.f32 %v3147_v21  ;;  %v851_v1 = vand.u32 2147483647, %v3147_v21 }
 0x13c   :  { %4832 = vst [vmem:[#allocation58_spill] sm:$0xff] %v3200_v22  ;;  %vm3259_vm13 = vcmp.eq.f32.partialorder %v865_v35, 8.507059e+37  ;;  %v868_v27 = vor.u32 1.1754944e-38, %v867_v40  ;;  %vm833_vm9 = vweird.f32 %v3150_v10  ;;  %v837_v35 = vand.u32 2147483647, %v3150_v10 }
 0x13d   :  { %4833 = vst [vmem:[#allocation59_spill] sm:$0xff] %v3204_v42  ;;  %763 = vadd.xlane.f32.xlu2 %v3023_v8  ;;  %v3225_v8 = vsel %vm127_vm0, %v3180_v3, 0.0  ;;  %v839_v9 = vand.u32 2147483648, %v3150_v10  ;;  %vm3273_vm12 = vcmp.eq.f32.partialorder %v851_v1, 8.507059e+37 }
 0x13e   :  { %760 = vadd.xlane.f32.xlu1 %v3056_v28  ;;  %757 = vadd.xlane.f32.xlu0 %v3060_v43  ;;  %v3229_v28 = vsel %vm134_vm1, %v3184_v5, 0.0  ;;  %v3241_v43 = vsel %vm134_vm1, %v3196_v16, 0.0  ;;  %v853_v16 = vand.u32 2147483648, %v3147_v21  ;;  %vm3285_vm3 = vcmp.eq.f32.partialorder %v837_v35, 8.507059e+37 }
 0x13f   :  { %v1943_v53 = vpop.eup %1942  ;;  %v840_v1 = vor.u32 1.1754944e-38, %v839_v9 }
 0x140   :  { %v1945_v38 = vpop.eup %1944  ;;  %v857_v17 = vmul.f32 %v1943_v53, %v3145_v4  ;;  %v3255_v52 = vpop.xlane.xlu2 %637  ;;  %vm862_vm10 = vweird.f32 %v1943_v53  ;;  %v854_v18 = vor.u32 1.1754944e-38, %v853_v16 }
 0x141   :  { %v3257_v50 = vpop.xlane.xlu1 %634  ;;  %v1947_v44 = vpop.eup %1946  ;;  %v843_v42 = vmul.f32 %v1945_v38, %v3147_v21  ;;  %1948 = vrcp.f32 %v3255_v52  ;;  %vm848_vm14 = vweird.f32 %v1945_v38  ;;  %v907_v55 = vand.u32 2147483647, %v3255_v52  ;;  %vm863_vm2 = vmor %vm861_vm8, %vm862_vm10 }
 0x142   :  { %v858_v41 = vsub.f32 1.0, %v857_v17  ;;  %v829_v5 = vmul.f32 %v1947_v44, %v3150_v10  ;;  %v3268_v3 = vpop.xlane.xlu0 %631  ;;  %1950 = vrcp.f32 %v3257_v50  ;;  %vm834_vm15 = vweird.f32 %v1947_v44  ;;  %vm849_vm5 = vmor %vm847_vm11, %vm848_vm14 }
 0x143   :  { %v844_v24 = vsub.f32 1.0, %v843_v42  ;;  %1952 = vrcp.f32 %v3268_v3  ;;  %vm903_vm4 = vweird.f32 %v3255_v52  ;;  %vm835_vm6 = vmor %vm833_vm9, %vm834_vm15  ;;  %vm3304_vm7 = vcmp.eq.f32.partialorder %v907_v55, 8.507059e+37 }
 0x144   :  { %v859_v61 = vmul.f32 %v1943_v53, %v858_v41  ;;  %v830_v40 = vsub.f32 1.0, %v829_v5  ;;  %vm889_vm8 = vweird.f32 %v3257_v50  ;;  %v879_v5 = vand.u32 2147483647, %v3268_v3 }
 0x145   :  { %v845_v17 = vmul.f32 %v1945_v38, %v844_v24  ;;  %772 = vadd.xlane.f32.xlu2 %v3071_v39 }
 0x146   :  { %769 = vadd.xlane.f32.xlu1 %v3075_v23  ;;  %v860_v42 = vadd.f32 %v1943_v53, %v859_v61  ;;  %v831_v15 = vmul.f32 %v1947_v44, %v830_v40  ;;  %766 = vadd.xlane.f32.xlu0 %v3080_v63  ;;  %v909_v61 = vand.u32 2147483648, %v3255_v52  ;;  %vm3359_vm15 = vcmp.eq.f32.partialorder %v879_v5, 8.507059e+37 }
 0x147   :  { %v1949_v41 = vpop.eup %1948  ;;  %v846_v24 = vadd.f32 %v1945_v38, %v845_v17 }
 0x148   :  { %v864_v39 = vsel %vm863_vm2, %v1943_v53, %v860_v42  ;;  %v832_v23 = vadd.f32 %v1947_v44, %v831_v15  ;;  %v899_v63 = vmul.f32 %v1949_v41, %v3255_v52  ;;  %v3295_v4 = vpop.xlane.xlu2 %646  ;;  %v3297_v16 = vpop.eup %1950  ;;  %v893_v15 = vand.u32 2147483647, %v3257_v50 }
 0x149   :  { %v869_v35 = vsel %vm3259_vm13, %v868_v27, %v864_v39  ;;  %v850_v9 = vsel %vm849_vm5, %v1945_v38, %v846_v24  ;;  %v1953_v38 = vpop.eup %1952  ;;  %v885_v10 = vmul.f32 %v3297_v16, %v3257_v50  ;;  %v895_v42 = vand.u32 2147483648, %v3257_v50  ;;  %v3319_v24 = vpop.xlane.xlu1 %643 }
 0x14a   :  { %v1796_v53 = vmul.f32 %v869_v35, %v2510_v2  ;;  %v855_v40 = vsel %vm3273_vm12, %v854_v18, %v850_v9  ;;  %v836_v22 = vsel %vm835_vm6, %v1947_v44, %v832_v23  ;;  %v900_v27 = vsub.f32 1.0, %v899_v63  ;;  %v3341_v23 = vpop.xlane.xlu0 %640 }
 0x14b   :  { %v1795_v17 = vmul.f32 %v855_v40, %v2514_v49  ;;  %v841_v55 = vsel %vm3285_vm3, %v840_v1, %v836_v22  ;;  %vm904_vm11 = vweird.f32 %v1949_v41  ;;  %v871_v49 = vmul.f32 %v1953_v38, %v3268_v3 }
 0x14c   :  { %1865 = vst.msk [vmem:[%s4603_s2 + $0x10] sm:$0x7f] %vm134_vm1, %v1796_v53  ;;  %v1794_v2 = vmul.f32 %v841_v55, %v2520_v56  ;;  %v901_v18 = vmul.f32 %v1949_v41, %v900_v27  ;;  %v910_v36 = vor.u32 1.1754944e-38, %v909_v61  ;;  %v886_v44 = vsub.f32 1.0, %v885_v10  ;;  %vm905_vm13 = vmor %vm903_vm4, %vm904_vm11 }
 0x14d   :  { %1864 = vst.msk [vmem:[%s4603_s2 + $0x8] sm:$0xff] %vm127_vm0, %v1795_v17  ;;  %1954 = vrcp.f32 %v3295_v4  ;;  %781 = vadd.xlane.f32.xlu2 %v3084_v47  ;;  %v872_v1 = vsub.f32 1.0, %v871_v49  ;;  %v881_v39 = vand.u32 2147483648, %v3268_v3  ;;  %vm890_vm9 = vweird.f32 %v3297_v16 }
 0x14e   :  { %778 = vadd.xlane.f32.xlu1 %v3088_v33  ;;  %1863 = vst.msk [vmem:[%s4603_s2] sm:$0xff] %vm127_vm0, %v1794_v2  ;;  %v902_v56 = vadd.f32 %v1949_v41, %v901_v18  ;;  %1956 = vrcp.f32 %v3319_v24  ;;  %775 = vadd.xlane.f32.xlu0 %v3093_v62  ;;  %v887_v47 = vmul.f32 %v3297_v16, %v886_v44  ;;  %vm3349_vm10 = vcmp.eq.f32.partialorder %v893_v15, 8.507059e+37  ;;  %vm891_vm2 = vmor %vm889_vm8, %vm890_vm9 }
 0x14f   :  { %vm875_vm12 = vweird.f32 %v3268_v3  ;;  %v896_v61 = vor.u32 1.1754944e-38, %v895_v42  ;;  %v873_v35 = vmul.f32 %v1953_v38, %v872_v1  ;;  %vm876_vm14 = vweird.f32 %v1953_v38 }
 0x150   :  { %v906_v63 = vsel %vm905_vm13, %v1949_v41, %v902_v56  ;;  %v3354_v9 = vpop.xlane.xlu2 %655  ;;  %v888_v52 = vadd.f32 %v3297_v16, %v887_v47  ;;  %1958 = vrcp.f32 %v3341_v23  ;;  %v882_v40 = vor.u32 1.1754944e-38, %v881_v39  ;;  %vm877_vm3 = vmor %vm875_vm12, %vm876_vm14 }
 0x151   :  { %v911_v62 = vsel %vm3304_vm7, %v910_v36, %v906_v63  ;;  %v874_v41 = vadd.f32 %v1953_v38, %v873_v35  ;;  %v949_v22 = vand.u32 2147483647, %v3295_v4  ;;  %v951_v17 = vand.u32 2147483648, %v3295_v4  ;;  %v3387_v49 = vpop.xlane.xlu1 %652 }
 0x152   :  { %v1799_v15 = vmul.f32 %v911_v62, %v2543_v6  ;;  %v892_v21 = vsel %vm891_vm2, %v3297_v16, %v888_v52  ;;  %v935_v55 = vand.u32 2147483647, %v3319_v24  ;;  %1960 = vrcp.f32 %v3354_v9  ;;  %v3413_v1 = vpop.xlane.xlu0 %649 }
 0x153   :  { %v1955_v27 = vpop.eup %1954  ;;  %v897_v50 = vsel %vm3349_vm10, %v896_v61, %v892_v21  ;;  %v878_v10 = vsel %vm877_vm3, %v1953_v38, %v874_v41  ;;  %vm945_vm4 = vweird.f32 %v3295_v4  ;;  %v937_v18 = vand.u32 2147483648, %v3319_v24 }
 0x154   :  { %v1957_v6 = vpop.eup %1956  ;;  %1868 = vst.msk [vmem:[%s4603_s2 + $0x28] sm:$0x7f] %vm134_vm1, %v1799_v15  ;;  %v941_v16 = vmul.f32 %v1955_v27, %v3295_v4  ;;  %v1798_v3 = vmul.f32 %v897_v50, %v2547_v7  ;;  %v883_v42 = vsel %vm3359_vm15, %v882_v40, %v878_v10  ;;  %vm3392_vm5 = vcmp.eq.f32.partialorder %v949_v22, 8.507059e+37 }
 0x155   :  { %v927_v2 = vmul.f32 %v1957_v6, %v3319_v24  ;;  %790 = vadd.xlane.f32.xlu2 %v3113_v34  ;;  %v1797_v38 = vmul.f32 %v883_v42, %v2553_v54  ;;  %vm931_vm6 = vweird.f32 %v3319_v24  ;;  %v952_v34 = vor.u32 1.1754944e-38, %v951_v17 }
 0x156   :  { %787 = vadd.xlane.f32.xlu1 %v3139_v45  ;;  %v942_v36 = vsub.f32 1.0, %v941_v16  ;;  %784 = vadd.xlane.f32.xlu0 %v3154_v30  ;;  %v1959_v7 = vpop.eup %1958  ;;  %1867 = vst.msk [vmem:[%s4603_s2 + $0x20] sm:$0xff] %vm127_vm0, %v1798_v3  ;;  %vm3402_vm7 = vcmp.eq.f32.partialorder %v935_v55, 8.507059e+37  ;;  %v921_v54 = vand.u32 2147483647, %v3341_v23  ;;  %vm946_vm8 = vweird.f32 %v1955_v27 }
 0x157   :  { %v928_v5 = vsub.f32 1.0, %v927_v2  ;;  %1866 = vst.msk [vmem:[%s4603_s2 + $0x18] sm:$0xff] %vm127_vm0, %v1797_v38  ;;  %v913_v56 = vmul.f32 %v1959_v7, %v3341_v23  ;;  %1962 = vrcp.f32 %v3387_v49  ;;  %vm932_vm11 = vweird.f32 %v1957_v6  ;;  %vm947_vm9 = vmor %vm945_vm4, %vm946_vm8 }
 0x158   :  { %v943_v30 = vmul.f32 %v1955_v27, %v942_v36  ;;  %v1961_v39 = vpop.eup %1960  ;;  %v938_v33 = vor.u32 1.1754944e-38, %v937_v18  ;;  %vm917_vm13 = vweird.f32 %v3341_v23  ;;  %v923_v35 = vand.u32 2147483648, %v3341_v23  ;;  %vm933_vm12 = vmor %vm931_vm6, %vm932_vm11  ;;  %v3431_v55 = vpop.xlane.xlu2 %664 }
 0x159   :  { %v929_v47 = vmul.f32 %v1957_v6, %v928_v5  ;;  %v914_v61 = vsub.f32 1.0, %v913_v56  ;;  %v983_v62 = vmul.f32 %v1961_v39, %v3354_v9  ;;  %vm3420_vm10 = vcmp.eq.f32.partialorder %v921_v54, 8.507059e+37  ;;  %v3458_v2 = vpop.xlane.xlu1 %661 }
 0x15a   :  { %v944_v63 = vadd.f32 %v1955_v27, %v943_v30  ;;  %v991_v15 = vand.u32 2147483647, %v3354_v9  ;;  %1964 = vrcp.f32 %v3413_v1  ;;  %vm918_vm14 = vweird.f32 %v1959_v7  ;;  %v3464_v45 = vpop.xlane.xlu0 %658 }
 0x15b   :  { %v930_v52 = vadd.f32 %v1957_v6, %v929_v47  ;;  %v915_v40 = vmul.f32 %v1959_v7, %v914_v61  ;;  %v984_v22 = vsub.f32 1.0, %v983_v62  ;;  %vm988_vm15 = vweird.f32 %v1961_v39  ;;  %vm919_vm2 = vmor %vm917_vm13, %vm918_vm14 }
 0x15c   :  { %v948_v41 = vsel %vm947_vm9, %v1955_v27, %v944_v63  ;;  %v993_v17 = vand.u32 2147483648, %v3354_v9  ;;  %v924_v3 = vor.u32 1.1754944e-38, %v923_v35  ;;  %vm987_vm3 = vweird.f32 %v3354_v9 }
 0x15d   :  { %v953_v4 = vsel %vm3392_vm5, %v952_v34, %v948_v41  ;;  %v934_v21 = vsel %vm933_vm12, %v1957_v6, %v930_v52  ;;  %799 = vadd.xlane.f32.xlu2 %v3158_v57  ;;  %v1963_v27 = vpop.eup %1962  ;;  %v916_v10 = vadd.f32 %v1959_v7, %v915_v40  ;;  %v985_v16 = vmul.f32 %v1961_v39, %v984_v22  ;;  %vm989_vm5 = vmor %vm987_vm3, %vm988_vm15 }
 0x15e   :  { %796 = vadd.xlane.f32.xlu1 %v3162_v60  ;;  %v1802_v24 = vmul.f32 %v953_v4, %v2576_v13  ;;  %v939_v50 = vsel %vm3402_vm7, %v938_v33, %v934_v21  ;;  %793 = vadd.xlane.f32.xlu0 %v3211_v37  ;;  %v969_v57 = vmul.f32 %v1963_v27, %v3387_v49  ;;  %vm992_vm4 = vcmp.eq.f32.partialorder %v991_v15, 8.507059e+37 }
 0x15f   :  { %v1801_v6 = vmul.f32 %v939_v50, %v2580_v14  ;;  %v920_v13 = vsel %vm919_vm2, %v1959_v7, %v916_v10  ;;  %v986_v60 = vadd.f32 %v1961_v39, %v985_v16  ;;  %1966 = vrcp.f32 %v3431_v55 }
 0x160   :  { %1871 = vst.msk [vmem:[%s4603_s2 + $0x40] sm:$0x7f] %vm134_vm1, %v1802_v24  ;;  %v1965_v14 = vpop.eup %1964  ;;  %v925_v37 = vsel %vm3420_vm10, %v924_v3, %v920_v13  ;;  %v994_v23 = vor.u32 1.1754944e-38, %v993_v17  ;;  %v970_v9 = vsub.f32 1.0, %v969_v57  ;;  %v979_v42 = vand.u32 2147483648, %v3387_v49  ;;  %v3490_v63 = vpop.xlane.xlu2 %673 }
 0x161   :  { %1870 = vst.msk [vmem:[%s4603_s2 + $0x38] sm:$0xff] %vm127_vm0, %v1801_v6  ;;  %v1800_v18 = vmul.f32 %v925_v37, %v2586_v46  ;;  %v990_v38 = vsel %vm989_vm5, %v1961_v39, %v986_v60  ;;  %v977_v36 = vand.u32 2147483647, %v3387_v49  ;;  %v955_v44 = vmul.f32 %v1965_v14, %v3413_v1  ;;  %v3511_v17 = vpop.xlane.xlu1 %670 }
 0x162   :  { %v995_v7 = vsel %vm992_vm4, %v994_v23, %v990_v38  ;;  %v971_v34 = vmul.f32 %v1963_v27, %v970_v9  ;;  %vm974_vm6 = vweird.f32 %v1963_v27  ;;  %v963_v5 = vand.u32 2147483647, %v3413_v1  ;;  %v3520_v13 = vpop.xlane.xlu0 %667 }
 0x163   :  { %1869 = vst.msk [vmem:[%s4603_s2 + $0x30] sm:$0xff] %vm127_vm0, %v1800_v18  ;;  %v1805_v54 = vmul.f32 %v995_v7, %v2609_v19  ;;  %vm973_vm7 = vweird.f32 %v3387_v49  ;;  %v956_v46 = vsub.f32 1.0, %v955_v44  ;;  %1968 = vrcp.f32 %v3458_v2 }
 0x164   :  { %v972_v30 = vadd.f32 %v1963_v27, %v971_v34  ;;  %v980_v56 = vor.u32 1.1754944e-38, %v979_v42  ;;  %vm959_vm8 = vweird.f32 %v3413_v1  ;;  %v965_v39 = vand.u32 2147483648, %v3413_v1  ;;  %vm975_vm11 = vmor %vm973_vm7, %vm974_vm6 }
 0x165   :  { %808 = vadd.xlane.f32.xlu2 %v3215_v48  ;;  %v1967_v47 = vpop.eup %1966  ;;  %1874 = vst.msk [vmem:[%s4603_s2 + $0x58] sm:$0x7f] %vm134_vm1, %v1805_v54  ;;  %v957_v19 = vmul.f32 %v1965_v14, %v956_v46  ;;  %vm960_vm13 = vweird.f32 %v1965_v14  ;;  %v1033_v49 = vand.u32 2147483647, %v3431_v55  ;;  %1970 = vrcp.f32 %v3464_v45 }
 0x166   :  { %805 = vadd.xlane.f32.xlu1 %v3219_v59  ;;  %802 = vadd.xlane.f32.xlu0 %v3225_v8  ;;  %v976_v33 = vsel %vm975_vm11, %v1963_v27, %v972_v30  ;;  %vm978_vm9 = vcmp.eq.f32.partialorder %v977_v36, 8.507059e+37  ;;  %vm3485_vm10 = vcmp.eq.f32.partialorder %v963_v5, 8.507059e+37  ;;  %v1025_v59 = vmul.f32 %v1967_v47, %v3431_v55  ;;  %vm961_vm12 = vmor %vm959_vm8, %vm960_vm13 }
 0x167   :  { %v981_v61 = vsel %vm978_vm9, %v980_v56, %v976_v33  ;;  %v958_v35 = vadd.f32 %v1965_v14, %v957_v19  ;;  %v1035_v62 = vand.u32 2147483648, %v3431_v55  ;;  %v1019_v52 = vand.u32 2147483647, %v3458_v2 }
 0x168   :  { %v1804_v53 = vmul.f32 %v981_v61, %v2613_v20  ;;  %v966_v8 = vor.u32 1.1754944e-38, %v965_v39  ;;  %v1026_v15 = vsub.f32 1.0, %v1025_v59  ;;  %v1021_v41 = vand.u32 2147483648, %v3458_v2 }
 0x169   :  { %v1969_v40 = vpop.eup %1968  ;;  %v962_v22 = vsel %vm961_vm12, %v1965_v14, %v958_v35  ;;  %vm1029_vm14 = vweird.f32 %v3431_v55  ;;  %vm3499_vm15 = vcmp.eq.f32.partialorder %v1033_v49, 8.507059e+37  ;;  %1972 = vrcp.f32 %v3490_v63  ;;  %v3569_v49 = vpop.xlane.xlu1 %679 }
 0x16a   :  { %1873 = vst.msk [vmem:[%s4603_s2 + $0x50] sm:$0xff] %vm127_vm0, %v1804_v53  ;;  %v967_v20 = vsel %vm3485_vm10, %v966_v8, %v962_v22  ;;  %v1027_v1 = vmul.f32 %v1967_v47, %v1026_v15  ;;  %vm1030_vm2 = vweird.f32 %v1967_v47  ;;  %v1011_v21 = vmul.f32 %v1969_v40, %v3458_v2  ;;  %v3598_v53 = vpop.xlane.xlu0 %676 }
 0x16b   :  { %v1971_v27 = vpop.eup %1970  ;;  %v1803_v24 = vmul.f32 %v967_v20, %v2619_v58  ;;  %v1036_v50 = vor.u32 1.1754944e-38, %v1035_v62  ;;  %vm1015_vm3 = vweird.f32 %v3458_v2  ;;  %vm3515_vm4 = vcmp.eq.f32.partialorder %v1019_v52, 8.507059e+37  ;;  %vm1031_vm5 = vmor %vm1029_vm14, %vm1030_vm2  ;;  %v4874_v62 = vld [vmem:[#allocation52_spill] sm:$0xff] }
 0x16c   :  { %v1028_v16 = vadd.f32 %v1967_v47, %v1027_v1  ;;  %v1012_v6 = vsub.f32 1.0, %v1011_v21  ;;  %v1022_v3 = vor.u32 1.1754944e-38, %v1021_v41  ;;  %v997_v57 = vmul.f32 %v1971_v27, %v3464_v45 }
 0x16d   :  { %817 = vadd.xlane.f32.xlu2 %v3229_v28  ;;  %1872 = vst.msk [vmem:[%s4603_s2 + $0x48] sm:$0xff] %vm127_vm0, %v1803_v24  ;;  %v1005_v58 = vand.u32 2147483647, %v3464_v45  ;;  %v1007_v60 = vand.u32 2147483648, %v3464_v45  ;;  %v1075_v14 = vand.u32 2147483647, %v3490_v63  ;;  %1974 = vrcp.f32 %v3511_v17 }
 0x16e   :  { %814 = vadd.xlane.f32.xlu1 %v3233_v51  ;;  %811 = vadd.xlane.f32.xlu0 %v3237_v0  ;;  %v1032_v28 = vsel %vm1031_vm5, %v1967_v47, %v1028_v16  ;;  %v1013_v51 = vmul.f32 %v1969_v40, %v1012_v6  ;;  %vm1016_vm6 = vweird.f32 %v1969_v40  ;;  %v998_v37 = vsub.f32 1.0, %v997_v57  ;;  %v3542_v0 = vpop.xlane.xlu2 %682 }
 0x16f   :  { %v1973_v23 = vpop.eup %1972  ;;  %v1037_v9 = vsel %vm3499_vm15, %v1036_v50, %v1032_v28  ;;  %vm1001_vm7 = vweird.f32 %v3464_v45  ;;  %vm1002_vm8 = vweird.f32 %v1971_v27  ;;  %1976 = vrcp.f32 %v3520_v13  ;;  %vm1017_vm11 = vmor %vm1015_vm3, %vm1016_vm6 }
 0x170   :  { %v1808_v55 = vmul.f32 %v1037_v9, %v2642_v25  ;;  %v1014_v42 = vadd.f32 %v1969_v40, %v1013_v51  ;;  %v999_v18 = vmul.f32 %v1971_v27, %v998_v37  ;;  %v1067_v38 = vmul.f32 %v1973_v23, %v3490_v63  ;;  %vm1003_vm12 = vmor %vm1001_vm7, %vm1002_vm8 }
 0x171   :  { %vm3546_vm13 = vcmp.eq.f32.partialorder %v1005_v58, 8.507059e+37  ;;  %v1008_v44 = vor.u32 1.1754944e-38, %v1007_v60  ;;  %vm1071_vm9 = vweird.f32 %v3490_v63  ;;  %v1077_v7 = vand.u32 2147483648, %v3490_v63  ;;  %v3629_v28 = vpop.xlane.xlu1 %688 }
 0x172   :  { %1877 = vst.msk [vmem:[%s4603_s2 + $0x70] sm:$0x7f] %vm134_vm1, %v1808_v55  ;;  %v1018_v25 = vsel %vm1017_vm11, %v1969_v40, %v1014_v42  ;;  %v1000_v34 = vadd.f32 %v1971_v27, %v999_v18  ;;  %v1068_v5 = vsub.f32 1.0, %v1067_v38  ;;  %vm3556_vm10 = vcmp.eq.f32.partialorder %v1075_v14, 8.507059e+37 }
 0x173   :  { %v1975_v54 = vpop.eup %1974  ;;  %v1023_v46 = vsel %vm3515_vm4, %v1022_v3, %v1018_v25  ;;  %vm1072_vm14 = vweird.f32 %v1973_v23  ;;  %v1061_v30 = vand.u32 2147483647, %v3511_v17  ;;  %1978 = vrcp.f32 %v3542_v0  ;;  %v3657_v25 = vpop.xlane.xlu0 %685 }
 0x174   :  { %v1807_v56 = vmul.f32 %v1023_v46, %v2646_v26  ;;  %v1004_v39 = vsel %vm1003_vm12, %v1971_v27, %v1000_v34  ;;  %v1069_v47 = vmul.f32 %v1973_v23, %v1068_v5  ;;  %v1053_v19 = vmul.f32 %v1975_v54, %v3511_v17  ;;  %vm1073_vm2 = vmor %vm1071_vm9, %vm1072_vm14  ;;  %v4871_v46 = vld [vmem:[#allocation51_spill] sm:$0xff] }
 0x175   :  { %826 = vadd.xlane.f32.xlu2 %v3241_v43  ;;  %v1977_v33 = vpop.eup %1976  ;;  %v1009_v45 = vsel %vm3546_vm13, %v1008_v44, %v1004_v39  ;;  %v1078_v48 = vor.u32 1.1754944e-38, %v1077_v7  ;;  %vm1057_vm15 = vweird.f32 %v3511_v17  ;;  %v1063_v59 = vand.u32 2147483648, %v3511_v17 }
 0x176   :  { %823 = vadd.xlane.f32.xlu1 %v3245_v29  ;;  %820 = vadd.xlane.f32.xlu0 %v3249_v12  ;;  %1876 = vst.msk [vmem:[%s4603_s2 + $0x68] sm:$0xff] %vm127_vm0, %v1807_v56  ;;  %v1806_v26 = vmul.f32 %v1009_v45, %v2652_v11  ;;  %v1070_v43 = vadd.f32 %v1973_v23, %v1069_v47  ;;  %v1054_v61 = vsub.f32 1.0, %v1053_v19  ;;  %vm3587_vm3 = vcmp.eq.f32.partialorder %v1061_v30, 8.507059e+37  ;;  %v3605_v1 = vpop.xlane.xlu2 %691 }
 0x177   :  { %v1039_v35 = vmul.f32 %v1977_v33, %v3520_v13  ;;  %v1047_v29 = vand.u32 2147483647, %v3520_v13  ;;  %v1049_v12 = vand.u32 2147483648, %v3520_v13  ;;  %1980 = vrcp.f32 %v3569_v49 }
 0x178   :  { %1875 = vst.msk [vmem:[%s4603_s2 + $0x60] sm:$0xff] %vm127_vm0, %v1806_v26  ;;  %v1074_v11 = vsel %vm1073_vm2, %v1973_v23, %v1070_v43  ;;  %v1055_v52 = vmul.f32 %v1975_v54, %v1054_v61  ;;  %vm1058_vm4 = vweird.f32 %v1975_v54  ;;  %v1064_v41 = vor.u32 1.1754944e-38, %v1063_v59 }
 0x179   :  { %v1040_v63 = vsub.f32 1.0, %v1039_v35  ;;  %v1979_v8 = vpop.eup %1978  ;;  %v1079_v15 = vsel %vm3556_vm10, %v1078_v48, %v1074_v11  ;;  %vm1043_vm5 = vweird.f32 %v3520_v13  ;;  %vm1044_vm6 = vweird.f32 %v1977_v33  ;;  %vm1059_vm7 = vmor %vm1057_vm15, %vm1058_vm4 }
 0x17a   :  { %v1811_v40 = vmul.f32 %v1079_v15, %v2675_v31  ;;  %v1056_v22 = vadd.f32 %v1975_v54, %v1055_v52  ;;  %v1109_v20 = vmul.f32 %v1979_v8, %v3542_v0  ;;  %vm3609_vm8 = vcmp.eq.f32.partialorder %v1047_v29, 8.507059e+37  ;;  %vm1045_vm11 = vmor %vm1043_vm5, %vm1044_vm6 }
 0x17b   :  { %v1041_v4 = vmul.f32 %v1977_v33, %v1040_v63  ;;  %v1050_v27 = vor.u32 1.1754944e-38, %v1049_v12  ;;  %v1117_v24 = vand.u32 2147483647, %v3542_v0  ;;  %1982 = vrcp.f32 %v3598_v53  ;;  %v3685_v63 = vpop.xlane.xlu1 %697 }
 0x17c   :  { %1880 = vst.msk [vmem:[%s4603_s2 + $0x88] sm:$0x7f] %vm134_vm1, %v1811_v40  ;;  %v1060_v31 = vsel %vm1059_vm7, %v1975_v54, %v1056_v22  ;;  %v1110_v10 = vsub.f32 1.0, %v1109_v20  ;;  %v1119_v17 = vand.u32 2147483648, %v3542_v0  ;;  %vm1114_vm13 = vweird.f32 %v1979_v8 }
 0x17d   :  { %v1042_v50 = vadd.f32 %v1977_v33, %v1041_v4  ;;  %v1981_v16 = vpop.eup %1980  ;;  %v1065_v6 = vsel %vm3587_vm3, %v1064_v41, %v1060_v31  ;;  %v1103_v3 = vand.u32 2147483647, %v3569_v49  ;;  %1984 = vrcp.f32 %v3605_v1 }
 0x17e   :  { %v1810_v57 = vmul.f32 %v1065_v6, %v2679_v32  ;;  %v1111_v60 = vmul.f32 %v1979_v8, %v1110_v10  ;;  %v1095_v14 = vmul.f32 %v1981_v16, %v3569_v49  ;;  %vm1113_vm9 = vweird.f32 %v3542_v0  ;;  %v4868_v32 = vld [vmem:[#allocation50_spill] sm:$0xff]  ;;  %v3678_v26 = vpop.xlane.xlu2 %700 }
 0x17f   :  { %v1046_v58 = vsel %vm1045_vm11, %v1977_v33, %v1042_v50  ;;  %vm3634_vm10 = vcmp.eq.f32.partialorder %v1117_v24, 8.507059e+37  ;;  %v1105_v37 = vand.u32 2147483648, %v3569_v49  ;;  %vm1099_vm12 = vweird.f32 %v3569_v49  ;;  %vm1115_vm14 = vmor %vm1113_vm9, %vm1114_vm13  ;;  %v4877_v24 = vld [vmem:[#allocation53_spill] sm:$0xff] }
 0x180   :  { %v1051_v51 = vsel %vm3609_vm8, %v1050_v27, %v1046_v58  ;;  %1879 = vst.msk [vmem:[%s4603_s2 + $0x80] sm:$0xff] %vm127_vm0, %v1810_v57  ;;  %v1112_v9 = vadd.f32 %v1979_v8, %v1111_v60  ;;  %v1096_v55 = vsub.f32 1.0, %v1095_v14  ;;  %v1120_v18 = vor.u32 1.1754944e-38, %v1119_v17  ;;  %v4880_v57 = vld [vmem:[#allocation54_spill] sm:$0xff] }
 0x181   :  { %v1809_v23 = vmul.f32 %v1051_v51, %v4868_v32  ;;  %v1983_v42 = vpop.eup %1982  ;;  %vm3646_vm15 = vcmp.eq.f32.partialorder %v1103_v3, 8.507059e+37  ;;  %v1089_v0 = vand.u32 2147483647, %v3598_v53  ;;  %1986 = vrcp.f32 %v3629_v28 }
 0x182   :  { %v1116_v36 = vsel %vm1115_vm14, %v1979_v8, %v1112_v9  ;;  %v1097_v44 = vmul.f32 %v1981_v16, %v1096_v55  ;;  %vm1100_vm2 = vweird.f32 %v1981_v16  ;;  %v1081_v7 = vmul.f32 %v1983_v42, %v3598_v53 }
 0x183   :  { %1878 = vst.msk [vmem:[%s4603_s2 + $0x78] sm:$0xff] %vm127_vm0, %v1809_v23  ;;  %v1985_v34 = vpop.eup %1984  ;;  %v1121_v5 = vsel %vm3634_vm10, %v1120_v18, %v1116_v36  ;;  %v1106_v2 = vor.u32 1.1754944e-38, %v1105_v37  ;;  %vm1085_vm3 = vweird.f32 %v3598_v53  ;;  %v1091_v54 = vand.u32 2147483648, %v3598_v53  ;;  %vm1101_vm4 = vmor %vm1099_vm12, %vm1100_vm2  ;;  %v4883_v36 = vld [vmem:[#allocation55_spill] sm:$0xff] }
 0x184   :  { %v1814_v30 = vmul.f32 %v1121_v5, %v4871_v46  ;;  %v1098_v56 = vadd.f32 %v1981_v16, %v1097_v44  ;;  %v1082_v39 = vsub.f32 1.0, %v1081_v7  ;;  %v1151_v47 = vmul.f32 %v1985_v34, %v3605_v1 }
 0x185   :  { %vm3667_vm5 = vcmp.eq.f32.partialorder %v1089_v0, 8.507059e+37  ;;  %v1159_v33 = vand.u32 2147483647, %v3605_v1  ;;  %v1161_v45 = vand.u32 2147483648, %v3605_v1  ;;  %1988 = vrcp.f32 %v3657_v25 }
 0x186   :  { %1883 = vst.msk [vmem:[%s4603_s2 + $0xa0] sm:$0x7f] %vm134_vm1, %v1814_v30  ;;  %v1102_v48 = vsel %vm1101_vm4, %v1981_v16, %v1098_v56  ;;  %v1083_v59 = vmul.f32 %v1983_v42, %v1082_v39  ;;  %vm1086_vm6 = vweird.f32 %v1983_v42  ;;  %v1152_v49 = vsub.f32 1.0, %v1151_v47  ;;  %v3709_v16 = vpop.xlane.xlu0 %694  ;;  %v3737_v55 = vpop.xlane.xlu2 %709 }
 0x187   :  { %v1987_v43 = vpop.eup %1986  ;;  %v1107_v61 = vsel %vm3646_vm15, %v1106_v2, %v1102_v48  ;;  %v1092_v35 = vor.u32 1.1754944e-38, %v1091_v54  ;;  %vm1155_vm7 = vweird.f32 %v3605_v1  ;;  %vm1156_vm8 = vweird.f32 %v1985_v34  ;;  %vm1087_vm11 = vmor %vm1085_vm3, %vm1086_vm6  ;;  %v3758_v39 = vpop.xlane.xlu1 %706 }
 0x188   :  { %v1813_v29 = vmul.f32 %v1107_v61, %v4874_v62  ;;  %v1084_v12 = vadd.f32 %v1983_v42, %v1083_v59  ;;  %v1153_v11 = vmul.f32 %v1985_v34, %v1152_v49  ;;  %v1137_v52 = vmul.f32 %v1987_v43, %v3629_v28  ;;  %vm1157_vm9 = vmor %vm1155_vm7, %vm1156_vm8 }
 0x189   :  { %vm3689_vm13 = vcmp.eq.f32.partialorder %v1159_v33, 8.507059e+37  ;;  %v1162_v15 = vor.u32 1.1754944e-38, %v1161_v45  ;;  %v1145_v41 = vand.u32 2147483647, %v3629_v28  ;;  %1990 = vrcp.f32 %v3678_v26  ;;  %v4886_v45 = vld [vmem:[#allocation56_spill] sm:$0xff] }
 0x18a   :  { %1882 = vst.msk [vmem:[%s4603_s2 + $0x98] sm:$0xff] %vm127_vm0, %v1813_v29  ;;  %v1088_v40 = vsel %vm1087_vm11, %v1983_v42, %v1084_v12  ;;  %v1154_v22 = vadd.f32 %v1985_v34, %v1153_v11  ;;  %v1138_v4 = vsub.f32 1.0, %v1137_v52  ;;  %v1147_v53 = vand.u32 2147483648, %v3629_v28 }
 0x18b   :  { %v1989_v20 = vpop.eup %1988  ;;  %v1093_v21 = vsel %vm3667_vm5, %v1092_v35, %v1088_v40  ;;  %vm1142_vm10 = vweird.f32 %v1987_v43  ;;  %v1131_v27 = vand.u32 2147483647, %v3657_v25  ;;  %1992 = vrcp.f32 %v3685_v63  ;;  %v4889_v40 = vld [vmem:[#allocation8_spill] sm:$0xff] }
 0x18c   :  { %v1812_v31 = vmul.f32 %v1093_v21, %v4877_v24  ;;  %v1158_v50 = vsel %vm1157_vm9, %v1985_v34, %v1154_v22  ;;  %v1139_v10 = vmul.f32 %v1987_v43, %v1138_v4  ;;  %v1123_v17 = vmul.f32 %v1989_v20, %v3657_v25 }
 0x18d   :  { %v1163_v6 = vsel %vm3689_vm13, %v1162_v15, %v1158_v50  ;;  %vm1141_vm12 = vweird.f32 %v3629_v28  ;;  %vm3714_vm14 = vcmp.eq.f32.partialorder %v1145_v41, 8.507059e+37  ;;  %v1133_v3 = vand.u32 2147483648, %v3657_v25 }
 0x18e   :  { %1881 = vst.msk [vmem:[%s4603_s2 + $0x90] sm:$0xff] %vm127_vm0, %v1812_v31  ;;  %v1817_v58 = vmul.f32 %v1163_v6, %v4880_v57  ;;  %v1140_v60 = vadd.f32 %v1987_v43, %v1139_v10  ;;  %v1124_v14 = vsub.f32 1.0, %v1123_v17  ;;  %vm1127_vm15 = vweird.f32 %v3657_v25  ;;  %vm1143_vm2 = vmor %vm1141_vm12, %vm1142_vm10  ;;  %v3765_v61 = vpop.xlane.xlu0 %703  ;;  %v3789_v21 = vpop.xlane.xlu2 %718  ;;  %v4892_v31 = vld [vmem:[#allocation9_spill] sm:$0xff] }
 0x18f   :  { %v1991_v51 = vpop.eup %1990  ;;  %v1148_v28 = vor.u32 1.1754944e-38, %v1147_v53  ;;  %vm3726_vm3 = vcmp.eq.f32.partialorder %v1131_v27, 8.507059e+37  ;;  %v1201_v37 = vand.u32 2147483647, %v3678_v26  ;;  %1994 = vrcp.f32 %v3709_v16 }
 0x190   :  { %1886 = vst.msk [vmem:[%s4603_s2 + $0xb8] sm:$0x7f] %vm134_vm1, %v1817_v58  ;;  %v1144_v32 = vsel %vm1143_vm2, %v1987_v43, %v1140_v60  ;;  %v1125_v23 = vmul.f32 %v1989_v20, %v1124_v14  ;;  %vm1128_vm4 = vweird.f32 %v1989_v20  ;;  %v1193_v9 = vmul.f32 %v1991_v51, %v3678_v26  ;;  %v3817_v14 = vpop.xlane.xlu1 %715 }
 0x191   :  { %v1993_v42 = vpop.eup %1992  ;;  %v1149_v18 = vsel %vm3714_vm14, %v1148_v28, %v1144_v32  ;;  %v1134_v38 = vor.u32 1.1754944e-38, %v1133_v3  ;;  %vm1197_vm5 = vweird.f32 %v3678_v26  ;;  %v1203_v0 = vand.u32 2147483648, %v3678_v26  ;;  %vm1129_vm6 = vmor %vm1127_vm15, %vm1128_vm4  ;;  %v4895_v32 = vld [vmem:[#allocation10_spill] sm:$0xff] }
 0x192   :  { %v1816_v44 = vmul.f32 %v1149_v18, %v4883_v36  ;;  %v1126_v7 = vadd.f32 %v1989_v20, %v1125_v23  ;;  %v1194_v34 = vsub.f32 1.0, %v1193_v9  ;;  %v1179_v5 = vmul.f32 %v1993_v42, %v3685_v63 }
 0x193   :  { %vm3747_vm7 = vcmp.eq.f32.partialorder %v1201_v37, 8.507059e+37  ;;  %v1187_v54 = vand.u32 2147483647, %v3685_v63  ;;  %v1189_v46 = vand.u32 2147483648, %v3685_v63  ;;  %1996 = vrcp.f32 %v3737_v55 }
 0x194   :  { %1885 = vst.msk [vmem:[%s4603_s2 + $0xb0] sm:$0xff] %vm127_vm0, %v1816_v44  ;;  %v1130_v30 = vsel %vm1129_vm6, %v1989_v20, %v1126_v7  ;;  %v1195_v56 = vmul.f32 %v1991_v51, %v1194_v34  ;;  %vm1198_vm8 = vweird.f32 %v1991_v51  ;;  %v1180_v25 = vsub.f32 1.0, %v1179_v5 }
 0x195   :  { %v1995_v47 = vpop.eup %1994  ;;  %v1135_v19 = vsel %vm3726_vm3, %v1134_v38, %v1130_v30  ;;  %v1204_v33 = vor.u32 1.1754944e-38, %v1203_v0  ;;  %vm1183_vm11 = vweird.f32 %v3685_v63  ;;  %vm1184_vm13 = vweird.f32 %v1993_v42  ;;  %vm1199_vm9 = vmor %vm1197_vm5, %vm1198_vm8 }
 0x196   :  { %v1815_v48 = vmul.f32 %v1135_v19, %v4886_v45  ;;  %v1196_v59 = vadd.f32 %v1991_v51, %v1195_v56  ;;  %v1181_v49 = vmul.f32 %v1993_v42, %v1180_v25  ;;  %v1165_v43 = vmul.f32 %v1995_v47, %v3709_v16  ;;  %vm1185_vm12 = vmor %vm1183_vm11, %vm1184_vm13  ;;  %v3838_v34 = vpop.xlane.xlu0 %712  ;;  %v3845_v19 = vpop.xlane.xlu2 %727 }
 0x197   :  { %vm3769_vm10 = vcmp.eq.f32.partialorder %v1187_v54, 8.507059e+37  ;;  %v1190_v62 = vor.u32 1.1754944e-38, %v1189_v46  ;;  %v1173_v29 = vand.u32 2147483647, %v3709_v16  ;;  %1998 = vrcp.f32 %v3758_v39  ;;  %v4898_v46 = vld [vmem:[#allocation11_spill] sm:$0xff] }
 0x198   :  { %1884 = vst.msk [vmem:[%s4603_s2 + $0xa8] sm:$0xff] %vm127_vm0, %v1815_v48  ;;  %v1200_v12 = vsel %vm1199_vm9, %v1991_v51, %v1196_v59  ;;  %v1182_v11 = vadd.f32 %v1993_v42, %v1181_v49  ;;  %v1166_v52 = vsub.f32 1.0, %v1165_v43  ;;  %v1175_v26 = vand.u32 2147483648, %v3709_v16 }
 0x199   :  { %v1997_v8 = vpop.eup %1996  ;;  %v1205_v15 = vsel %vm3747_vm7, %v1204_v33, %v1200_v12  ;;  %vm1170_vm14 = vweird.f32 %v1995_v47  ;;  %v1243_v41 = vand.u32 2147483647, %v3737_v55  ;;  %2000 = vrcp.f32 %v3765_v61  ;;  %v4901_v12 = vld [vmem:[#allocation12_spill] sm:$0xff] }
 0x19a   :  { %v1820_v22 = vmul.f32 %v1205_v15, %v4889_v40  ;;  %v1186_v4 = vsel %vm1185_vm12, %v1993_v42, %v1182_v11  ;;  %v1167_v53 = vmul.f32 %v1995_v47, %v1166_v52  ;;  %v1235_v20 = vmul.f32 %v1997_v8, %v3737_v55  ;;  %v3869_v15 = vpop.xlane.xlu1 %724 }
 0x19b   :  { %v1191_v27 = vsel %vm3769_vm10, %v1190_v62, %v1186_v4  ;;  %vm1169_vm15 = vweird.f32 %v3709_v16  ;;  %vm3794_vm2 = vcmp.eq.f32.partialorder %v1173_v29, 8.507059e+37  ;;  %v1245_v24 = vand.u32 2147483648, %v3737_v55 }
 0x19c   :  { %1889 = vst.msk [vmem:[%s4603_s2 + $0xd0] sm:$0x7f] %vm134_vm1, %v1820_v22  ;;  %v1819_v50 = vmul.f32 %v1191_v27, %v4892_v31  ;;  %v1168_v10 = vadd.f32 %v1995_v47, %v1167_v53  ;;  %v1236_v17 = vsub.f32 1.0, %v1235_v20  ;;  %vm1239_vm3 = vweird.f32 %v3737_v55  ;;  %vm1171_vm4 = vmor %vm1169_vm15, %vm1170_vm14  ;;  %v4904_v22 = vld [vmem:[#allocation13_spill] sm:$0xff] }
 0x19d   :  { %v1999_v6 = vpop.eup %1998  ;;  %v1176_v16 = vor.u32 1.1754944e-38, %v1175_v26  ;;  %vm3806_vm5 = vcmp.eq.f32.partialorder %v1243_v41, 8.507059e+37  ;;  %v1229_v3 = vand.u32 2147483647, %v3758_v39  ;;  %2002 = vrcp.f32 %v3789_v21 }
 0x19e   :  { %1888 = vst.msk [vmem:[%s4603_s2 + $0xc8] sm:$0xff] %vm127_vm0, %v1819_v50  ;;  %v1172_v57 = vsel %vm1171_vm4, %v1995_v47, %v1168_v10  ;;  %v1237_v58 = vmul.f32 %v1997_v8, %v1236_v17  ;;  %vm1240_vm6 = vweird.f32 %v1997_v8  ;;  %v1221_v60 = vmul.f32 %v1999_v6, %v3758_v39  ;;  %v3897_v17 = vpop.xlane.xlu0 %721 }
 0x19f   :  { %v2001_v51 = vpop.eup %2000  ;;  %v1177_v28 = vsel %vm3794_vm2, %v1176_v16, %v1172_v57  ;;  %v1246_v13 = vor.u32 1.1754944e-38, %v1245_v24  ;;  %vm1225_vm7 = vweird.f32 %v3758_v39  ;;  %v1231_v37 = vand.u32 2147483648, %v3758_v39  ;;  %vm1241_vm8 = vmor %vm1239_vm3, %vm1240_vm6  ;;  %v4907_v57 = vld [vmem:[#allocation14_spill] sm:$0xff] }
 0x1a0   :  { %v1818_v23 = vmul.f32 %v1177_v28, %v4895_v32  ;;  %v1238_v9 = vadd.f32 %v1997_v8, %v1237_v58  ;;  %v1222_v42 = vsub.f32 1.0, %v1221_v60  ;;  %v1207_v18 = vmul.f32 %v2001_v51, %v3765_v61 }
 0x1a1   :  { %vm3827_vm11 = vcmp.eq.f32.partialorder %v1229_v3, 8.507059e+37  ;;  %v1215_v0 = vand.u32 2147483647, %v3765_v61  ;;  %v1217_v36 = vand.u32 2147483648, %v3765_v61  ;;  %2004 = vrcp.f32 %v3817_v14 }
 0x1a2   :  { %1887 = vst.msk [vmem:[%s4603_s2 + $0xc0] sm:$0xff] %vm127_vm0, %v1818_v23  ;;  %v1242_v44 = vsel %vm1241_vm8, %v1997_v8, %v1238_v9  ;;  %v1223_v7 = vmul.f32 %v1999_v6, %v1222_v42  ;;  %vm1226_vm13 = vweird.f32 %v1999_v6  ;;  %v1208_v55 = vsub.f32 1.0, %v1207_v18  ;;  %v3918_v42 = vpop.xlane.xlu2 %736 }
 0x1a3   :  { %v2003_v5 = vpop.eup %2002  ;;  %v1247_v2 = vsel %vm3806_vm5, %v1246_v13, %v1242_v44  ;;  %v1232_v54 = vor.u32 1.1754944e-38, %v1231_v37  ;;  %vm1211_vm9 = vweird.f32 %v3765_v61  ;;  %vm1212_vm10 = vweird.f32 %v2001_v51  ;;  %vm1227_vm12 = vmor %vm1225_vm7, %vm1226_vm13 }
 0x1a4   :  { %v1823_v30 = vmul.f32 %v1247_v2, %v4898_v46  ;;  %v1224_v56 = vadd.f32 %v1999_v6, %v1223_v7  ;;  %v1209_v25 = vmul.f32 %v2001_v51, %v1208_v55  ;;  %v1277_v47 = vmul.f32 %v2003_v5, %v3789_v21  ;;  %vm1213_vm15 = vmor %vm1211_vm9, %vm1212_vm10  ;;  %v3925_v2 = vpop.xlane.xlu1 %733 }
 0x1a5   :  { %vm3849_vm14 = vcmp.eq.f32.partialorder %v1215_v0, 8.507059e+37  ;;  %v1218_v45 = vor.u32 1.1754944e-38, %v1217_v36  ;;  %v1285_v48 = vand.u32 2147483647, %v3789_v21  ;;  %2006 = vrcp.f32 %v3838_v34  ;;  %v4910_v36 = vld [vmem:[#allocation15_spill] sm:$0xff] }
 0x1a6   :  { %1892 = vst.msk [vmem:[%s4603_s2 + $0xe8] sm:$0x7f] %vm134_vm1, %v1823_v30  ;;  %v1228_v59 = vsel %vm1227_vm12, %v1999_v6, %v1224_v56  ;;  %v1210_v49 = vadd.f32 %v2001_v51, %v1209_v25  ;;  %v1278_v43 = vsub.f32 1.0, %v1277_v47  ;;  %v1287_v39 = vand.u32 2147483648, %v3789_v21 }
 0x1a7   :  { %v2005_v35 = vpop.eup %2004  ;;  %v1233_v62 = vsel %vm3827_vm11, %v1232_v54, %v1228_v59  ;;  %vm1282_vm2 = vweird.f32 %v2003_v5  ;;  %v1271_v29 = vand.u32 2147483647, %v3817_v14  ;;  %2008 = vrcp.f32 %v3845_v19  ;;  %v4913_v59 = vld [vmem:[#allocation16_spill] sm:$0xff] }
 0x1a8   :  { %v1822_v11 = vmul.f32 %v1233_v62, %v4901_v12  ;;  %v1214_v52 = vsel %vm1213_vm15, %v2001_v51, %v1210_v49  ;;  %v1279_v26 = vmul.f32 %v2003_v5, %v1278_v43  ;;  %v1263_v8 = vmul.f32 %v2005_v35, %v3817_v14  ;;  %v3949_v62 = vpop.xlane.xlu0 %730 }
 0x1a9   :  { %v1219_v41 = vsel %vm3849_vm14, %v1218_v45, %v1214_v52  ;;  %vm1281_vm3 = vweird.f32 %v3789_v21  ;;  %vm3874_vm4 = vcmp.eq.f32.partialorder %v1285_v48, 8.507059e+37  ;;  %v1273_v40 = vand.u32 2147483648, %v3817_v14 }
 0x1aa   :  { %1891 = vst.msk [vmem:[%s4603_s2 + $0xe0] sm:$0xff] %vm127_vm0, %v1822_v11  ;;  %v1821_v4 = vmul.f32 %v1219_v41, %v4904_v22  ;;  %v1280_v53 = vadd.f32 %v2003_v5, %v1279_v26  ;;  %v1264_v20 = vsub.f32 1.0, %v1263_v8  ;;  %vm1267_vm5 = vweird.f32 %v3817_v14  ;;  %vm1283_vm6 = vmor %vm1281_vm3, %vm1282_vm2  ;;  %v4916_v11 = vld [vmem:[#allocation17_spill] sm:$0xff] }
 0x1ab   :  { %v2007_v27 = vpop.eup %2006  ;;  %v1288_v21 = vor.u32 1.1754944e-38, %v1287_v39  ;;  %vm3886_vm7 = vcmp.eq.f32.partialorder %v1271_v29, 8.507059e+37  ;;  %v1257_v24 = vand.u32 2147483647, %v3838_v34  ;;  %2010 = vrcp.f32 %v3869_v15 }
 0x1ac   :  { %1890 = vst.msk [vmem:[%s4603_s2 + $0xd8] sm:$0xff] %vm127_vm0, %v1821_v4  ;;  %v1284_v31 = vsel %vm1283_vm6, %v2003_v5, %v1280_v53  ;;  %v1265_v50 = vmul.f32 %v2005_v35, %v1264_v20  ;;  %vm1268_vm8 = vweird.f32 %v2005_v35  ;;  %v1249_v10 = vmul.f32 %v2007_v27, %v3838_v34  ;;  %v3977_v20 = vpop.xlane.xlu2 %745 }
 0x1ad   :  { %v2009_v6 = vpop.eup %2008  ;;  %v1289_v16 = vsel %vm3874_vm4, %v1288_v21, %v1284_v31  ;;  %v1274_v1 = vor.u32 1.1754944e-38, %v1273_v40  ;;  %vm1253_vm11 = vweird.f32 %v3838_v34  ;;  %v1259_v3 = vand.u32 2147483648, %v3838_v34  ;;  %vm1269_vm13 = vmor %vm1267_vm5, %vm1268_vm8  ;;  %v4919_v31 = vld [vmem:[#allocation18_spill] sm:$0xff] }
 0x1ae   :  { %v1826_v58 = vmul.f32 %v1289_v16, %v4907_v57  ;;  %v1266_v60 = vadd.f32 %v2005_v35, %v1265_v50  ;;  %v1250_v51 = vsub.f32 1.0, %v1249_v10  ;;  %v1319_v28 = vmul.f32 %v2009_v6, %v3845_v19 }
 0x1af   :  { %vm3907_vm9 = vcmp.eq.f32.partialorder %v1257_v24, 8.507059e+37  ;;  %v1327_v37 = vand.u32 2147483647, %v3845_v19  ;;  %v1329_v32 = vand.u32 2147483648, %v3845_v19  ;;  %2012 = vrcp.f32 %v3897_v17 }
 0x1b0   :  { %1895 = vst.msk [vmem:[%s4603_s2 + $0x100] sm:$0x7f] %vm134_vm1, %v1826_v58  ;;  %v1270_v23 = vsel %vm1269_vm13, %v2005_v35, %v1266_v60  ;;  %v1251_v9 = vmul.f32 %v2007_v27, %v1250_v51  ;;  %vm1254_vm10 = vweird.f32 %v2007_v27  ;;  %v1320_v14 = vsub.f32 1.0, %v1319_v28  ;;  %v3998_v51 = vpop.xlane.xlu1 %742 }
 0x1b1   :  { %v2011_v18 = vpop.eup %2010  ;;  %v1275_v38 = vsel %vm3886_vm7, %v1274_v1, %v1270_v23  ;;  %v1260_v0 = vor.u32 1.1754944e-38, %v1259_v3  ;;  %vm1323_vm12 = vweird.f32 %v3845_v19  ;;  %vm1324_vm14 = vweird.f32 %v2009_v6  ;;  %vm1255_vm15 = vmor %vm1253_vm11, %vm1254_vm10 }
 0x1b2   :  { %v1825_v44 = vmul.f32 %v1275_v38, %v4910_v36  ;;  %v1252_v7 = vadd.f32 %v2007_v27, %v1251_v9  ;;  %v1321_v55 = vmul.f32 %v2009_v6, %v1320_v14  ;;  %v1305_v5 = vmul.f32 %v2011_v18, %v3869_v15  ;;  %vm1325_vm3 = vmor %vm1323_vm12, %vm1324_vm14  ;;  %v4005_v38 = vpop.xlane.xlu0 %739 }
 0x1b3   :  { %vm3929_vm2 = vcmp.eq.f32.partialorder %v1327_v37, 8.507059e+37  ;;  %v1330_v46 = vor.u32 1.1754944e-38, %v1329_v32  ;;  %v1313_v30 = vand.u32 2147483647, %v3869_v15  ;;  %2014 = vrcp.f32 %v3918_v42  ;;  %v4922_v32 = vld [vmem:[#allocation19_spill] sm:$0xff] }
 0x1b4   :  { %1894 = vst.msk [vmem:[%s4603_s2 + $0xf8] sm:$0xff] %vm127_vm0, %v1825_v44  ;;  %v1256_v56 = vsel %vm1255_vm15, %v2007_v27, %v1252_v7  ;;  %v1322_v25 = vadd.f32 %v2009_v6, %v1321_v55  ;;  %v1306_v47 = vsub.f32 1.0, %v1305_v5  ;;  %v1315_v34 = vand.u32 2147483648, %v3869_v15 }
 0x1b5   :  { %v2013_v33 = vpop.eup %2012  ;;  %v1261_v45 = vsel %vm3907_vm9, %v1260_v0, %v1256_v56  ;;  %vm1310_vm4 = vweird.f32 %v2011_v18  ;;  %v1299_v48 = vand.u32 2147483647, %v3897_v17  ;;  %2016 = vrcp.f32 %v3925_v2  ;;  %v4925_v56 = vld [vmem:[#allocation20_spill] sm:$0xff] }
 0x1b6   :  { %v1824_v49 = vmul.f32 %v1261_v45, %v4913_v59  ;;  %v1326_v43 = vsel %vm1325_vm3, %v2009_v6, %v1322_v25  ;;  %v1307_v39 = vmul.f32 %v2011_v18, %v1306_v47  ;;  %v1291_v35 = vmul.f32 %v2013_v33, %v3897_v17  ;;  %v4029_v45 = vpop.xlane.xlu2 %754 }
 0x1b7   :  { %v1331_v29 = vsel %vm3929_vm2, %v1330_v46, %v1326_v43  ;;  %vm1309_vm5 = vweird.f32 %v3869_v15  ;;  %vm3954_vm6 = vcmp.eq.f32.partialorder %v1313_v30, 8.507059e+37  ;;  %v1301_v12 = vand.u32 2147483648, %v3897_v17 }
 0x1b8   :  { %1893 = vst.msk [vmem:[%s4603_s2 + $0xf0] sm:$0xff] %vm127_vm0, %v1824_v49  ;;  %v1829_v52 = vmul.f32 %v1331_v29, %v4916_v11  ;;  %v1308_v26 = vadd.f32 %v2011_v18, %v1307_v39  ;;  %v1292_v8 = vsub.f32 1.0, %v1291_v35  ;;  %vm1295_vm7 = vweird.f32 %v3897_v17  ;;  %vm1311_vm8 = vmor %vm1309_vm5, %vm1310_vm4  ;;  %v4928_v49 = vld [vmem:[#allocation21_spill] sm:$0xff] }
 0x1b9   :  { %v2015_v41 = vpop.eup %2014  ;;  %v1316_v15 = vor.u32 1.1754944e-38, %v1315_v34  ;;  %vm3966_vm11 = vcmp.eq.f32.partialorder %v1299_v48, 8.507059e+37  ;;  %v1369_v40 = vand.u32 2147483647, %v3918_v42  ;;  %2018 = vrcp.f32 %v3949_v62 }
 0x1ba   :  { %1898 = vst.msk [vmem:[%s4603_s2 + $0x118] sm:$0x7f] %vm134_vm1, %v1829_v52  ;;  %v1312_v22 = vsel %vm1311_vm8, %v2011_v18, %v1308_v26  ;;  %v1293_v4 = vmul.f32 %v2013_v33, %v1292_v8  ;;  %vm1296_vm13 = vweird.f32 %v2013_v33  ;;  %v1361_v53 = vmul.f32 %v2015_v41, %v3918_v42  ;;  %v4057_v8 = vpop.xlane.xlu1 %751 }
 0x1bb   :  { %v2017_v27 = vpop.eup %2016  ;;  %v1317_v21 = vsel %vm3954_vm6, %v1316_v15, %v1312_v22  ;;  %v1302_v63 = vor.u32 1.1754944e-38, %v1301_v12  ;;  %vm1365_vm9 = vweird.f32 %v3918_v42  ;;  %v1371_v24 = vand.u32 2147483648, %v3918_v42  ;;  %vm1297_vm10 = vmor %vm1295_vm7, %vm1296_vm13  ;;  %v4931_v22 = vld [vmem:[#allocation22_spill] sm:$0xff] }
 0x1bc   :  { %v1828_v50 = vmul.f32 %v1317_v21, %v4919_v31  ;;  %v1294_v10 = vadd.f32 %v2013_v33, %v1293_v4  ;;  %v1362_v6 = vsub.f32 1.0, %v1361_v53  ;;  %v1347_v16 = vmul.f32 %v2017_v27, %v3925_v2 }
 0x1bd   :  { %vm3987_vm12 = vcmp.eq.f32.partialorder %v1369_v40, 8.507059e+37  ;;  %v1355_v3 = vand.u32 2147483647, %v3925_v2  ;;  %v1357_v57 = vand.u32 2147483648, %v3925_v2  ;;  %2020 = vrcp.f32 %v3977_v20 }
 0x1be   :  { %1897 = vst.msk [vmem:[%s4603_s2 + $0x110] sm:$0xff] %vm127_vm0, %v1828_v50  ;;  %v1298_v58 = vsel %vm1297_vm10, %v2013_v33, %v1294_v10  ;;  %v1363_v60 = vmul.f32 %v2015_v41, %v1362_v6  ;;  %vm1366_vm14 = vweird.f32 %v2015_v41  ;;  %v1348_v17 = vsub.f32 1.0, %v1347_v16  ;;  %v4078_v6 = vpop.xlane.xlu0 %748 }
 0x1bf   :  { %v2019_v28 = vpop.eup %2018  ;;  %v1303_v13 = vsel %vm3966_vm11, %v1302_v63, %v1298_v58  ;;  %v1372_v37 = vor.u32 1.1754944e-38, %v1371_v24  ;;  %vm1351_vm15 = vweird.f32 %v3925_v2  ;;  %vm1352_vm2 = vweird.f32 %v2017_v27  ;;  %vm1367_vm3 = vmor %vm1365_vm9, %vm1366_vm14 }
 0x1c0   :  { %v1827_v23 = vmul.f32 %v1303_v13, %v4922_v32  ;;  %v1364_v9 = vadd.f32 %v2015_v41, %v1363_v60  ;;  %v1349_v14 = vmul.f32 %v2017_v27, %v1348_v17  ;;  %v1333_v18 = vmul.f32 %v2019_v28, %v3949_v62  ;;  %vm1353_vm5 = vmor %vm1351_vm15, %vm1352_vm2  ;;  %v4085_v13 = vpop.xlane.xlu2 %763 }
 0x1c1   :  { %vm4009_vm4 = vcmp.eq.f32.partialorder %v1355_v3, 8.507059e+37  ;;  %v1358_v36 = vor.u32 1.1754944e-38, %v1357_v57  ;;  %v1341_v44 = vand.u32 2147483647, %v3949_v62  ;;  %2022 = vrcp.f32 %v3998_v51  ;;  %v4934_v57 = vld [vmem:[#allocation23_spill] sm:$0xff] }
 0x1c2   :  { %1896 = vst.msk [vmem:[%s4603_s2 + $0x108] sm:$0xff] %vm127_vm0, %v1827_v23  ;;  %v1368_v7 = vsel %vm1367_vm3, %v2015_v41, %v1364_v9  ;;  %v1350_v55 = vadd.f32 %v2017_v27, %v1349_v14  ;;  %v1334_v5 = vsub.f32 1.0, %v1333_v18  ;;  %v1343_v42 = vand.u32 2147483648, %v3949_v62 }
 0x1c3   :  { %v2021_v54 = vpop.eup %2020  ;;  %v1373_v46 = vsel %vm3987_vm12, %v1372_v37, %v1368_v7  ;;  %vm1338_vm6 = vweird.f32 %v2019_v28  ;;  %v1411_v30 = vand.u32 2147483647, %v3977_v20  ;;  %2024 = vrcp.f32 %v4005_v38  ;;  %v4937_v7 = vld [vmem:[#allocation24_spill] sm:$0xff] }
 0x1c4   :  { %v1832_v25 = vmul.f32 %v1373_v46, %v4925_v56  ;;  %v1354_v47 = vsel %vm1353_vm5, %v2017_v27, %v1350_v55  ;;  %v1335_v34 = vmul.f32 %v2019_v28, %v1334_v5  ;;  %v1403_v33 = vmul.f32 %v2021_v54, %v3977_v20  ;;  %v4109_v46 = vpop.xlane.xlu1 %760 }
 0x1c5   :  { %v1359_v48 = vsel %vm4009_vm4, %v1358_v36, %v1354_v47  ;;  %vm1337_vm7 = vweird.f32 %v3949_v62  ;;  %vm4034_vm8 = vcmp.eq.f32.partialorder %v1341_v44, 8.507059e+37  ;;  %v1413_v59 = vand.u32 2147483648, %v3977_v20 }
 0x1c6   :  { %1901 = vst.msk [vmem:[%s4603_s2 + $0x130] sm:$0x7f] %vm134_vm1, %v1832_v25  ;;  %v1831_v43 = vmul.f32 %v1359_v48, %v4928_v49  ;;  %v1336_v39 = vadd.f32 %v2019_v28, %v1335_v34  ;;  %v1404_v35 = vsub.f32 1.0, %v1403_v33  ;;  %vm1407_vm11 = vweird.f32 %v3977_v20  ;;  %vm1339_vm13 = vmor %vm1337_vm7, %vm1338_vm6  ;;  %v4940_v25 = vld [vmem:[#allocation25_spill] sm:$0xff] }
 0x1c7   :  { %v2023_v29 = vpop.eup %2022  ;;  %v1344_v62 = vor.u32 1.1754944e-38, %v1343_v42  ;;  %vm4046_vm9 = vcmp.eq.f32.partialorder %v1411_v30, 8.507059e+37  ;;  %v1397_v12 = vand.u32 2147483647, %v3998_v51  ;;  %2026 = vrcp.f32 %v4029_v45 }
 0x1c8   :  { %1900 = vst.msk [vmem:[%s4603_s2 + $0x128] sm:$0xff] %vm127_vm0, %v1831_v43  ;;  %v1340_v11 = vsel %vm1339_vm13, %v2019_v28, %v1336_v39  ;;  %v1405_v52 = vmul.f32 %v2021_v54, %v1404_v35  ;;  %vm1408_vm10 = vweird.f32 %v2021_v54  ;;  %v1389_v26 = vmul.f32 %v2023_v29, %v3998_v51  ;;  %v4137_v35 = vpop.xlane.xlu0 %757 }
 0x1c9   :  { %v2025_v41 = vpop.eup %2024  ;;  %v1345_v15 = vsel %vm4034_vm8, %v1344_v62, %v1340_v11  ;;  %v1414_v61 = vor.u32 1.1754944e-38, %v1413_v59  ;;  %vm1393_vm12 = vweird.f32 %v3998_v51  ;;  %v1399_v40 = vand.u32 2147483648, %v3998_v51  ;;  %vm1409_vm14 = vmor %vm1407_vm11, %vm1408_vm10  ;;  %v4943_v11 = vld [vmem:[#allocation26_spill] sm:$0xff] }
 0x1ca   :  { %v1830_v4 = vmul.f32 %v1345_v15, %v4931_v22  ;;  %v1406_v53 = vadd.f32 %v2021_v54, %v1405_v52  ;;  %v1390_v27 = vsub.f32 1.0, %v1389_v26  ;;  %v1375_v21 = vmul.f32 %v2025_v41, %v4005_v38 }
 0x1cb   :  { %vm4067_vm15 = vcmp.eq.f32.partialorder %v1397_v12, 8.507059e+37  ;;  %v1383_v24 = vand.u32 2147483647, %v4005_v38  ;;  %v1385_v31 = vand.u32 2147483648, %v4005_v38  ;;  %2028 = vrcp.f32 %v4057_v8 }
 0x1cc   :  { %1899 = vst.msk [vmem:[%s4603_s2 + $0x120] sm:$0xff] %vm127_vm0, %v1830_v4  ;;  %v1410_v50 = vsel %vm1409_vm14, %v2021_v54, %v1406_v53  ;;  %v1391_v10 = vmul.f32 %v2023_v29, %v1390_v27  ;;  %vm1394_vm2 = vweird.f32 %v2023_v29  ;;  %v1376_v20 = vsub.f32 1.0, %v1375_v21  ;;  %v4158_v27 = vpop.xlane.xlu2 %772 }
 0x1cd   :  { %v2027_v16 = vpop.eup %2026  ;;  %v1415_v1 = vsel %vm4046_vm9, %v1414_v61, %v1410_v50  ;;  %v1400_v3 = vor.u32 1.1754944e-38, %v1399_v40  ;;  %vm1379_vm3 = vweird.f32 %v4005_v38  ;;  %vm1380_vm4 = vweird.f32 %v2025_v41  ;;  %vm1395_vm5 = vmor %vm1393_vm12, %vm1394_vm2 }
 0x1ce   :  { %v1835_v58 = vmul.f32 %v1415_v1, %v4934_v57  ;;  %v1392_v60 = vadd.f32 %v2023_v29, %v1391_v10  ;;  %v1377_v17 = vmul.f32 %v2025_v41, %v1376_v20  ;;  %v1445_v28 = vmul.f32 %v2027_v16, %v4029_v45  ;;  %vm1381_vm7 = vmor %vm1379_vm3, %vm1380_vm4  ;;  %v4165_v1 = vpop.xlane.xlu1 %769 }
 0x1cf   :  { %vm4089_vm6 = vcmp.eq.f32.partialorder %v1383_v24, 8.507059e+37  ;;  %v1386_v32 = vor.u32 1.1754944e-38, %v1385_v31  ;;  %v1453_v23 = vand.u32 2147483647, %v4029_v45  ;;  %2030 = vrcp.f32 %v4078_v6  ;;  %v4946_v31 = vld [vmem:[#allocation27_spill] sm:$0xff] }
 0x1d0   :  { %1904 = vst.msk [vmem:[%s4603_s2 + $0x148] sm:$0x7f] %vm134_vm1, %v1835_v58  ;;  %v1396_v9 = vsel %vm1395_vm5, %v2023_v29, %v1392_v60  ;;  %v1378_v14 = vadd.f32 %v2025_v41, %v1377_v17  ;;  %v1446_v18 = vsub.f32 1.0, %v1445_v28  ;;  %v1455_v51 = vand.u32 2147483648, %v4029_v45 }
 0x1d1   :  { %v2029_v0 = vpop.eup %2028  ;;  %v1401_v36 = vsel %vm4067_vm15, %v1400_v3, %v1396_v9  ;;  %vm1450_vm8 = vweird.f32 %v2027_v16  ;;  %v1439_v44 = vand.u32 2147483647, %v4057_v8  ;;  %2032 = vrcp.f32 %v4085_v13  ;;  %v4949_v9 = vld [vmem:[#allocation28_spill] sm:$0xff] }
 0x1d2   :  { %v1834_v55 = vmul.f32 %v1401_v36, %v4937_v7  ;;  %v1382_v5 = vsel %vm1381_vm7, %v2025_v41, %v1378_v14  ;;  %v1447_v42 = vmul.f32 %v2027_v16, %v1446_v18  ;;  %v1431_v54 = vmul.f32 %v2029_v0, %v4057_v8  ;;  %v4189_v36 = vpop.xlane.xlu0 %766 }
 0x1d3   :  { %v1387_v30 = vsel %vm4089_vm6, %v1386_v32, %v1382_v5  ;;  %vm1449_vm11 = vweird.f32 %v4029_v45  ;;  %vm4114_vm13 = vcmp.eq.f32.partialorder %v1453_v23, 8.507059e+37  ;;  %v1441_v56 = vand.u32 2147483648, %v4057_v8 }
 0x1d4   :  { %1903 = vst.msk [vmem:[%s4603_s2 + $0x140] sm:$0xff] %vm127_vm0, %v1834_v55  ;;  %v1833_v47 = vmul.f32 %v1387_v30, %v4940_v25  ;;  %v1448_v34 = vadd.f32 %v2027_v16, %v1447_v42  ;;  %v1432_v33 = vsub.f32 1.0, %v1431_v54  ;;  %vm1435_vm9 = vweird.f32 %v4057_v8  ;;  %vm1451_vm10 = vmor %vm1449_vm11, %vm1450_vm8  ;;  %v4952_v55 = vld [vmem:[#allocation29_spill] sm:$0xff] }
 0x1d5   :  { %v2031_v48 = vpop.eup %2030  ;;  %v1456_v45 = vor.u32 1.1754944e-38, %v1455_v51  ;;  %vm4126_vm12 = vcmp.eq.f32.partialorder %v1439_v44, 8.507059e+37  ;;  %v1425_v59 = vand.u32 2147483647, %v4078_v6  ;;  %2034 = vrcp.f32 %v4109_v46 }
 0x1d6   :  { %1902 = vst.msk [vmem:[%s4603_s2 + $0x138] sm:$0xff] %vm127_vm0, %v1833_v47  ;;  %v1452_v49 = vsel %vm1451_vm10, %v2027_v16, %v1448_v34  ;;  %v1433_v43 = vmul.f32 %v2029_v0, %v1432_v33  ;;  %vm1436_vm14 = vweird.f32 %v2029_v0  ;;  %v1417_v39 = vmul.f32 %v2031_v48, %v4078_v6  ;;  %v4217_v33 = vpop.xlane.xlu2 %781 }
 0x1d7   :  { %v2033_v29 = vpop.eup %2032  ;;  %v1457_v62 = vsel %vm4114_vm13, %v1456_v45, %v1452_v49  ;;  %v1442_v19 = vor.u32 1.1754944e-38, %v1441_v56  ;;  %vm1421_vm15 = vweird.f32 %v4078_v6  ;;  %v1427_v12 = vand.u32 2147483648, %v4078_v6  ;;  %vm1437_vm2 = vmor %vm1435_vm9, %vm1436_vm14  ;;  %v4955_v49 = vld [vmem:[#allocation30_spill] sm:$0xff] }
 0x1d8   :  { %v1838_v52 = vmul.f32 %v1457_v62, %v4943_v11  ;;  %v1434_v26 = vadd.f32 %v2029_v0, %v1433_v43  ;;  %v1418_v41 = vsub.f32 1.0, %v1417_v39  ;;  %v1487_v15 = vmul.f32 %v2033_v29, %v4085_v13 }
 0x1d9   :  { %vm4147_vm3 = vcmp.eq.f32.partialorder %v1425_v59, 8.507059e+37  ;;  %v1495_v40 = vand.u32 2147483647, %v4085_v13  ;;  %v1497_v22 = vand.u32 2147483648, %v4085_v13  ;;  %2036 = vrcp.f32 %v4137_v35 }
 0x1da   :  { %1907 = vst.msk [vmem:[%s4603_s2 + $0x160] sm:$0x7f] %vm134_vm1, %v1838_v52  ;;  %v1438_v4 = vsel %vm1437_vm2, %v2029_v0, %v1434_v26  ;;  %v1419_v53 = vmul.f32 %v2031_v48, %v1418_v41  ;;  %vm1422_vm4 = vweird.f32 %v2031_v48  ;;  %v1488_v8 = vsub.f32 1.0, %v1487_v15  ;;  %v4238_v41 = vpop.xlane.xlu1 %778 }
 0x1db   :  { %v2035_v21 = vpop.eup %2034  ;;  %v1443_v63 = vsel %vm4126_vm12, %v1442_v19, %v1438_v4  ;;  %v1428_v24 = vor.u32 1.1754944e-38, %v1427_v12  ;;  %vm1491_vm5 = vweird.f32 %v4085_v13  ;;  %vm1492_vm6 = vweird.f32 %v2033_v29  ;;  %vm1423_vm7 = vmor %vm1421_vm15, %vm1422_vm4 }
 0x1dc   :  { %v1837_v50 = vmul.f32 %v1443_v63, %v4946_v31  ;;  %v1420_v10 = vadd.f32 %v2031_v48, %v1419_v53  ;;  %v1489_v20 = vmul.f32 %v2033_v29, %v1488_v8  ;;  %v1473_v16 = vmul.f32 %v2035_v21, %v4109_v46  ;;  %vm1493_vm11 = vmor %vm1491_vm5, %vm1492_vm6  ;;  %v4245_v63 = vpop.xlane.xlu0 %775 }
 0x1dd   :  { %vm4169_vm8 = vcmp.eq.f32.partialorder %v1495_v40, 8.507059e+37  ;;  %v1498_v57 = vor.u32 1.1754944e-38, %v1497_v22  ;;  %v1481_v58 = vand.u32 2147483647, %v4109_v46  ;;  %2038 = vrcp.f32 %v4158_v27  ;;  %v4958_v22 = vld [vmem:[#allocation31_spill] sm:$0xff] }
 0x1de   :  { %1906 = vst.msk [vmem:[%s4603_s2 + $0x158] sm:$0xff] %vm127_vm0, %v1837_v50  ;;  %v1424_v60 = vsel %vm1423_vm7, %v2031_v48, %v1420_v10  ;;  %v1490_v17 = vadd.f32 %v2033_v29, %v1489_v20  ;;  %v1474_v28 = vsub.f32 1.0, %v1473_v16  ;;  %v1483_v6 = vand.u32 2147483648, %v4109_v46 }
 0x1df   :  { %v2037_v37 = vpop.eup %2036  ;;  %v1429_v32 = vsel %vm4147_vm3, %v1428_v24, %v1424_v60  ;;  %vm1478_vm13 = vweird.f32 %v2035_v21  ;;  %v1467_v23 = vand.u32 2147483647, %v4137_v35  ;;  %2040 = vrcp.f32 %v4165_v1  ;;  %v4961_v60 = vld [vmem:[#allocation32_spill] sm:$0xff] }
 0x1e0   :  { %v1836_v14 = vmul.f32 %v1429_v32, %v4949_v9  ;;  %v1494_v18 = vsel %vm1493_vm11, %v2033_v29, %v1490_v17  ;;  %v1475_v51 = vmul.f32 %v2035_v21, %v1474_v28  ;;  %v1459_v0 = vmul.f32 %v2037_v37, %v4137_v35  ;;  %v4269_v32 = vpop.xlane.xlu2 %790 }
 0x1e1   :  { %v1499_v44 = vsel %vm4169_vm8, %v1498_v57, %v1494_v18  ;;  %vm1477_vm9 = vweird.f32 %v4109_v46  ;;  %vm4194_vm10 = vcmp.eq.f32.partialorder %v1481_v58, 8.507059e+37  ;;  %v1469_v7 = vand.u32 2147483648, %v4137_v35 }
 0x1e2   :  { %1905 = vst.msk [vmem:[%s4603_s2 + $0x150] sm:$0xff] %vm127_vm0, %v1836_v14  ;;  %v1841_v5 = vmul.f32 %v1499_v44, %v4952_v55  ;;  %v1476_v42 = vadd.f32 %v2035_v21, %v1475_v51  ;;  %v1460_v54 = vsub.f32 1.0, %v1459_v0  ;;  %vm1463_vm12 = vweird.f32 %v4137_v35  ;;  %vm1479_vm14 = vmor %vm1477_vm9, %vm1478_vm13  ;;  %v4964_v14 = vld [vmem:[#allocation33_spill] sm:$0xff] }
 0x1e3   :  { %v2039_v30 = vpop.eup %2038  ;;  %v1484_v46 = vor.u32 1.1754944e-38, %v1483_v6  ;;  %vm4206_vm15 = vcmp.eq.f32.partialorder %v1467_v23, 8.507059e+37  ;;  %v1537_v56 = vand.u32 2147483647, %v4158_v27  ;;  %2042 = vrcp.f32 %v4189_v36 }
 0x1e4   :  { %1910 = vst.msk [vmem:[%s4603_s2 + $0x178] sm:$0x7f] %vm134_vm1, %v1841_v5  ;;  %v1480_v25 = vsel %vm1479_vm14, %v2035_v21, %v1476_v42  ;;  %v1461_v47 = vmul.f32 %v2037_v37, %v1460_v54  ;;  %vm1464_vm2 = vweird.f32 %v2037_v37  ;;  %v1529_v34 = vmul.f32 %v2039_v30, %v4158_v27  ;;  %v4297_v54 = vpop.xlane.xlu1 %787 }
 0x1e5   :  { %v2041_v48 = vpop.eup %2040  ;;  %v1485_v45 = vsel %vm4194_vm10, %v1484_v46, %v1480_v25  ;;  %v1470_v2 = vor.u32 1.1754944e-38, %v1469_v7  ;;  %vm1533_vm3 = vweird.f32 %v4158_v27  ;;  %v1539_v59 = vand.u32 2147483648, %v4158_v27  ;;  %vm1465_vm4 = vmor %vm1463_vm12, %vm1464_vm2  ;;  %v4967_v25 = vld [vmem:[#allocation34_spill] sm:$0xff] }
 0x1e6   :  { %v1840_v43 = vmul.f32 %v1485_v45, %v4955_v49  ;;  %v1462_v39 = vadd.f32 %v2037_v37, %v1461_v47  ;;  %v1530_v29 = vsub.f32 1.0, %v1529_v34  ;;  %v1515_v62 = vmul.f32 %v2041_v48, %v4165_v1 }
 0x1e7   :  { %vm4227_vm5 = vcmp.eq.f32.partialorder %v1537_v56, 8.507059e+37  ;;  %v1523_v12 = vand.u32 2147483647, %v4165_v1  ;;  %v1525_v11 = vand.u32 2147483648, %v4165_v1  ;;  %2044 = vrcp.f32 %v4217_v33 }
 0x1e8   :  { %1909 = vst.msk [vmem:[%s4603_s2 + $0x170] sm:$0xff] %vm127_vm0, %v1840_v43  ;;  %v1466_v52 = vsel %vm1465_vm4, %v2037_v37, %v1462_v39  ;;  %v1531_v26 = vmul.f32 %v2039_v30, %v1530_v29  ;;  %vm1534_vm6 = vweird.f32 %v2039_v30  ;;  %v1516_v35 = vsub.f32 1.0, %v1515_v62  ;;  %v4318_v29 = vpop.xlane.xlu0 %784 }
 0x1e9   :  { %v2043_v15 = vpop.eup %2042  ;;  %v1471_v61 = vsel %vm4206_vm15, %v1470_v2, %v1466_v52  ;;  %v1540_v40 = vor.u32 1.1754944e-38, %v1539_v59  ;;  %vm1519_vm7 = vweird.f32 %v4165_v1  ;;  %vm1520_vm8 = vweird.f32 %v2041_v48  ;;  %vm1535_vm11 = vmor %vm1533_vm3, %vm1534_vm6 }
 0x1ea   :  { %v1839_v4 = vmul.f32 %v1471_v61, %v4958_v22  ;;  %v1532_v53 = vadd.f32 %v2039_v30, %v1531_v26  ;;  %v1517_v8 = vmul.f32 %v2041_v48, %v1516_v35  ;;  %v1501_v21 = vmul.f32 %v2043_v15, %v4189_v36  ;;  %vm1521_vm9 = vmor %vm1519_vm7, %vm1520_vm8  ;;  %v4325_v61 = vpop.xlane.xlu2 %799 }
 0x1eb   :  { %vm4249_vm13 = vcmp.eq.f32.partialorder %v1523_v12, 8.507059e+37  ;;  %v1526_v31 = vor.u32 1.1754944e-38, %v1525_v11  ;;  %v1509_v50 = vand.u32 2147483647, %v4189_v36  ;;  %2046 = vrcp.f32 %v4238_v41  ;;  %v4970_v11 = vld [vmem:[#allocation35_spill] sm:$0xff] }
 0x1ec   :  { %1908 = vst.msk [vmem:[%s4603_s2 + $0x168] sm:$0xff] %vm127_vm0, %v1839_v4  ;;  %v1536_v10 = vsel %vm1535_vm11, %v2039_v30, %v1532_v53  ;;  %v1518_v20 = vadd.f32 %v2041_v48, %v1517_v8  ;;  %v1502_v16 = vsub.f32 1.0, %v1501_v21  ;;  %v1511_v27 = vand.u32 2147483648, %v4189_v36 }
 0x1ed   :  { %v2045_v3 = vpop.eup %2044  ;;  %v1541_v57 = vsel %vm4227_vm5, %v1540_v40, %v1536_v10  ;;  %vm1506_vm10 = vweird.f32 %v2043_v15  ;;  %v1579_v58 = vand.u32 2147483647, %v4217_v33  ;;  %2048 = vrcp.f32 %v4245_v63  ;;  %v4973_v10 = vld [vmem:[#allocation36_spill] sm:$0xff] }
 0x1ee   :  { %v1844_v17 = vmul.f32 %v1541_v57, %v4961_v60  ;;  %v1522_v28 = vsel %vm1521_vm9, %v2041_v48, %v1518_v20  ;;  %v1503_v6 = vmul.f32 %v2043_v15, %v1502_v16  ;;  %v1571_v37 = vmul.f32 %v2045_v3, %v4217_v33  ;;  %v4349_v57 = vpop.xlane.xlu1 %796 }
 0x1ef   :  { %v1527_v23 = vsel %vm4249_vm13, %v1526_v31, %v1522_v28  ;;  %vm1505_vm12 = vweird.f32 %v4189_v36  ;;  %vm4274_vm14 = vcmp.eq.f32.partialorder %v1509_v50, 8.507059e+37  ;;  %v1581_v9 = vand.u32 2147483648, %v4217_v33 }
 0x1f0   :  { %1913 = vst.msk [vmem:[%s4603_s2 + $0x190] sm:$0x7f] %vm134_vm1, %v1844_v17  ;;  %v1843_v18 = vmul.f32 %v1527_v23, %v4964_v14  ;;  %v1504_v51 = vadd.f32 %v2043_v15, %v1503_v6  ;;  %v1572_v0 = vsub.f32 1.0, %v1571_v37  ;;  %vm1575_vm15 = vweird.f32 %v4217_v33  ;;  %vm1507_vm2 = vmor %vm1505_vm12, %vm1506_vm10  ;;  %v4976_v17 = vld [vmem:[#allocation37_spill] sm:$0xff] }
 0x1f1   :  { %v2047_v44 = vpop.eup %2046  ;;  %v1512_v36 = vor.u32 1.1754944e-38, %v1511_v27  ;;  %vm4286_vm3 = vcmp.eq.f32.partialorder %v1579_v58, 8.507059e+37  ;;  %v1565_v7 = vand.u32 2147483647, %v4238_v41  ;;  %2050 = vrcp.f32 %v4269_v32 }
 0x1f2   :  { %1912 = vst.msk [vmem:[%s4603_s2 + $0x188] sm:$0xff] %vm127_vm0, %v1843_v18  ;;  %v1508_v55 = vsel %vm1507_vm2, %v2043_v15, %v1504_v51  ;;  %v1573_v5 = vmul.f32 %v2045_v3, %v1572_v0  ;;  %vm1576_vm4 = vweird.f32 %v2045_v3  ;;  %v1557_v42 = vmul.f32 %v2047_v44, %v4238_v41  ;;  %v4377_v0 = vpop.xlane.xlu0 %793 }
 0x1f3   :  { %v2049_v30 = vpop.eup %2048  ;;  %v1513_v46 = vsel %vm4274_vm14, %v1512_v36, %v1508_v55  ;;  %v1582_v38 = vor.u32 1.1754944e-38, %v1581_v9  ;;  %vm1561_vm5 = vweird.f32 %v4238_v41  ;;  %v1567_v56 = vand.u32 2147483648, %v4238_v41  ;;  %vm1577_vm6 = vmor %vm1575_vm15, %vm1576_vm4  ;;  %v4979_v55 = vld [vmem:[#allocation38_spill] sm:$0xff] }
 0x1f4   :  { %v1842_v47 = vmul.f32 %v1513_v46, %v4967_v25  ;;  %v1574_v34 = vadd.f32 %v2045_v3, %v1573_v5  ;;  %v1558_v48 = vsub.f32 1.0, %v1557_v42  ;;  %v1543_v45 = vmul.f32 %v2049_v30, %v4245_v63 }
 0x1f5   :  { %vm4307_vm7 = vcmp.eq.f32.partialorder %v1565_v7, 8.507059e+37  ;;  %v1551_v59 = vand.u32 2147483647, %v4245_v63  ;;  %v1553_v49 = vand.u32 2147483648, %v4245_v63  ;;  %2052 = vrcp.f32 %v4297_v54 }
 0x1f6   :  { %1911 = vst.msk [vmem:[%s4603_s2 + $0x180] sm:$0xff] %vm127_vm0, %v1842_v47  ;;  %v1578_v43 = vsel %vm1577_vm6, %v2045_v3, %v1574_v34  ;;  %v1559_v39 = vmul.f32 %v2047_v44, %v1558_v48  ;;  %vm1562_vm8 = vweird.f32 %v2047_v44  ;;  %v1544_v33 = vsub.f32 1.0, %v1543_v45  ;;  %v4398_v48 = vpop.xlane.xlu2 %808 }
 0x1f7   :  { %v2051_v62 = vpop.eup %2050  ;;  %v1583_v19 = vsel %vm4286_vm3, %v1582_v38, %v1578_v43  ;;  %v1568_v12 = vor.u32 1.1754944e-38, %v1567_v56  ;;  %vm1547_vm11 = vweird.f32 %v4245_v63  ;;  %vm1548_vm13 = vweird.f32 %v2049_v30  ;;  %vm1563_vm9 = vmor %vm1561_vm5, %vm1562_vm8 }
 0x1f8   :  { %v1847_v52 = vmul.f32 %v1583_v19, %v4970_v11  ;;  %v1560_v26 = vadd.f32 %v2047_v44, %v1559_v39  ;;  %v1545_v35 = vmul.f32 %v2049_v30, %v1544_v33  ;;  %v1613_v15 = vmul.f32 %v2051_v62, %v4269_v32  ;;  %vm1549_vm12 = vmor %vm1547_vm11, %vm1548_vm13  ;;  %v4405_v19 = vpop.xlane.xlu1 %805 }
 0x1f9   :  { %vm4329_vm10 = vcmp.eq.f32.partialorder %v1551_v59, 8.507059e+37  ;;  %v1554_v22 = vor.u32 1.1754944e-38, %v1553_v49  ;;  %v1621_v4 = vand.u32 2147483647, %v4269_v32  ;;  %2054 = vrcp.f32 %v4318_v29  ;;  %v4982_v49 = vld [vmem:[#allocation39_spill] sm:$0xff] }
 0x1fa   :  { %1916 = vst.msk [vmem:[%s4603_s2 + $0x1a8] sm:$0x7f] %vm134_vm1, %v1847_v52  ;;  %v1564_v53 = vsel %vm1563_vm9, %v2047_v44, %v1560_v26  ;;  %v1546_v8 = vadd.f32 %v2049_v30, %v1545_v35  ;;  %v1614_v21 = vsub.f32 1.0, %v1613_v15  ;;  %v1623_v41 = vand.u32 2147483648, %v4269_v32 }
 0x1fb   :  { %v2053_v24 = vpop.eup %2052  ;;  %v1569_v31 = vsel %vm4307_vm7, %v1568_v12, %v1564_v53  ;;  %vm1618_vm14 = vweird.f32 %v2051_v62  ;;  %v1607_v50 = vand.u32 2147483647, %v4297_v54  ;;  %2056 = vrcp.f32 %v4325_v61  ;;  %v4985_v53 = vld [vmem:[#allocation40_spill] sm:$0xff] }
 0x1fc   :  { %v1846_v20 = vmul.f32 %v1569_v31, %v4973_v10  ;;  %v1550_v16 = vsel %vm1549_vm12, %v2049_v30, %v1546_v8  ;;  %v1615_v27 = vmul.f32 %v2051_v62, %v1614_v21  ;;  %v1599_v3 = vmul.f32 %v2053_v24, %v4297_v54  ;;  %v4429_v31 = vpop.xlane.xlu0 %802  ;;  %v4986_v10 = vld [vmem:[#allocation41_spill] sm:$0xff]  ;;  %v4995_v12 = vld [vmem:[#allocation44_spill] sm:$0xff] }
 0x1fd   :  { %v1555_v58 = vsel %vm4329_vm10, %v1554_v22, %v1550_v16  ;;  %vm1617_vm15 = vweird.f32 %v4269_v32  ;;  %vm4354_vm2 = vcmp.eq.f32.partialorder %v1621_v4, 8.507059e+37  ;;  %v1609_v60 = vand.u32 2147483648, %v4297_v54 }
 0x1fe   :  { %1915 = vst.msk [vmem:[%s4603_s2 + $0x1a0] sm:$0xff] %vm127_vm0, %v1846_v20  ;;  %v1845_v28 = vmul.f32 %v1555_v58, %v4976_v17  ;;  %v1616_v6 = vadd.f32 %v2051_v62, %v1615_v27  ;;  %v1600_v37 = vsub.f32 1.0, %v1599_v3  ;;  %vm1603_vm3 = vweird.f32 %v4297_v54  ;;  %vm1619_vm4 = vmor %vm1617_vm15, %vm1618_vm14 }
 0x1ff   :  { %v2055_v23 = vpop.eup %2054  ;;  %v1624_v32 = vor.u32 1.1754944e-38, %v1623_v41  ;;  %vm4366_vm5 = vcmp.eq.f32.partialorder %v1607_v50, 8.507059e+37  ;;  %v1593_v9 = vand.u32 2147483647, %v4318_v29  ;;  %2058 = vrcp.f32 %v4349_v57 }
 0x200   :  { %1914 = vst.msk [vmem:[%s4603_s2 + $0x198] sm:$0xff] %vm127_vm0, %v1845_v28  ;;  %v1620_v14 = vsel %vm1619_vm4, %v2051_v62, %v1616_v6  ;;  %v1601_v18 = vmul.f32 %v2053_v24, %v1600_v37  ;;  %vm1604_vm6 = vweird.f32 %v2053_v24  ;;  %v1585_v51 = vmul.f32 %v2055_v23, %v4318_v29  ;;  %v4452_v28 = vpop.xlane.xlu2 %817 }
 0x201   :  { %v2057_v44 = vpop.eup %2056  ;;  %v1625_v36 = vsel %vm4354_vm2, %v1624_v32, %v1620_v14  ;;  %v1610_v13 = vor.u32 1.1754944e-38, %v1609_v60  ;;  %vm1589_vm7 = vweird.f32 %v4318_v29  ;;  %v1595_v7 = vand.u32 2147483648, %v4318_v29  ;;  %vm1605_vm8 = vmor %vm1603_vm3, %vm1604_vm6 }
 0x202   :  { %v1850_v5 = vmul.f32 %v1625_v36, %v4979_v55  ;;  %v1602_v42 = vadd.f32 %v2053_v24, %v1601_v18  ;;  %v1586_v30 = vsub.f32 1.0, %v1585_v51  ;;  %v1655_v46 = vmul.f32 %v2057_v44, %v4325_v61 }
 0x203   :  { %vm4387_vm11 = vcmp.eq.f32.partialorder %v1593_v9, 8.507059e+37  ;;  %v1663_v56 = vand.u32 2147483647, %v4325_v61  ;;  %v1665_v25 = vand.u32 2147483648, %v4325_v61  ;;  %2060 = vrcp.f32 %v4377_v0  ;;  %v4989_v9 = vld [vmem:[#allocation42_spill] sm:$0xff] }
 0x204   :  { %1919 = vst.msk [vmem:[%s4603_s2 + $0x1c0] sm:$0x7f] %vm134_vm1, %v1850_v5  ;;  %v1606_v47 = vsel %vm1605_vm8, %v2053_v24, %v1602_v42  ;;  %v1587_v34 = vmul.f32 %v2055_v23, %v1586_v30  ;;  %vm1590_vm13 = vweird.f32 %v2055_v23  ;;  %v1656_v54 = vsub.f32 1.0, %v1655_v46  ;;  %v4468_v42 = vpop.xlane.xlu1 %814 }
 0x205   :  { %v2059_v45 = vpop.eup %2058  ;;  %v1611_v2 = vsel %vm4366_vm5, %v1610_v13, %v1606_v47  ;;  %v1596_v59 = vor.u32 1.1754944e-38, %v1595_v7  ;;  %vm1659_vm9 = vweird.f32 %v4325_v61  ;;  %vm1660_vm10 = vweird.f32 %v2057_v44  ;;  %vm1591_vm12 = vmor %vm1589_vm7, %vm1590_vm13 }
 0x206   :  { %v1849_v43 = vmul.f32 %v1611_v2, %v4982_v49  ;;  %v1588_v39 = vadd.f32 %v2055_v23, %v1587_v34  ;;  %v1657_v33 = vmul.f32 %v2057_v44, %v1656_v54  ;;  %v1641_v62 = vmul.f32 %v2059_v45, %v4349_v57  ;;  %vm1661_vm15 = vmor %vm1659_vm9, %vm1660_vm10 }
 0x207   :  { %vm4409_vm14 = vcmp.eq.f32.partialorder %v1663_v56, 8.507059e+37  ;;  %v1666_v11 = vor.u32 1.1754944e-38, %v1665_v25  ;;  %v1649_v52 = vand.u32 2147483647, %v4349_v57  ;;  %2062 = vrcp.f32 %v4398_v48  ;;  %v4992_v56 = vld [vmem:[#allocation43_spill] sm:$0xff] }
 0x208   :  { %1918 = vst.msk [vmem:[%s4603_s2 + $0x1b8] sm:$0xff] %vm127_vm0, %v1849_v43  ;;  %v1592_v26 = vsel %vm1591_vm12, %v2055_v23, %v1588_v39  ;;  %v1658_v35 = vadd.f32 %v2057_v44, %v1657_v33  ;;  %v1642_v15 = vsub.f32 1.0, %v1641_v62  ;;  %v1651_v29 = vand.u32 2147483648, %v4349_v57 }
 0x209   :  { %v2061_v40 = vpop.eup %2060  ;;  %v1597_v22 = vsel %vm4387_vm11, %v1596_v59, %v1592_v26  ;;  %vm1646_vm2 = vweird.f32 %v2059_v45  ;;  %v1635_v4 = vand.u32 2147483647, %v4377_v0  ;;  %2064 = vrcp.f32 %v4405_v19 }
 0x20a   :  { %v1848_v8 = vmul.f32 %v1597_v22, %v4985_v53  ;;  %v1662_v21 = vsel %vm1661_vm15, %v2057_v44, %v1658_v35  ;;  %v1643_v41 = vmul.f32 %v2059_v45, %v1642_v15  ;;  %v1627_v24 = vmul.f32 %v2061_v40, %v4377_v0  ;;  %v4500_v15 = vpop.xlane.xlu2 %826 }
 0x20b   :  { %v1667_v50 = vsel %vm4409_vm14, %v1666_v11, %v1662_v21  ;;  %vm1645_vm3 = vweird.f32 %v4349_v57  ;;  %v1637_v61 = vand.u32 2147483648, %v4377_v0  ;;  %vm1650_vm4 = vcmp.eq.f32.partialorder %v1649_v52, 8.507059e+37  ;;  %v4999_v57 = vld [vmem:[#allocation46_spill] sm:$0xff] }
 0x20c   :  { %1917 = vst.msk [vmem:[%s4603_s2 + $0x1b0] sm:$0xff] %vm127_vm0, %v1848_v8  ;;  %v1853_v20 = vmul.f32 %v1667_v50, %v4986_v10  ;;  %v1644_v16 = vadd.f32 %v2059_v45, %v1643_v41  ;;  %v1628_v27 = vsub.f32 1.0, %v1627_v24  ;;  %vm1647_vm5 = vmor %vm1645_vm3, %vm1646_vm2  ;;  %v1652_v58 = vor.u32 1.1754944e-38, %v1651_v29  ;;  %v4520_v10 = vpop.xlane.xlu1 %823 }
 0x20d   :  { %v2063_v3 = vpop.eup %2062  ;;  %vm1631_vm6 = vweird.f32 %v4377_v0  ;;  %vm4442_vm7 = vcmp.eq.f32.partialorder %v1635_v4, 8.507059e+37  ;;  %2066 = vrcp.f32 %v4429_v31  ;;  %vm1632_vm8 = vweird.f32 %v2061_v40  ;;  %v4996_v4 = vld [vmem:[#allocation45_spill] sm:$0xff] }
 0x20e   :  { %1922 = vst.msk [vmem:[%s4603_s2 + $0x1d8] sm:$0x7f] %vm134_vm1, %v1853_v20  ;;  %v1648_v63 = vsel %vm1647_vm5, %v2059_v45, %v1644_v16  ;;  %v1629_v60 = vmul.f32 %v2061_v40, %v1628_v27  ;;  %v1697_v17 = vmul.f32 %v2063_v3, %v4398_v48  ;;  %v1638_v23 = vor.u32 1.1754944e-38, %v1637_v61  ;;  %vm1633_vm11 = vmor %vm1631_vm6, %vm1632_vm8  ;;  %v4478_v45 = vpop.xlane.xlu0 %811 }
 0x20f   :  { %v2065_v6 = vpop.eup %2064  ;;  %v1653_v37 = vsel %vm1650_vm4, %v1652_v58, %v1648_v63  ;;  %v1705_v32 = vand.u32 2147483647, %v4398_v48  ;;  %v1707_v1 = vand.u32 2147483648, %v4398_v48  ;;  %vm1701_vm13 = vweird.f32 %v4398_v48 }
 0x210   :  { %v1852_v14 = vmul.f32 %v1653_v37, %v4989_v9  ;;  %v1630_v18 = vadd.f32 %v2061_v40, %v1629_v60  ;;  %v1698_v51 = vsub.f32 1.0, %v1697_v17  ;;  %v1683_v44 = vmul.f32 %v2065_v6, %v4405_v19 }
 0x211   :  { %v1691_v36 = vand.u32 2147483647, %v4405_v19  ;;  %v1693_v13 = vand.u32 2147483648, %v4405_v19  ;;  %2068 = vrcp.f32 %v4452_v28  ;;  %vm1702_vm9 = vweird.f32 %v2063_v3 }
 0x212   :  { %1921 = vst.msk [vmem:[%s4603_s2 + $0x1d0] sm:$0xff] %vm127_vm0, %v1852_v14  ;;  %v1634_v7 = vsel %vm1633_vm11, %v2061_v40, %v1630_v18  ;;  %v1699_v55 = vmul.f32 %v2063_v3, %v1698_v51  ;;  %v1684_v5 = vsub.f32 1.0, %v1683_v44  ;;  %vm4472_vm10 = vcmp.eq.f32.partialorder %v1705_v32, 8.507059e+37  ;;  %vm1703_vm14 = vmor %vm1701_vm13, %vm1702_vm9 }
 0x213   :  { %v2067_v0 = vpop.eup %2066  ;;  %v1639_v30 = vsel %vm4442_vm7, %v1638_v23, %v1634_v7  ;;  %v1708_v38 = vor.u32 1.1754944e-38, %v1707_v1  ;;  %vm1688_vm12 = vweird.f32 %v2065_v6  ;;  %vm1687_vm15 = vweird.f32 %v4405_v19 }
 0x214   :  { %v1851_v25 = vmul.f32 %v1639_v30, %v4992_v56  ;;  %v1700_v47 = vadd.f32 %v2063_v3, %v1699_v55  ;;  %v1685_v34 = vmul.f32 %v2065_v6, %v1684_v5  ;;  %v1669_v54 = vmul.f32 %v2067_v0, %v4429_v31  ;;  %vm1689_vm3 = vmor %vm1687_vm15, %vm1688_vm12 }
 0x215   :  { %vm4483_vm2 = vcmp.eq.f32.partialorder %v1691_v36, 8.507059e+37  ;;  %v1694_v59 = vor.u32 1.1754944e-38, %v1693_v13  ;;  %2070 = vrcp.f32 %v4468_v42  ;;  %v1677_v48 = vand.u32 2147483647, %v4429_v31  ;;  %v5002_v36 = vld [vmem:[#allocation47_spill] sm:$0xff] }
 0x216   :  { %1920 = vst.msk [vmem:[%s4603_s2 + $0x1c8] sm:$0xff] %vm127_vm0, %v1851_v25  ;;  %v1704_v49 = vsel %vm1703_vm14, %v2063_v3, %v1700_v47  ;;  %v1686_v43 = vadd.f32 %v2065_v6, %v1685_v34  ;;  %v1670_v39 = vsub.f32 1.0, %v1669_v54  ;;  %vm1674_vm4 = vweird.f32 %v2067_v0  ;;  %v4539_v18 = vpop.xlane.xlu0 %820 }
 0x217   :  { %v2069_v33 = vpop.eup %2068  ;;  %v1709_v62 = vsel %vm4472_vm10, %v1708_v38, %v1704_v49  ;;  %v1679_v19 = vand.u32 2147483648, %v4429_v31  ;;  %2072 = vrcp.f32 %v4478_v45  ;;  %v1747_v40 = vand.u32 2147483647, %v4452_v28 }
 0x218   :  { %v1856_v11 = vmul.f32 %v1709_v62, %v4995_v12  ;;  %v1690_v52 = vsel %vm1689_vm3, %v2065_v6, %v1686_v43  ;;  %v1671_v26 = vmul.f32 %v2067_v0, %v1670_v39  ;;  %v1739_v35 = vmul.f32 %v2069_v33, %v4452_v28 }
 0x219   :  { %v1695_v29 = vsel %vm4483_vm2, %v1694_v59, %v1690_v52  ;;  %v1749_v22 = vand.u32 2147483648, %v4452_v28  ;;  %vm1673_vm5 = vweird.f32 %v4429_v31  ;;  %vm1678_vm7 = vcmp.eq.f32.partialorder %v1677_v48, 8.507059e+37  ;;  %v5006_v48 = vld [vmem:[#allocation49_spill] sm:$0xff] }
 0x21a   :  { %1925 = vst.msk [vmem:[%s4603_s2 + $0x1f0] sm:$0x7f] %vm134_vm1, %v1856_v11  ;;  %v1855_v53 = vmul.f32 %v1695_v29, %v4996_v4  ;;  %v1672_v8 = vadd.f32 %v2067_v0, %v1671_v26  ;;  %v1740_v21 = vsub.f32 1.0, %v1739_v35  ;;  %vm1675_vm6 = vmor %vm1673_vm5, %vm1674_vm4  ;;  %v1680_v24 = vor.u32 1.1754944e-38, %v1679_v19 }
 0x21b   :  { %v2071_v41 = vpop.eup %2070  ;;  %vm1743_vm8 = vweird.f32 %v4452_v28  ;;  %2074 = vrcp.f32 %v4500_v15  ;;  %vm1744_vm11 = vweird.f32 %v2069_v33  ;;  %vm4522_vm13 = vcmp.eq.f32.partialorder %v1747_v40, 8.507059e+37 }
 0x21c   :  { %1924 = vst.msk [vmem:[%s4603_s2 + $0x1e8] sm:$0xff] %vm127_vm0, %v1855_v53  ;;  %v1676_v50 = vsel %vm1675_vm6, %v2067_v0, %v1672_v8  ;;  %v1741_v61 = vmul.f32 %v2069_v33, %v1740_v21  ;;  %v1725_v31 = vmul.f32 %v2071_v41, %v4468_v42  ;;  %v1750_v3 = vor.u32 1.1754944e-38, %v1749_v22  ;;  %vm1745_vm9 = vmor %vm1743_vm8, %vm1744_vm11  ;;  %v5007_v22 = vld [vmem:[#allocation57_spill] sm:$0xff] }
 0x21d   :  { %v2073_v20 = vpop.eup %2072  ;;  %v1681_v16 = vsel %vm1678_vm7, %v1680_v24, %v1676_v50  ;;  %v1733_v58 = vand.u32 2147483647, %v4468_v42  ;;  %v1735_v37 = vand.u32 2147483648, %v4468_v42  ;;  %v1719_v23 = vand.u32 2147483647, %v4478_v45 }
 0x21e   :  { %v1854_v63 = vmul.f32 %v1681_v16, %v4999_v57  ;;  %v1742_v60 = vadd.f32 %v2069_v33, %v1741_v61  ;;  %v1726_v17 = vsub.f32 1.0, %v1725_v31  ;;  %v1711_v6 = vmul.f32 %v2073_v20, %v4478_v45  ;;  %v5009_v57 = vld [vmem:[#allocation59_spill] sm:$0xff] }
 0x21f   :  { %v1721_v32 = vand.u32 2147483648, %v4478_v45  ;;  %2076 = vrcp.f32 %v4520_v10  ;;  %vm1730_vm10 = vweird.f32 %v2071_v41  ;;  %vm1729_vm12 = vweird.f32 %v4468_v42 }
 0x220   :  { %1923 = vst.msk [vmem:[%s4603_s2 + $0x1e0] sm:$0xff] %vm127_vm0, %v1854_v63  ;;  %v1746_v1 = vsel %vm1745_vm9, %v2069_v33, %v1742_v60  ;;  %v1727_v9 = vmul.f32 %v2071_v41, %v1726_v17  ;;  %v1712_v14 = vsub.f32 1.0, %v1711_v6  ;;  %vm4544_vm14 = vcmp.eq.f32.partialorder %v1733_v58, 8.507059e+37  ;;  %vm1731_vm2 = vmor %vm1729_vm12, %vm1730_vm10 }
 0x221   :  { %v2075_v28 = vpop.eup %2074  ;;  %v1751_v51 = vsel %vm4522_vm13, %v1750_v3, %v1746_v1  ;;  %vm1716_vm15 = vweird.f32 %v2073_v20  ;;  %v1736_v0 = vor.u32 1.1754944e-38, %v1735_v37  ;;  %vm1715_vm3 = vweird.f32 %v4478_v45  ;;  %v5005_v45 = vld [vmem:[#allocation48_spill] sm:$0xff] }
 0x222   :  { %v1859_v13 = vmul.f32 %v1751_v51, %v5002_v36  ;;  %v1728_v7 = vadd.f32 %v2071_v41, %v1727_v9  ;;  %v1713_v55 = vmul.f32 %v2073_v20, %v1712_v14  ;;  %v1781_v5 = vmul.f32 %v2075_v28, %v4500_v15  ;;  %vm1717_vm5 = vmor %vm1715_vm3, %vm1716_vm15 }
 0x223   :  { %vm4551_vm4 = vcmp.eq.f32.partialorder %v1719_v23, 8.507059e+37  ;;  %2078 = vrcp.f32 %v4539_v18  ;;  %v1722_v38 = vor.u32 1.1754944e-38, %v1721_v32  ;;  %vm1786_vm6 = vweird.f32 %v2075_v28 }
 0x224   :  { %1928 = vst.msk [vmem:[%s4603_s2 + $0x208] sm:$0x7f] %vm134_vm1, %v1859_v13  ;;  %v1732_v42 = vsel %vm1731_vm2, %v2071_v41, %v1728_v7  ;;  %v1714_v46 = vadd.f32 %v2073_v20, %v1713_v55  ;;  %v1782_v56 = vsub.f32 1.0, %v1781_v5  ;;  %v1789_v34 = vand.u32 2147483647, %v4500_v15 }
 0x225   :  { %v2077_v25 = vpop.eup %2076  ;;  %v1737_v47 = vsel %vm4544_vm14, %v1736_v0, %v1732_v42  ;;  %v1791_v54 = vand.u32 2147483648, %v4500_v15  ;;  %vm1785_vm7 = vweird.f32 %v4500_v15  ;;  %v1775_v52 = vand.u32 2147483647, %v4520_v10 }
 0x226   :  { %v1858_v2 = vmul.f32 %v1737_v47, %v5005_v45  ;;  %v1718_v59 = vsel %vm1717_vm5, %v2073_v20, %v1714_v46  ;;  %v1783_v49 = vmul.f32 %v2075_v28, %v1782_v56  ;;  %v1767_v43 = vmul.f32 %v2077_v25, %v4520_v10  ;;  %vm1787_vm8 = vmor %vm1785_vm7, %vm1786_vm6  ;;  %v5008_v20 = vld [vmem:[#allocation58_spill] sm:$0xff] }
 0x227   :  { %v1723_v39 = vsel %vm4551_vm4, %v1722_v38, %v1718_v59  ;;  %vm1790_vm11 = vcmp.eq.f32.partialorder %v1789_v34, 8.507059e+37  ;;  %v1792_v11 = vor.u32 1.1754944e-38, %v1791_v54  ;;  %v1777_v26 = vand.u32 2147483648, %v4520_v10 }
 0x228   :  { %1927 = vst.msk [vmem:[%s4603_s2 + $0x200] sm:$0xff] %vm127_vm0, %v1858_v2  ;;  %v1857_v33 = vmul.f32 %v1723_v39, %v5006_v48  ;;  %v1784_v62 = vadd.f32 %v2075_v28, %v1783_v49  ;;  %v1768_v19 = vsub.f32 1.0, %v1767_v43  ;;  %vm1772_vm13 = vweird.f32 %v2077_v25 }
 0x229   :  { %v2079_v12 = vpop.eup %2078  ;;  %vm1771_vm9 = vweird.f32 %v4520_v10  ;;  %vm1776_vm12 = vcmp.eq.f32.partialorder %v1775_v52, 8.507059e+37  ;;  %v1778_v21 = vor.u32 1.1754944e-38, %v1777_v26  ;;  %v1763_v41 = vand.u32 2147483648, %v4539_v18 }
 0x22a   :  { %1926 = vst.msk [vmem:[%s4603_s2 + $0x1f8] sm:$0xff] %vm127_vm0, %v1857_v33  ;;  %v1788_v35 = vsel %vm1787_vm8, %v2075_v28, %v1784_v62  ;;  %v1769_v29 = vmul.f32 %v2077_v25, %v1768_v19  ;;  %v1753_v40 = vmul.f32 %v2079_v12, %v4539_v18  ;;  %vm1773_vm10 = vmor %vm1771_vm9, %vm1772_vm13  ;;  %vm1758_vm14 = vweird.f32 %v2079_v12 }
 0x22b   :  { %v1793_v15 = vsel %vm1790_vm11, %v1792_v11, %v1788_v35  ;;  %v1761_v61 = vand.u32 2147483647, %v4539_v18  ;;  %vm1757_vm15 = vweird.f32 %v4539_v18  ;;  %v1764_v27 = vor.u32 1.1754944e-38, %v1763_v41 }
 0x22c   :  { %v1862_v4 = vmul.f32 %v1793_v15, %v5007_v22  ;;  %v1770_v53 = vadd.f32 %v2077_v25, %v1769_v29  ;;  %v1754_v8 = vsub.f32 1.0, %v1753_v40  ;;  %vm1759_vm2 = vmor %vm1757_vm15, %vm1758_vm14 }
 0x22e   :  { %1931 = vst.msk [vmem:[%s4603_s2 + $0x220] sm:$0x7f] %vm134_vm1, %v1862_v4  ;;  %v1774_v24 = vsel %vm1773_vm10, %v2077_v25, %v1770_v53  ;;  %v1755_v50 = vmul.f32 %v2079_v12, %v1754_v8  ;;  %vm1762_vm1 = vcmp.eq.f32.partialorder %v1761_v61, 8.507059e+37 }
 0x22f   :  { %v1779_v31 = vsel %vm1776_vm12, %v1778_v21, %v1774_v24 }
 0x230   :  { %v1861_v16 = vmul.f32 %v1779_v31, %v5008_v20  ;;  %v1756_v10 = vadd.f32 %v2079_v12, %v1755_v50 }
 0x232   :  { %1930 = vst.msk [vmem:[%s4603_s2 + $0x218] sm:$0xff] %vm127_vm0, %v1861_v16  ;;  %v1760_v3 = vsel %vm1759_vm2, %v2079_v12, %v1756_v10 }
 0x233   :  { %v1765_v58 = vsel %vm1762_vm1, %v1764_v27, %v1760_v3 }
 0x234   :  { %v1860_v63 = vmul.f32 %v1765_v58, %v5009_v57 }
 0x236   :  { %1929 = vst.msk [vmem:[%s4603_s2 + $0x210] sm:$0xff] %vm127_vm0, %v1860_v63 }
 0x237   :  { %1936 = vsyncpa [#allocation3], 1 }
 0x238   :  { %1937 = vsyncpa [#allocation5], 1 }

// kernel: squeeze.1
= control target key start
LH: loop header
LB: loop body
LE: loop exit
PB: predicated region body
PF: predicated region fallthrough
CT: control target
= control target key end

     0   :  { %s7_s6 = smov 3  ;;  %s10_s7 = smov 3  ;;  %vm12_vm0 = vcmask 23552   ;;  %vm44_vm1 = vcmask 105472   ;;  %vm28_vm2 = vcmask 48128   ;;  %vm59_vm3 = vcmask 130048   ;;  %s419_s0 = inlined_call_operand.vmem [shape: f32[2,23,23,1], index: 0, kind: input, shape index: {}]   ;;  %s420_s1 = inlined_call_operand.vmem [shape: f32[2,529], index: 1, kind: output, shape index: {}]  }
   0x1   :  { %v239_v0 = vld [vmem:[%s419_s0 + $0xb] ss:$24 sm:%s7_s6]   ;;  %s39_s12 = smov 3  ;;  %s42_s15 = smov 3  ;;  %vm4_vm4 = vcmask 187392   ;;  %vm16_vm5 = vcmask 162816  }
   0x2   :  { %v240_v1 = vld [vmem:[%s419_s0 + $0xb] ss:$24 sm:%s10_s7]   ;;  %v243_v3 = vld [vmem:[%s419_s0 + $0x5] ss:$24 sm:%s39_s12]   ;;  %s291_s16 = smov 125   ;;  %s23_s19 = smov 3 }
   0x3   :  { %v13_v2 = vsel %vm12_vm0, %v240_v1, %v239_v0  ;;  %v244_v4 = vld [vmem:[%s419_s0 + $0x5] ss:$24 sm:%s42_s15]   ;;  %s26_s20 = smov 3  ;;  %v241_v6 = vld [vmem:[%s419_s0 + $0x16] ss:$24 sm:%s23_s19]   ;;  %s54_s23 = smov 3 }
   0x4   :  { %14 = vrot.lane.b32.xlu0 %v13_v2, %s291_s16  ;;  %v45_v5 = vsel %vm44_vm1, %v244_v4, %v243_v3  ;;  %s292_s24 = smov 115   ;;  %v242_v7 = vld [vmem:[%s419_s0 + $0x16] ss:$24 sm:%s26_s20]   ;;  %s57_s27 = smov 3  ;;  %vm19_vm6 = vcmask 1048552   ;;  %vm48_vm7 = vcmask 80896  }
   0x5   :  { %46 = vrot.lane.b32.xlu1 %v45_v5, %s292_s24  ;;  %v245_v8 = vld [vmem:[%s419_s0 + $0x10] ss:$24 sm:%s54_s23]   ;;  %v29_v10 = vsel %vm28_vm2, %v242_v7, %v241_v6  ;;  %s70_s3 = smov 3  ;;  %s293_s6 = smov 122   ;;  %vm51_vm8 = vcmask 1048472   ;;  %vm74_vm9 = vcmask 1023792  }
   0x6   :  { %v246_v9 = vld [vmem:[%s419_s0 + $0x10] ss:$24 sm:%s57_s27]   ;;  %v247_v12 = vld [vmem:[%s419_s0 + $0xa] ss:$24 sm:%s70_s3]   ;;  %s294_s7 = smov 102   ;;  %s295_s8 = smov 112  }
   0x7   :  { %v60_v11 = vsel %vm59_vm3, %v246_v9, %v245_v8  ;;  %72 = vrot.lane.b32.xlu2 %v247_v12, %s294_s7  ;;  %s86_s9 = smov 3  ;;  %s78_s10 = smov 3  ;;  %vm105_vm10 = vcmask 835192   ;;  %vm32_vm11 = vcmask 138240   ;;  %vm35_vm12 = vcmask 1048528  }
   0x8   :  { %s93_s11 = smov 3  ;;  %v249_v13 = vld [vmem:[%s419_s0 + $0x4] ss:$24 sm:%s86_s9]   ;;  %v248_v14 = vld [vmem:[%s419_s0 + $0x15] ss:$24 sm:%s78_s10]   ;;  %s296_s18 = smov 92  }
   0x9   :  { %v250_v15 = vld [vmem:[%s419_s0 + $0xf] ss:$24 sm:%s93_s11]   ;;  %s297_s19 = smov 99   ;;  %s298_s20 = smov 89   ;;  %vm63_vm13 = vcmask 56320   ;;  %vm66_vm14 = vcmask 1048448  }
   0xa   :  { %s109_s21 = smov 3  ;;  %s101_s22 = smov 3  ;;  %vm82_vm15 = vcmask 999192   ;;  %vm90_vm0 = vcmask 941792   ;;  %vm97_vm1 = vcmask 917192   ;;  %vm128_vm2 = vcmask 728592  }
   0xb   :  { %s117_s23 = smov 3  ;;  %v252_v16 = vld [vmem:[%s419_s0 + $0x14] ss:$24 sm:%s109_s21]   ;;  %v251_v17 = vld [vmem:[%s419_s0 + $0x9] ss:$24 sm:%s101_s22]   ;;  %s299_s30 = smov 76  }
   0xc   :  { %30 = vrot.lane.b32.xlu0 %v29_v10, %s293_s6  ;;  %v253_v18 = vld [vmem:[%s419_s0 + $0x3] ss:$24 sm:%s117_s23]   ;;  %s300_s2 = smov 79   ;;  %s301_s3 = smov 69   ;;  %vm113_vm3 = vcmask 810592  }
   0xd   :  { %61 = vrot.lane.b32.xlu1 %v60_v11, %s295_s8  ;;  %s132_s4 = smov 3  ;;  %s124_s5 = smov 3 }
   0xe   :  { %s140_s6 = smov 3  ;;  %v255_v19 = vld [vmem:[%s419_s0 + $0x8] ss:$24 sm:%s132_s4]   ;;  %v254_v20 = vld [vmem:[%s419_s0 + $0xe] ss:$24 sm:%s124_s5]   ;;  %s302_s13 = smov 56  }
   0xf   :  { %80 = vrot.lane.b32.xlu2 %v248_v14, %s297_s19  ;;  %v256_v21 = vld [vmem:[%s419_s0 + $0x13] ss:$24 sm:%s140_s6]   ;;  %s303_s14 = smov 66   ;;  %s304_s15 = smov 53  }
  0x10   :  { %s155_s16 = smov 3  ;;  %s148_s17 = smov 3 }
  0x11   :  { %v258_v22 = vld [vmem:[%s419_s0 + $0xd] ss:$24 sm:%s155_s16]   ;;  %v257_v23 = vld [vmem:[%s419_s0 + $0x2] ss:$24 sm:%s148_s17]   ;;  %s305_s25 = smov 43   ;;  %s306_s26 = smov 46  }
  0x12   :  { %s307_s27 = smov 33   ;;  %s179_s28 = smov 3 }
  0x13   :  { %s171_s29 = smov 3  ;;  %v261_v25 = vld [vmem:[%s419_s0 + $0x1] ss:$24 sm:%s179_s28]   ;;  %s308_s8 = smov 23  }
  0x14   :  { %88 = vrot.lane.b32.xlu0 %v249_v13, %s296_s18  ;;  %s163_s18 = smov 3  ;;  %v260_v26 = vld [vmem:[%s419_s0 + $0x12] ss:$24 sm:%s171_s29]   ;;  %s309_s9 = smov 30  }
  0x15   :  { %95 = vrot.lane.b32.xlu1 %v250_v15, %s298_s20  ;;  %v259_v24 = vld [vmem:[%s419_s0 + $0x7] ss:$24 sm:%s163_s18]   ;;  %s310_s10 = smov 20   ;;  %s202_s11 = smov 3 }
  0x16   :  { %s194_s12 = smov 3  ;;  %v264_v28 = vld [vmem:[%s419_s0 + $0x11] ss:$24 sm:%s202_s11]   ;;  %s311_s17 = smov 7  }
  0x17   :  { %103 = vrot.lane.b32.xlu2 %v251_v17, %s300_s2  ;;  %v263_v29 = vld [vmem:[%s419_s0 + $0x6] ss:$24 sm:%s194_s12]   ;;  %s312_s18 = smov 10   ;;  %s2_s19 = smov 3 }
  0x18   :  { %v3_v30 = vld [vmem:[%s419_s0] ss:$24 sm:%s2_s19]  }
  0x19   :  { %5 = vst.msk [vmem:[#allocation0] sm:$0x3] %vm4_vm4, %v3_v30   ;;  %vm121_vm4 = vcmask 753192  }
  0x1c   :  { %111 = vrot.lane.b32.xlu0 %v252_v16, %s299_s30  ;;  %s186_s30 = smov 3 }
  0x1d   :  { %119 = vrot.lane.b32.xlu1 %v253_v18, %s301_s3  ;;  %v262_v27 = vld [vmem:[%s419_s0 + $0xc] ss:$24 sm:%s186_s30]  }
  0x1f   :  { %126 = vrot.lane.b32.xlu2 %v254_v20, %s303_s14 }
  0x24   :  { %134 = vrot.lane.b32.xlu0 %v255_v19, %s302_s13 }
  0x25   :  { %142 = vrot.lane.b32.xlu1 %v256_v21, %s304_s15 }
  0x27   :  { %150 = vrot.lane.b32.xlu2 %v257_v23, %s306_s26 }
  0x2c   :  { %157 = vrot.lane.b32.xlu0 %v258_v22, %s305_s25 }
  0x2d   :  { %165 = vrot.lane.b32.xlu1 %v259_v24, %s307_s27 }
  0x2f   :  { %173 = vrot.lane.b32.xlu2 %v260_v26, %s309_s9 }
  0x34   :  { %181 = vrot.lane.b32.xlu0 %v261_v25, %s308_s8 }
  0x35   :  { %188 = vrot.lane.b32.xlu1 %v262_v27, %s310_s10 }
  0x37   :  { %196 = vrot.lane.b32.xlu2 %v263_v29, %s312_s18 }
  0x3c   :  { %204 = vrot.lane.b32.xlu0 %v264_v28, %s311_s17 }
  0x61   :  { %v73_v31 = vpop.permute.xlu2 %72  }
  0x69   :  { %v81_v32 = vpop.permute.xlu2 %80  }
  0x71   :  { %v104_v34 = vpop.permute.xlu2 %103  }
  0x76   :  { %v15_v33 = vpop.permute.xlu0 %14  }
  0x77   :  { %18 = vst.msk [vmem:[#allocation0 + $0x10] sm:$0x3] %vm16_vm5, %v15_v33   ;;  %v47_v35 = vpop.permute.xlu1 %46   ;;  %vm152_vm5 = vcmask 564592  }
  0x78   :  { %21 = vst.msk [vmem:[#allocation0 + $0x8] sm:$0x3] %vm19_vm6, %v15_v33   ;;  %vm136_vm6 = vcmask 646592  }
  0x79   :  { %50 = vst.msk [vmem:[#allocation0 + $0x8] sm:$0x3] %vm48_vm7, %v47_v35   ;;  %v127_v37 = vpop.permute.xlu2 %126   ;;  %vm144_vm7 = vcmask 621992  }
  0x7a   :  { %52 = vst.msk [vmem:[#allocation0] sm:$0x3] %vm51_vm8, %v47_v35   ;;  %vm175_vm8 = vcmask 433392  }
  0x7b   :  { %76 = vst.msk [vmem:[#allocation0 + $0x8] sm:$0x3] %vm74_vm9, %v73_v31   ;;  %vm159_vm9 = vcmask 539992  }
  0x7c   :  { %107 = vst.msk [vmem:[#allocation0 + $0x8] sm:$0x3] %vm105_vm10, %v104_v34   ;;  %vm167_vm10 = vcmask 457992  }
  0x7e   :  { %v31_v36 = vpop.permute.xlu0 %30  }
  0x7f   :  { %34 = vst.msk [vmem:[#allocation0 + $0x20] sm:$0x3] %vm32_vm11, %v31_v36   ;;  %v62_v38 = vpop.permute.xlu1 %61   ;;  %vm198_vm11 = vcmask 269392  }
  0x80   :  { %37 = vst.msk [vmem:[#allocation0 + $0x18] sm:$0x3] %vm35_vm12, %v31_v36   ;;  %vm183_vm12 = vcmask 375992  }
  0x81   :  { %65 = vst.msk [vmem:[#allocation0 + $0x18] sm:$0x3] %vm63_vm13, %v62_v38   ;;  %v151_v41 = vpop.permute.xlu2 %150   ;;  %vm190_vm13 = vcmask 351392  }
  0x82   :  { %68 = vst.msk [vmem:[#allocation0 + $0x10] sm:$0x3] %vm66_vm14, %v62_v38   ;;  %vm206_vm14 = vcmask 244792  }
  0x83   :  { %84 = vst.msk [vmem:[#allocation0 + $0x18] sm:$0x3] %vm82_vm15, %v81_v32  }
  0x86   :  { %v234_v39 = vld [vmem:[#allocation0 + $0x20] sm:$0x3]  ;;  %v89_v40 = vpop.permute.xlu0 %88  }
  0x87   :  { %268 = vst [vmem:[%s420_s1 + $0x8] sm:$0x3] %v234_v39  ;;  %v96_v42 = vpop.permute.xlu1 %95  }
  0x88   :  { %91 = vst.msk [vmem:[#allocation0] sm:$0x3] %vm90_vm0, %v89_v40  }
  0x89   :  { %99 = vst.msk [vmem:[#allocation0 + $0x10] sm:$0x3] %vm97_vm1, %v96_v42   ;;  %v174_v44 = vpop.permute.xlu2 %173  }
  0x8a   :  { %130 = vst.msk [vmem:[#allocation0 + $0x10] sm:$0x3] %vm128_vm2, %v127_v37  }
  0x8e   :  { %v112_v43 = vpop.permute.xlu0 %111  }
  0x8f   :  { %115 = vst.msk [vmem:[#allocation0 + $0x18] sm:$0x3] %vm113_vm3, %v112_v43   ;;  %v120_v45 = vpop.permute.xlu1 %119  }
  0x90   :  { %122 = vst.msk [vmem:[#allocation0] sm:$0x3] %vm121_vm4, %v120_v45  }
  0x91   :  { %153 = vst.msk [vmem:[#allocation0] sm:$0x3] %vm152_vm5, %v151_v41   ;;  %v197_v47 = vpop.permute.xlu2 %196  }
  0x96   :  { %v135_v46 = vpop.permute.xlu0 %134  }
  0x97   :  { %138 = vst.msk [vmem:[#allocation0 + $0x8] sm:$0x3] %vm136_vm6, %v135_v46   ;;  %v143_v48 = vpop.permute.xlu1 %142  }
  0x98   :  { %146 = vst.msk [vmem:[#allocation0 + $0x18] sm:$0x3] %vm144_vm7, %v143_v48  }
  0x99   :  { %177 = vst.msk [vmem:[#allocation0 + $0x18] sm:$0x3] %vm175_vm8, %v174_v44  }
  0x9e   :  { %v158_v49 = vpop.permute.xlu0 %157  }
  0x9f   :  { %161 = vst.msk [vmem:[#allocation0 + $0x10] sm:$0x3] %vm159_vm9, %v158_v49   ;;  %v166_v50 = vpop.permute.xlu1 %165  }
  0xa0   :  { %169 = vst.msk [vmem:[#allocation0 + $0x8] sm:$0x3] %vm167_vm10, %v166_v50  }
  0xa1   :  { %200 = vst.msk [vmem:[#allocation0 + $0x8] sm:$0x3] %vm198_vm11, %v197_v47  }
  0xa6   :  { %v182_v51 = vpop.permute.xlu0 %181  }
  0xa7   :  { %184 = vst.msk [vmem:[#allocation0] sm:$0x3] %vm183_vm12, %v182_v51   ;;  %v189_v52 = vpop.permute.xlu1 %188  }
  0xa8   :  { %v216_v53 = vld [vmem:[#allocation0 + $0x8] sm:$0x3]  ;;  %192 = vst.msk [vmem:[#allocation0 + $0x10] sm:$0x3] %vm190_vm13, %v189_v52  }
  0xa9   :  { %265 = vst [vmem:[%s420_s1 + $0x2] sm:$0x3] %v216_v53 }
  0xae   :  { %v211_v54 = vld [vmem:[#allocation0] sm:$0x3]  ;;  %v205_v55 = vpop.permute.xlu0 %204  }
  0xaf   :  { %214 = vst [vmem:[%s420_s1] sm:$0x3] %v211_v54  ;;  %v222_v56 = vld [vmem:[#allocation0 + $0x10] sm:$0x3] }
  0xb0   :  { %208 = vst.msk [vmem:[#allocation0 + $0x18] sm:$0x3] %vm206_vm14, %v205_v55  }
  0xb1   :  { %266 = vst [vmem:[%s420_s1 + $0x4] sm:$0x3] %v222_v56 }
  0xb7   :  { %v228_v57 = vld [vmem:[#allocation0 + $0x18] sm:$0x3] }
  0xb8   :  { %267 = vst [vmem:[%s420_s1 + $0x6] sm:$0x3] %v228_v57 }

// kernel: my_gat_forward.3
= control target key start
LH: loop header
LB: loop body
LE: loop exit
PB: predicated region body
PF: predicated region fallthrough
CT: control target
= control target key end

     0   :  { %vm1353_vm0 = vcmask 1040384   ;;  %vm47_vm1 = vcmask 1041408   ;;  %vm49_vm2 = vcmask 1045508   ;;  %vm51_vm3 = vcmask 1043456   ;;  %s7851_s0 = inlined_call_operand.vmem [shape: bf16[529,529], index: 0, kind: input, shape index: {}]   ;;  %s7852_s2 = inlined_call_operand.vmem [shape: f32[2,529], index: 2, kind: input, shape index: {}]   ;;  %s7853_s1 = inlined_call_operand.vmem [shape: bf16[529,529], index: 1, kind: input, shape index: {}]   ;;  %s7854_s3 = inlined_call_operand.vmem [shape: f32[2,529], index: 3, kind: output, shape index: {}]  }
   0x1   :  { %v3417_v0 = vld [vmem:[%s7851_s0 + $0x118] sm:$0xf]  ;;  %v4647_v1 = vld [vmem:[%s7851_s0 + $0x128] sm:$0xf0]  ;;  %v3397_v11 = vld [vmem:[%s7851_s0 + $0xf0] sm:$0xf] }
   0x2   :  { %v3577_v2 = vld [vmem:[%s7851_s0 + $0x258] sm:$0xf]  ;;  %v4971_v3 = vor.u32 %v4647_v1, %v3417_v0  ;;  %v4687_v4 = vld [vmem:[%s7851_s0 + $0x268] sm:$0xf0]  ;;  %v4642_v13 = vld [vmem:[%s7851_s0 + $0x100] sm:$0xf0] }
   0x3   :  { %v3737_v5 = vld [vmem:[%s7851_s0 + $0x398] sm:$0xf]  ;;  %v4727_v6 = vld [vmem:[%s7851_s0 + $0x3a8] sm:$0xf0]  ;;  %v4982_v7 = vor.u32 %v4687_v4, %v3577_v2  ;;  %v3557_v14 = vld [vmem:[%s7851_s0 + $0x230] sm:$0xf]  ;;  %v5009_v16 = vor.u32 %v4642_v13, %v3397_v11 }
   0x4   :  { %v4984_v8 = vor.u32 %v4727_v6, %v3737_v5  ;;  %v3897_v9 = vld [vmem:[%s7851_s0 + $0x4d8] sm:$0xf]  ;;  %v4767_v10 = vld [vmem:[%s7851_s0 + $0x4e8] sm:$0xf0]  ;;  %1371 = vmatpush.bf16.msra.mxu0 %v4971_v3  ;;  %v4682_v15 = vld [vmem:[%s7851_s0 + $0x240] sm:$0xf0] }
   0x5   :  { %v4996_v12 = vor.u32 %v4767_v10, %v3897_v9  ;;  %1384 = vmatpush.bf16.msra.mxu1 %v4982_v7  ;;  %v5011_v17 = vor.u32 %v4682_v15, %v3557_v14  ;;  %v3717_v18 = vld [vmem:[%s7851_s0 + $0x370] sm:$0xf]  ;;  %v4722_v19 = vld [vmem:[%s7851_s0 + $0x380] sm:$0xf0]  ;;  %v3377_v23 = vld [vmem:[%s7851_s0 + $0xc8] sm:$0xf] }
   0x6   :  { %1397 = vmatpush.bf16.msra.mxu2 %v4984_v8  ;;  %v3877_v20 = vld [vmem:[%s7851_s0 + $0x4b0] sm:$0xf]  ;;  %v5023_v21 = vor.u32 %v4722_v19, %v3717_v18  ;;  %v4762_v22 = vld [vmem:[%s7851_s0 + $0x4c0] sm:$0xf0]  ;;  %v4637_v24 = vld [vmem:[%s7851_s0 + $0xd8] sm:$0xf0] }
   0x7   :  { %1410 = vmatpush.bf16.msra.mxu3 %v4996_v12  ;;  %v5034_v25 = vor.u32 %v4762_v22, %v3877_v20  ;;  %v3537_v26 = vld [vmem:[%s7851_s0 + $0x208] sm:$0xf]  ;;  %v4677_v27 = vld [vmem:[%s7851_s0 + $0x218] sm:$0xf0]  ;;  %v5046_v29 = vor.u32 %v4637_v24, %v3377_v23  ;;  %v3357_v35 = vld [vmem:[%s7851_s0 + $0xa0] sm:$0xf] }
   0x8   :  { %v3697_v28 = vld [vmem:[%s7851_s0 + $0x348] sm:$0xf]  ;;  %1372 = vmatpush.bf16.msra.mxu0 %v5009_v16  ;;  %v4717_v30 = vld [vmem:[%s7851_s0 + $0x358] sm:$0xf0]  ;;  %v5059_v33 = vor.u32 %v4677_v27, %v3537_v26  ;;  %v4632_v36 = vld [vmem:[%s7851_s0 + $0xb0] sm:$0xf0] }
   0x9   :  { %v3857_v31 = vld [vmem:[%s7851_s0 + $0x488] sm:$0xf]  ;;  %v4757_v32 = vld [vmem:[%s7851_s0 + $0x498] sm:$0xf0]  ;;  %1385 = vmatpush.bf16.msra.mxu1 %v5011_v17  ;;  %v5061_v34 = vor.u32 %v4717_v30, %v3697_v28  ;;  %v3517_v37 = vld [vmem:[%s7851_s0 + $0x1e0] sm:$0xf]  ;;  %v5091_v44 = vor.u32 %v4632_v36, %v3357_v35 }
   0xa   :  { %1398 = vmatpush.bf16.msra.mxu2 %v5023_v21  ;;  %v5073_v38 = vor.u32 %v4757_v32, %v3857_v31  ;;  %v4672_v39 = vld [vmem:[%s7851_s0 + $0x1f0] sm:$0xf0]  ;;  %v3677_v40 = vld [vmem:[%s7851_s0 + $0x320] sm:$0xf]  ;;  %v3337_v47 = vld [vmem:[%s7851_s0 + $0x78] sm:$0xf] }
   0xb   :  { %1411 = vmatpush.bf16.msra.mxu3 %v5034_v25  ;;  %v4712_v41 = vld [vmem:[%s7851_s0 + $0x330] sm:$0xf0]  ;;  %v3837_v42 = vld [vmem:[%s7851_s0 + $0x460] sm:$0xf]  ;;  %v5095_v45 = vor.u32 %v4672_v39, %v3517_v37  ;;  %v4627_v48 = vld [vmem:[%s7851_s0 + $0x88] sm:$0xf0] }
   0xc   :  { %v4752_v43 = vld [vmem:[%s7851_s0 + $0x470] sm:$0xf0]  ;;  %1373 = vmatpush.bf16.msra.mxu0 %v5046_v29  ;;  %v5097_v46 = vor.u32 %v4712_v41, %v3677_v40  ;;  %v3497_v49 = vld [vmem:[%s7851_s0 + $0x1b8] sm:$0xf]  ;;  %v4667_v51 = vld [vmem:[%s7851_s0 + $0x1c8] sm:$0xf0]  ;;  %v5127_v56 = vor.u32 %v4627_v48, %v3337_v47 }
   0xd   :  { %1386 = vmatpush.bf16.msra.mxu1 %v5059_v33  ;;  %v5109_v50 = vor.u32 %v4752_v43, %v3837_v42  ;;  %v3657_v52 = vld [vmem:[%s7851_s0 + $0x2f8] sm:$0xf]  ;;  %v4707_v53 = vld [vmem:[%s7851_s0 + $0x308] sm:$0xf0]  ;;  %v5131_v57 = vor.u32 %v4667_v51, %v3497_v49  ;;  %v3317_v59 = vld [vmem:[%s7851_s0 + $0x50] sm:$0xf] }
   0xe   :  { %1399 = vmatpush.bf16.msra.mxu2 %v5061_v34  ;;  %v3817_v54 = vld [vmem:[%s7851_s0 + $0x438] sm:$0xf]  ;;  %v4747_v55 = vld [vmem:[%s7851_s0 + $0x448] sm:$0xf0]  ;;  %v5133_v58 = vor.u32 %v4707_v53, %v3657_v52  ;;  %v4622_v60 = vld [vmem:[%s7851_s0 + $0x60] sm:$0xf0] }
   0xf   :  { %1412 = vmatpush.bf16.msra.mxu3 %v5073_v38  ;;  %v3477_v61 = vld [vmem:[%s7851_s0 + $0x190] sm:$0xf]  ;;  %v5145_v62 = vor.u32 %v4747_v55, %v3817_v54  ;;  %v4662_v63 = vld [vmem:[%s7851_s0 + $0x1a0] sm:$0xf0]  ;;  %v5163_v5 = vor.u32 %v4622_v60, %v3317_v59  ;;  %v3297_v6 = vld [vmem:[%s7851_s0 + $0x28] sm:$0xf] }
  0x10   :  { %1374 = vmatpush.bf16.msra.mxu0 %v5091_v44  ;;  %v3637_v0 = vld [vmem:[%s7851_s0 + $0x2d0] sm:$0xf]  ;;  %v4702_v1 = vld [vmem:[%s7851_s0 + $0x2e0] sm:$0xf0]  ;;  %v5170_v9 = vor.u32 %v4662_v63, %v3477_v61  ;;  %v4617_v11 = vld [vmem:[%s7851_s0 + $0x38] sm:$0xf0] }
  0x11   :  { %1387 = vmatpush.bf16.msra.mxu1 %v5095_v45  ;;  %v3797_v2 = vld [vmem:[%s7851_s0 + $0x410] sm:$0xf]  ;;  %v4742_v4 = vld [vmem:[%s7851_s0 + $0x420] sm:$0xf0]  ;;  %v5172_v10 = vor.u32 %v4702_v1, %v3637_v0  ;;  %v3457_v13 = vld [vmem:[%s7851_s0 + $0x168] sm:$0xf]  ;;  %v5205_v26 = vor.u32 %v4617_v11, %v3297_v6 }
  0x12   :  { %1400 = vmatpush.bf16.msra.mxu2 %v5097_v46  ;;  %v4657_v14 = vld [vmem:[%s7851_s0 + $0x178] sm:$0xf0]  ;;  %v5184_v15 = vor.u32 %v4742_v4, %v3797_v2  ;;  %v3617_v18 = vld [vmem:[%s7851_s0 + $0x2a8] sm:$0xf]  ;;  %v3277_v27 = vld [vmem:[%s7851_s0] sm:$0xf] }
  0x13   :  { %1413 = vmatpush.bf16.msra.mxu3 %v5109_v50  ;;  %v4697_v19 = vld [vmem:[%s7851_s0 + $0x2b8] sm:$0xf0]  ;;  %v5195_v20 = vld [vmem:[%s7851_s0 + $0x528] sm:$0x11]  ;;  %v4612_v28 = vld [vmem:[%s7851_s0 + $0x10] sm:$0xf0]  ;;  %v5220_v31 = vor.u32 %v4657_v14, %v3457_v13 }
  0x14   :  { %1375 = vmatpush.bf16.msra.mxu0 %v5127_v56  ;;  %7974 = vst [vmem:[#allocation2_spill] sm:$0xff] %v5184_v15  ;;  %v3777_v22 = vld [vmem:[%s7851_s0 + $0x3e8] sm:$0xf]  ;;  %v4737_v23 = vld [vmem:[%s7851_s0 + $0x3f8] sm:$0xf0]  ;;  %v1009_v24 = vunpack.c.l.b16 %v5195_v20  ;;  %v5216_v30 = vld [vmem:[%s7852_s2] sm:$0xff]  ;;  %v5222_v32 = vor.u32 %v4697_v19, %v3617_v18  ;;  %v5253_v51 = vor.u32 %v4612_v28, %v3277_v27 }
  0x15   :  { %1388 = vmatpush.bf16.msra.mxu1 %v5131_v57  ;;  %v3437_v35 = vld [vmem:[%s7851_s0 + $0x140] sm:$0xf]  ;;  %v4652_v36 = vld [vmem:[%s7851_s0 + $0x150] sm:$0xf0]  ;;  %v5234_v39 = vor.u32 %v4737_v23, %v3777_v22  ;;  %v4941_v47 = vmov 0   ;;  %vm1349_vm4 = vcmask 138240  }
  0x16   :  { %1401 = vmatpush.bf16.msra.mxu2 %v5133_v58  ;;  %v3597_v37 = vld [vmem:[%s7851_s0 + $0x280] sm:$0xf]  ;;  %v4692_v40 = vld [vmem:[%s7851_s0 + $0x290] sm:$0xf0]  ;;  %v1179_v43 = vpack.c.b16 %v1009_v24, %v1009_v24  ;;  %v5246_v48 = vsel %vm1353_vm0, 65535, %v4941_v47  ;;  %v5266_v55 = vor.u32 %v4652_v36, %v3437_v35  ;;  %vm3269_vm5 = vcmask 132096  }
  0x17   :  { %1414 = vmatpush.bf16.msra.mxu3 %v5145_v62  ;;  %7975 = vst [vmem:[#allocation3_spill] sm:$0xff] %v5234_v39  ;;  %v3757_v41 = vld [vmem:[%s7851_s0 + $0x3c0] sm:$0xf]  ;;  %v4732_v42 = vld [vmem:[%s7851_s0 + $0x3d0] sm:$0xf0]  ;;  %v5268_v59 = vor.u32 %v4692_v40, %v3597_v37 }
  0x18   :  { %1376 = vmatpush.bf16.msra.mxu0 %v5163_v5  ;;  %v4645_v49 = vld [vmem:[%s7851_s0 + $0x11c] sm:$0xf]  ;;  %19 = vst [vmem:[#allocation1] ss:$4 sm:$0xff] %v5216_v30  ;;  %v3419_v52 = vld [vmem:[%s7851_s0 + $0x12c] sm:$0xf0]  ;;  %v5277_v63 = vor.u32 %v4732_v42, %v3757_v41  ;;  %v5280_v0 = vand.u32 %v5246_v48, %v1179_v43 }
  0x19   :  { %1389 = vmatpush.bf16.msra.mxu1 %v5170_v9  ;;  %v4685_v53 = vld [vmem:[%s7851_s0 + $0x25c] sm:$0xf]  ;;  %v3579_v54 = vld [vmem:[%s7851_s0 + $0x26c] sm:$0xf0]  ;;  %v5282_v1 = vor.u32 %v4645_v49, %v3419_v52  ;;  %v3917_v4 = vld [vmem:[%s7851_s0 + $0x500] sm:$0xf] }
  0x1a   :  { %1402 = vmatpush.bf16.msra.mxu2 %v5172_v10  ;;  %v4725_v60 = vld [vmem:[%s7851_s0 + $0x39c] sm:$0xf]  ;;  %v3739_v61 = vld [vmem:[%s7851_s0 + $0x3ac] sm:$0xf0]  ;;  %7976 = vst [vmem:[#allocation4_spill] sm:$0xff] %v5277_v63  ;;  %v5284_v2 = vor.u32 %v4685_v53, %v3579_v54 }
  0x1b   :  { %1415 = vmatpush.bf16.msra.mxu3 %v5184_v15  ;;  %v4772_v6 = vld [vmem:[%s7851_s0 + $0x510] sm:$0xf0]  ;;  %v5296_v13 = vor.u32 %v4725_v60, %v3739_v61  ;;  %v3399_v14 = vld [vmem:[%s7851_s0 + $0x104] sm:$0xf0]  ;;  %v4635_v35 = vld [vmem:[%s7851_s0 + $0xcc] sm:$0xf] }
  0x1c   :  { %1377 = vmatpush.bf16.msra.mxu0 %v5205_v26  ;;  %v4640_v11 = vld [vmem:[%s7851_s0 + $0xf4] sm:$0xf]  ;;  %v3559_v19 = vld [vmem:[%s7851_s0 + $0x244] sm:$0xf0]  ;;  %v5317_v24 = vor.u32 %v4772_v6, %v3917_v4  ;;  %v3379_v49 = vld [vmem:[%s7851_s0 + $0xdc] sm:$0xf0] }
  0x1d   :  { %1390 = vmatpush.bf16.msra.mxu1 %v5220_v31  ;;  %7977 = vst [vmem:[#allocation5_spill] sm:$0xff] %v5296_v13  ;;  %v4680_v18 = vld [vmem:[%s7851_s0 + $0x234] sm:$0xf]  ;;  %v3719_v23 = vld [vmem:[%s7851_s0 + $0x384] sm:$0xf0]  ;;  %v5324_v36 = vor.u32 %v4640_v11, %v3399_v14 }
  0x1e   :  { %1403 = vmatpush.bf16.msra.mxu2 %v5222_v32  ;;  %v4720_v22 = vld [vmem:[%s7851_s0 + $0x374] sm:$0xf]  ;;  %v5326_v37 = vor.u32 %v4680_v18, %v3559_v19  ;;  %v4675_v52 = vld [vmem:[%s7851_s0 + $0x20c] sm:$0xf]  ;;  %v3539_v53 = vld [vmem:[%s7851_s0 + $0x21c] sm:$0xf0]  ;;  %v5357_v18 = vor.u32 %v4635_v35, %v3379_v49 }
  0x1f   :  { %1416 = vmatpush.bf16.msra.mxu3 %v5234_v39  ;;  %v22_v27 = vld.sshfl [vmem:[#allocation1] sm:$0xff pattern:$0x73625140]  ;;  %v23_v28 = vld.sshfl [vmem:[#allocation1 + $0x8] sm:$0xff pattern:$0x73625140]  ;;  %v5331_v43 = vor.u32 %v4720_v22, %v3719_v23  ;;  %v5359_v19 = vor.u32 %v4675_v52, %v3539_v53 }
  0x20   :  { %1378 = vmatpush.bf16.msra.mxu0 %v5253_v51  ;;  %7978 = vst [vmem:[#allocation6_spill] sm:$0xff] %v5326_v37  ;;  %v24_v40 = vld.sshfl [vmem:[#allocation1 + $0x10] sm:$0xff pattern:$0x73625140]  ;;  %v5328_v42 = vpack.c.bf16 %v23_v28, %v22_v27  ;;  %v4715_v61 = vld [vmem:[%s7851_s0 + $0x34c] sm:$0xf] }
  0x21   :  { %1391 = vmatpush.bf16.msra.mxu1 %v5266_v55  ;;  %v25_v41 = vld.sshfl [vmem:[#allocation1 + $0x18] sm:$0xff pattern:$0x73625140]  ;;  %7979 = vst [vmem:[#allocation7_spill] sm:$0xff] %v5331_v43  ;;  %v3699_v4 = vld [vmem:[%s7851_s0 + $0x35c] sm:$0xf0] }
  0x22   :  { %1404 = vmatpush.bf16.msra.mxu2 %v5268_v59  ;;  %v5333_v47 = vpack.c.bf16 %v25_v41, %v24_v40  ;;  %v35_v54 = vunpack.c.l.bf16 %v5328_v42  ;;  %v36_v60 = vunpack.c.h.bf16 %v5328_v42  ;;  %7980 = vst [vmem:[#allocation8_spill] sm:$0xff] %v5357_v18  ;;  %v4630_v22 = vld [vmem:[%s7851_s0 + $0xa4] sm:$0xf]  ;;  %v3359_v23 = vld [vmem:[%s7851_s0 + $0xb4] sm:$0xf0]  ;;  %v5368_v40 = vor.u32 %v4715_v61, %v3699_v4 }
  0x23   :  { %1417 = vmatpush.bf16.msra.mxu3 %v5277_v63  ;;  %7981 = vst [vmem:[#allocation9_spill] sm:$0xff] %v5359_v19  ;;  %v4670_v35 = vld [vmem:[%s7851_s0 + $0x1e4] sm:$0xf]  ;;  %v3519_v41 = vld [vmem:[%s7851_s0 + $0x1f4] sm:$0xf0]  ;;  %v5387_v4 = vor.u32 %v4630_v22, %v3359_v23 }
  0x24   :  { %1429 = vmatpush.bf16.msrb.mxu0 %v5280_v0  ;;  %v37_v6 = vunpack.c.l.bf16 %v5333_v47  ;;  %v38_v11 = vunpack.c.h.bf16 %v5333_v47  ;;  %v44_v14 = vrot.slane %v36_v60, 6  ;;  %7982 = vst [vmem:[#allocation10_spill] sm:$0xff] %v5368_v40  ;;  %v4710_v52 = vld [vmem:[%s7851_s0 + $0x324] sm:$0xf]  ;;  %v3679_v53 = vld [vmem:[%s7851_s0 + $0x334] sm:$0xf0] }
  0x25   :  { %1436 = vmatpush.bf16.msrb.mxu1 %v5282_v1  ;;  %7983 = vst [vmem:[#allocation11_spill] sm:$0xff] %v5387_v4  ;;  %v4665_v22 = vld [vmem:[%s7851_s0 + $0x1bc] sm:$0xf]  ;;  %v3499_v23 = vld [vmem:[%s7851_s0 + $0x1cc] sm:$0xf0] }
  0x26   :  { %1449 = vmatpush.bf16.msrb.mxu2 %v5284_v2  ;;  %v45_v27 = vrot.slane %v37_v6, 4  ;;  %v46_v28 = vrot.slane %v38_v11, 2  ;;  %v48_v49 = vsel %vm47_vm1, %v35_v54, %v44_v14  ;;  %v5389_v6 = vor.u32 %v4670_v35, %v3519_v41  ;;  %v4625_v54 = vld [vmem:[%s7851_s0 + $0x7c] sm:$0xf]  ;;  %v5416_v35 = vld [vmem:[%s7852_s2 + $0x8] sm:$0x3] }
  0x27   :  { %1462 = vmatpush.bf16.msrb.mxu3 %v5296_v13  ;;  %v5396_v14 = vor.u32 %v4710_v52, %v3679_v53  ;;  %v4620_v52 = vld [vmem:[%s7851_s0 + $0x54] sm:$0xf]  ;;  %21 = vst [vmem:[#allocation1 + $0x20] ss:$4 sm:$0xff] %v5416_v35 }
  0x28   :  { %1430 = vmatpush.bf16.msrb.mxu0 %v5317_v24  ;;  %v50_v60 = vsel %vm49_vm2, %v45_v27, %v46_v28  ;;  %7984 = vst [vmem:[#allocation12_spill] sm:$0xff] %v5389_v6  ;;  %v3339_v27 = vld [vmem:[%s7851_s0 + $0x8c] sm:$0xf0] }
  0x29   :  { %1437 = vmatpush.bf16.msrb.mxu1 %v5324_v36  ;;  %v52_v61 = vsel %vm51_vm3, %v48_v49, %v50_v60  ;;  %7985 = vst [vmem:[#allocation13_spill] sm:$0xff] %v5396_v14  ;;  %v3659_v28 = vld [vmem:[%s7851_s0 + $0x30c] sm:$0xf0]  ;;  %v5420_v41 = vor.u32 %v4625_v54, %v3339_v27  ;;  %v5422_v49 = vor.u32 %v4665_v22, %v3499_v23  ;;  %v3319_v60 = vld [vmem:[%s7851_s0 + $0x64] sm:$0xf0] }
  0x2a   :  { %1450 = vmatpush.bf16.msrb.mxu2 %v5326_v37  ;;  %v54_v11 = vsub.f32 %v5216_v30, %v52_v61  ;;  %v4705_v30 = vld [vmem:[%s7851_s0 + $0x2fc] sm:$0xf]  ;;  %v4660_v61 = vld [vmem:[%s7851_s0 + $0x194] sm:$0xf]  ;;  %v3479_v54 = vld [vmem:[%s7851_s0 + $0x1a4] sm:$0xf0]  ;;  %v5448_v22 = vor.u32 %v4620_v52, %v3319_v60 }
  0x2b   :  { %1463 = vmatpush.bf16.msrb.mxu3 %v5331_v43  ;;  %7986 = vst [vmem:[#allocation14_spill] sm:$0xff] %v5420_v41  ;;  %v5429_v53 = vor.u32 %v4705_v30, %v3659_v28  ;;  %v3899_v27 = vld [vmem:[%s7851_s0 + $0x4ec] sm:$0xf0]  ;;  %v5450_v23 = vor.u32 %v4660_v61, %v3479_v54  ;;  %v4700_v30 = vld [vmem:[%s7851_s0 + $0x2d4] sm:$0xf] }
  0x2c   :  { %58 = vst [vmem:[#allocation1] ss:$4 sm:$0xff] %v54_v11  ;;  %v4765_v11 = vld [vmem:[%s7851_s0 + $0x4dc] sm:$0xf]  ;;  %v3639_v28 = vld [vmem:[%s7851_s0 + $0x2e4] sm:$0xf0] }
  0x2d   :  { %1438 = vmatpush.bf16.msrb.mxu1 %v5357_v18  ;;  %7987 = vst [vmem:[#allocation15_spill] sm:$0xff] %v5422_v49  ;;  %v4760_v52 = vld [vmem:[%s7851_s0 + $0x4b4] sm:$0xf]  ;;  %v3879_v60 = vld [vmem:[%s7851_s0 + $0x4c4] sm:$0xf0] }
  0x2e   :  { %1451 = vmatpush.bf16.msrb.mxu2 %v5359_v19  ;;  %7988 = vst [vmem:[#allocation16_spill] sm:$0xff] %v5429_v53  ;;  %v3299_v61 = vld [vmem:[%s7851_s0 + $0x3c] sm:$0xf0]  ;;  %v4655_v54 = vld [vmem:[%s7851_s0 + $0x16c] sm:$0xf] }
  0x2f   :  { %1464 = vmatpush.bf16.msrb.mxu3 %v5368_v40  ;;  %7989 = vst [vmem:[#allocation17_spill] sm:$0xff] %v5448_v22  ;;  %v1010_v40 = vunpack.c.h.b16 %v5195_v20  ;;  %v3459_v20 = vld [vmem:[%s7851_s0 + $0x17c] sm:$0xf0] }
  0x30   :  { %7990 = vst [vmem:[#allocation18_spill] sm:$0xff] %v5450_v23 }
  0x31   :  { %1439 = vmatpush.bf16.msrb.mxu1 %v5387_v4  ;;  %v5484_v4 = vor.u32 %v4700_v30, %v3639_v28  ;;  %v5513_v30 = vor.u32 %v4760_v52, %v3879_v60  ;;  %v4755_v28 = vld [vmem:[%s7851_s0 + $0x48c] sm:$0xf]  ;;  %v3425_v60 = vld [vmem:[%s7851_s0 + $0x120] sm:$0xf] }
  0x32   :  { %1452 = vmatpush.bf16.msrb.mxu2 %v5389_v6 }
  0x33   :  { %1465 = vmatpush.bf16.msrb.mxu3 %v5396_v14  ;;  %v4615_v14 = vld [vmem:[%s7851_s0 + $0x2c] sm:$0xf]  ;;  %v61_v43 = vld.sshfl [vmem:[#allocation1] sm:$0xff pattern:$0x73625140]  ;;  %7992 = vst [vmem:[#allocation20_spill] sm:$0xff] %v5484_v4 }
  0x34   :  { %v5480_v13 = vpack.c.bf16 %v61_v43, %v61_v43  ;;  %v64_v6 = vld.sshfl [vmem:[#allocation1 + $0x18] sm:$0xff pattern:$0x73625140]  ;;  %v5492_v18 = vor.u32 %v4615_v14, %v3299_v61  ;;  %v4695_v43 = vld [vmem:[%s7851_s0 + $0x2ac] sm:$0xf] }
  0x35   :  { %1440 = vmatpush.bf16.msrb.mxu1 %v5420_v41  ;;  %v63_v41 = vld.sshfl [vmem:[#allocation1 + $0x10] sm:$0xff pattern:$0x73625140]  ;;  %v5488_v19 = vpack.c.bf16 %v64_v6, %v64_v6  ;;  %v3619_v6 = vld [vmem:[%s7851_s0 + $0x2bc] sm:$0xf0] }
  0x36   :  { %1453 = vmatpush.bf16.msrb.mxu2 %v5422_v49  ;;  %v5478_v49 = vor.u32 %v4765_v11, %v3899_v27  ;;  %v5482_v63 = vpack.c.bf16 %v63_v41, %v63_v41  ;;  %7993 = vst [vmem:[#allocation21_spill] sm:$0xff] %v5492_v18  ;;  %v26_v41 = vld.sshfl [vmem:[#allocation1 + $0x20] sm:$0xff pattern:$0x73625140]  ;;  %v1180_v11 = vpack.c.b16 %v1010_v40, %v1010_v40  ;;  %v3279_v40 = vld [vmem:[%s7851_s0 + $0x14] sm:$0xf0] }
  0x37   :  { %1466 = vmatpush.bf16.msrb.mxu3 %v5429_v53  ;;  %v62_v53 = vld.sshfl [vmem:[#allocation1 + $0x8] sm:$0xff pattern:$0x73625140]  ;;  %1379 = vmatmul.bf16.vlgmr.msra.gmra.mxu0 %v5480_v13  ;;  %v5504_v27 = vpack.c.bf16 %v26_v41, %v26_v41  ;;  %v4610_v14 = vld [vmem:[%s7851_s0 + $0x4] sm:$0xf] }
  0x38   :  { %7991 = vst [vmem:[#allocation19_spill] sm:$0xff] %v5478_v49  ;;  %v5486_v39 = vpack.c.bf16 %v62_v53, %v62_v53  ;;  %1405 = vmatmul.bf16.vlgmr.msra.gmra.mxu2 %v5482_v63  ;;  %v5499_v53 = vor.u32 %v4655_v54, %v3459_v20  ;;  %1475 = vmatpush.bf16.msra.mxu0 %v5478_v49  ;;  %v4650_v61 = vld [vmem:[%s7851_s0 + $0x144] sm:$0xf]  ;;  %v3439_v54 = vld [vmem:[%s7851_s0 + $0x154] sm:$0xf0] }
  0x39   :  { %1441 = vmatpush.bf16.msrb.mxu1 %v5448_v22  ;;  %7995 = vst [vmem:[#allocation23_spill] sm:$0xff] %v5504_v27  ;;  %v3859_v20 = vld [vmem:[%s7851_s0 + $0x49c] sm:$0xf0]  ;;  %1418 = vmatmul.bf16.vlgmr.msra.gmra.mxu3 %v5488_v19  ;;  %v39_v52 = vunpack.c.l.bf16 %v5504_v27  ;;  %v4648_v41 = vld [vmem:[%s7851_s0 + $0x130] sm:$0xf0]  ;;  %v5540_v22 = vor.u32 %v4610_v14, %v3279_v40  ;;  %v5550_v37 = vor.u32 %v4650_v61, %v3439_v54 }
  0x3a   :  { %1454 = vmatpush.bf16.msrb.mxu2 %v5450_v23  ;;  %7994 = vst [vmem:[#allocation22_spill] sm:$0xff] %v5499_v53  ;;  %1392 = vmatmul.bf16.vlgmr.msra.gmra.mxu1 %v5486_v39  ;;  %v5538_v23 = vor.u32 %v4695_v43, %v3619_v6  ;;  %v4750_v27 = vld [vmem:[%s7851_s0 + $0x464] sm:$0xf]  ;;  %v3839_v49 = vld [vmem:[%s7851_s0 + $0x474] sm:$0xf0]  ;;  %v5559_v14 = vand.u32 %v5246_v48, %v1180_v11 }
  0x3b   :  { %1467 = vmatpush.bf16.msrb.mxu3 %v5484_v4  ;;  %7997 = vst [vmem:[#allocation25_spill] sm:$0xff] %v5540_v22  ;;  %v55_v15 = vsub.f32 %v5416_v35, %v39_v52  ;;  %v4690_v43 = vld [vmem:[%s7851_s0 + $0x284] sm:$0xf]  ;;  %v3599_v6 = vld [vmem:[%s7851_s0 + $0x294] sm:$0xf0]  ;;  %v5565_v35 = vor.u32 %v4755_v28, %v3859_v20  ;;  %v5567_v61 = vor.u32 %v4648_v41, %v3425_v60 }
  0x3c   :  { %7996 = vst [vmem:[#allocation24_spill] sm:$0xff] %v5538_v23  ;;  %v3585_v40 = vld [vmem:[%s7851_s0 + $0x260] sm:$0xf]  ;;  %1476 = vmatpush.bf16.msra.mxu0 %v5513_v30  ;;  %v4688_v54 = vld [vmem:[%s7851_s0 + $0x270] sm:$0xf0]  ;;  %v5586_v60 = vor.u32 %v4690_v43, %v3599_v6  ;;  %v5595_v4 = vor.u32 %v4750_v27, %v3839_v49 }
  0x3d   :  { %1442 = vmatpush.bf16.msrb.mxu1 %v5492_v18  ;;  %7998 = vst [vmem:[#allocation26_spill] sm:$0xff] %v5550_v37  ;;  %v4770_v52 = vld [vmem:[%s7851_s0 + $0x504] sm:$0xf]  ;;  %v3919_v11 = vld [vmem:[%s7851_s0 + $0x514] sm:$0xf0]  ;;  %v5590_v41 = vor.u32 %v4688_v54, %v3585_v40 }
  0x3e   :  { %1455 = vmatpush.bf16.msrb.mxu2 %v5499_v53  ;;  %7999 = vst [vmem:[#allocation27_spill] sm:$0xff] %v5559_v14  ;;  %v3405_v28 = vld [vmem:[%s7851_s0 + $0xf8] sm:$0xf]  ;;  %v4643_v20 = vld [vmem:[%s7851_s0 + $0x108] sm:$0xf0] }
  0x3f   :  { %8000 = vst [vmem:[#allocation28_spill] sm:$0xff] %v5565_v35  ;;  %1468 = vmatpush.bf16.msrb.mxu3 %v5538_v23  ;;  %v5598_v53 = vor.u32 %v4643_v20, %v3405_v28  ;;  %v3565_v43 = vld [vmem:[%s7851_s0 + $0x238] sm:$0xf]  ;;  %v4683_v6 = vld [vmem:[%s7851_s0 + $0x248] sm:$0xf0] }
  0x40   :  { %8001 = vst [vmem:[#allocation29_spill] sm:$0xff] %v5567_v61  ;;  %1477 = vmatpush.bf16.msra.mxu0 %v5565_v35  ;;  %v4745_v40 = vld [vmem:[%s7851_s0 + $0x43c] sm:$0xf]  ;;  %v3819_v49 = vld [vmem:[%s7851_s0 + $0x44c] sm:$0xf0]  ;;  %v5627_v28 = vor.u32 %v4683_v6, %v3565_v43 }
  0x41   :  { %60 = vst [vmem:[#allocation1 + $0x20] ss:$4 sm:$0xff] %v55_v15  ;;  %1443 = vmatpush.bf16.msrb.mxu1 %v5540_v22  ;;  %v5592_v15 = vor.u32 %v4770_v52, %v3919_v11  ;;  %v3905_v27 = vld [vmem:[%s7851_s0 + $0x4e0] sm:$0xf]  ;;  %v4768_v54 = vld [vmem:[%s7851_s0 + $0x4f0] sm:$0xf0] }
  0x42   :  { %8002 = vst [vmem:[#allocation30_spill] sm:$0xff] %v5586_v60  ;;  %1456 = vmatpush.bf16.msrb.mxu2 %v5550_v37  ;;  %v3385_v52 = vld [vmem:[%s7851_s0 + $0xd0] sm:$0xf]  ;;  %v4638_v11 = vld [vmem:[%s7851_s0 + $0xe0] sm:$0xf0] }
  0x43   :  { %8003 = vst [vmem:[#allocation31_spill] sm:$0xff] %v5590_v41  ;;  %1469 = vmatpush.bf16.msrb.mxu3 %v5586_v60  ;;  %v3545_v20 = vld [vmem:[%s7851_s0 + $0x210] sm:$0xf]  ;;  %v5633_v60 = vor.u32 %v4745_v40, %v3819_v49  ;;  %v4740_v43 = vld [vmem:[%s7851_s0 + $0x414] sm:$0xf]  ;;  %v5647_v40 = vor.u32 %v4768_v54, %v3905_v27  ;;  %v5649_v49 = vor.u32 %v4638_v11, %v3385_v52 }
  0x44   :  { %8004 = vst [vmem:[#allocation32_spill] sm:$0xff] %v5592_v15  ;;  %1478 = vmatpush.bf16.msra.mxu0 %v5595_v4  ;;  %v3799_v6 = vld [vmem:[%s7851_s0 + $0x424] sm:$0xf0]  ;;  %v4673_v11 = vld [vmem:[%s7851_s0 + $0x1f8] sm:$0xf0] }
  0x45   :  { %1494 = vmatpush.bf16.msra.mxu1 %v5559_v14  ;;  %8005 = vst [vmem:[#allocation33_spill] sm:$0xff] %v5595_v4  ;;  %v3365_v14 = vld [vmem:[%s7851_s0 + $0xa8] sm:$0xf]  ;;  %v5669_v54 = vor.u32 %v4740_v43, %v3799_v6  ;;  %v3865_v6 = vld [vmem:[%s7851_s0 + $0x490] sm:$0xf] }
  0x46   :  { %1501 = vmatpush.bf16.msra.mxu2 %v5567_v61  ;;  %8006 = vst [vmem:[#allocation34_spill] sm:$0xff] %v5598_v53  ;;  %v4763_v61 = vld [vmem:[%s7851_s0 + $0x4c8] sm:$0xf0]  ;;  %v3525_v52 = vld [vmem:[%s7851_s0 + $0x1e8] sm:$0xf] }
  0x47   :  { %1514 = vmatpush.bf16.msra.mxu3 %v5590_v41  ;;  %8007 = vst [vmem:[#allocation35_spill] sm:$0xff] %v5627_v28  ;;  %v4678_v41 = vld [vmem:[%s7851_s0 + $0x220] sm:$0xf0]  ;;  %v4753_v18 = vld [vmem:[%s7851_s0 + $0x478] sm:$0xf0] }
  0x48   :  { %8008 = vst [vmem:[#allocation36_spill] sm:$0xff] %v5633_v60  ;;  %v65_v23 = vld.sshfl [vmem:[#allocation1 + $0x20] sm:$0xff pattern:$0x73625140]  ;;  %v5666_v27 = vor.u32 %v4678_v41, %v3545_v20  ;;  %1479 = vmatpush.bf16.msra.mxu0 %v5633_v60  ;;  %1457 = vmatmul.bf16.vlgmr.msrb.gmra.mxu2 %v5486_v39  ;;  %v4773_v4 = vld [vmem:[%s7851_s0 + $0x518] sm:$0xf0] }
  0x49   :  { %1495 = vmatpush.bf16.msra.mxu1 %v5592_v15  ;;  %v5645_v15 = vpack.c.bf16 %v65_v23, %v65_v23  ;;  %8009 = vst [vmem:[#allocation37_spill] sm:$0xff] %v5647_v40  ;;  %v4633_v23 = vld [vmem:[%s7851_s0 + $0xb8] sm:$0xf0]  ;;  %v3779_v41 = vld [vmem:[%s7851_s0 + $0x3fc] sm:$0xf0]  ;;  %1470 = vmatmul.bf16.vlgmr.msrb.gmra.mxu3 %v5482_v63 }
  0x4a   :  { %1502 = vmatpush.bf16.msra.mxu2 %v5598_v53  ;;  %8010 = vst [vmem:[#allocation38_spill] sm:$0xff] %v5649_v49  ;;  %v3885_v53 = vld [vmem:[%s7851_s0 + $0x4b8] sm:$0xf]  ;;  %1444 = vmatmul.bf16.vlgmr.msrb.gmra.mxu1 %v5480_v13  ;;  %v5688_v43 = vor.u32 %v4633_v23, %v3365_v14  ;;  %v4758_v37 = vld [vmem:[%s7851_s0 + $0x4a0] sm:$0xf0]  ;;  %v5705_v14 = vor.u32 %v4673_v11, %v3525_v52 }
  0x4b   :  { %3935 = vmatmul.msk.bf16.vlgmr.msrb.gmra.mxu0 %vm1349_vm4, %v5645_v15  ;;  %1515 = vmatpush.bf16.msra.mxu3 %v5627_v28  ;;  %8011 = vst [vmem:[#allocation39_spill] sm:$0xff] %v5666_v27  ;;  %v4735_v28 = vld [vmem:[%s7851_s0 + $0x3ec] sm:$0xf]  ;;  %v5686_v20 = vor.u32 %v4763_v61, %v3885_v53  ;;  %v4628_v53 = vld [vmem:[%s7851_s0 + $0x90] sm:$0xf0]  ;;  %v5727_v11 = vor.u32 %v4758_v37, %v3865_v6 }
  0x4c   :  { %8012 = vst [vmem:[#allocation40_spill] sm:$0xff] %v5669_v54  ;;  %1480 = vmatpush.bf16.msra.mxu0 %v5669_v54  ;;  %v5708_v61 = vor.u32 %v4735_v28, %v3779_v41  ;;  %v3505_v23 = vld [vmem:[%s7851_s0 + $0x1c0] sm:$0xf]  ;;  %v4730_v22 = vld [vmem:[%s7851_s0 + $0x3c4] sm:$0xf] }
  0x4d   :  { %1540 = vmatpush.bf16.msrb.mxu1 %v5647_v40  ;;  %8013 = vst [vmem:[#allocation41_spill] sm:$0xff] %v5686_v20  ;;  %v3345_v40 = vld [vmem:[%s7851_s0 + $0x80] sm:$0xf]  ;;  %v3759_v52 = vld [vmem:[%s7851_s0 + $0x3d4] sm:$0xf0] }
  0x4e   :  { %1503 = vmatpush.bf16.msra.mxu2 %v5649_v49  ;;  %8014 = vst [vmem:[#allocation42_spill] sm:$0xff] %v5688_v43  ;;  %v4668_v49 = vld [vmem:[%s7851_s0 + $0x1d0] sm:$0xf0]  ;;  %v3745_v28 = vld [vmem:[%s7851_s0 + $0x3a0] sm:$0xf]  ;;  %v5729_v41 = vor.u32 %v4628_v53, %v3345_v40  ;;  %v5750_v6 = vor.u32 %v4730_v22, %v3759_v52 }
  0x4f   :  { %1516 = vmatpush.bf16.msra.mxu3 %v5666_v27  ;;  %8015 = vst [vmem:[#allocation43_spill] sm:$0xff] %v5705_v14  ;;  %v4728_v27 = vld [vmem:[%s7851_s0 + $0x3b0] sm:$0xf0]  ;;  %v3845_v54 = vld [vmem:[%s7851_s0 + $0x468] sm:$0xf] }
  0x50   :  { %8016 = vst [vmem:[#allocation44_spill] sm:$0xff] %v5708_v61  ;;  %v3325_v37 = vld [vmem:[%s7851_s0 + $0x58] sm:$0xf]  ;;  %v4623_v40 = vld [vmem:[%s7851_s0 + $0x68] sm:$0xf0]  ;;  %1481 = vmatpush.bf16.msra.mxu0 %v5708_v61  ;;  %v5770_v52 = vor.u32 %v4753_v18, %v3845_v54 }
  0x51   :  { %1541 = vmatpush.bf16.msrb.mxu1 %v5686_v20  ;;  %8017 = vst [vmem:[#allocation45_spill] sm:$0xff] %v5727_v11  ;;  %v5741_v20 = vor.u32 %v4668_v49, %v3505_v23  ;;  %v3485_v53 = vld [vmem:[%s7851_s0 + $0x198] sm:$0xf]  ;;  %v4663_v49 = vld [vmem:[%s7851_s0 + $0x1a8] sm:$0xf0]  ;;  %v5775_v61 = vor.u32 %v4623_v40, %v3325_v37 }
  0x52   :  { %1504 = vmatpush.bf16.msra.mxu2 %v5688_v43  ;;  %8018 = vst [vmem:[#allocation46_spill] sm:$0xff] %v5729_v41  ;;  %v5761_v23 = vld [vmem:[%s7851_s0 + $0x530] sm:$0x11]  ;;  %v3725_v22 = vld [vmem:[%s7851_s0 + $0x378] sm:$0xf] }
  0x53   :  { %1517 = vmatpush.bf16.msra.mxu3 %v5705_v14  ;;  %8019 = vst [vmem:[#allocation47_spill] sm:$0xff] %v5741_v20  ;;  %v5763_v14 = vor.u32 %v4728_v27, %v3745_v28  ;;  %v4723_v43 = vld [vmem:[%s7851_s0 + $0x388] sm:$0xf0]  ;;  %v3825_v27 = vld [vmem:[%s7851_s0 + $0x440] sm:$0xf]  ;;  %v1011_v37 = vunpack.c.l.b16 %v5761_v23 }
  0x54   :  { %8020 = vst [vmem:[#allocation48_spill] sm:$0xff] %v5750_v6  ;;  %v4748_v28 = vld [vmem:[%s7851_s0 + $0x450] sm:$0xf0]  ;;  %v3305_v18 = vld [vmem:[%s7851_s0 + $0x30] sm:$0xf]  ;;  %1482 = vmatpush.bf16.msra.mxu0 %v5750_v6 }
  0x55   :  { %8021 = vst [vmem:[#allocation49_spill] sm:$0xff] %v5763_v14  ;;  %1542 = vmatpush.bf16.msrb.mxu1 %v5727_v11  ;;  %v5784_v11 = vor.u32 %v4663_v49, %v3485_v53  ;;  %v4618_v54 = vld [vmem:[%s7851_s0 + $0x40] sm:$0xf0]  ;;  %v3465_v40 = vld [vmem:[%s7851_s0 + $0x170] sm:$0xf]  ;;  %v5801_v49 = vor.u32 %v4723_v43, %v3725_v22 }
  0x56   :  { %1505 = vmatpush.bf16.msra.mxu2 %v5729_v41  ;;  %8022 = vst [vmem:[#allocation50_spill] sm:$0xff] %v5770_v52  ;;  %v4658_v53 = vld [vmem:[%s7851_s0 + $0x180] sm:$0xf0]  ;;  %v5807_v41 = vor.u32 %v4748_v28, %v3825_v27  ;;  %v5813_v60 = vor.u32 %v4618_v54, %v3305_v18  ;;  %v3805_v43 = vld [vmem:[%s7851_s0 + $0x418] sm:$0xf]  ;;  %v1181_v54 = vpack.c.b16 %v1011_v37, %v1011_v37 }
  0x57   :  { %8023 = vst [vmem:[#allocation51_spill] sm:$0xff] %v5775_v61  ;;  %1518 = vmatpush.bf16.msra.mxu3 %v5741_v20  ;;  %v3705_v20 = vld [vmem:[%s7851_s0 + $0x350] sm:$0xf]  ;;  %v4718_v6 = vld [vmem:[%s7851_s0 + $0x360] sm:$0xf0]  ;;  %v5822_v27 = vor.u32 %v4658_v53, %v3465_v40 }
  0x58   :  { %8024 = vst [vmem:[#allocation52_spill] sm:$0xff] %v5784_v11  ;;  %1527 = vmatpush.bf16.msrb.mxu0 %v5763_v14  ;;  %v4743_v22 = vld [vmem:[%s7851_s0 + $0x428] sm:$0xf0]  ;;  %v3285_v28 = vld [vmem:[%s7851_s0 + $0x8] sm:$0xf]  ;;  %v5840_v53 = vor.u32 %v4718_v6, %v3705_v20 }
  0x59   :  { %8025 = vst [vmem:[#allocation53_spill] sm:$0xff] %v5801_v49  ;;  %1543 = vmatpush.bf16.msrb.mxu1 %v5770_v52  ;;  %v4613_v18 = vld [vmem:[%s7851_s0 + $0x18] sm:$0xf0]  ;;  %v5846_v37 = vor.u32 %v4743_v22, %v3805_v43  ;;  %v4646_v52 = vld [vmem:[%s7851_s0 + $0x124] sm:$0xf] }
  0x5a   :  { %8026 = vst [vmem:[#allocation54_spill] sm:$0xff] %v5807_v41  ;;  %1506 = vmatpush.bf16.msra.mxu2 %v5775_v61  ;;  %3936 = vmatmul.msk.bf16.vlgmr.msra.gmra.mxu1 %vm1349_vm4, %v5645_v15  ;;  %v4653_v40 = vld [vmem:[%s7851_s0 + $0x158] sm:$0xf0]  ;;  %v3685_v61 = vld [vmem:[%s7851_s0 + $0x328] sm:$0xf]  ;;  %v5858_v6 = vor.u32 %v4613_v18, %v3285_v28 }
  0x5b   :  { %8027 = vst [vmem:[#allocation55_spill] sm:$0xff] %v5813_v60  ;;  %1519 = vmatpush.bf16.msra.mxu3 %v5784_v11  ;;  %1483 = vmatmul.bf16.vlgmr.msra.gmra.mxu0 %v5488_v19  ;;  %v3445_v11 = vld [vmem:[%s7851_s0 + $0x148] sm:$0xf]  ;;  %v3427_v14 = vld [vmem:[%s7851_s0 + $0x134] sm:$0xf0] }
  0x5c   :  { %8028 = vst [vmem:[#allocation56_spill] sm:$0xff] %v5822_v27  ;;  %1528 = vmatpush.bf16.msrb.mxu0 %v5801_v49  ;;  %v4713_v20 = vld [vmem:[%s7851_s0 + $0x338] sm:$0xf0]  ;;  %v3785_v43 = vld [vmem:[%s7851_s0 + $0x3f0] sm:$0xf]  ;;  %v5870_v49 = vand.u32 %v5246_v48, %v1181_v54  ;;  %v5875_v18 = vor.u32 %v4646_v52, %v3427_v14 }
  0x5d   :  { %8029 = vst [vmem:[#allocation57_spill] sm:$0xff] %v5840_v53  ;;  %1544 = vmatpush.bf16.msrb.mxu1 %v5807_v41  ;;  %v4738_v22 = vld [vmem:[%s7851_s0 + $0x400] sm:$0xf0]  ;;  %v5867_v41 = vor.u32 %v4653_v40, %v3445_v11  ;;  %v3665_v28 = vld [vmem:[%s7851_s0 + $0x300] sm:$0xf]  ;;  %v5887_v54 = vor.u32 %v4713_v20, %v3685_v61 }
  0x5e   :  { %8030 = vst [vmem:[#allocation58_spill] sm:$0xff] %v5846_v37  ;;  %1507 = vmatpush.bf16.msra.mxu2 %v5813_v60  ;;  %v3925_v60 = vld [vmem:[%s7851_s0 + $0x508] sm:$0xf]  ;;  %v4641_v11 = vld [vmem:[%s7851_s0 + $0xfc] sm:$0xf]  ;;  %v5890_v14 = vor.u32 %v4738_v22, %v3785_v43 }
  0x5f   :  { %8031 = vst [vmem:[#allocation59_spill] sm:$0xff] %v5858_v6  ;;  %1520 = vmatpush.bf16.msra.mxu3 %v5822_v27  ;;  %v3407_v52 = vld [vmem:[%s7851_s0 + $0x10c] sm:$0xf0]  ;;  %v4766_v40 = vld [vmem:[%s7851_s0 + $0x4e4] sm:$0xf]  ;;  %v5913_v22 = vor.u32 %v4773_v4, %v3925_v60 }
  0x60   :  { %8032 = vst [vmem:[#allocation60_spill] sm:$0xff] %v5867_v41  ;;  %1529 = vmatpush.bf16.msrb.mxu0 %v5840_v53  ;;  %v3907_v27 = vld [vmem:[%s7851_s0 + $0x4f4] sm:$0xf0]  ;;  %v4708_v61 = vld [vmem:[%s7851_s0 + $0x310] sm:$0xf0]  ;;  %v5922_v53 = vor.u32 %v4641_v11, %v3407_v52 }
  0x61   :  { %8033 = vst [vmem:[#allocation61_spill] sm:$0xff] %v5870_v49  ;;  %1545 = vmatpush.bf16.msrb.mxu1 %v5846_v37  ;;  %v3765_v20 = vld [vmem:[%s7851_s0 + $0x3c8] sm:$0xf]  ;;  %v4733_v43 = vld [vmem:[%s7851_s0 + $0x3d8] sm:$0xf0]  ;;  %v5924_v35 = vor.u32 %v4766_v40, %v3907_v27  ;;  %v5930_v4 = vor.u32 %v4708_v61, %v3665_v28 }
  0x62   :  { %8034 = vst [vmem:[#allocation62_spill] sm:$0xff] %v5875_v18  ;;  %1508 = vmatpush.bf16.msra.mxu2 %v5858_v6  ;;  %v4726_v37 = vld [vmem:[%s7851_s0 + $0x3a4] sm:$0xf]  ;;  %v3747_v6 = vld [vmem:[%s7851_s0 + $0x3b4] sm:$0xf0]  ;;  %v5933_v60 = vor.u32 %v4733_v43, %v3765_v20 }
  0x63   :  { %8035 = vst [vmem:[#allocation63_spill] sm:$0xff] %v5887_v54  ;;  %1521 = vmatpush.bf16.msra.mxu3 %v5867_v41  ;;  %v4636_v41 = vld [vmem:[%s7851_s0 + $0xd4] sm:$0xf]  ;;  %v4761_v27 = vld [vmem:[%s7851_s0 + $0x4bc] sm:$0xf]  ;;  %v5952_v40 = vor.u32 %v4726_v37, %v3747_v6 }
  0x64   :  { %8036 = vst [vmem:[#allocation64_spill] sm:$0xff] %v5890_v14  ;;  %1530 = vmatpush.bf16.msrb.mxu0 %v5887_v54  ;;  %v3887_v11 = vld [vmem:[%s7851_s0 + $0x4cc] sm:$0xf0]  ;;  %v3645_v28 = vld [vmem:[%s7851_s0 + $0x2d8] sm:$0xf] }
  0x65   :  { %8037 = vst [vmem:[#allocation65_spill] sm:$0xff] %v5913_v22  ;;  %1546 = vmatpush.bf16.msrb.mxu1 %v5890_v14  ;;  %v4703_v52 = vld [vmem:[%s7851_s0 + $0x2e8] sm:$0xf0]  ;;  %1509 = vmatmul.bf16.vlgmr.msra.gmra.mxu2 %v5480_v13  ;;  %v4721_v61 = vld [vmem:[%s7851_s0 + $0x37c] sm:$0xf] }
  0x66   :  { %1559 = vmatpush.bf16.msrb.mxu2 %v5870_v49  ;;  %8038 = vst [vmem:[#allocation66_spill] sm:$0xff] %v5922_v53  ;;  %1522 = vmatmul.bf16.vlgmr.msra.gmra.mxu3 %v5486_v39  ;;  %v3727_v20 = vld [vmem:[%s7851_s0 + $0x38c] sm:$0xf0]  ;;  %v5965_v49 = vor.u32 %v4761_v27, %v3887_v11  ;;  %v4631_v37 = vld [vmem:[%s7851_s0 + $0xac] sm:$0xf]  ;;  %v5971_v6 = vor.u32 %v4703_v52, %v3645_v28 }
  0x67   :  { %1566 = vmatpush.bf16.msrb.mxu3 %v5875_v18  ;;  %8039 = vst [vmem:[#allocation67_spill] sm:$0xff] %v5924_v35  ;;  %v3387_v18 = vld [vmem:[%s7851_s0 + $0xe4] sm:$0xf0]  ;;  %v3625_v27 = vld [vmem:[%s7851_s0 + $0x2b0] sm:$0xf]  ;;  %v5990_v28 = vor.u32 %v4721_v61, %v3727_v20 }
  0x68   :  { %8040 = vst [vmem:[#allocation68_spill] sm:$0xff] %v5930_v4  ;;  %v5963_v43 = vor.u32 %v4636_v41, %v3387_v18  ;;  %1531 = vmatpush.bf16.msrb.mxu0 %v5930_v4  ;;  %v4756_v41 = vld [vmem:[%s7851_s0 + $0x494] sm:$0xf]  ;;  %v3867_v18 = vld [vmem:[%s7851_s0 + $0x4a4] sm:$0xf0] }
  0x69   :  { %8041 = vst [vmem:[#allocation69_spill] sm:$0xff] %v5933_v60  ;;  %1547 = vmatpush.bf16.msrb.mxu1 %v5933_v60  ;;  %v4698_v11 = vld [vmem:[%s7851_s0 + $0x2c0] sm:$0xf0]  ;;  %v4716_v52 = vld [vmem:[%s7851_s0 + $0x354] sm:$0xf]  ;;  %v6002_v60 = vor.u32 %v4756_v41, %v3867_v18 }
  0x6a   :  { %8042 = vst [vmem:[#allocation70_spill] sm:$0xff] %v5952_v40  ;;  %1560 = vmatpush.bf16.msrb.mxu2 %v5913_v22  ;;  %v4626_v61 = vld [vmem:[%s7851_s0 + $0x84] sm:$0xf]  ;;  %v6008_v20 = vor.u32 %v4698_v11, %v3625_v27  ;;  %v3605_v41 = vld [vmem:[%s7851_s0 + $0x288] sm:$0xf] }
  0x6b   :  { %1567 = vmatpush.bf16.msrb.mxu3 %v5922_v53  ;;  %8043 = vst [vmem:[#allocation71_spill] sm:$0xff] %v5963_v43  ;;  %v3367_v53 = vld [vmem:[%s7851_s0 + $0xbc] sm:$0xf0]  ;;  %v4693_v18 = vld [vmem:[%s7851_s0 + $0x298] sm:$0xf0] }
  0x6c   :  { %8044 = vst [vmem:[#allocation72_spill] sm:$0xff] %v5965_v49  ;;  %v6000_v22 = vor.u32 %v4631_v37, %v3367_v53  ;;  %1532 = vmatpush.bf16.msrb.mxu0 %v5971_v6  ;;  %1548 = vmatmul.bf16.vlgmr.msrb.gmra.mxu1 %v5488_v19  ;;  %v4751_v53 = vld [vmem:[%s7851_s0 + $0x46c] sm:$0xf]  ;;  %v3847_v37 = vld [vmem:[%s7851_s0 + $0x47c] sm:$0xf0] }
  0x6d   :  { %8045 = vst [vmem:[#allocation73_spill] sm:$0xff] %v5971_v6  ;;  %1592 = vmatpush.bf16.msra.mxu1 %v5952_v40  ;;  %v4686_v27 = vld [vmem:[%s7851_s0 + $0x264] sm:$0xf]  ;;  %v4711_v40 = vld [vmem:[%s7851_s0 + $0x32c] sm:$0xf] }
  0x6e   :  { %1605 = vmatpush.bf16.msra.mxu2 %v5924_v35  ;;  %8046 = vst [vmem:[#allocation74_spill] sm:$0xff] %v5990_v28  ;;  %v3707_v35 = vld [vmem:[%s7851_s0 + $0x364] sm:$0xf0]  ;;  %v3687_v14 = vld [vmem:[%s7851_s0 + $0x33c] sm:$0xf0] }
  0x6f   :  { %1568 = vmatpush.bf16.msrb.mxu3 %v5963_v43  ;;  %8047 = vst [vmem:[#allocation75_spill] sm:$0xff] %v6000_v22  ;;  %v3347_v43 = vld [vmem:[%s7851_s0 + $0x94] sm:$0xf0]  ;;  %v6030_v11 = vor.u32 %v4716_v52, %v3707_v35  ;;  %v6045_v35 = vor.u32 %v4751_v53, %v3847_v37  ;;  %v6048_v52 = vor.u32 %v4693_v18, %v3605_v41  ;;  %v3327_v4 = vld [vmem:[%s7851_s0 + $0x6c] sm:$0xf0] }
  0x70   :  { %8048 = vst [vmem:[#allocation76_spill] sm:$0xff] %v6002_v60  ;;  %v6043_v6 = vor.u32 %v4626_v61, %v3347_v43  ;;  %1533 = vmatpush.bf16.msrb.mxu0 %v6008_v20  ;;  %v4681_v43 = vld [vmem:[%s7851_s0 + $0x23c] sm:$0xf]  ;;  %v6062_v61 = vor.u32 %v4711_v40, %v3687_v14  ;;  %v4746_v53 = vld [vmem:[%s7851_s0 + $0x444] sm:$0xf] }
  0x71   :  { %8049 = vst [vmem:[#allocation77_spill] sm:$0xff] %v6008_v20  ;;  %1593 = vmatpush.bf16.msra.mxu1 %v5990_v28  ;;  %v4621_v28 = vld [vmem:[%s7851_s0 + $0x5c] sm:$0xf]  ;;  %v3827_v37 = vld [vmem:[%s7851_s0 + $0x454] sm:$0xf0] }
  0x72   :  { %1606 = vmatpush.bf16.msra.mxu2 %v5965_v49  ;;  %8050 = vst [vmem:[#allocation78_spill] sm:$0xff] %v6030_v11  ;;  %v3587_v49 = vld [vmem:[%s7851_s0 + $0x274] sm:$0xf0]  ;;  %v4706_v41 = vld [vmem:[%s7851_s0 + $0x304] sm:$0xf]  ;;  %v6081_v40 = vor.u32 %v4621_v28, %v3327_v4  ;;  %v6084_v18 = vor.u32 %v4746_v53, %v3827_v37 }
  0x73   :  { %1569 = vmatpush.bf16.msrb.mxu3 %v6000_v22  ;;  %8051 = vst [vmem:[#allocation79_spill] sm:$0xff] %v6043_v6  ;;  %v6056_v54 = vor.u32 %v4686_v27, %v3587_v49  ;;  %v3567_v49 = vld [vmem:[%s7851_s0 + $0x24c] sm:$0xf0]  ;;  %v3667_v14 = vld [vmem:[%s7851_s0 + $0x314] sm:$0xf0] }
  0x74   :  { %8052 = vst [vmem:[#allocation80_spill] sm:$0xff] %v6045_v35  ;;  %1534 = vmatpush.bf16.msrb.mxu0 %v6048_v52  ;;  %v4616_v27 = vld [vmem:[%s7851_s0 + $0x34] sm:$0xf]  ;;  %v3307_v22 = vld [vmem:[%s7851_s0 + $0x44] sm:$0xf0]  ;;  %v6100_v28 = vor.u32 %v4706_v41, %v3667_v14 }
  0x75   :  { %8053 = vst [vmem:[#allocation81_spill] sm:$0xff] %v6048_v52  ;;  %1594 = vmatpush.bf16.msra.mxu1 %v6030_v11  ;;  %v4676_v4 = vld [vmem:[%s7851_s0 + $0x214] sm:$0xf]  ;;  %v4741_v53 = vld [vmem:[%s7851_s0 + $0x41c] sm:$0xf]  ;;  %3937 = vmatmul.msk.bf16.vlgmr.msrb.gmra.mxu2 %vm1349_vm4, %v5645_v15  ;;  %v6121_v41 = vor.u32 %v4616_v27, %v3307_v22 }
  0x76   :  { %1607 = vmatpush.bf16.msra.mxu2 %v6002_v60  ;;  %8054 = vst [vmem:[#allocation82_spill] sm:$0xff] %v6056_v54  ;;  %v1012_v60 = vunpack.c.h.b16 %v5761_v23  ;;  %v3807_v23 = vld [vmem:[%s7851_s0 + $0x42c] sm:$0xf0]  ;;  %v4701_v37 = vld [vmem:[%s7851_s0 + $0x2dc] sm:$0xf] }
  0x77   :  { %8055 = vst [vmem:[#allocation83_spill] sm:$0xff] %v6062_v61  ;;  %1570 = vmatpush.bf16.msrb.mxu3 %v6043_v6  ;;  %v6094_v6 = vor.u32 %v4681_v43, %v3567_v49  ;;  %v3547_v43 = vld [vmem:[%s7851_s0 + $0x224] sm:$0xf0]  ;;  %v3647_v49 = vld [vmem:[%s7851_s0 + $0x2ec] sm:$0xf0]  ;;  %1535 = vmatmul.bf16.vlgmr.msrb.gmra.mxu0 %v5482_v63  ;;  %v6124_v14 = vor.u32 %v4741_v53, %v3807_v23 }
  0x78   :  { %8056 = vst [vmem:[#allocation84_spill] sm:$0xff] %v6081_v40  ;;  %1579 = vmatpush.bf16.msra.mxu0 %v6056_v54  ;;  %v1182_v11 = vpack.c.b16 %v1012_v60, %v1012_v60  ;;  %v6133_v54 = vor.u32 %v4676_v4, %v3547_v43  ;;  %v4671_v22 = vld [vmem:[%s7851_s0 + $0x1ec] sm:$0xf]  ;;  %v6139_v27 = vor.u32 %v4701_v37, %v3647_v49  ;;  %v4736_v53 = vld [vmem:[%s7851_s0 + $0x3f4] sm:$0xf] }
  0x79   :  { %8057 = vst [vmem:[#allocation85_spill] sm:$0xff] %v6084_v18  ;;  %1595 = vmatpush.bf16.msra.mxu1 %v6062_v61  ;;  %v3287_v61 = vld [vmem:[%s7851_s0 + $0x1c] sm:$0xf0]  ;;  %v3787_v60 = vld [vmem:[%s7851_s0 + $0x404] sm:$0xf0] }
  0x7a   :  { %1608 = vmatpush.bf16.msra.mxu2 %v6045_v35  ;;  %8058 = vst [vmem:[#allocation86_spill] sm:$0xff] %v6094_v6  ;;  %v4611_v35 = vld [vmem:[%s7851_s0 + $0xc] sm:$0xf]  ;;  %v3527_v4 = vld [vmem:[%s7851_s0 + $0x1fc] sm:$0xf0] }
  0x7b   :  { %8059 = vst [vmem:[#allocation87_spill] sm:$0xff] %v6100_v28  ;;  %1571 = vmatpush.bf16.msrb.mxu3 %v6081_v40  ;;  %v4696_v23 = vld [vmem:[%s7851_s0 + $0x2b4] sm:$0xf]  ;;  %v3627_v43 = vld [vmem:[%s7851_s0 + $0x2c4] sm:$0xf0]  ;;  %v6157_v37 = vor.u32 %v4611_v35, %v3287_v61  ;;  %v6175_v61 = vor.u32 %v4671_v22, %v3527_v4 }
  0x7c   :  { %8060 = vst [vmem:[#allocation88_spill] sm:$0xff] %v6121_v41  ;;  %1580 = vmatpush.bf16.msra.mxu0 %v6094_v6  ;;  %v4666_v49 = vld [vmem:[%s7851_s0 + $0x1c4] sm:$0xf]  ;;  %v3507_v40 = vld [vmem:[%s7851_s0 + $0x1d4] sm:$0xf0] }
  0x7d   :  { %8061 = vst [vmem:[#allocation89_spill] sm:$0xff] %v6124_v14  ;;  %1596 = vmatpush.bf16.msra.mxu1 %v6100_v28  ;;  %v6169_v28 = vand.u32 %v5246_v48, %v1182_v11  ;;  %v4731_v35 = vld [vmem:[%s7851_s0 + $0x3cc] sm:$0xf]  ;;  %v3607_v4 = vld [vmem:[%s7851_s0 + $0x29c] sm:$0xf0]  ;;  %v6221_v20 = vor.u32 %v4666_v49, %v3507_v40 }
  0x7e   :  { %1609 = vmatpush.bf16.msra.mxu2 %v6084_v18  ;;  %8062 = vst [vmem:[#allocation90_spill] sm:$0xff] %v6133_v54  ;;  %v6166_v18 = vor.u32 %v4736_v53, %v3787_v60  ;;  %v3767_v53 = vld [vmem:[%s7851_s0 + $0x3dc] sm:$0xf0]  ;;  %v4771_v11 = vld [vmem:[%s7851_s0 + $0x50c] sm:$0xf] }
  0x7f   :  { %8063 = vst [vmem:[#allocation91_spill] sm:$0xff] %v6139_v27  ;;  %1572 = vmatpush.bf16.msrb.mxu3 %v6121_v41  ;;  %v6178_v41 = vor.u32 %v4696_v23, %v3627_v43  ;;  %v3927_v60 = vld [vmem:[%s7851_s0 + $0x51c] sm:$0xf0]  ;;  %v4691_v22 = vld [vmem:[%s7851_s0 + $0x28c] sm:$0xf] }
  0x80   :  { %8064 = vst [vmem:[#allocation92_spill] sm:$0xff] %v6157_v37  ;;  %1581 = vmatpush.bf16.msra.mxu0 %v6133_v54  ;;  %v3593_v23 = vld [vmem:[%s7851_s0 + $0x268] sm:$0xf]  ;;  %v4689_v43 = vld [vmem:[%s7851_s0 + $0x278] sm:$0xf0]  ;;  %v6210_v54 = vor.u32 %v4731_v35, %v3767_v53  ;;  %v6212_v6 = vor.u32 %v4771_v11, %v3927_v60 }
  0x81   :  { %8065 = vst [vmem:[#allocation93_spill] sm:$0xff] %v6166_v18  ;;  %1597 = vmatpush.bf16.msra.mxu1 %v6139_v27  ;;  %v4729_v27 = vld [vmem:[%s7851_s0 + $0x3b8] sm:$0xf0]  ;;  %v3487_v53 = vld [vmem:[%s7851_s0 + $0x1ac] sm:$0xf0]  ;;  %v6233_v11 = vor.u32 %v4689_v43, %v3593_v23 }
  0x82   :  { %1610 = vmatpush.bf16.msra.mxu2 %v6124_v14  ;;  %8066 = vst [vmem:[#allocation94_spill] sm:$0xff] %v6169_v28  ;;  %v3753_v14 = vld [vmem:[%s7851_s0 + $0x3a8] sm:$0xf]  ;;  %v4769_v52 = vld [vmem:[%s7851_s0 + $0x4f8] sm:$0xf0] }
  0x83   :  { %8067 = vst [vmem:[#allocation95_spill] sm:$0xff] %v6178_v41  ;;  %1573 = vmatpush.bf16.msrb.mxu3 %v6157_v37  ;;  %v3913_v37 = vld [vmem:[%s7851_s0 + $0x4e8] sm:$0xf]  ;;  %v4661_v35 = vld [vmem:[%s7851_s0 + $0x19c] sm:$0xf]  ;;  %v6235_v60 = vor.u32 %v4729_v27, %v3753_v14 }
  0x84   :  { %8068 = vst [vmem:[#allocation96_spill] sm:$0xff] %v6210_v54  ;;  %1582 = vmatpush.bf16.msra.mxu0 %v6175_v61  ;;  %v3573_v40 = vld [vmem:[%s7851_s0 + $0x240] sm:$0xf]  ;;  %v6240_v49 = vor.u32 %v4769_v52, %v3913_v37  ;;  %v4724_v23 = vld [vmem:[%s7851_s0 + $0x390] sm:$0xf0]  ;;  %v6260_v27 = vor.u32 %v4661_v35, %v3487_v53 }
  0x85   :  { %8069 = vst [vmem:[#allocation97_spill] sm:$0xff] %v6212_v6  ;;  %1598 = vmatpush.bf16.msra.mxu1 %v6178_v41  ;;  %v3893_v52 = vld [vmem:[%s7851_s0 + $0x4c0] sm:$0xf]  ;;  %v4764_v14 = vld [vmem:[%s7851_s0 + $0x4d0] sm:$0xf0] }
  0x86   :  { %1611 = vmatpush.bf16.msra.mxu2 %v6166_v18  ;;  %v6224_v18 = vor.u32 %v4691_v22, %v3607_v4  ;;  %1574 = vmatmul.bf16.vlgmr.msrb.gmra.mxu3 %v5480_v13  ;;  %8071 = vst [vmem:[#allocation99_spill] sm:$0xff] %v6233_v11  ;;  %v4684_v22 = vld [vmem:[%s7851_s0 + $0x250] sm:$0xf0]  ;;  %v3733_v4 = vld [vmem:[%s7851_s0 + $0x380] sm:$0xf]  ;;  %v6279_v53 = vor.u32 %v4764_v14, %v3893_v52 }
  0x87   :  { %1624 = vmatpush.bf16.msra.mxu3 %v6169_v28  ;;  %8072 = vst [vmem:[#allocation100_spill] sm:$0xff] %v6235_v60  ;;  %v4656_v37 = vld [vmem:[%s7851_s0 + $0x174] sm:$0xf]  ;;  %v3467_v43 = vld [vmem:[%s7851_s0 + $0x184] sm:$0xf0]  ;;  %v6273_v28 = vor.u32 %v4724_v23, %v3733_v4 }
  0x88   :  { %8070 = vst [vmem:[#allocation98_spill] sm:$0xff] %v6224_v18  ;;  %1583 = vmatpush.bf16.msra.mxu0 %v6221_v20  ;;  %v3553_v35 = vld [vmem:[%s7851_s0 + $0x218] sm:$0xf]  ;;  %v4759_v4 = vld [vmem:[%s7851_s0 + $0x4a8] sm:$0xf0]  ;;  %v6299_v23 = vor.u32 %v4656_v37, %v3467_v43 }
  0x89   :  { %8073 = vst [vmem:[#allocation101_spill] sm:$0xff] %v6240_v49  ;;  %1599 = vmatpush.bf16.msra.mxu1 %v6224_v18  ;;  %v4651_v52 = vld [vmem:[%s7851_s0 + $0x14c] sm:$0xf]  ;;  %v3447_v14 = vld [vmem:[%s7851_s0 + $0x15c] sm:$0xf0] }
  0x8a   :  { %1612 = vmatpush.bf16.msra.mxu2 %v6210_v54  ;;  %8074 = vst [vmem:[#allocation102_spill] sm:$0xff] %v6260_v27  ;;  %v4679_v54 = vld [vmem:[%s7851_s0 + $0x228] sm:$0xf0]  ;;  %v3533_v41 = vld [vmem:[%s7851_s0 + $0x1f0] sm:$0xf] }
  0x8b   :  { %1625 = vmatpush.bf16.msra.mxu3 %v6212_v6  ;;  %v6271_v6 = vor.u32 %v4684_v22, %v3573_v40  ;;  %8076 = vst [vmem:[#allocation104_spill] sm:$0xff] %v6273_v28  ;;  %v4719_v40 = vld [vmem:[%s7851_s0 + $0x368] sm:$0xf0]  ;;  %v3873_v22 = vld [vmem:[%s7851_s0 + $0x498] sm:$0xf]  ;;  %v6315_v37 = vor.u32 %v4679_v54, %v3553_v35 }
  0x8c   :  { %8077 = vst [vmem:[#allocation105_spill] sm:$0xff] %v6279_v53  ;;  %1600 = vmatmul.bf16.vlgmr.msra.gmra.mxu1 %v5482_v63  ;;  %1584 = vmatpush.bf16.msra.mxu0 %v6260_v27  ;;  %v6320_v18 = vor.u32 %v4759_v4, %v3873_v22  ;;  %v4674_v27 = vld [vmem:[%s7851_s0 + $0x200] sm:$0xf0]  ;;  %v3413_v4 = vld [vmem:[%s7851_s0 + $0x100] sm:$0xf] }
  0x8d   :  { %1644 = vmatpush.bf16.msrb.mxu1 %v6233_v11  ;;  %8075 = vst [vmem:[#allocation103_spill] sm:$0xff] %v6271_v6  ;;  %1613 = vmatmul.bf16.vlgmr.msra.gmra.mxu2 %v5488_v19  ;;  %v4649_v11 = vld [vmem:[%s7851_s0 + $0x138] sm:$0xf0]  ;;  %v4714_v54 = vld [vmem:[%s7851_s0 + $0x340] sm:$0xf0] }
  0x8e   :  { %1657 = vmatpush.bf16.msrb.mxu2 %v6235_v60  ;;  %v3713_v60 = vld [vmem:[%s7851_s0 + $0x358] sm:$0xf]  ;;  %8078 = vst [vmem:[#allocation106_spill] sm:$0xff] %v6315_v37  ;;  %v4754_v35 = vld [vmem:[%s7851_s0 + $0x480] sm:$0xf0] }
  0x8f   :  { %1670 = vmatpush.bf16.msrb.mxu3 %v6240_v49  ;;  %v3433_v49 = vld [vmem:[%s7851_s0 + $0x128] sm:$0xf]  ;;  %v6317_v43 = vor.u32 %v4719_v40, %v3713_v60  ;;  %8080 = vst [vmem:[#allocation108_spill] sm:$0xff] %v6320_v18  ;;  %v3853_v60 = vld [vmem:[%s7851_s0 + $0x470] sm:$0xf]  ;;  %v6341_v40 = vor.u32 %v4651_v52, %v3447_v14 }
  0x90   :  { %1585 = vmatpush.bf16.msra.mxu0 %v6299_v23  ;;  %v6343_v22 = vor.u32 %v4649_v11, %v3433_v49  ;;  %v6358_v11 = vor.u32 %v4754_v35, %v3853_v60  ;;  %v3513_v49 = vld [vmem:[%s7851_s0 + $0x1c8] sm:$0xf]  ;;  %v4669_v14 = vld [vmem:[%s7851_s0 + $0x1d8] sm:$0xf0]  ;;  %v3393_v60 = vld [vmem:[%s7851_s0 + $0xd8] sm:$0xf] }
  0x91   :  { %1645 = vmatpush.bf16.msrb.mxu1 %v6271_v6  ;;  %8079 = vst [vmem:[#allocation107_spill] sm:$0xff] %v6317_v43  ;;  %v6353_v6 = vor.u32 %v4674_v27, %v3533_v41  ;;  %v4709_v41 = vld [vmem:[%s7851_s0 + $0x318] sm:$0xf0]  ;;  %v4639_v35 = vld [vmem:[%s7851_s0 + $0xe8] sm:$0xf0] }
  0x92   :  { %1658 = vmatpush.bf16.msrb.mxu2 %v6273_v28  ;;  %v3693_v28 = vld [vmem:[%s7851_s0 + $0x330] sm:$0xf]  ;;  %8081 = vst [vmem:[#allocation109_spill] sm:$0xff] %v6343_v22  ;;  %v4749_v27 = vld [vmem:[%s7851_s0 + $0x458] sm:$0xf0] }
  0x93   :  { %1671 = vmatpush.bf16.msrb.mxu3 %v6279_v53  ;;  %v4644_v53 = vld [vmem:[%s7851_s0 + $0x110] sm:$0xf0]  ;;  %8082 = vst [vmem:[#allocation110_spill] sm:$0xff] %v6353_v6  ;;  %v6356_v52 = vor.u32 %v4714_v54, %v3693_v28  ;;  %v3833_v28 = vld [vmem:[%s7851_s0 + $0x448] sm:$0xf] }
  0x94   :  { %8084 = vst [vmem:[#allocation112_spill] sm:$0xff] %v6358_v11  ;;  %1586 = vmatpush.bf16.msra.mxu0 %v6341_v40  ;;  %v6380_v54 = vor.u32 %v4644_v53, %v3413_v4  ;;  %v6395_v53 = vor.u32 %v4749_v27, %v3833_v28  ;;  %v3493_v4 = vld [vmem:[%s7851_s0 + $0x1a0] sm:$0xf]  ;;  %v6419_v28 = vor.u32 %v4639_v35, %v3393_v60  ;;  %v3373_v27 = vld [vmem:[%s7851_s0 + $0xb0] sm:$0xf] }
  0x95   :  { %1646 = vmatpush.bf16.msrb.mxu1 %v6315_v37  ;;  %8083 = vst [vmem:[#allocation111_spill] sm:$0xff] %v6356_v52  ;;  %v3473_v35 = vld [vmem:[%s7851_s0 + $0x178] sm:$0xf] }
  0x96   :  { %1659 = vmatpush.bf16.msrb.mxu2 %v6317_v43  ;;  %v3673_v43 = vld [vmem:[%s7851_s0 + $0x308] sm:$0xf]  ;;  %8085 = vst [vmem:[#allocation113_spill] sm:$0xff] %v6380_v54  ;;  %3938 = vmatmul.msk.bf16.vlgmr.msra.gmra.mxu3 %vm1349_vm4, %v5645_v15 }
  0x97   :  { %1672 = vmatpush.bf16.msrb.mxu3 %v6320_v18  ;;  %v6389_v18 = vor.u32 %v4669_v14, %v3513_v49  ;;  %v6393_v37 = vor.u32 %v4709_v41, %v3673_v43  ;;  %8088 = vst [vmem:[#allocation116_spill] sm:$0xff] %v6395_v53  ;;  %v3653_v49 = vld [vmem:[%s7851_s0 + $0x2e0] sm:$0xf]  ;;  %1587 = vmatmul.bf16.vlgmr.msra.gmra.mxu0 %v5486_v39  ;;  %v4704_v43 = vld [vmem:[%s7851_s0 + $0x2f0] sm:$0xf0] }
  0x98   :  { %1631 = vmatpush.bf16.msrb.mxu0 %v6343_v22  ;;  %v4664_v22 = vld [vmem:[%s7851_s0 + $0x1b0] sm:$0xf0]  ;;  %v3813_v14 = vld [vmem:[%s7851_s0 + $0x420] sm:$0xf]  ;;  %8089 = vst [vmem:[#allocation117_spill] sm:$0xff] %v6419_v28 }
  0x99   :  { %1647 = vmatpush.bf16.msrb.mxu1 %v6353_v6  ;;  %8086 = vst [vmem:[#allocation114_spill] sm:$0xff] %v6389_v18  ;;  %v4744_v41 = vld [vmem:[%s7851_s0 + $0x430] sm:$0xf0]  ;;  %v6432_v6 = vor.u32 %v4704_v43, %v3653_v49  ;;  %v3793_v49 = vld [vmem:[%s7851_s0 + $0x3f8] sm:$0xf] }
  0x9a   :  { %1660 = vmatpush.bf16.msrb.mxu2 %v6356_v52  ;;  %8087 = vst [vmem:[#allocation115_spill] sm:$0xff] %v6393_v37  ;;  %v6428_v52 = vor.u32 %v4664_v22, %v3493_v4  ;;  %v6434_v60 = vor.u32 %v4744_v41, %v3813_v14  ;;  %v3633_v22 = vld [vmem:[%s7851_s0 + $0x2b8] sm:$0xf]  ;;  %v4699_v4 = vld [vmem:[%s7851_s0 + $0x2c8] sm:$0xf0] }
  0x9b   :  { %1673 = vmatpush.bf16.msrb.mxu3 %v6358_v11  ;;  %v4634_v11 = vld [vmem:[%s7851_s0 + $0xc0] sm:$0xf0]  ;;  %8091 = vst [vmem:[#allocation119_spill] sm:$0xff] %v6432_v6  ;;  %v4739_v43 = vld [vmem:[%s7851_s0 + $0x408] sm:$0xf0] }
  0x9c   :  { %1632 = vmatpush.bf16.msrb.mxu0 %v6380_v54  ;;  %8090 = vst [vmem:[#allocation118_spill] sm:$0xff] %v6428_v52  ;;  %v4659_v54 = vld [vmem:[%s7851_s0 + $0x188] sm:$0xf0]  ;;  %v6455_v14 = vor.u32 %v4634_v11, %v3373_v27  ;;  %v3353_v41 = vld [vmem:[%s7851_s0 + $0x88] sm:$0xf]  ;;  %v6470_v11 = vor.u32 %v4739_v43, %v3793_v49 }
  0x9d   :  { %1648 = vmatpush.bf16.msrb.mxu1 %v6389_v18  ;;  %8092 = vst [vmem:[#allocation120_spill] sm:$0xff] %v6434_v60  ;;  %v6468_v18 = vor.u32 %v4699_v4, %v3633_v22  ;;  %v3453_v27 = vld [vmem:[%s7851_s0 + $0x150] sm:$0xf]  ;;  %v4734_v4 = vld [vmem:[%s7851_s0 + $0x3e0] sm:$0xf0] }
  0x9e   :  { %1661 = vmatpush.bf16.msrb.mxu2 %v6393_v37  ;;  %v6464_v37 = vor.u32 %v4659_v54, %v3473_v35  ;;  %v3613_v54 = vld [vmem:[%s7851_s0 + $0x290] sm:$0xf]  ;;  %v4694_v35 = vld [vmem:[%s7851_s0 + $0x2a0] sm:$0xf0] }
  0x9f   :  { %1674 = vmatpush.bf16.msrb.mxu3 %v6395_v53  ;;  %v4629_v53 = vld [vmem:[%s7851_s0 + $0x98] sm:$0xf0]  ;;  %v3773_v22 = vld [vmem:[%s7851_s0 + $0x3d0] sm:$0xf] }
  0xa0   :  { %1633 = vmatpush.bf16.msrb.mxu0 %v6419_v28  ;;  %v4654_v28 = vld [vmem:[%s7851_s0 + $0x160] sm:$0xf0]  ;;  %v6491_v49 = vor.u32 %v4629_v53, %v3353_v41  ;;  %v6506_v53 = vor.u32 %v4734_v4, %v3773_v22  ;;  %v8103_v4 = vld [vmem:[#allocation28_spill] sm:$0xff] }
  0xa1   :  { %1649 = vmatpush.bf16.msrb.mxu1 %v6428_v52  ;;  %v6494_v43 = vor.u32 %v4654_v28, %v3453_v27  ;;  %v6504_v52 = vor.u32 %v4694_v35, %v3613_v54  ;;  %v276_v28 = vld [vmem:[%s7851_s0 + $0x538] sm:$0x1]  ;;  %v4619_v54 = vld [vmem:[%s7851_s0 + $0x48] sm:$0xf0] }
  0xa2   :  { %1662 = vmatpush.bf16.msrb.mxu2 %v6432_v6  ;;  %v4624_v6 = vld [vmem:[%s7851_s0 + $0x70] sm:$0xf0]  ;;  %v3313_v27 = vld [vmem:[%s7851_s0 + $0x38] sm:$0xf]  ;;  %v1013_v35 = vunpack.c.l.b16 %v276_v28 }
  0xa3   :  { %1675 = vmatpush.bf16.msrb.mxu3 %v6434_v60  ;;  %v3333_v60 = vld [vmem:[%s7851_s0 + $0x60] sm:$0xf] }
  0xa4   :  { %1634 = vmatpush.bf16.msrb.mxu0 %v6455_v14  ;;  %v6512_v41 = vor.u32 %v4624_v6, %v3333_v60  ;;  %v6528_v6 = vor.u32 %v4619_v54, %v3313_v27  ;;  %v3293_v60 = vld [vmem:[%s7851_s0 + $0x10] sm:$0xf]  ;;  %v1183_v22 = vpack.c.b16 %v1013_v35, %v1013_v35 }
  0xa5   :  { %1650 = vmatpush.bf16.msrb.mxu1 %v6464_v37 }
  0xa6   :  { %1663 = vmatpush.bf16.msrb.mxu2 %v6468_v18 }
  0xa7   :  { %1676 = vmatpush.bf16.msrb.mxu3 %v6470_v11 }
  0xa8   :  { %1635 = vmatpush.bf16.msrb.mxu0 %v6491_v49 }
  0xa9   :  { %1651 = vmatpush.bf16.msrb.mxu1 %v6494_v43 }
  0xaa   :  { %1664 = vmatpush.bf16.msrb.mxu2 %v6504_v52 }
  0xab   :  { %1677 = vmatpush.bf16.msrb.mxu3 %v6506_v53 }
  0xac   :  { %1652 = vmatmul.bf16.vlgmr.msrb.gmra.mxu1 %v5486_v39  ;;  %1636 = vmatpush.bf16.msrb.mxu0 %v6512_v41  ;;  %v3933_v39 = vld [vmem:[%s7851_s0 + $0x510] sm:$0xf] }
  0xad   :  { %1716 = vmatpush.bf16.msra.mxu1 %v4971_v3  ;;  %1665 = vmatmul.bf16.vlgmr.msrb.gmra.mxu2 %v5482_v63  ;;  %v4614_v3 = vld [vmem:[%s7851_s0 + $0x20] sm:$0xf0] }
  0xae   :  { %1729 = vmatpush.bf16.msra.mxu2 %v4982_v7  ;;  %1678 = vmatmul.bf16.vlgmr.msrb.gmra.mxu3 %v5488_v19  ;;  %v6542_v7 = vor.u32 %v4614_v3, %v3293_v60  ;;  %v4774_v63 = vld [vmem:[%s7851_s0 + $0x520] sm:$0xf0]  ;;  %v8105_v60 = vld [vmem:[#allocation14_spill] sm:$0xff] }
  0xaf   :  { %1742 = vmatpush.bf16.msra.mxu3 %v4984_v8  ;;  %v6545_v8 = vand.u32 %v5246_v48, %v1183_v22  ;;  %v8106_v22 = vld [vmem:[#allocation15_spill] sm:$0xff] }
  0xb0   :  { %1637 = vmatpush.bf16.msrb.mxu0 %v6528_v6 }
  0xb1   :  { %1717 = vmatpush.bf16.msra.mxu1 %v5009_v16  ;;  %v6558_v16 = vor.u32 %v4774_v63, %v3933_v39  ;;  %v8107_v39 = vld [vmem:[#allocation33_spill] sm:$0xff]  ;;  %v8108_v63 = vld [vmem:[#allocation7_spill] sm:$0xff] }
  0xb2   :  { %1730 = vmatpush.bf16.msra.mxu2 %v5011_v17 }
  0xb3   :  { %1743 = vmatpush.bf16.msra.mxu3 %v5023_v21 }
  0xb4   :  { %1638 = vmatpush.bf16.msrb.mxu0 %v6542_v7  ;;  %v1380_v17 = vpop.f32.mrf.mxu0 }
  0xb5   :  { %1718 = vmatpush.bf16.msra.mxu1 %v5046_v29 }
  0xb6   :  { %1731 = vmatpush.bf16.msra.mxu2 %v5059_v33 }
  0xb7   :  { %1744 = vmatpush.bf16.msra.mxu3 %v5061_v34  ;;  %1639 = vmatmul.bf16.vlgmr.msrb.gmra.mxu0 %v5480_v13  ;;  %v1393_v21 = vpop.f32.mrf.mxu1  ;;  %v1701_v34 = vunpack.c.l.b16 %v5333_v47 }
  0xb8   :  { %1689 = vmatpush.bf16.msra.mxu0 %v6545_v8  ;;  %v1394_v29 = vadd.f32 %v1393_v21, %v1380_v17  ;;  %v8109_v17 = vld [vmem:[#allocation17_spill] sm:$0xff] }
  0xb9   :  { %1719 = vmatpush.bf16.msra.mxu1 %v5091_v44 }
  0xba   :  { %1732 = vmatpush.bf16.msra.mxu2 %v5095_v45 }
  0xbb   :  { %1745 = vmatpush.bf16.msra.mxu3 %v5097_v46  ;;  %v1406_v33 = vpop.f32.mrf.mxu2 }
  0xbc   :  { %1690 = vmatpush.bf16.msra.mxu0 %v6558_v16  ;;  %v1407_v44 = vadd.f32 %v1406_v33, %v1394_v29  ;;  %v1382_v45 = vpop.f32.mrf.mxu0  ;;  %v1419_v46 = vpop.f32.mrf.mxu3  ;;  %v8110_v29 = vld [vmem:[#allocation18_spill] sm:$0xff] }
  0xbd   :  { %1720 = vmatpush.bf16.msra.mxu1 %v5127_v56 }
  0xbe   :  { %1733 = vmatpush.bf16.msra.mxu2 %v5131_v57 }
  0xbf   :  { %1746 = vmatpush.bf16.msra.mxu3 %v5133_v58  ;;  %v1395_v57 = vpop.f32.mrf.mxu1 }
  0xc0   :  { %1755 = vmatpush.bf16.msrb.mxu0 %v4996_v12  ;;  %v1699_v12 = vunpack.c.l.b16 %v5328_v42  ;;  %v8114_v57 = vld [vmem:[#allocation22_spill] sm:$0xff] }
  0xc1   :  { %1721 = vmatpush.bf16.msra.mxu1 %v5163_v5  ;;  %v6589_v5 = vpack.c.b16 %v1701_v34, %v1701_v34 }
  0xc2   :  { %1734 = vmatpush.bf16.msra.mxu2 %v5170_v9  ;;  %v6582_v56 = vpack.c.b16 %v1699_v12, %v1699_v12  ;;  %v8111_v12 = vld [vmem:[#allocation36_spill] sm:$0xff] }
  0xc3   :  { %1747 = vmatpush.bf16.msra.mxu3 %v5172_v10  ;;  %v8093_v10 = vld [vmem:[#allocation6_spill] sm:$0xff] }
  0xc4   :  { %1756 = vmatpush.bf16.msrb.mxu0 %v5034_v25  ;;  %v1700_v25 = vunpack.c.h.b16 %v5328_v42  ;;  %v8101_v42 = vld [vmem:[#allocation12_spill] sm:$0xff] }
  0xc5   :  { %1722 = vmatpush.bf16.msra.mxu1 %v5205_v26  ;;  %v1421_v26 = vpop.f32.mrf.mxu3 }
  0xc6   :  { %1735 = vmatpush.bf16.msra.mxu2 %v5220_v31  ;;  %v6587_v58 = vpack.c.b16 %v1700_v25, %v1700_v25  ;;  %v8094_v31 = vld [vmem:[#allocation2_spill] sm:$0xff] }
  0xc7   :  { %1748 = vmatpush.bf16.msra.mxu3 %v5222_v32  ;;  %3939 = vmatmul.msk.bf16.vlgmr.msra.gmra.mxu0 %vm1349_vm4, %v5645_v15  ;;  %v8102_v15 = vld [vmem:[#allocation4_spill] sm:$0xff] }
  0xc8   :  { %1757 = vmatpush.bf16.msrb.mxu0 %v5073_v38  ;;  %v1420_v38 = vadd.f32 %v1419_v46, %v1407_v44  ;;  %v1432_v9 = vpop.f32.mrf.mxu0  ;;  %v8112_v44 = vld [vmem:[#allocation10_spill] sm:$0xff] }
  0xc9   :  { %1723 = vmatpush.bf16.msra.mxu1 %v5253_v51  ;;  %v1445_v51 = vpop.f32.mrf.mxu1 }
  0xca   :  { %1736 = vmatpush.bf16.msra.mxu2 %v5266_v55  ;;  %v6603_v32 = vadd.f32 %v1432_v9, %v1420_v38  ;;  %v8096_v55 = vld [vmem:[#allocation8_spill] sm:$0xff]  ;;  %v8113_v38 = vld [vmem:[#allocation21_spill] sm:$0xff] }
  0xcb   :  { %1749 = vmatpush.bf16.msra.mxu3 %v5268_v59  ;;  %v8097_v59 = vld [vmem:[#allocation9_spill] sm:$0xff] }
  0xcc   :  { %1758 = vmatpush.bf16.msrb.mxu0 %v5109_v50  ;;  %1724 = vmatmul.bf16.vlgmr.msra.gmra.mxu1 %v6582_v56  ;;  %v1408_v50 = vpop.f32.mrf.mxu2  ;;  %v8116_v9 = vld [vmem:[#allocation13_spill] sm:$0xff] }
  0xcd   :  { %1774 = vmatpush.bf16.msrb.mxu1 %v5280_v0  ;;  %1737 = vmatmul.bf16.vlgmr.msra.gmra.mxu2 %v6587_v58  ;;  %v1702_v0 = vunpack.c.h.b16 %v5333_v47  ;;  %v8104_v47 = vld [vmem:[#allocation5_spill] sm:$0xff]  ;;  %v1471_v35 = vpop.f32.mrf.mxu3  ;;  %v8115_v50 = vld [vmem:[#allocation40_spill] sm:$0xff] }
  0xce   :  { %1781 = vmatpush.bf16.msrb.mxu2 %v5282_v1  ;;  %1750 = vmatmul.bf16.vlgmr.msra.gmra.mxu3 %v6589_v5  ;;  %v8098_v1 = vld [vmem:[#allocation3_spill] sm:$0xff] }
  0xcf   :  { %1794 = vmatpush.bf16.msrb.mxu3 %v5284_v2  ;;  %v8099_v2 = vld [vmem:[#allocation23_spill] sm:$0xff] }
  0xd0   :  { %1759 = vmatpush.bf16.msrb.mxu0 %v5145_v62  ;;  %v8095_v62 = vld [vmem:[#allocation19_spill] sm:$0xff]  ;;  %v1703_v13 = vunpack.c.l.b16 %v8099_v2  ;;  %v1434_v19 = vpop.f32.mrf.mxu0  ;;  %v8124_v2 = vld [vmem:[#allocation20_spill] sm:$0xff] }
  0xd1   :  { %1775 = vmatpush.bf16.msrb.mxu1 %v5317_v24  ;;  %v6612_v24 = vpack.c.b16 %v1702_v0, %v1702_v0  ;;  %v1447_v27 = vpop.f32.mrf.mxu1  ;;  %v8122_v0 = vld [vmem:[#allocation29_spill] sm:$0xff] }
  0xd2   :  { %1782 = vmatpush.bf16.msrb.mxu2 %v5324_v36  ;;  %v8100_v36 = vld [vmem:[#allocation11_spill] sm:$0xff]  ;;  %v6619_v54 = vpack.c.b16 %v1703_v13, %v1703_v13  ;;  %v8125_v13 = vld [vmem:[#allocation32_spill] sm:$0xff]  ;;  %v8128_v19 = vld [vmem:[#allocation37_spill] sm:$0xff] }
  0xd3   :  { %1795 = vmatpush.bf16.msrb.mxu3 %v8093_v10  ;;  %v8117_v10 = vld [vmem:[#allocation25_spill] sm:$0xff] }
  0xd4   :  { %1760 = vmatpush.bf16.msrb.mxu0 %v8094_v31  ;;  %v1458_v28 = vpop.f32.mrf.mxu2  ;;  %v8118_v31 = vld [vmem:[#allocation26_spill] sm:$0xff] }
  0xd5   :  { %1820 = vmatpush.bf16.msra.mxu1 %v8095_v62  ;;  %v1473_v45 = vpop.f32.mrf.mxu3  ;;  %v8119_v62 = vld [vmem:[#allocation44_spill] sm:$0xff] }
  0xd6   :  { %1783 = vmatpush.bf16.msrb.mxu2 %v8096_v55  ;;  %v8120_v55 = vld [vmem:[#allocation16_spill] sm:$0xff] }
  0xd7   :  { %1796 = vmatpush.bf16.msrb.mxu3 %v8097_v59  ;;  %v8121_v59 = vld [vmem:[#allocation27_spill] sm:$0xff] }
  0xd8   :  { %1761 = vmatpush.bf16.msrb.mxu0 %v8098_v1  ;;  %v1484_v21 = vpop.f32.mrf.mxu0  ;;  %v8123_v1 = vld [vmem:[#allocation48_spill] sm:$0xff] }
  0xd9   :  { %1821 = vmatpush.bf16.msra.mxu1 %v5513_v30  ;;  %v1459_v30 = vadd.f32 %v1458_v28, %v1445_v51  ;;  %v1497_v34 = vpop.f32.mrf.mxu1  ;;  %v8129_v28 = vld [vmem:[#allocation24_spill] sm:$0xff] }
  0xda   :  { %1784 = vmatpush.bf16.msrb.mxu2 %v8100_v36  ;;  %v8126_v36 = vld [vmem:[#allocation34_spill] sm:$0xff] }
  0xdb   :  { %1797 = vmatpush.bf16.msrb.mxu3 %v8101_v42  ;;  %v1472_v3 = vadd.f32 %v1471_v35, %v1459_v30  ;;  %v8127_v42 = vld [vmem:[#allocation49_spill] sm:$0xff]  ;;  %v8130_v30 = vld [vmem:[#allocation38_spill] sm:$0xff] }
  0xdc   :  { %1762 = vmatpush.bf16.msrb.mxu0 %v8102_v15  ;;  %3940 = vmatmul.msk.bf16.vlgmr.msrb.gmra.mxu1 %vm1349_vm4, %v6619_v54  ;;  %v1460_v33 = vpop.f32.mrf.mxu2  ;;  %v8131_v35 = vld [vmem:[#allocation53_spill] sm:$0xff] }
  0xdd   :  { %1822 = vmatpush.bf16.msra.mxu1 %v8103_v4  ;;  %v1485_v25 = vadd.f32 %v1484_v21, %v1472_v3  ;;  %v8133_v3 = vld [vmem:[#allocation30_spill] sm:$0xff]  ;;  %v8138_v33 = vld [vmem:[#allocation35_spill] sm:$0xff] }
  0xde   :  { %1785 = vmatpush.bf16.msrb.mxu2 %v8105_v60  ;;  %v8132_v60 = vld [vmem:[#allocation41_spill] sm:$0xff] }
  0xdf   :  { %1763 = vmatmul.bf16.vlgmr.msrb.gmra.mxu0 %v6612_v24  ;;  %1798 = vmatpush.bf16.msrb.mxu3 %v8106_v22  ;;  %v6632_v46 = vadd.f32 %v1497_v34, %v1485_v25  ;;  %v8134_v22 = vld [vmem:[#allocation31_spill] sm:$0xff]  ;;  %v8139_v25 = vld [vmem:[#allocation46_spill] sm:$0xff] }
  0xe0   :  { %1807 = vmatpush.bf16.msra.mxu0 %v8104_v47  ;;  %v1486_v26 = vpop.f32.mrf.mxu0  ;;  %v8140_v34 = vld [vmem:[#allocation63_spill] sm:$0xff] }
  0xe1   :  { %1823 = vmatpush.bf16.msra.mxu1 %v8107_v39  ;;  %v1499_v51 = vpop.f32.mrf.mxu1  ;;  %v8135_v39 = vld [vmem:[#allocation42_spill] sm:$0xff] }
  0xe2   :  { %1786 = vmatpush.bf16.msrb.mxu2 %v8109_v17  ;;  %v8137_v17 = vld [vmem:[#allocation45_spill] sm:$0xff]  ;;  %v8145_v26 = vld [vmem:[#allocation54_spill] sm:$0xff]  ;;  %v8147_v51 = vld [vmem:[#allocation55_spill] sm:$0xff] }
  0xe3   :  { %1799 = vmatpush.bf16.msrb.mxu3 %v8110_v29 }
  0xe4   :  { %1808 = vmatpush.bf16.msra.mxu0 %v8108_v63  ;;  %v8136_v63 = vld [vmem:[#allocation57_spill] sm:$0xff] }
  0xe5   :  { %1824 = vmatpush.bf16.msra.mxu1 %v8111_v12 }
  0xe6   :  { %1787 = vmatpush.bf16.msrb.mxu2 %v8113_v38 }
  0xe7   :  { %1800 = vmatpush.bf16.msrb.mxu3 %v8114_v57  ;;  %v8142_v57 = vld [vmem:[#allocation39_spill] sm:$0xff] }
  0xe8   :  { %1809 = vmatpush.bf16.msra.mxu0 %v8112_v44  ;;  %v1510_v15 = vpop.f32.mrf.mxu2  ;;  %v8141_v44 = vld [vmem:[#allocation50_spill] sm:$0xff] }
  0xe9   :  { %1825 = vmatpush.bf16.msra.mxu1 %v8115_v50  ;;  %v1523_v4 = vpop.f32.mrf.mxu3  ;;  %v1549_v47 = vpop.f32.mrf.mxu1  ;;  %v8143_v50 = vld [vmem:[#allocation51_spill] sm:$0xff] }
  0xea   :  { %1788 = vmatpush.bf16.msrb.mxu2 %v8117_v10  ;;  %v1524_v27 = vadd.f32 %v1523_v4, %v1510_v15  ;;  %v8144_v10 = vld [vmem:[#allocation68_spill] sm:$0xff] }
  0xeb   :  { %1801 = vmatpush.bf16.msrb.mxu3 %v8118_v31  ;;  %v8155_v4 = vld [vmem:[#allocation52_spill] sm:$0xff] }
  0xec   :  { %1810 = vmatpush.bf16.msra.mxu0 %v8116_v9 }
  0xed   :  { %1826 = vmatpush.bf16.msra.mxu1 %v8119_v62  ;;  %1789 = vmatmul.bf16.vlgmr.msrb.gmra.mxu2 %v6582_v56  ;;  %v8146_v62 = vld [vmem:[#allocation43_spill] sm:$0xff] }
  0xee   :  { %1839 = vmatpush.bf16.msra.mxu2 %v8121_v59  ;;  %1802 = vmatmul.bf16.vlgmr.msrb.gmra.mxu3 %v6587_v58  ;;  %v8148_v59 = vld [vmem:[#allocation73_spill] sm:$0xff] }
  0xef   :  { %1846 = vmatpush.bf16.msra.mxu3 %v8122_v0  ;;  %v8149_v0 = vld [vmem:[#allocation58_spill] sm:$0xff] }
  0xf0   :  { %1811 = vmatpush.bf16.msra.mxu0 %v8120_v55  ;;  %v1512_v21 = vpop.f32.mrf.mxu2 }
  0xf1   :  { %1827 = vmatpush.bf16.msra.mxu1 %v8123_v1  ;;  %v1525_v29 = vpop.f32.mrf.mxu3  ;;  %v1551_v12 = vpop.f32.mrf.mxu1  ;;  %v8165_v21 = vld [vmem:[#allocation72_spill] sm:$0xff] }
  0xf2   :  { %1840 = vmatpush.bf16.msra.mxu2 %v8125_v13  ;;  %v8151_v13 = vld [vmem:[#allocation59_spill] sm:$0xff]  ;;  %v8166_v29 = vld [vmem:[#allocation60_spill] sm:$0xff] }
  0xf3   :  { %1847 = vmatpush.bf16.msra.mxu3 %v8126_v36  ;;  %v8152_v36 = vld [vmem:[#allocation77_spill] sm:$0xff] }
  0xf4   :  { %1812 = vmatpush.bf16.msra.mxu0 %v8124_v2  ;;  %1828 = vmatmul.bf16.vlgmr.msra.gmra.mxu1 %v6612_v24  ;;  %v1536_v45 = vpop.f32.mrf.mxu0  ;;  %v8150_v2 = vld [vmem:[#allocation47_spill] sm:$0xff] }
  0xf5   :  { %1872 = vmatpush.bf16.msrb.mxu1 %v8127_v42  ;;  %v1537_v38 = vadd.f32 %v1536_v45, %v1524_v27  ;;  %v8153_v42 = vld [vmem:[#allocation64_spill] sm:$0xff]  ;;  %v8157_v27 = vld [vmem:[#allocation69_spill] sm:$0xff] }
  0xf6   :  { %1885 = vmatpush.bf16.msrb.mxu2 %v8128_v19  ;;  %v8154_v19 = vld [vmem:[#allocation61_spill] sm:$0xff] }
  0xf7   :  { %1848 = vmatpush.bf16.msra.mxu3 %v8130_v30  ;;  %v1550_v9 = vadd.f32 %v1549_v47, %v1537_v38  ;;  %v8158_v47 = vld [vmem:[#allocation65_spill] sm:$0xff]  ;;  %v8159_v30 = vld [vmem:[#allocation82_spill] sm:$0xff]  ;;  %v8170_v38 = vld [vmem:[#allocation76_spill] sm:$0xff] }
  0xf8   :  { %1813 = vmatpush.bf16.msra.mxu0 %v8129_v28  ;;  %v1562_v31 = vpop.f32.mrf.mxu2  ;;  %v8156_v28 = vld [vmem:[#allocation81_spill] sm:$0xff] }
  0xf9   :  { %1873 = vmatpush.bf16.msrb.mxu1 %v8131_v35  ;;  %v6675_v55 = vadd.f32 %v1562_v31, %v1550_v9  ;;  %v8160_v35 = vld [vmem:[#allocation70_spill] sm:$0xff] }
  0xfa   :  { %1886 = vmatpush.bf16.msrb.mxu2 %v8132_v60  ;;  %v8161_v60 = vld [vmem:[#allocation67_spill] sm:$0xff] }
  0xfb   :  { %1849 = vmatpush.bf16.msra.mxu3 %v8135_v39  ;;  %v8162_v39 = vld [vmem:[#allocation56_spill] sm:$0xff] }
  0xfc   :  { %1814 = vmatpush.bf16.msra.mxu0 %v8133_v3  ;;  %v1538_v1 = vpop.f32.mrf.mxu0 }
  0xfd   :  { %1874 = vmatpush.bf16.msrb.mxu1 %v8136_v63  ;;  %3941 = vmatmul.msk.bf16.vlgmr.msra.gmra.mxu2 %vm1349_vm4, %v6619_v54  ;;  %v8163_v63 = vld [vmem:[#allocation86_spill] sm:$0xff]  ;;  %v8177_v1 = vld [vmem:[#allocation75_spill] sm:$0xff] }
  0xfe   :  { %1887 = vmatpush.bf16.msrb.mxu2 %v8137_v17  ;;  %v8164_v17 = vld [vmem:[#allocation74_spill] sm:$0xff] }
  0xff   :  { %1815 = vmatmul.bf16.vlgmr.msra.gmra.mxu0 %v6589_v5  ;;  %1850 = vmatpush.bf16.msra.mxu3 %v8139_v25  ;;  %v8168_v25 = vld [vmem:[#allocation90_spill] sm:$0xff] }
 0x100   :  { %1859 = vmatpush.bf16.msrb.mxu0 %v8134_v22  ;;  %v1564_v15 = vpop.f32.mrf.mxu2 }
 0x101   :  { %1875 = vmatpush.bf16.msrb.mxu1 %v8140_v34  ;;  %v8169_v34 = vld [vmem:[#allocation78_spill] sm:$0xff]  ;;  %v8180_v15 = vld [vmem:[#allocation89_spill] sm:$0xff] }
 0x102   :  { %1888 = vmatpush.bf16.msrb.mxu2 %v8141_v44 }
 0x103   :  { %1851 = vmatpush.bf16.msra.mxu3 %v8143_v50  ;;  %v8172_v50 = vld [vmem:[#allocation83_spill] sm:$0xff] }
 0x104   :  { %1860 = vmatpush.bf16.msrb.mxu0 %v8138_v33  ;;  %v8167_v33 = vld [vmem:[#allocation62_spill] sm:$0xff] }
 0x105   :  { %1876 = vmatpush.bf16.msrb.mxu1 %v8144_v10  ;;  %v8173_v10 = vld [vmem:[#allocation80_spill] sm:$0xff] }
 0x106   :  { %1889 = vmatpush.bf16.msrb.mxu2 %v8145_v26 }
 0x107   :  { %1852 = vmatpush.bf16.msra.mxu3 %v8147_v51 }
 0x108   :  { %1861 = vmatpush.bf16.msrb.mxu0 %v8142_v57  ;;  %v8171_v57 = vld [vmem:[#allocation66_spill] sm:$0xff] }
 0x109   :  { %1877 = vmatpush.bf16.msrb.mxu1 %v8148_v59  ;;  %v1575_v3 = vpop.f32.mrf.mxu3  ;;  %v1601_v22 = vpop.f32.mrf.mxu1  ;;  %v8175_v59 = vld [vmem:[#allocation87_spill] sm:$0xff] }
 0x10a   :  { %1890 = vmatpush.bf16.msrb.mxu2 %v8149_v0  ;;  %v8176_v0 = vld [vmem:[#allocation85_spill] sm:$0xff] }
 0x10b   :  { %1853 = vmatpush.bf16.msra.mxu3 %v8151_v13  ;;  %v8178_v13 = vld [vmem:[#allocation102_spill] sm:$0xff] }
 0x10c   :  { %1862 = vmatpush.bf16.msrb.mxu0 %v8146_v62  ;;  %v8174_v62 = vld [vmem:[#allocation71_spill] sm:$0xff] }
 0x10d   :  { %1878 = vmatpush.bf16.msrb.mxu1 %v8152_v36 }
 0x10e   :  { %1891 = vmatpush.bf16.msrb.mxu2 %v8153_v42  ;;  %1854 = vmatmul.bf16.vlgmr.msra.gmra.mxu3 %v6582_v56  ;;  %v8179_v42 = vld [vmem:[#allocation91_spill] sm:$0xff] }
 0x10f   :  { %1904 = vmatpush.bf16.msrb.mxu3 %v8154_v19 }
 0x110   :  { %1863 = vmatpush.bf16.msrb.mxu0 %v8150_v2  ;;  %v1614_v12 = vpop.f32.mrf.mxu2 }
 0x111   :  { %1879 = vmatpush.bf16.msrb.mxu1 %v8156_v28  ;;  %v1577_v44 = vpop.f32.mrf.mxu3  ;;  %v1603_v45 = vpop.f32.mrf.mxu1  ;;  %v8183_v28 = vld [vmem:[#allocation93_spill] sm:$0xff] }
 0x112   :  { %1892 = vmatpush.bf16.msrb.mxu2 %v8157_v27  ;;  %v8184_v27 = vld [vmem:[#allocation84_spill] sm:$0xff]  ;;  %v8198_v45 = vld [vmem:[#allocation107_spill] sm:$0xff] }
 0x113   :  { %1905 = vmatpush.bf16.msrb.mxu3 %v8158_v47 }
 0x114   :  { %1864 = vmatpush.bf16.msrb.mxu0 %v8155_v4  ;;  %1880 = vmatmul.bf16.vlgmr.msrb.gmra.mxu1 %v6589_v5  ;;  %v1588_v9 = vpop.f32.mrf.mxu0  ;;  %v8181_v4 = vld [vmem:[#allocation79_spill] sm:$0xff] }
 0x115   :  { %1924 = vmatpush.bf16.msra.mxu1 %v8159_v30  ;;  %1893 = vmatmul.bf16.vlgmr.msrb.gmra.mxu2 %v6612_v24  ;;  %v1589_v26 = vadd.f32 %v1588_v9, %v1575_v3  ;;  %v8185_v30 = vld [vmem:[#allocation98_spill] sm:$0xff]  ;;  %v8188_v3 = vld [vmem:[#allocation99_spill] sm:$0xff] }
 0x116   :  { %1937 = vmatpush.bf16.msra.mxu2 %v8160_v35  ;;  %v8186_v35 = vld [vmem:[#allocation109_spill] sm:$0xff] }
 0x117   :  { %1950 = vmatpush.bf16.msra.mxu3 %v8161_v60  ;;  %v1602_v51 = vadd.f32 %v1601_v22, %v1589_v26  ;;  %v8187_v60 = vld [vmem:[#allocation96_spill] sm:$0xff] }
 0x118   :  { %1865 = vmatpush.bf16.msrb.mxu0 %v8162_v39  ;;  %v1616_v31 = vpop.f32.mrf.mxu2  ;;  %v8189_v39 = vld [vmem:[#allocation88_spill] sm:$0xff] }
 0x119   :  { %1925 = vmatpush.bf16.msra.mxu1 %v8163_v63  ;;  %v1627_v2 = vpop.f32.mrf.mxu3  ;;  %v8192_v63 = vld [vmem:[#allocation103_spill] sm:$0xff]  ;;  %v8203_v31 = vld [vmem:[#allocation105_spill] sm:$0xff] }
 0x11a   :  { %1938 = vmatpush.bf16.msra.mxu2 %v8164_v17  ;;  %v8193_v17 = vld [vmem:[#allocation92_spill] sm:$0xff] }
 0x11b   :  { %1951 = vmatpush.bf16.msra.mxu3 %v8165_v21  ;;  %v8194_v21 = vld [vmem:[#allocation104_spill] sm:$0xff] }
 0x11c   :  { %1866 = vmatpush.bf16.msrb.mxu0 %v8166_v29  ;;  %v1590_v19 = vpop.f32.mrf.mxu0  ;;  %v8195_v29 = vld [vmem:[#allocation94_spill] sm:$0xff] }
 0x11d   :  { %1926 = vmatpush.bf16.msra.mxu1 %v8168_v25  ;;  %v8197_v25 = vld [vmem:[#allocation106_spill] sm:$0xff] }
 0x11e   :  { %1939 = vmatpush.bf16.msra.mxu2 %v8169_v34  ;;  %3942 = vmatmul.msk.bf16.vlgmr.msrb.gmra.mxu3 %vm1349_vm4, %v6619_v54  ;;  %v4812_v19 = vld [vmem:[%s7853_s1 + $0x128] sm:$0xf0] }
 0x11f   :  { %1867 = vmatmul.bf16.vlgmr.msrb.gmra.mxu0 %v6587_v58  ;;  %1952 = vmatpush.bf16.msra.mxu3 %v8170_v38  ;;  %v8199_v38 = vld [vmem:[#allocation97_spill] sm:$0xff] }
 0x120   :  { %1911 = vmatpush.bf16.msra.mxu0 %v8167_v33 }
 0x121   :  { %1927 = vmatpush.bf16.msra.mxu1 %v6175_v61  ;;  %v1615_v61 = vadd.f32 %v1614_v12, %v1602_v51  ;;  %v1629_v47 = vpop.f32.mrf.mxu3  ;;  %v8196_v12 = vld [vmem:[#allocation117_spill] sm:$0xff] }
 0x122   :  { %1940 = vmatpush.bf16.msra.mxu2 %v8172_v50  ;;  %v8201_v50 = vld [vmem:[#allocation110_spill] sm:$0xff]  ;;  %v4567_v47 = vld [vmem:[%s7853_s1 + $0x4d8] sm:$0xf] }
 0x123   :  { %1953 = vmatpush.bf16.msra.mxu3 %v8173_v10  ;;  %v6716_v36 = vadd.f32 %v1627_v2, %v1615_v61  ;;  %v8202_v10 = vld [vmem:[#allocation111_spill] sm:$0xff]  ;;  %v8206_v2 = vld [vmem:[#allocation108_spill] sm:$0xff] }
 0x124   :  { %1912 = vmatpush.bf16.msra.mxu0 %v8171_v57  ;;  %v8200_v57 = vld [vmem:[#allocation101_spill] sm:$0xff]  ;;  %v8205_v61 = vld [vmem:[#allocation115_spill] sm:$0xff] }
 0x125   :  { %1928 = vmatpush.bf16.msra.mxu1 %v6221_v20  ;;  %v8182_v20 = vld [vmem:[#allocation95_spill] sm:$0xff] }
 0x126   :  { %1941 = vmatpush.bf16.msra.mxu2 %v8175_v59  ;;  %v8204_v59 = vld [vmem:[#allocation114_spill] sm:$0xff] }
 0x127   :  { %1954 = vmatpush.bf16.msra.mxu3 %v8176_v0 }
 0x128   :  { %1913 = vmatpush.bf16.msra.mxu0 %v8174_v62 }
 0x129   :  { %1929 = vmatpush.bf16.msra.mxu1 %v8178_v13  ;;  %v1653_v22 = vpop.f32.mrf.mxu1 }
 0x12a   :  { %1942 = vmatpush.bf16.msra.mxu2 %v8179_v42  ;;  %v8208_v42 = vld [vmem:[#allocation119_spill] sm:$0xff] }
 0x12b   :  { %1955 = vmatpush.bf16.msra.mxu3 %v8180_v15  ;;  %v8209_v15 = vld [vmem:[#allocation112_spill] sm:$0xff] }
 0x12c   :  { %1914 = vmatpush.bf16.msra.mxu0 %v8177_v1 }
 0x12d   :  { %1930 = vmatpush.bf16.msra.mxu1 %v6299_v23  ;;  %v8190_v23 = vld [vmem:[#allocation100_spill] sm:$0xff] }
 0x12e   :  { %1943 = vmatpush.bf16.msra.mxu2 %v8182_v20 }
 0x12f   :  { %1956 = vmatpush.bf16.msra.mxu3 %v8183_v28 }
 0x130   :  { %1915 = vmatpush.bf16.msra.mxu0 %v8181_v4  ;;  %v1666_v33 = vpop.f32.mrf.mxu2  ;;  %v4852_v4 = vld [vmem:[%s7853_s1 + $0x268] sm:$0xf0] }
 0x131   :  { %1931 = vmatpush.bf16.msra.mxu1 %v6341_v40  ;;  %v8191_v40 = vld [vmem:[#allocation113_spill] sm:$0xff]  ;;  %v1655_v34 = vpop.f32.mrf.mxu1  ;;  %v1679_v44 = vpop.f32.mrf.mxu3 }
 0x132   :  { %1944 = vmatpush.bf16.msra.mxu2 %v8185_v30  ;;  %v8210_v30 = vld [vmem:[#allocation116_spill] sm:$0xff] }
 0x133   :  { %1957 = vmatpush.bf16.msra.mxu3 %v8187_v60 }
 0x134   :  { %1916 = vmatpush.bf16.msra.mxu0 %v8184_v27  ;;  %1932 = vmatmul.bf16.vlgmr.msra.gmra.mxu1 %v6587_v58  ;;  %v1640_v9 = vpop.f32.mrf.mxu0  ;;  %v4807_v27 = vld [vmem:[%s7853_s1 + $0x100] sm:$0xf0] }
 0x135   :  { %1976 = vmatpush.bf16.msrb.mxu1 %v8186_v35  ;;  %1945 = vmatmul.bf16.vlgmr.msra.gmra.mxu2 %v6589_v5  ;;  %v1654_v26 = vadd.f32 %v1653_v22, %v1640_v9  ;;  %v4847_v35 = vld [vmem:[%s7853_s1 + $0x240] sm:$0xf0] }
 0x136   :  { %1989 = vmatpush.bf16.msrb.mxu2 %v8188_v3  ;;  %1958 = vmatmul.bf16.vlgmr.msra.gmra.mxu3 %v6612_v24 }
 0x137   :  { %2002 = vmatpush.bf16.msrb.mxu3 %v8190_v23  ;;  %v1667_v62 = vadd.f32 %v1666_v33, %v1654_v26  ;;  %v4892_v33 = vld [vmem:[%s7853_s1 + $0x3a8] sm:$0xf0]  ;;  %v4387_v26 = vld [vmem:[%s7853_s1 + $0x370] sm:$0xf] }
 0x138   :  { %1917 = vmatpush.bf16.msra.mxu0 %v8189_v39  ;;  %v1668_v51 = vpop.f32.mrf.mxu2  ;;  %v4047_v39 = vld [vmem:[%s7853_s1 + $0xc8] sm:$0xf] }
 0x139   :  { %1977 = vmatpush.bf16.msrb.mxu1 %v8191_v40  ;;  %v1681_v0 = vpop.f32.mrf.mxu3  ;;  %v1680_v1 = vadd.f32 %v1679_v44, %v1667_v62  ;;  %v8211_v40 = vld [vmem:[#allocation120_spill] sm:$0xff]  ;;  %v4027_v44 = vld [vmem:[%s7853_s1 + $0xa0] sm:$0xf] }
 0x13a   :  { %1990 = vmatpush.bf16.msrb.mxu2 %v8192_v63  ;;  %v4007_v51 = vld [vmem:[%s7853_s1 + $0x78] sm:$0xf] }
 0x13b   :  { %2003 = vmatpush.bf16.msrb.mxu3 %v8194_v21  ;;  %v4842_v21 = vld [vmem:[%s7853_s1 + $0x218] sm:$0xf0] }
 0x13c   :  { %1918 = vmatpush.bf16.msra.mxu0 %v8193_v17  ;;  %v1642_v13 = vpop.f32.mrf.mxu0  ;;  %v4207_v17 = vld [vmem:[%s7853_s1 + $0x208] sm:$0xf] }
 0x13d   :  { %1978 = vmatpush.bf16.msrb.mxu1 %v8196_v12  ;;  %v4407_v12 = vld [vmem:[%s7853_s1 + $0x398] sm:$0xf] }
 0x13e   :  { %1991 = vmatpush.bf16.msrb.mxu2 %v8197_v25  ;;  %v4408_v9 = vor.u32 %v4892_v33, %v4407_v12 }
 0x13f   :  { %1919 = vmatmul.bf16.vlgmr.msra.gmra.mxu0 %v6582_v56  ;;  %2004 = vmatpush.bf16.msrb.mxu3 %v8198_v45  ;;  %v4527_v45 = vld [vmem:[%s7853_s1 + $0x488] sm:$0xf] }
 0x140   :  { %1969 = vmatpush.bf16.msrb.mxu0 %v8195_v29 }
 0x141   :  { %1979 = vmatpush.bf16.msrb.mxu1 %v6455_v14  ;;  %v8207_v14 = vld [vmem:[#allocation118_spill] sm:$0xff] }
 0x142   :  { %1992 = vmatpush.bf16.msrb.mxu2 %v8201_v50  ;;  %v4837_v50 = vld [vmem:[%s7853_s1 + $0x1f0] sm:$0xf0] }
 0x143   :  { %2005 = vmatpush.bf16.msrb.mxu3 %v8202_v10 }
 0x144   :  { %1970 = vmatpush.bf16.msrb.mxu0 %v8199_v38  ;;  %v1692_v60 = vpop.f32.mrf.mxu0  ;;  %v4922_v38 = vld [vmem:[%s7853_s1 + $0x498] sm:$0xf0] }
 0x145   :  { %1980 = vmatpush.bf16.msrb.mxu1 %v6491_v49  ;;  %v4087_v49 = vld [vmem:[%s7853_s1 + $0x118] sm:$0xf]  ;;  %v6798_v3 = vadd.f32 %v1692_v60, %v1680_v1  ;;  %v4528_v62 = vor.u32 %v4922_v38, %v4527_v45  ;;  %v4792_v1 = vld [vmem:[%s7853_s1 + $0x88] sm:$0xf0] }
 0x146   :  { %1993 = vmatpush.bf16.msrb.mxu2 %v8204_v59  ;;  %v4088_v20 = vor.u32 %v4812_v19, %v4087_v49  ;;  %v4167_v49 = vld [vmem:[%s7853_s1 + $0x1b8] sm:$0xf]  ;;  %v4832_v19 = vld [vmem:[%s7853_s1 + $0x1c8] sm:$0xf0] }
 0x147   :  { %2006 = vmatpush.bf16.msrb.mxu3 %v8205_v61  ;;  %v6902_v60 = vld [vmem:[%s7853_s1 + $0x528] sm:$0x11]  ;;  %v4327_v45 = vld [vmem:[%s7853_s1 + $0x2f8] sm:$0xf] }
 0x148   :  { %2015 = vmatpush.bf16.msra.mxu0 %v8200_v57  ;;  %v4187_v57 = vld [vmem:[%s7853_s1 + $0x1e0] sm:$0xf]  ;;  %v2572_v12 = vunpack.c.l.b16 %v6902_v60  ;;  %v4872_v38 = vld [vmem:[%s7853_s1 + $0x308] sm:$0xf0] }
 0x149   :  { %1981 = vmatpush.bf16.msrb.mxu1 %v6512_v41  ;;  %v4247_v41 = vld [vmem:[%s7853_s1 + $0x258] sm:$0xf]  ;;  %v1725_v63 = vpop.f32.mrf.mxu1  ;;  %v4188_v0 = vor.u32 %v4837_v50, %v4187_v57 }
 0x14a   :  { %1994 = vmatpush.bf16.msrb.mxu2 %v8207_v14  ;;  %v4248_v28 = vor.u32 %v4852_v4, %v4247_v41  ;;  %v1726_v29 = vadd.f32 %v1725_v63, %v6603_v32  ;;  %v4797_v32 = vld [vmem:[%s7853_s1 + $0xb0] sm:$0xf0]  ;;  %v4367_v41 = vld [vmem:[%s7853_s1 + $0x348] sm:$0xf]  ;;  %v4782_v63 = vld [vmem:[%s7853_s1 + $0x38] sm:$0xf0] }
 0x14b   :  { %2007 = vmatpush.bf16.msrb.mxu3 %v8208_v42  ;;  %v4917_v14 = vld [vmem:[%s7853_s1 + $0x470] sm:$0xf0] }
 0x14c   :  { %2016 = vmatpush.bf16.msra.mxu0 %v8203_v31  ;;  %v1694_v10 = vpop.f32.mrf.mxu0  ;;  %v4887_v31 = vld [vmem:[%s7853_s1 + $0x380] sm:$0xf0] }
 0x14d   :  { %1982 = vmatpush.bf16.msrb.mxu1 %v6528_v6  ;;  %v4067_v6 = vld [vmem:[%s7853_s1 + $0xf0] sm:$0xf]  ;;  %v3947_v10 = vld [vmem:[%s7853_s1] sm:$0xf] }
 0x14e   :  { %1995 = vmatpush.bf16.msrb.mxu2 %v6464_v37  ;;  %v4932_v37 = vld [vmem:[%s7853_s1 + $0x4e8] sm:$0xf0]  ;;  %v4068_v22 = vor.u32 %v4807_v27, %v4067_v6  ;;  %v4168_v27 = vor.u32 %v4832_v19, %v4167_v49  ;;  %v4427_v19 = vld [vmem:[%s7853_s1 + $0x3c0] sm:$0xf] }
 0x14f   :  { %3943 = vmatmul.msk.bf16.vlgmr.msrb.gmra.mxu0 %vm1349_vm4, %v6619_v54  ;;  %2008 = vmatpush.bf16.msrb.mxu3 %v6468_v18  ;;  %v4227_v18 = vld [vmem:[%s7853_s1 + $0x230] sm:$0xf] }
 0x150   :  { %2017 = vmatpush.bf16.msra.mxu0 %v8206_v2  ;;  %v4228_v23 = vor.u32 %v4847_v35, %v4227_v18  ;;  %v1738_v59 = vpop.f32.mrf.mxu2  ;;  %v4507_v2 = vld [vmem:[%s7853_s1 + $0x460] sm:$0xf]  ;;  %v4147_v18 = vld [vmem:[%s7853_s1 + $0x190] sm:$0xf]  ;;  %v4827_v35 = vld [vmem:[%s7853_s1 + $0x1a0] sm:$0xf0] }
 0x151   :  { %1983 = vmatpush.bf16.msrb.mxu1 %v6542_v7  ;;  %v4568_v7 = vor.u32 %v4932_v37, %v4567_v47  ;;  %v1751_v61 = vpop.f32.mrf.mxu3  ;;  %v1739_v13 = vadd.f32 %v1738_v59, %v1726_v29  ;;  %v1727_v42 = vpop.f32.mrf.mxu1  ;;  %v4508_v6 = vor.u32 %v4917_v14, %v4507_v2  ;;  %v4787_v47 = vld [vmem:[%s7853_s1 + $0x60] sm:$0xf0]  ;;  %v4487_v37 = vld [vmem:[%s7853_s1 + $0x438] sm:$0xf]  ;;  %v4107_v59 = vld [vmem:[%s7853_s1 + $0x140] sm:$0xf] }
 0x152   :  { %1996 = vmatpush.bf16.msrb.mxu2 %v6494_v43  ;;  %v4802_v43 = vld [vmem:[%s7853_s1 + $0xd8] sm:$0xf0]  ;;  %v4089_v2 = vld [vmem:[%s7853_s1 + $0x12c] sm:$0xf0] }
 0x153   :  { %2009 = vmatpush.bf16.msrb.mxu3 %v6504_v52  ;;  %v4547_v52 = vld [vmem:[%s7853_s1 + $0x4b0] sm:$0xf]  ;;  %v4048_v25 = vor.u32 %v4802_v43, %v4047_v39  ;;  %v1752_v4 = vadd.f32 %v1751_v61, %v1739_v13  ;;  %v4877_v39 = vld [vmem:[%s7853_s1 + $0x330] sm:$0xf0]  ;;  %v4328_v61 = vor.u32 %v4872_v38, %v4327_v45  ;;  %v4867_v13 = vld [vmem:[%s7853_s1 + $0x2e0] sm:$0xf0] }
 0x154   :  { %2018 = vmatpush.bf16.msra.mxu0 %v8209_v15  ;;  %1984 = vmatmul.bf16.vlgmr.msrb.gmra.mxu1 %v6582_v56  ;;  %v4388_v15 = vor.u32 %v4887_v31, %v4387_v26  ;;  %v4777_v31 = vld [vmem:[%s7853_s1 + $0x10] sm:$0xf0]  ;;  %v4307_v14 = vld [vmem:[%s7853_s1 + $0x2d0] sm:$0xf] }
 0x155   :  { %2034 = vmatpush.bf16.msra.mxu1 %v6545_v8  ;;  %v4927_v8 = vld [vmem:[%s7853_s1 + $0x4c0] sm:$0xf0]  ;;  %1997 = vmatmul.bf16.vlgmr.msrb.gmra.mxu2 %v6587_v58  ;;  %v3948_v42 = vor.u32 %v4777_v31, %v3947_v10  ;;  %v4249_v45 = vld [vmem:[%s7853_s1 + $0x26c] sm:$0xf0]  ;;  %v4880_v10 = vld [vmem:[%s7853_s1 + $0x34c] sm:$0xf] }
 0x156   :  { %2927 = vmatpush.bf16.msra.mxu2 %v4088_v20  ;;  %2010 = vmatmul.bf16.vlgmr.msrb.gmra.mxu3 %v6589_v5  ;;  %v4548_v34 = vor.u32 %v4927_v8, %v4547_v52  ;;  %v4008_v20 = vor.u32 %v4792_v1, %v4007_v51  ;;  %v3967_v52 = vld [vmem:[%s7853_s1 + $0x28] sm:$0xf]  ;;  %v2742_v51 = vpack.c.b16 %v2572_v12, %v2572_v12  ;;  %v4810_v1 = vld [vmem:[%s7853_s1 + $0x11c] sm:$0xf] }
 0x157   :  { %2940 = vmatpush.bf16.msra.mxu3 %v4248_v28  ;;  %v3987_v28 = vld [vmem:[%s7853_s1 + $0x50] sm:$0xf]  ;;  %v3968_v50 = vor.u32 %v4782_v63, %v3967_v52 }
 0x158   :  { %2019 = vmatpush.bf16.msra.mxu0 %v8210_v30  ;;  %v4912_v30 = vld [vmem:[%s7853_s1 + $0x448] sm:$0xf0]  ;;  %v1740_v29 = vpop.f32.mrf.mxu2 }
 0x159   :  { %2035 = vmatpush.bf16.msra.mxu1 %v6558_v16  ;;  %v4208_v16 = vor.u32 %v4842_v21, %v4207_v17  ;;  %v4488_v43 = vor.u32 %v4912_v30, %v4487_v37  ;;  %v4467_v17 = vld [vmem:[%s7853_s1 + $0x410] sm:$0xf]  ;;  %v4907_v21 = vld [vmem:[%s7853_s1 + $0x420] sm:$0xf0]  ;;  %v4308_v30 = vor.u32 %v4867_v13, %v4307_v14  ;;  %v4389_v29 = vld [vmem:[%s7853_s1 + $0x384] sm:$0xf0] }
 0x15a   :  { %2928 = vmatpush.bf16.msra.mxu2 %v4068_v22  ;;  %v4409_v37 = vld [vmem:[%s7853_s1 + $0x3ac] sm:$0xf0] }
 0x15b   :  { %2941 = vmatpush.bf16.msra.mxu3 %v4228_v23  ;;  %v3988_v23 = vor.u32 %v4787_v47, %v3987_v28  ;;  %v4092_v28 = vor.u32 %v4810_v1, %v4089_v2  ;;  %v4890_v47 = vld [vmem:[%s7853_s1 + $0x39c] sm:$0xf]  ;;  %v4229_v1 = vld [vmem:[%s7853_s1 + $0x244] sm:$0xf0] }
 0x15c   :  { %2020 = vmatpush.bf16.msra.mxu0 %v8211_v40  ;;  %v1764_v8 = vpop.f32.mrf.mxu0  ;;  %v4148_v40 = vor.u32 %v4827_v35, %v4147_v18  ;;  %v4069_v18 = vld [vmem:[%s7853_s1 + $0x104] sm:$0xf0]  ;;  %v4930_v35 = vld [vmem:[%s7853_s1 + $0x4dc] sm:$0xf] }
 0x15d   :  { %2966 = vmatpush.bf16.msrb.mxu1 %v4568_v7  ;;  %v4347_v7 = vld [vmem:[%s7853_s1 + $0x320] sm:$0xf]  ;;  %v1765_v33 = vadd.f32 %v1764_v8, %v1752_v4  ;;  %v4412_v8 = vor.u32 %v4890_v47, %v4409_v37 }
 0x15e   :  { %2929 = vmatpush.bf16.msra.mxu2 %v4048_v25  ;;  %v4127_v25 = vld [vmem:[%s7853_s1 + $0x168] sm:$0xf]  ;;  %v4587_v4 = vld [vmem:[%s7853_s1 + $0x500] sm:$0xf] }
 0x15f   :  { %2942 = vmatpush.bf16.msra.mxu3 %v4208_v16  ;;  %v4348_v16 = vor.u32 %v4877_v39, %v4347_v7  ;;  %v4287_v39 = vld [vmem:[%s7853_s1 + $0x2a8] sm:$0xf]  ;;  %v4209_v47 = vld [vmem:[%s7853_s1 + $0x21c] sm:$0xf0] }
 0x160   :  { %2021 = vmatpush.bf16.msra.mxu0 %v6470_v11  ;;  %v4028_v11 = vor.u32 %v4797_v32, %v4027_v44  ;;  %v1753_v44 = vpop.f32.mrf.mxu3  ;;  %v1777_v32 = vpop.f32.mrf.mxu1 }
 0x161   :  { %2967 = vmatpush.bf16.msrb.mxu1 %v4548_v34  ;;  %v4822_v34 = vld [vmem:[%s7853_s1 + $0x178] sm:$0xf0]  ;;  %v6937_v57 = vadd.f32 %v1777_v32, %v1765_v33  ;;  %v4049_v33 = vld [vmem:[%s7853_s1 + $0xdc] sm:$0xf0] }
 0x162   :  { %2930 = vmatpush.bf16.msra.mxu2 %v4028_v11  ;;  %v4128_v26 = vor.u32 %v4822_v34, %v4127_v25  ;;  %v4447_v11 = vld [vmem:[%s7853_s1 + $0x3e8] sm:$0xf]  ;;  %v4925_v25 = vld [vmem:[%s7853_s1 + $0x4b4] sm:$0xf]  ;;  %v4267_v44 = vld [vmem:[%s7853_s1 + $0x280] sm:$0xf] }
 0x163   :  { %2943 = vmatpush.bf16.msra.mxu3 %v4188_v0  ;;  %v4817_v0 = vld [vmem:[%s7853_s1 + $0x150] sm:$0xf0]  ;;  %v4549_v34 = vld [vmem:[%s7853_s1 + $0x4c4] sm:$0xf0]  ;;  %v4850_v32 = vld [vmem:[%s7853_s1 + $0x25c] sm:$0xf] }
 0x164   :  { %2022 = vmatpush.bf16.msra.mxu0 %v6506_v53  ;;  %v4882_v53 = vld [vmem:[%s7853_s1 + $0x358] sm:$0xf0]  ;;  %3944 = vmatmul.msk.bf16.vlgmr.msra.gmra.mxu1 %vm1349_vm4, %v6619_v54 }
 0x165   :  { %2968 = vmatpush.bf16.msrb.mxu1 %v4528_v62  ;;  %v4368_v22 = vor.u32 %v4882_v53, %v4367_v41  ;;  %v4902_v62 = vld [vmem:[%s7853_s1 + $0x3f8] sm:$0xf0]  ;;  %v2913_v41 = vand.u32 %v2742_v51, %v5246_v48  ;;  %v4897_v53 = vld [vmem:[%s7853_s1 + $0x3d0] sm:$0xf0]  ;;  %v4252_v51 = vor.u32 %v4850_v32, %v4249_v45  ;;  %v4780_v32 = vld [vmem:[%s7853_s1 + $0x2c] sm:$0xf] }
 0x166   :  { %2931 = vmatpush.bf16.msra.mxu2 %v4008_v20  ;;  %v4448_v49 = vor.u32 %v4902_v62, %v4447_v11  ;;  %v4937_v20 = vld [vmem:[%s7853_s1 + $0x510] sm:$0xf0]  ;;  %v4795_v11 = vld [vmem:[%s7853_s1 + $0xa4] sm:$0xf]  ;;  %v4029_v62 = vld [vmem:[%s7853_s1 + $0xb4] sm:$0xf0] }
 0x167   :  { %2023 = vmatmul.bf16.vlgmr.msra.gmra.mxu0 %v6612_v24  ;;  %2944 = vmatpush.bf16.msra.mxu3 %v4168_v27  ;;  %v4805_v27 = vld [vmem:[%s7853_s1 + $0xf4] sm:$0xf]  ;;  %v4588_v52 = vor.u32 %v4937_v20, %v4587_v4  ;;  %v4790_v4 = vld [vmem:[%s7853_s1 + $0x7c] sm:$0xf]  ;;  %v4009_v20 = vld [vmem:[%s7853_s1 + $0x8c] sm:$0xf0] }
 0x168   :  { %2953 = vmatpush.bf16.msrb.mxu0 %v4408_v9  ;;  %v4468_v9 = vor.u32 %v4907_v21, %v4467_v17  ;;  %v1779_v7 = vpop.f32.mrf.mxu1  ;;  %v4800_v17 = vld [vmem:[%s7853_s1 + $0xcc] sm:$0xf]  ;;  %v4885_v21 = vld [vmem:[%s7853_s1 + $0x374] sm:$0xf]  ;;  %v3969_v45 = vld [vmem:[%s7853_s1 + $0x3c] sm:$0xf0] }
 0x169   :  { %2969 = vmatpush.bf16.msrb.mxu1 %v4508_v6  ;;  %v1766_v6 = vpop.f32.mrf.mxu0  ;;  %v4392_v38 = vor.u32 %v4885_v21, %v4389_v29 }
 0x16a   :  { %2932 = vmatpush.bf16.msra.mxu2 %v3988_v23  ;;  %v4862_v23 = vld [vmem:[%s7853_s1 + $0x2b8] sm:$0xf0] }
 0x16b   :  { %2945 = vmatpush.bf16.msra.mxu3 %v4148_v40  ;;  %v4072_v40 = vor.u32 %v4805_v27, %v4069_v18  ;;  %v4288_v12 = vor.u32 %v4862_v23, %v4287_v39  ;;  %v4840_v27 = vld [vmem:[%s7853_s1 + $0x20c] sm:$0xf]  ;;  %v4012_v18 = vor.u32 %v4790_v4, %v4009_v20  ;;  %v4785_v39 = vld [vmem:[%s7853_s1 + $0x54] sm:$0xf]  ;;  %v3989_v23 = vld [vmem:[%s7853_s1 + $0x64] sm:$0xf0] }
 0x16c   :  { %2954 = vmatpush.bf16.msrb.mxu0 %v4388_v15  ;;  %v4108_v15 = vor.u32 %v4817_v0, %v4107_v59  ;;  %v4920_v59 = vld [vmem:[%s7853_s1 + $0x48c] sm:$0xf]  ;;  %v4529_v0 = vld [vmem:[%s7853_s1 + $0x49c] sm:$0xf0]  ;;  %v4855_v4 = vld [vmem:[%s7853_s1 + $0x284] sm:$0xf] }
 0x16d   :  { %2970 = vmatpush.bf16.msrb.mxu1 %v4488_v43  ;;  %v4428_v43 = vor.u32 %v4897_v53, %v4427_v19  ;;  %v4349_v19 = vld [vmem:[%s7853_s1 + $0x334] sm:$0xf0] }
 0x16e   :  { %2933 = vmatpush.bf16.msra.mxu2 %v3968_v50  ;;  %v4052_v50 = vor.u32 %v4800_v17, %v4049_v33  ;;  %v3992_v33 = vor.u32 %v4785_v39, %v3989_v23  ;;  %v4269_v20 = vld [vmem:[%s7853_s1 + $0x294] sm:$0xf0] }
 0x16f   :  { %2946 = vmatpush.bf16.msra.mxu3 %v4128_v26  ;;  %v4369_v26 = vld [vmem:[%s7853_s1 + $0x35c] sm:$0xf0]  ;;  %v4589_v39 = vld [vmem:[%s7853_s1 + $0x514] sm:$0xf0] }
 0x170   :  { %2955 = vmatpush.bf16.msrb.mxu0 %v4368_v22  ;;  %v4569_v22 = vld [vmem:[%s7853_s1 + $0x4ec] sm:$0xf0]  ;;  %v4372_v2 = vor.u32 %v4880_v10, %v4369_v26  ;;  %v1790_v13 = vpop.f32.mrf.mxu2  ;;  %v4905_v10 = vld [vmem:[%s7853_s1 + $0x414] sm:$0xf]  ;;  %v4469_v26 = vld [vmem:[%s7853_s1 + $0x424] sm:$0xf0] }
 0x171   :  { %2971 = vmatpush.bf16.msrb.mxu1 %v4468_v9  ;;  %v4572_v63 = vor.u32 %v4930_v35, %v4569_v22  ;;  %v4552_v9 = vor.u32 %v4925_v25, %v4549_v34  ;;  %v1829_v14 = vpop.f32.mrf.mxu1  ;;  %v1803_v53 = vpop.f32.mrf.mxu3  ;;  %v4870_v35 = vld [vmem:[%s7853_s1 + $0x2fc] sm:$0xf]  ;;  %v4329_v22 = vld [vmem:[%s7853_s1 + $0x30c] sm:$0xf0]  ;;  %v4865_v25 = vld [vmem:[%s7853_s1 + $0x2d4] sm:$0xf] }
 0x172   :  { %2934 = vmatpush.bf16.msra.mxu2 %v3948_v42  ;;  %v4032_v42 = vor.u32 %v4795_v11, %v4029_v62  ;;  %v4332_v17 = vor.u32 %v4870_v35, %v4329_v22  ;;  %v4309_v34 = vld [vmem:[%s7853_s1 + $0x2e4] sm:$0xf0]  ;;  %v4830_v11 = vld [vmem:[%s7853_s1 + $0x1bc] sm:$0xf]  ;;  %v4429_v22 = vld [vmem:[%s7853_s1 + $0x3d4] sm:$0xf0] }
 0x173   :  { %2947 = vmatpush.bf16.msra.mxu3 %v4108_v15  ;;  %v1791_v15 = vadd.f32 %v1790_v13, %v6632_v46  ;;  %v4509_v46 = vld [vmem:[%s7853_s1 + $0x474] sm:$0xf0]  ;;  %v4312_v62 = vor.u32 %v4865_v25, %v4309_v34  ;;  %v4848_v25 = vld [vmem:[%s7853_s1 + $0x248] sm:$0xf0] }
 0x174   :  { %2956 = vmatpush.bf16.msrb.mxu0 %v4348_v16  ;;  %v4857_v16 = vld [vmem:[%s7853_s1 + $0x290] sm:$0xf0] }
 0x175   :  { %2972 = vmatpush.bf16.msrb.mxu1 %v4448_v49  ;;  %2935 = vmatmul.bf16.vlgmr.msra.gmra.mxu2 %v6582_v56  ;;  %v4268_v31 = vor.u32 %v4857_v16, %v4267_v44  ;;  %v4875_v49 = vld [vmem:[%s7853_s1 + $0x324] sm:$0xf]  ;;  %v1804_v37 = vadd.f32 %v1803_v53, %v1791_v15  ;;  %v4149_v15 = vld [vmem:[%s7853_s1 + $0x1a4] sm:$0xf0] }
 0x176   :  { %2985 = vmatpush.bf16.msrb.mxu2 %v2913_v41  ;;  %2948 = vmatmul.bf16.vlgmr.msra.gmra.mxu3 %v6587_v58  ;;  %v4532_v41 = vor.u32 %v4920_v59, %v4529_v0  ;;  %v4860_v59 = vld [vmem:[%s7853_s1 + $0x2ac] sm:$0xf]  ;;  %v4289_v0 = vld [vmem:[%s7853_s1 + $0x2bc] sm:$0xf0] }
 0x177   :  { %2992 = vmatpush.bf16.msrb.mxu3 %v4092_v28  ;;  %v4915_v28 = vld [vmem:[%s7853_s1 + $0x464] sm:$0xf] }
 0x178   :  { %2957 = vmatpush.bf16.msrb.mxu0 %v4328_v61  ;;  %v4845_v61 = vld [vmem:[%s7853_s1 + $0x234] sm:$0xf]  ;;  %v4512_v7 = vor.u32 %v4915_v28, %v4509_v46  ;;  %v4820_v28 = vld [vmem:[%s7853_s1 + $0x16c] sm:$0xf] }
 0x179   :  { %2973 = vmatpush.bf16.msrb.mxu1 %v4428_v43  ;;  %v4232_v6 = vor.u32 %v4845_v61, %v4229_v1  ;;  %v4212_v43 = vor.u32 %v4840_v27, %v4209_v47  ;;  %v1831_v21 = vpop.f32.mrf.mxu1  ;;  %v4472_v61 = vor.u32 %v4905_v10, %v4469_v26  ;;  %v4775_v1 = vld [vmem:[%s7853_s1 + $0x4] sm:$0xf]  ;;  %v4813_v10 = vld [vmem:[%s7853_s1 + $0x130] sm:$0xf0] }
 0x17a   :  { %2986 = vmatpush.bf16.msrb.mxu2 %v4588_v52  ;;  %v4910_v52 = vld [vmem:[%s7853_s1 + $0x43c] sm:$0xf]  ;;  %v4895_v47 = vld [vmem:[%s7853_s1 + $0x3c4] sm:$0xf]  ;;  %v4933_v21 = vld [vmem:[%s7853_s1 + $0x4f0] sm:$0xf0] }
 0x17b   :  { %2993 = vmatpush.bf16.msrb.mxu3 %v4072_v40  ;;  %v4835_v40 = vld [vmem:[%s7853_s1 + $0x1e4] sm:$0xf] }
 0x17c   :  { %2958 = vmatpush.bf16.msrb.mxu0 %v4308_v30  ;;  %2974 = vmatmul.bf16.vlgmr.msrb.gmra.mxu1 %v6612_v24  ;;  %v4352_v30 = vor.u32 %v4875_v49, %v4349_v19  ;;  %v1816_v29 = vpop.f32.mrf.mxu0  ;;  %v4449_v49 = vld [vmem:[%s7853_s1 + $0x3fc] sm:$0xf0]  ;;  %v4825_v19 = vld [vmem:[%s7853_s1 + $0x194] sm:$0xf] }
 0x17d   :  { %3018 = vmatpush.bf16.msra.mxu1 %v4412_v8  ;;  %v4489_v8 = vld [vmem:[%s7853_s1 + $0x44c] sm:$0xf0]  ;;  %v1817_v44 = vadd.f32 %v1816_v29, %v1804_v37  ;;  %v4255_v37 = vld [vmem:[%s7853_s1 + $0x260] sm:$0xf]  ;;  %v4432_v29 = vor.u32 %v4895_v47, %v4429_v22  ;;  %v4355_v47 = vld [vmem:[%s7853_s1 + $0x328] sm:$0xf] }
 0x17e   :  { %3031 = vmatpush.bf16.msra.mxu2 %v4572_v63  ;;  %v4189_v63 = vld [vmem:[%s7853_s1 + $0x1f4] sm:$0xf0]  ;;  %v4492_v16 = vor.u32 %v4910_v52, %v4489_v8  ;;  %v4272_v52 = vor.u32 %v4855_v4, %v4269_v20  ;;  %v4415_v8 = vld [vmem:[%s7853_s1 + $0x3a0] sm:$0xf]  ;;  %v4515_v22 = vld [vmem:[%s7853_s1 + $0x468] sm:$0xf] }
 0x17f   :  { %2994 = vmatpush.bf16.msrb.mxu3 %v4052_v50  ;;  %v1805_v50 = vpop.f32.mrf.mxu3 }
 0x180   :  { %2959 = vmatpush.bf16.msrb.mxu0 %v4288_v12  ;;  %v1792_v12 = vpop.f32.mrf.mxu2  ;;  %v4395_v50 = vld [vmem:[%s7853_s1 + $0x378] sm:$0xf] }
 0x181   :  { %3019 = vmatpush.bf16.msra.mxu1 %v4392_v38  ;;  %v2573_v38 = vunpack.c.h.b16 %v6902_v60  ;;  %v4169_v60 = vld [vmem:[%s7853_s1 + $0x1cc] sm:$0xf0] }
 0x182   :  { %3032 = vmatpush.bf16.msra.mxu2 %v4552_v9  ;;  %v4192_v9 = vor.u32 %v4835_v40, %v4189_v63  ;;  %v4172_v13 = vor.u32 %v4830_v11, %v4169_v60  ;;  %v4893_v40 = vld [vmem:[%s7853_s1 + $0x3b0] sm:$0xf0]  ;;  %v4928_v11 = vld [vmem:[%s7853_s1 + $0x4c8] sm:$0xf0]  ;;  %v4215_v60 = vld [vmem:[%s7853_s1 + $0x210] sm:$0xf] }
 0x183   :  { %2995 = vmatpush.bf16.msrb.mxu3 %v4032_v42  ;;  %v4900_v42 = vld [vmem:[%s7853_s1 + $0x3ec] sm:$0xf] }
 0x184   :  { %2960 = vmatpush.bf16.msrb.mxu0 %v4268_v31  ;;  %v1830_v31 = vadd.f32 %v1829_v14, %v1817_v44  ;;  %v2743_v14 = vpack.c.b16 %v2573_v38, %v2573_v38  ;;  %v4452_v46 = vor.u32 %v4900_v42, %v4449_v49  ;;  %v4815_v44 = vld [vmem:[%s7853_s1 + $0x144] sm:$0xf]  ;;  %v4808_v42 = vld [vmem:[%s7853_s1 + $0x108] sm:$0xf0] }
 0x185   :  { %3020 = vmatpush.bf16.msra.mxu1 %v4372_v2  ;;  %4605 = vmatmul.msk.bf16.vlgmr.msrb.gmra.mxu2 %vm1349_vm4, %v6619_v54  ;;  %v3949_v2 = vld [vmem:[%s7853_s1 + $0x14] sm:$0xf0] }
 0x186   :  { %3033 = vmatpush.bf16.msra.mxu2 %v4532_v41  ;;  %v4292_v41 = vor.u32 %v4860_v59, %v4289_v0  ;;  %v3952_v53 = vor.u32 %v4775_v1, %v3949_v2  ;;  %v2916_v27 = vand.u32 %v2743_v14, %v5246_v48  ;;  %v4075_v1 = vld [vmem:[%s7853_s1 + $0xf8] sm:$0xf]  ;;  %v4375_v14 = vld [vmem:[%s7853_s1 + $0x350] sm:$0xf] }
 0x187   :  { %2961 = vmatmul.bf16.vlgmr.msrb.gmra.mxu0 %v6589_v5  ;;  %2996 = vmatpush.bf16.msrb.mxu3 %v4012_v18  ;;  %v4152_v18 = vor.u32 %v4825_v19, %v4149_v15  ;;  %v4535_v19 = vld [vmem:[%s7853_s1 + $0x490] sm:$0xf]  ;;  %v4923_v15 = vld [vmem:[%s7853_s1 + $0x4a0] sm:$0xf0]  ;;  %v4076_v20 = vor.u32 %v4808_v42, %v4075_v1  ;;  %v3995_v42 = vld [vmem:[%s7853_s1 + $0x58] sm:$0xf] }
 0x188   :  { %3005 = vmatpush.bf16.msra.mxu0 %v4252_v51  ;;  %v3972_v51 = vor.u32 %v4780_v32, %v3969_v45  ;;  %v1842_v35 = vpop.f32.mrf.mxu2  ;;  %v4416_v32 = vor.u32 %v4893_v40, %v4415_v8  ;;  %v4095_v45 = vld [vmem:[%s7853_s1 + $0x120] sm:$0xf]  ;;  %v4035_v8 = vld [vmem:[%s7853_s1 + $0xa8] sm:$0xf]  ;;  %v4823_v1 = vld [vmem:[%s7853_s1 + $0x180] sm:$0xf0] }
 0x189   :  { %3021 = vmatpush.bf16.msra.mxu1 %v4352_v30  ;;  %v4853_v30 = vld [vmem:[%s7853_s1 + $0x270] sm:$0xf0]  ;;  %v7192_v23 = vadd.f32 %v1842_v35, %v1830_v31  ;;  %v4555_v31 = vld [vmem:[%s7853_s1 + $0x4b8] sm:$0xf] }
 0x18a   :  { %3034 = vmatpush.bf16.msra.mxu2 %v4512_v7  ;;  %v4935_v7 = vld [vmem:[%s7853_s1 + $0x504] sm:$0xf]  ;;  %v4256_v63 = vor.u32 %v4853_v30, %v4255_v37  ;;  %v4556_v2 = vor.u32 %v4928_v11, %v4555_v31  ;;  %v4878_v37 = vld [vmem:[%s7853_s1 + $0x338] sm:$0xf0]  ;;  %v4868_v31 = vld [vmem:[%s7853_s1 + $0x2e8] sm:$0xf0] }
 0x18b   :  { %2997 = vmatpush.bf16.msrb.mxu3 %v3992_v33  ;;  %v4592_v12 = vor.u32 %v4935_v7, %v4589_v39  ;;  %v4235_v33 = vld [vmem:[%s7853_s1 + $0x238] sm:$0xf]  ;;  %v4918_v7 = vld [vmem:[%s7853_s1 + $0x478] sm:$0xf0]  ;;  %v4833_v39 = vld [vmem:[%s7853_s1 + $0x1d0] sm:$0xf0] }
 0x18c   :  { %3006 = vmatpush.bf16.msra.mxu0 %v4232_v6  ;;  %v1818_v6 = vpop.f32.mrf.mxu0  ;;  %v4236_v26 = vor.u32 %v4848_v25, %v4235_v33  ;;  %v4516_v40 = vor.u32 %v4918_v7, %v4515_v22  ;;  %v4495_v33 = vld [vmem:[%s7853_s1 + $0x440] sm:$0xf]  ;;  %v4913_v25 = vld [vmem:[%s7853_s1 + $0x450] sm:$0xf0] }
 0x18d   :  { %3022 = vmatpush.bf16.msra.mxu1 %v4332_v17  ;;  %v4575_v17 = vld [vmem:[%s7853_s1 + $0x4e0] sm:$0xf] }
 0x18e   :  { %3035 = vmatpush.bf16.msra.mxu2 %v4492_v16  ;;  %v4109_v16 = vld [vmem:[%s7853_s1 + $0x154] sm:$0xf0]  ;;  %v4576_v38 = vor.u32 %v4933_v21, %v4575_v17  ;;  %v4873_v17 = vld [vmem:[%s7853_s1 + $0x310] sm:$0xf0]  ;;  %v4798_v21 = vld [vmem:[%s7853_s1 + $0xb8] sm:$0xf0] }
 0x18f   :  { %2998 = vmatpush.bf16.msrb.mxu3 %v3972_v51  ;;  %v4112_v51 = vor.u32 %v4815_v44, %v4109_v16  ;;  %v4155_v44 = vld [vmem:[%s7853_s1 + $0x198] sm:$0xf]  ;;  %v4828_v16 = vld [vmem:[%s7853_s1 + $0x1a8] sm:$0xf0] }
 0x190   :  { %3007 = vmatpush.bf16.msra.mxu0 %v4212_v43  ;;  %v4129_v43 = vld [vmem:[%s7853_s1 + $0x17c] sm:$0xf0]  ;;  %v1844_v0 = vpop.f32.mrf.mxu2 }
 0x191   :  { %3023 = vmatpush.bf16.msra.mxu1 %v4312_v62  ;;  %v4132_v34 = vor.u32 %v4820_v28, %v4129_v43  ;;  %v4843_v62 = vld [vmem:[%s7853_s1 + $0x220] sm:$0xf0]  ;;  %v1855_v6 = vpop.f32.mrf.mxu3  ;;  %v4055_v28 = vld [vmem:[%s7853_s1 + $0xd0] sm:$0xf]  ;;  %v4356_v43 = vor.u32 %v4878_v37, %v4355_v47  ;;  %v4908_v0 = vld [vmem:[%s7853_s1 + $0x428] sm:$0xf0] }
 0x192   :  { %3036 = vmatpush.bf16.msra.mxu2 %v4472_v61  ;;  %v4096_v61 = vor.u32 %v4813_v10, %v4095_v45  ;;  %v4216_v49 = vor.u32 %v4843_v62, %v4215_v60  ;;  %v1856_v30 = vadd.f32 %v1855_v6, %v6675_v55  ;;  %v4175_v55 = vld [vmem:[%s7853_s1 + $0x1c0] sm:$0xf]  ;;  %v4496_v10 = vor.u32 %v4913_v25, %v4495_v33  ;;  %v4793_v62 = vld [vmem:[%s7853_s1 + $0x90] sm:$0xf0]  ;;  %v3975_v37 = vld [vmem:[%s7853_s1 + $0x30] sm:$0xf] }
 0x193   :  { %2999 = vmatpush.bf16.msrb.mxu3 %v3952_v53  ;;  %v4838_v53 = vld [vmem:[%s7853_s1 + $0x1f8] sm:$0xf0]  ;;  %v7375_v47 = vld [vmem:[%s7853_s1 + $0x530] sm:$0x11]  ;;  %v4257_v33 = vld [vmem:[%s7853_s1 + $0x274] sm:$0xf0] }
 0x194   :  { %3008 = vmatpush.bf16.msra.mxu0 %v4192_v9  ;;  %v4888_v9 = vld [vmem:[%s7853_s1 + $0x388] sm:$0xf0]  ;;  %v4891_v25 = vld [vmem:[%s7853_s1 + $0x3a4] sm:$0xf] }
 0x195   :  { %3024 = vmatpush.bf16.msra.mxu1 %v4292_v41  ;;  %v4396_v59 = vor.u32 %v4888_v9, %v4395_v50  ;;  %v4195_v41 = vld [vmem:[%s7853_s1 + $0x1e8] sm:$0xf]  ;;  %v4015_v9 = vld [vmem:[%s7853_s1 + $0x80] sm:$0xf] }
 0x196   :  { %3037 = vmatpush.bf16.msra.mxu2 %v4452_v46  ;;  %3000 = vmatmul.bf16.vlgmr.msrb.gmra.mxu3 %v6582_v56  ;;  %v4536_v46 = vor.u32 %v4923_v15, %v4535_v19  ;;  %v4196_v35 = vor.u32 %v4838_v53, %v4195_v41  ;;  %v4295_v19 = vld [vmem:[%s7853_s1 + $0x2b0] sm:$0xf]  ;;  %v4863_v15 = vld [vmem:[%s7853_s1 + $0x2c0] sm:$0xf0]  ;;  %v4788_v41 = vld [vmem:[%s7853_s1 + $0x68] sm:$0xf0] }
 0x197   :  { %3050 = vmatpush.bf16.msra.mxu3 %v2916_v27  ;;  %v1881_v27 = vpop.f32.mrf.mxu1  ;;  %v3996_v22 = vor.u32 %v4788_v41, %v3995_v42  ;;  %v4595_v42 = vld [vmem:[%s7853_s1 + $0x508] sm:$0xf]  ;;  %v4841_v41 = vld [vmem:[%s7853_s1 + $0x214] sm:$0xf] }
 0x198   :  { %3009 = vmatpush.bf16.msra.mxu0 %v4172_v13  ;;  %v4883_v13 = vld [vmem:[%s7853_s1 + $0x360] sm:$0xf0] }
 0x199   :  { %3025 = vmatpush.bf16.msra.mxu1 %v4272_v52  ;;  %v4376_v4 = vor.u32 %v4883_v13, %v4375_v14  ;;  %v1857_v50 = vpop.f32.mrf.mxu3  ;;  %v4016_v13 = vor.u32 %v4793_v62, %v4015_v9  ;;  %v4778_v9 = vld [vmem:[%s7853_s1 + $0x18] sm:$0xf0]  ;;  %v4237_v62 = vld [vmem:[%s7853_s1 + $0x24c] sm:$0xf0] }
 0x19a   :  { %3038 = vmatpush.bf16.msra.mxu2 %v4432_v29  ;;  %v1894_v29 = vpop.f32.mrf.mxu2  ;;  %v3955_v50 = vld [vmem:[%s7853_s1 + $0x8] sm:$0xf] }
 0x19b   :  { %3051 = vmatpush.bf16.msra.mxu3 %v4592_v12  ;;  %v4176_v12 = vor.u32 %v4833_v39, %v4175_v55  ;;  %v4783_v55 = vld [vmem:[%s7853_s1 + $0x40] sm:$0xf0] }
 0x19c   :  { %3010 = vmatpush.bf16.msra.mxu0 %v4152_v18  ;;  %3026 = vmatmul.bf16.vlgmr.msra.gmra.mxu1 %v6589_v5  ;;  %v4803_v18 = vld [vmem:[%s7853_s1 + $0xe0] sm:$0xf0] }
 0x19d   :  { %3070 = vmatpush.bf16.msrb.mxu1 %v4256_v63  ;;  %3039 = vmatmul.bf16.vlgmr.msra.gmra.mxu2 %v6612_v24  ;;  %v4056_v52 = vor.u32 %v4803_v18, %v4055_v28  ;;  %v4335_v63 = vld [vmem:[%s7853_s1 + $0x300] sm:$0xf]  ;;  %v4811_v18 = vld [vmem:[%s7853_s1 + $0x124] sm:$0xf] }
 0x19e   :  { %3083 = vmatpush.bf16.msrb.mxu2 %v4416_v32  ;;  %v4336_v45 = vor.u32 %v4873_v17, %v4335_v63  ;;  %v4435_v63 = vld [vmem:[%s7853_s1 + $0x3c8] sm:$0xf]  ;;  %v4898_v17 = vld [vmem:[%s7853_s1 + $0x3d8] sm:$0xf0] }
 0x19f   :  { %3096 = vmatpush.bf16.msrb.mxu3 %v4576_v38  ;;  %v4036_v38 = vor.u32 %v4798_v21, %v4035_v8  ;;  %v1883_v11 = vpop.f32.mrf.mxu1  ;;  %v4851_v21 = vld [vmem:[%s7853_s1 + $0x264] sm:$0xf] }
 0x1a0   :  { %3011 = vmatpush.bf16.msra.mxu0 %v4132_v34  ;;  %v1868_v34 = vpop.f32.mrf.mxu0 }
 0x1a1   :  { %3071 = vmatpush.bf16.msrb.mxu1 %v4236_v26  ;;  %v1869_v32 = vadd.f32 %v1868_v34, %v1856_v30  ;;  %v4315_v26 = vld [vmem:[%s7853_s1 + $0x2d8] sm:$0xf]  ;;  %v4296_v30 = vor.u32 %v4863_v15, %v4295_v19  ;;  %v1907_v7 = vpop.f32.mrf.mxu3 }
 0x1a2   :  { %3084 = vmatpush.bf16.msrb.mxu2 %v4396_v59  ;;  %v4475_v59 = vld [vmem:[%s7853_s1 + $0x418] sm:$0xf]  ;;  %v4316_v14 = vor.u32 %v4868_v31, %v4315_v26  ;;  %v1896_v6 = vpop.f32.mrf.mxu2 }
 0x1a3   :  { %3097 = vmatpush.bf16.msrb.mxu3 %v4556_v2  ;;  %v1882_v60 = vadd.f32 %v1881_v27, %v1869_v32  ;;  %v4818_v27 = vld [vmem:[%s7853_s1 + $0x158] sm:$0xf0]  ;;  %v4417_v34 = vld [vmem:[%s7853_s1 + $0x3b4] sm:$0xf0]  ;;  %v4077_v32 = vld [vmem:[%s7853_s1 + $0x10c] sm:$0xf0] }
 0x1a4   :  { %3012 = vmatpush.bf16.msra.mxu0 %v4112_v51  ;;  %v4156_v51 = vor.u32 %v4828_v16, %v4155_v44  ;;  %v4806_v16 = vld [vmem:[%s7853_s1 + $0xfc] sm:$0xf]  ;;  %v4420_v26 = vor.u32 %v4891_v25, %v4417_v34  ;;  %v4931_v6 = vld [vmem:[%s7853_s1 + $0x4e4] sm:$0xf]  ;;  %v4177_v34 = vld [vmem:[%s7853_s1 + $0x1d4] sm:$0xf0] }
 0x1a5   :  { %3072 = vmatpush.bf16.msrb.mxu1 %v4216_v49  ;;  %v1895_v2 = vadd.f32 %v1894_v29, %v1882_v60  ;;  %v4476_v49 = vor.u32 %v4908_v0, %v4475_v59  ;;  %v2574_v29 = vunpack.c.l.b16 %v7375_v47  ;;  %v4080_v11 = vor.u32 %v4806_v16, %v4077_v32  ;;  %v4846_v60 = vld [vmem:[%s7853_s1 + $0x23c] sm:$0xf]  ;;  %v4397_v59 = vld [vmem:[%s7853_s1 + $0x38c] sm:$0xf0]  ;;  %v4801_v0 = vld [vmem:[%s7853_s1 + $0xd4] sm:$0xf] }
 0x1a6   :  { %3085 = vmatpush.bf16.msrb.mxu2 %v4376_v4  ;;  %4606 = vmatmul.msk.bf16.vlgmr.msra.gmra.mxu3 %vm1349_vm4, %v6619_v54  ;;  %v4455_v4 = vld [vmem:[%s7853_s1 + $0x3f0] sm:$0xf]  ;;  %v4831_v25 = vld [vmem:[%s7853_s1 + $0x1c4] sm:$0xf] }
 0x1a7   :  { %3013 = vmatmul.bf16.vlgmr.msra.gmra.mxu0 %v6587_v58  ;;  %3098 = vmatpush.bf16.msrb.mxu3 %v4536_v46  ;;  %v4115_v46 = vld [vmem:[%s7853_s1 + $0x148] sm:$0xf]  ;;  %v7395_v8 = vadd.f32 %v1907_v7, %v1895_v2  ;;  %v2744_v31 = vpack.c.b16 %v2574_v29, %v2574_v29  ;;  %v4836_v7 = vld [vmem:[%s7853_s1 + $0x1ec] sm:$0xf] }
 0x1a8   :  { %3057 = vmatpush.bf16.msrb.mxu0 %v4096_v61  ;;  %v4135_v61 = vld [vmem:[%s7853_s1 + $0x170] sm:$0xf]  ;;  %v1870_v28 = vpop.f32.mrf.mxu0 }
 0x1a9   :  { %3073 = vmatpush.bf16.msrb.mxu1 %v4196_v35  ;;  %v4136_v53 = vor.u32 %v4823_v1, %v4135_v61  ;;  %v4097_v35 = vld [vmem:[%s7853_s1 + $0x134] sm:$0xf0]  ;;  %v4057_v61 = vld [vmem:[%s7853_s1 + $0xe4] sm:$0xf0]  ;;  %v3956_v1 = vor.u32 %v4778_v9, %v3955_v50  ;;  %v1909_v2 = vpop.f32.mrf.mxu3  ;;  %v4921_v50 = vld [vmem:[%s7853_s1 + $0x494] sm:$0xf] }
 0x1aa   :  { %3086 = vmatpush.bf16.msrb.mxu2 %v4356_v43  ;;  %v4275_v43 = vld [vmem:[%s7853_s1 + $0x288] sm:$0xf]  ;;  %v4060_v15 = vor.u32 %v4801_v0, %v4057_v61  ;;  %v4577_v28 = vld [vmem:[%s7853_s1 + $0x4f4] sm:$0xf0]  ;;  %v4157_v61 = vld [vmem:[%s7853_s1 + $0x1ac] sm:$0xf0] }
 0x1ab   :  { %3099 = vmatpush.bf16.msrb.mxu3 %v4516_v40  ;;  %v4116_v40 = vor.u32 %v4818_v27, %v4115_v46  ;;  %v4796_v46 = vld [vmem:[%s7853_s1 + $0xac] sm:$0xf]  ;;  %v4037_v27 = vld [vmem:[%s7853_s1 + $0xbc] sm:$0xf0]  ;;  %v4537_v9 = vld [vmem:[%s7853_s1 + $0x4a4] sm:$0xf0] }
 0x1ac   :  { %3058 = vmatpush.bf16.msrb.mxu0 %v4076_v20  ;;  %v4903_v20 = vld [vmem:[%s7853_s1 + $0x400] sm:$0xf0]  ;;  %v4540_v0 = vor.u32 %v4921_v50, %v4537_v9  ;;  %v4901_v9 = vld [vmem:[%s7853_s1 + $0x3f4] sm:$0xf] }
 0x1ad   :  { %3074 = vmatpush.bf16.msrb.mxu1 %v4176_v12  ;;  %v4456_v39 = vor.u32 %v4903_v20, %v4455_v4  ;;  %v4100_v12 = vor.u32 %v4811_v18, %v4097_v35  ;;  %v4881_v4 = vld [vmem:[%s7853_s1 + $0x354] sm:$0xf]  ;;  %v4377_v20 = vld [vmem:[%s7853_s1 + $0x364] sm:$0xf0] }
 0x1ae   :  { %3087 = vmatpush.bf16.msrb.mxu2 %v4336_v45  ;;  %v3976_v45 = vor.u32 %v4783_v55, %v3975_v37  ;;  %v4380_v35 = vor.u32 %v4881_v4, %v4377_v20  ;;  %v4197_v55 = vld [vmem:[%s7853_s1 + $0x1fc] sm:$0xf0] }
 0x1af   :  { %3100 = vmatpush.bf16.msrb.mxu3 %v4496_v10  ;;  %v4260_v10 = vor.u32 %v4851_v21, %v4257_v33  ;;  %v4017_v21 = vld [vmem:[%s7853_s1 + $0x94] sm:$0xf0]  ;;  %v4200_v29 = vor.u32 %v4836_v7, %v4197_v55  ;;  %v4776_v7 = vld [vmem:[%s7853_s1 + $0xc] sm:$0xf]  ;;  %v3957_v55 = vld [vmem:[%s7853_s1 + $0x1c] sm:$0xf0] }
 0x1b0   :  { %3059 = vmatpush.bf16.msrb.mxu0 %v4056_v52  ;;  %v4858_v52 = vld [vmem:[%s7853_s1 + $0x298] sm:$0xf0] }
 0x1b1   :  { %3075 = vmatpush.bf16.msrb.mxu1 %v4156_v51  ;;  %v4276_v44 = vor.u32 %v4858_v52, %v4275_v43  ;;  %v4886_v51 = vld [vmem:[%s7853_s1 + $0x37c] sm:$0xf]  ;;  %v4040_v43 = vor.u32 %v4796_v46, %v4037_v27  ;;  %v4357_v52 = vld [vmem:[%s7853_s1 + $0x33c] sm:$0xf0]  ;;  %v4137_v46 = vld [vmem:[%s7853_s1 + $0x184] sm:$0xf0] }
 0x1b2   :  { %3088 = vmatpush.bf16.msrb.mxu2 %v4316_v14  ;;  %v2919_v14 = vand.u32 %v2744_v31, %v5246_v48  ;;  %v4400_v19 = vor.u32 %v4886_v51, %v4397_v59  ;;  %v4786_v31 = vld [vmem:[%s7853_s1 + $0x5c] sm:$0xf]  ;;  %v4861_v27 = vld [vmem:[%s7853_s1 + $0x2b4] sm:$0xf] }
 0x1b3   :  { %3101 = vmatpush.bf16.msrb.mxu3 %v4476_v49  ;;  %v4938_v49 = vld [vmem:[%s7853_s1 + $0x518] sm:$0xf0] }
 0x1b4   :  { %3060 = vmatpush.bf16.msrb.mxu0 %v4036_v38  ;;  %v4436_v38 = vor.u32 %v4898_v17, %v4435_v63  ;;  %v4596_v37 = vor.u32 %v4938_v49, %v4595_v42  ;;  %v4557_v63 = vld [vmem:[%s7853_s1 + $0x4cc] sm:$0xf0]  ;;  %v4791_v17 = vld [vmem:[%s7853_s1 + $0x84] sm:$0xf]  ;;  %v4517_v42 = vld [vmem:[%s7853_s1 + $0x47c] sm:$0xf0] }
 0x1b5   :  { %3076 = vmatpush.bf16.msrb.mxu1 %v4136_v53  ;;  %v4217_v53 = vld [vmem:[%s7853_s1 + $0x224] sm:$0xf0] }
 0x1b6   :  { %3089 = vmatpush.bf16.msrb.mxu2 %v4296_v30  ;;  %v1933_v30 = vpop.f32.mrf.mxu1  ;;  %v4220_v18 = vor.u32 %v4841_v41, %v4217_v53  ;;  %v2575_v41 = vunpack.c.h.b16 %v7375_v47 }
 0x1b7   :  { %3102 = vmatpush.bf16.msrb.mxu3 %v4456_v39  ;;  %v4876_v39 = vld [vmem:[%s7853_s1 + $0x32c] sm:$0xf] }
 0x1b8   :  { %3061 = vmatpush.bf16.msrb.mxu0 %v4016_v13  ;;  %v4240_v13 = vor.u32 %v4846_v60, %v4237_v62  ;;  %v1946_v32 = vpop.f32.mrf.mxu2  ;;  %v4180_v60 = vor.u32 %v4831_v25, %v4177_v34  ;;  %v4906_v25 = vld [vmem:[%s7853_s1 + $0x41c] sm:$0xf]  ;;  %v4477_v34 = vld [vmem:[%s7853_s1 + $0x42c] sm:$0xf0] }
 0x1b9   :  { %3077 = vmatpush.bf16.msrb.mxu1 %v4116_v40  ;;  %v4926_v40 = vld [vmem:[%s7853_s1 + $0x4bc] sm:$0xf] }
 0x1ba   :  { %3090 = vmatpush.bf16.msrb.mxu2 %v4276_v44  ;;  %v4560_v33 = vor.u32 %v4926_v40, %v4557_v63  ;;  %v4871_v44 = vld [vmem:[%s7853_s1 + $0x304] sm:$0xf]  ;;  %v4816_v40 = vld [vmem:[%s7853_s1 + $0x14c] sm:$0xf] }
 0x1bb   :  { %3103 = vmatpush.bf16.msrb.mxu3 %v4436_v38  ;;  %v4337_v38 = vld [vmem:[%s7853_s1 + $0x314] sm:$0xf0] }
 0x1bc   :  { %3062 = vmatpush.bf16.msrb.mxu0 %v3996_v22  ;;  %3078 = vmatmul.bf16.vlgmr.msrb.gmra.mxu1 %v6587_v58  ;;  %v4580_v22 = vor.u32 %v4931_v6, %v4577_v28  ;;  %v1920_v16 = vpop.f32.mrf.mxu0  ;;  %v4340_v59 = vor.u32 %v4871_v44, %v4337_v38  ;;  %v4821_v28 = vld [vmem:[%s7853_s1 + $0x174] sm:$0xf]  ;;  %v4103_v44 = vld [vmem:[%s7853_s1 + $0x128] sm:$0xf] }
 0x1bd   :  { %3122 = vmatpush.bf16.msra.mxu1 %v4100_v12  ;;  %3091 = vmatmul.bf16.vlgmr.msrb.gmra.mxu2 %v6589_v5  ;;  %v4360_v12 = vor.u32 %v4876_v39, %v4357_v52  ;;  %v2745_v39 = vpack.c.b16 %v2575_v41, %v2575_v41  ;;  %v4140_v52 = vor.u32 %v4821_v28, %v4137_v46  ;;  %v4929_v28 = vld [vmem:[%s7853_s1 + $0x4d0] sm:$0xf0]  ;;  %v4804_v46 = vld [vmem:[%s7853_s1 + $0xe8] sm:$0xf0] }
 0x1be   :  { %3135 = vmatpush.bf16.msra.mxu2 %v4260_v10  ;;  %3104 = vmatmul.bf16.vlgmr.msrb.gmra.mxu3 %v6612_v24  ;;  %v1921_v10 = vadd.f32 %v1920_v16, %v6716_v36  ;;  %v1935_v62 = vpop.f32.mrf.mxu1  ;;  %v4826_v36 = vld [vmem:[%s7853_s1 + $0x19c] sm:$0xf] }
 0x1bf   :  { %3148 = vmatpush.bf16.msra.mxu3 %v4420_v26  ;;  %v1959_v26 = vpop.f32.mrf.mxu3  ;;  %v4160_v53 = vor.u32 %v4826_v36, %v4157_v61  ;;  %v4814_v16 = vld [vmem:[%s7853_s1 + $0x138] sm:$0xf0]  ;;  %v2922_v38 = vand.u32 %v2745_v39, %v5246_v48  ;;  %v4583_v36 = vld [vmem:[%s7853_s1 + $0x4e8] sm:$0xf] }
 0x1c0   :  { %3063 = vmatpush.bf16.msrb.mxu0 %v3976_v45  ;;  %v4020_v45 = vor.u32 %v4791_v17, %v4017_v21  ;;  %v1934_v51 = vadd.f32 %v1933_v30, %v1921_v10  ;;  %v4297_v30 = vld [vmem:[%s7853_s1 + $0x2c4] sm:$0xf0]  ;;  %v4117_v21 = vld [vmem:[%s7853_s1 + $0x15c] sm:$0xf0]  ;;  %v4934_v61 = vld [vmem:[%s7853_s1 + $0x4f8] sm:$0xf0] }
 0x1c1   :  { %3123 = vmatpush.bf16.msra.mxu1 %v4080_v11  ;;  %v3997_v11 = vld [vmem:[%s7853_s1 + $0x6c] sm:$0xf0]  ;;  %v4300_v63 = vor.u32 %v4861_v27, %v4297_v30  ;;  %v4120_v50 = vor.u32 %v4816_v40, %v4117_v21  ;;  %v4584_v41 = vor.u32 %v4934_v61, %v4583_v36  ;;  %v4223_v27 = vld [vmem:[%s7853_s1 + $0x218] sm:$0xf]  ;;  %v4423_v30 = vld [vmem:[%s7853_s1 + $0x3a8] sm:$0xf] }
 0x1c2   :  { %3136 = vmatpush.bf16.msra.mxu2 %v4240_v13  ;;  %v4000_v2 = vor.u32 %v4786_v31, %v3997_v11  ;;  %v4916_v13 = vld [vmem:[%s7853_s1 + $0x46c] sm:$0xf]  ;;  %v1947_v49 = vadd.f32 %v1946_v32, %v1934_v51  ;;  %v4263_v32 = vld [vmem:[%s7853_s1 + $0x268] sm:$0xf]  ;;  %v4104_v51 = vor.u32 %v4814_v16, %v4103_v44  ;;  %v4543_v40 = vld [vmem:[%s7853_s1 + $0x498] sm:$0xf] }
 0x1c3   :  { %3149 = vmatpush.bf16.msra.mxu3 %v4400_v19  ;;  %v4781_v19 = vld [vmem:[%s7853_s1 + $0x34] sm:$0xf]  ;;  %v4520_v6 = vor.u32 %v4916_v13, %v4517_v42  ;;  %v4457_v31 = vld [vmem:[%s7853_s1 + $0x404] sm:$0xf0]  ;;  %v4936_v11 = vld [vmem:[%s7853_s1 + $0x50c] sm:$0xf] }
 0x1c4   :  { %3064 = vmatpush.bf16.msrb.mxu0 %v3956_v1  ;;  %v4866_v1 = vld [vmem:[%s7853_s1 + $0x2dc] sm:$0xf]  ;;  %v1960_v4 = vadd.f32 %v1959_v26, %v1947_v49  ;;  %v1922_v47 = vpop.f32.mrf.mxu0  ;;  %v4480_v26 = vor.u32 %v4906_v25, %v4477_v34  ;;  %v4849_v13 = vld [vmem:[%s7853_s1 + $0x250] sm:$0xf0]  ;;  %v4460_v49 = vor.u32 %v4901_v9, %v4457_v31  ;;  %v4203_v21 = vld [vmem:[%s7853_s1 + $0x1f0] sm:$0xf] }
 0x1c5   :  { %3124 = vmatpush.bf16.msra.mxu1 %v4060_v15  ;;  %v3977_v15 = vld [vmem:[%s7853_s1 + $0x44] sm:$0xf0]  ;;  %v4844_v47 = vld [vmem:[%s7853_s1 + $0x228] sm:$0xf0]  ;;  %v4794_v9 = vld [vmem:[%s7853_s1 + $0x98] sm:$0xf0] }
 0x1c6   :  { %3137 = vmatpush.bf16.msra.mxu2 %v4220_v18  ;;  %v4911_v18 = vld [vmem:[%s7853_s1 + $0x444] sm:$0xf]  ;;  %v4023_v16 = vld [vmem:[%s7853_s1 + $0x88] sm:$0xf] }
 0x1c7   :  { %3065 = vmatmul.bf16.vlgmr.msrb.gmra.mxu0 %v6582_v56  ;;  %3150 = vmatpush.bf16.msra.mxu3 %v4380_v35  ;;  %v4497_v35 = vld [vmem:[%s7853_s1 + $0x454] sm:$0xf0]  ;;  %v4024_v36 = vor.u32 %v4794_v9, %v4023_v16  ;;  %v4123_v16 = vld [vmem:[%s7853_s1 + $0x150] sm:$0xf] }
 0x1c8   :  { %3115 = vmatpush.bf16.msra.mxu0 %v2919_v14  ;;  %v4317_v14 = vld [vmem:[%s7853_s1 + $0x2ec] sm:$0xf0]  ;;  %v4500_v17 = vor.u32 %v4911_v18, %v4497_v35  ;;  %v4894_v18 = vld [vmem:[%s7853_s1 + $0x3b8] sm:$0xf0] }
 0x1c9   :  { %3125 = vmatpush.bf16.msra.mxu1 %v4040_v43  ;;  %v4320_v20 = vor.u32 %v4866_v1, %v4317_v14  ;;  %v1961_v43 = vpop.f32.mrf.mxu3  ;;  %v4243_v14 = vld [vmem:[%s7853_s1 + $0x240] sm:$0xf] }
 0x1ca   :  { %3138 = vmatpush.bf16.msra.mxu2 %v4200_v29  ;;  %v4856_v29 = vld [vmem:[%s7853_s1 + $0x28c] sm:$0xf]  ;;  %v4224_v43 = vor.u32 %v4844_v47, %v4223_v27  ;;  %v3983_v47 = vld [vmem:[%s7853_s1 + $0x38] sm:$0xf] }
 0x1cb   :  { %3151 = vmatpush.bf16.msra.mxu3 %v4360_v12  ;;  %v4277_v12 = vld [vmem:[%s7853_s1 + $0x29c] sm:$0xf0] }
 0x1cc   :  { %3116 = vmatpush.bf16.msra.mxu0 %v4596_v37  ;;  %v3980_v37 = vor.u32 %v4781_v19, %v3977_v15  ;;  %v4280_v10 = vor.u32 %v4856_v29, %v4277_v12  ;;  %v1972_v62 = vpop.f32.mrf.mxu0  ;;  %v4896_v19 = vld [vmem:[%s7853_s1 + $0x3cc] sm:$0xf]  ;;  %v4437_v15 = vld [vmem:[%s7853_s1 + $0x3dc] sm:$0xf0]  ;;  %v4839_v29 = vld [vmem:[%s7853_s1 + $0x200] sm:$0xf0] }
 0x1cd   :  { %3126 = vmatpush.bf16.msra.mxu1 %v4020_v45  ;;  %v4854_v45 = vld [vmem:[%s7853_s1 + $0x278] sm:$0xf0]  ;;  %v7633_v1 = vadd.f32 %v1972_v62, %v1960_v4  ;;  %v4244_v4 = vor.u32 %v4849_v13, %v4243_v14  ;;  %v4403_v12 = vld [vmem:[%s7853_s1 + $0x380] sm:$0xf]  ;;  %v4204_v44 = vor.u32 %v4839_v29, %v4203_v21  ;;  %v4383_v62 = vld [vmem:[%s7853_s1 + $0x358] sm:$0xf] }
 0x1ce   :  { %3139 = vmatpush.bf16.msra.mxu2 %v4180_v60  ;;  %v4597_v60 = vld [vmem:[%s7853_s1 + $0x51c] sm:$0xf0]  ;;  %v4503_v14 = vld [vmem:[%s7853_s1 + $0x448] sm:$0xf]  ;;  %v4914_v13 = vld [vmem:[%s7853_s1 + $0x458] sm:$0xf0] }
 0x1cf   :  { %3152 = vmatpush.bf16.msra.mxu3 %v4340_v59  ;;  %v4264_v59 = vor.u32 %v4854_v45, %v4263_v32  ;;  %v4600_v42 = vor.u32 %v4936_v11, %v4597_v60  ;;  %v4523_v32 = vld [vmem:[%s7853_s1 + $0x470] sm:$0xf]  ;;  %v4919_v45 = vld [vmem:[%s7853_s1 + $0x480] sm:$0xf0] }
 0x1d0   :  { %3161 = vmatpush.bf16.msrb.mxu0 %v4580_v22  ;;  %v1948_v22 = vpop.f32.mrf.mxu2 }
 0x1d1   :  { %3127 = vmatpush.bf16.msra.mxu1 %v4000_v2  ;;  %v4809_v2 = vld [vmem:[%s7853_s1 + $0x110] sm:$0xf0]  ;;  %v4440_v22 = vor.u32 %v4896_v19, %v4437_v15  ;;  %v4163_v19 = vld [vmem:[%s7853_s1 + $0x1a0] sm:$0xf] }
 0x1d2   :  { %3140 = vmatpush.bf16.msra.mxu2 %v4160_v53  ;;  %v4829_v15 = vld [vmem:[%s7853_s1 + $0x1b0] sm:$0xf0] }
 0x1d3   :  { %3153 = vmatpush.bf16.msra.mxu3 %v4320_v20  ;;  %v4063_v20 = vld [vmem:[%s7853_s1 + $0xd8] sm:$0xf]  ;;  %v4164_v27 = vor.u32 %v4829_v15, %v4163_v19 }
 0x1d4   :  { %3162 = vmatpush.bf16.msrb.mxu0 %v4560_v33  ;;  %v3960_v33 = vor.u32 %v4776_v7, %v3957_v55  ;;  %v1974_v55 = vpop.f32.mrf.mxu0  ;;  %v4064_v39 = vor.u32 %v4804_v46, %v4063_v20  ;;  %v477_v20 = vld [vmem:[%s7853_s1 + $0x538] sm:$0x1] }
 0x1d5   :  { %3128 = vmatpush.bf16.msra.mxu1 %v3980_v37  ;;  %v1985_v37 = vpop.f32.mrf.mxu1 }
 0x1d6   :  { %3141 = vmatpush.bf16.msra.mxu2 %v4140_v52  ;;  %v1986_v35 = vadd.f32 %v1985_v37, %v6798_v3  ;;  %v4043_v52 = vld [vmem:[%s7853_s1 + $0xb0] sm:$0xf]  ;;  %v4924_v3 = vld [vmem:[%s7853_s1 + $0x4a8] sm:$0xf0]  ;;  %v4483_v37 = vld [vmem:[%s7853_s1 + $0x420] sm:$0xf] }
 0x1d7   :  { %4607 = vmatmul.msk.bf16.vlgmr.msra.gmra.mxu0 %vm1349_vm4, %v6619_v54  ;;  %3154 = vmatpush.bf16.msra.mxu3 %v4300_v63  ;;  %v4424_v63 = vor.u32 %v4894_v18, %v4423_v30  ;;  %v4544_v25 = vor.u32 %v4924_v3, %v4543_v40  ;;  %v4909_v30 = vld [vmem:[%s7853_s1 + $0x430] sm:$0xf0]  ;;  %v4874_v40 = vld [vmem:[%s7853_s1 + $0x318] sm:$0xf0] }
 0x1d8   :  { %3163 = vmatpush.bf16.msrb.mxu0 %v4540_v0  ;;  %v4083_v0 = vld [vmem:[%s7853_s1 + $0x100] sm:$0xf] }
 0x1d9   :  { %3129 = vmatpush.bf16.msra.mxu1 %v3960_v33  ;;  %v4084_v53 = vor.u32 %v4809_v2, %v4083_v0  ;;  %v4889_v33 = vld [vmem:[%s7853_s1 + $0x390] sm:$0xf0]  ;;  %v2011_v60 = vpop.f32.mrf.mxu3  ;;  %v4003_v2 = vld [vmem:[%s7853_s1 + $0x60] sm:$0xf] }
 0x1da   :  { %3142 = vmatpush.bf16.msra.mxu2 %v4120_v50  ;;  %v4404_v50 = vor.u32 %v4889_v33, %v4403_v12  ;;  %v3963_v12 = vld [vmem:[%s7853_s1 + $0x10] sm:$0xf]  ;;  %v4463_v33 = vld [vmem:[%s7853_s1 + $0x3f8] sm:$0xf] }
 0x1db   :  { %3155 = vmatpush.bf16.msra.mxu3 %v4280_v10  ;;  %v4183_v10 = vld [vmem:[%s7853_s1 + $0x1c8] sm:$0xf] }
 0x1dc   :  { %3164 = vmatpush.bf16.msrb.mxu0 %v4520_v6  ;;  %v4563_v6 = vld [vmem:[%s7853_s1 + $0x4c0] sm:$0xf]  ;;  %3130 = vmatmul.bf16.vlgmr.msra.gmra.mxu1 %v6582_v56 }
 0x1dd   :  { %3180 = vmatpush.bf16.msrb.mxu1 %v2922_v38  ;;  %3143 = vmatmul.bf16.vlgmr.msra.gmra.mxu2 %v6587_v58  ;;  %v4564_v7 = vor.u32 %v4929_v28, %v4563_v6  ;;  %v1998_v38 = vpop.f32.mrf.mxu2  ;;  %v1987_v11 = vpop.f32.mrf.mxu1  ;;  %v4504_v28 = vor.u32 %v4914_v13, %v4503_v14 }
 0x1de   :  { %3187 = vmatpush.bf16.msrb.mxu2 %v4104_v51  ;;  %3156 = vmatmul.bf16.vlgmr.msra.gmra.mxu3 %v6589_v5  ;;  %v1999_v31 = vadd.f32 %v1998_v38, %v1986_v35  ;;  %v4884_v51 = vld [vmem:[%s7853_s1 + $0x368] sm:$0xf0]  ;;  %v4323_v38 = vld [vmem:[%s7853_s1 + $0x2e0] sm:$0xf] }
 0x1df   :  { %3200 = vmatpush.bf16.msrb.mxu3 %v4264_v59  ;;  %v4524_v59 = vor.u32 %v4919_v45, %v4523_v32  ;;  %v4784_v35 = vld [vmem:[%s7853_s1 + $0x48] sm:$0xf0]  ;;  %v4819_v32 = vld [vmem:[%s7853_s1 + $0x160] sm:$0xf0] }
 0x1e0   :  { %3165 = vmatpush.bf16.msrb.mxu0 %v4500_v17  ;;  %v4799_v17 = vld [vmem:[%s7853_s1 + $0xc0] sm:$0xf0]  ;;  %v2012_v0 = vadd.f32 %v2011_v60, %v1999_v31  ;;  %v3984_v21 = vor.u32 %v4784_v35, %v3983_v47  ;;  %v4124_v31 = vor.u32 %v4819_v32, %v4123_v16 }
 0x1e1   :  { %3181 = vmatpush.bf16.msrb.mxu1 %v4600_v42  ;;  %v4044_v34 = vor.u32 %v4799_v17, %v4043_v52  ;;  %v4384_v42 = vor.u32 %v4884_v51, %v4383_v62  ;;  %v4343_v52 = vld [vmem:[%s7853_s1 + $0x308] sm:$0xf]  ;;  %v2013_v3 = vpop.f32.mrf.mxu3  ;;  %v4484_v17 = vor.u32 %v4909_v30, %v4483_v37  ;;  %v4303_v62 = vld [vmem:[%s7853_s1 + $0x2b8] sm:$0xf]  ;;  %v4443_v51 = vld [vmem:[%s7853_s1 + $0x3d0] sm:$0xf] }
 0x1e2   :  { %3188 = vmatpush.bf16.msrb.mxu2 %v4084_v53  ;;  %v4363_v53 = vld [vmem:[%s7853_s1 + $0x330] sm:$0xf] }
 0x1e3   :  { %3201 = vmatpush.bf16.msrb.mxu3 %v4244_v4  ;;  %v4879_v4 = vld [vmem:[%s7853_s1 + $0x340] sm:$0xf0] }
 0x1e4   :  { %3166 = vmatpush.bf16.msrb.mxu0 %v4480_v26  ;;  %v4834_v26 = vld [vmem:[%s7853_s1 + $0x1d8] sm:$0xf0]  ;;  %v4364_v18 = vor.u32 %v4879_v4, %v4363_v53 }
 0x1e5   :  { %3226 = vmatpush.bf16.msra.mxu1 %v4584_v41  ;;  %v4184_v61 = vor.u32 %v4834_v26, %v4183_v10  ;;  %v2024_v41 = vpop.f32.mrf.mxu0  ;;  %v2000_v55 = vpop.f32.mrf.mxu2 }
 0x1e6   :  { %3189 = vmatpush.bf16.msrb.mxu2 %v4064_v39  ;;  %v2025_v6 = vadd.f32 %v2024_v41, %v2012_v0  ;;  %v2576_v39 = vunpack.c.l.b16 %v477_v20  ;;  %v4864_v0 = vld [vmem:[%s7853_s1 + $0x2c8] sm:$0xf0] }
 0x1e7   :  { %3202 = vmatpush.bf16.msrb.mxu3 %v4224_v43  ;;  %v2037_v43 = vpop.f32.mrf.mxu1  ;;  %v4304_v14 = vor.u32 %v4864_v0, %v4303_v62 }
 0x1e8   :  { %3167 = vmatpush.bf16.msrb.mxu0 %v4460_v49  ;;  %v4789_v49 = vld [vmem:[%s7853_s1 + $0x70] sm:$0xf0]  ;;  %v2746_v45 = vpack.c.b16 %v2576_v39, %v2576_v39 }
 0x1e9   :  { %3227 = vmatpush.bf16.msra.mxu1 %v4564_v7  ;;  %v4004_v46 = vor.u32 %v4789_v49, %v4003_v2  ;;  %v4824_v7 = vld [vmem:[%s7853_s1 + $0x188] sm:$0xf0]  ;;  %v4859_v49 = vld [vmem:[%s7853_s1 + $0x2a0] sm:$0xf0] }
 0x1ea   :  { %3190 = vmatpush.bf16.msrb.mxu2 %v4044_v34  ;;  %v4344_v34 = vor.u32 %v4874_v40, %v4343_v52  ;;  %v2925_v60 = vand.u32 %v2746_v45, %v5246_v48  ;;  %v4603_v48 = vld [vmem:[%s7853_s1 + $0x510] sm:$0xf] }
 0x1eb   :  { %3203 = vmatpush.bf16.msrb.mxu3 %v4204_v44  ;;  %v4779_v44 = vld [vmem:[%s7853_s1 + $0x20] sm:$0xf0] }
 0x1ec   :  { %3168 = vmatpush.bf16.msrb.mxu0 %v4440_v22  ;;  %4608 = vmatmul.msk.bf16.vlgmr.msrb.gmra.mxu1 %vm1349_vm4, %v6619_v54  ;;  %v4143_v22 = vld [vmem:[%s7853_s1 + $0x178] sm:$0xf]  ;;  %v3964_v26 = vor.u32 %v4779_v44, %v3963_v12 }
 0x1ed   :  { %3228 = vmatpush.bf16.msra.mxu1 %v4544_v25  ;;  %v4144_v29 = vor.u32 %v4824_v7, %v4143_v22  ;;  %v4904_v25 = vld [vmem:[%s7853_s1 + $0x408] sm:$0xf0]  ;;  %v2026_v9 = vpop.f32.mrf.mxu0 }
 0x1ee   :  { %3191 = vmatpush.bf16.msrb.mxu2 %v4024_v36  ;;  %v4464_v10 = vor.u32 %v4904_v25, %v4463_v33  ;;  %v4939_v36 = vld [vmem:[%s7853_s1 + $0x520] sm:$0xf0] }
 0x1ef   :  { %3169 = vmatmul.bf16.vlgmr.msrb.gmra.mxu0 %v6612_v24  ;;  %3204 = vmatpush.bf16.msrb.mxu3 %v4184_v61  ;;  %v2039_v61 = vpop.f32.mrf.mxu1  ;;  %v4604_v13 = vor.u32 %v4939_v36, %v4603_v48 }
 0x1f0   :  { %3213 = vmatpush.bf16.msra.mxu0 %v4424_v63  ;;  %v7780_v63 = vadd.f32 %v2037_v43, %v2025_v6 }
 0x1f1   :  { %3229 = vmatpush.bf16.msra.mxu1 %v4524_v59  ;;  %v4899_v59 = vld [vmem:[%s7853_s1 + $0x3e0] sm:$0xf0] }
 0x1f2   :  { %3192 = vmatpush.bf16.msrb.mxu2 %v4004_v46  ;;  %v4444_v2 = vor.u32 %v4899_v59, %v4443_v51 }
 0x1f3   :  { %3205 = vmatpush.bf16.msrb.mxu3 %v4164_v27 }
 0x1f4   :  { %3214 = vmatpush.bf16.msra.mxu0 %v4404_v50  ;;  %v4869_v50 = vld [vmem:[%s7853_s1 + $0x2f0] sm:$0xf0] }
 0x1f5   :  { %3230 = vmatpush.bf16.msra.mxu1 %v4504_v28  ;;  %v4324_v11 = vor.u32 %v4869_v50, %v4323_v38 }
 0x1f6   :  { %3193 = vmatpush.bf16.msrb.mxu2 %v3984_v21 }
 0x1f7   :  { %3206 = vmatpush.bf16.msrb.mxu3 %v4144_v29 }
 0x1f8   :  { %3215 = vmatpush.bf16.msra.mxu0 %v4384_v42  ;;  %v4283_v42 = vld [vmem:[%s7853_s1 + $0x290] sm:$0xf]  ;;  %v2936_v41 = vpop.f32.mrf.mxu2 }
 0x1f9   :  { %3231 = vmatpush.bf16.msra.mxu1 %v4484_v17  ;;  %v4284_v19 = vor.u32 %v4859_v49, %v4283_v42  ;;  %v2975_v15 = vpop.f32.mrf.mxu1  ;;  %v2949_v53 = vpop.f32.mrf.mxu3 }
 0x1fa   :  { %3194 = vmatpush.bf16.msrb.mxu2 %v3964_v26  ;;  %v2950_v4 = vadd.f32 %v2949_v53, %v2936_v41 }
 0x1fb   :  { %3207 = vmatpush.bf16.msrb.mxu3 %v4124_v31 }
 0x1fc   :  { %3216 = vmatpush.bf16.msra.mxu0 %v4364_v18 }
 0x1fd   :  { %3232 = vmatpush.bf16.msra.mxu1 %v4464_v10  ;;  %3195 = vmatmul.bf16.vlgmr.msrb.gmra.mxu2 %v6582_v56 }
 0x1fe   :  { %3245 = vmatpush.bf16.msra.mxu2 %v2925_v60  ;;  %3208 = vmatmul.bf16.vlgmr.msrb.gmra.mxu3 %v6587_v58 }
 0x200   :  { %3217 = vmatpush.bf16.msra.mxu0 %v4344_v34  ;;  %v2938_v56 = vpop.f32.mrf.mxu2 }
 0x201   :  { %3233 = vmatpush.bf16.msra.mxu1 %v4444_v2  ;;  %v2977_v28 = vpop.f32.mrf.mxu1  ;;  %v2951_v58 = vpop.f32.mrf.mxu3 }
 0x202   :  { %3246 = vmatpush.bf16.msra.mxu2 %v4604_v13 }
 0x204   :  { %3218 = vmatpush.bf16.msra.mxu0 %v4324_v11  ;;  %3234 = vmatmul.bf16.vlgmr.msra.gmra.mxu1 %v6612_v24  ;;  %v2962_v20 = vpop.f32.mrf.mxu0 }
 0x205   :  { %v2963_v6 = vadd.f32 %v2962_v20, %v2950_v4 }
 0x207   :  { %v2976_v46 = vadd.f32 %v2975_v15, %v2963_v6 }
 0x208   :  { %3219 = vmatpush.bf16.msra.mxu0 %v4304_v14  ;;  %v2988_v47 = vpop.f32.mrf.mxu2 }
 0x209   :  { %v2989_v37 = vadd.f32 %v2988_v47, %v2976_v46 }
 0x20b   :  { %v3252_v24 = vadd.f32 %v2989_v37, %v6937_v57 }
 0x20c   :  { %3220 = vmatpush.bf16.msra.mxu0 %v4284_v19  ;;  %v2964_v27 = vpop.f32.mrf.mxu0 }
 0x20d   :  { %4609 = vmatmul.msk.bf16.vlgmr.msra.gmra.mxu2 %vm1349_vm4, %v6619_v54 }
 0x20f   :  { %3221 = vmatmul.bf16.vlgmr.msra.gmra.mxu0 %v6589_v5 }
 0x210   :  { %v2990_v30 = vpop.f32.mrf.mxu2 }
 0x219   :  { %v3027_v18 = vpop.f32.mrf.mxu1  ;;  %v3001_v35 = vpop.f32.mrf.mxu3 }
 0x220   :  { %v3040_v7 = vpop.f32.mrf.mxu2 }
 0x221   :  { %v3029_v55 = vpop.f32.mrf.mxu1  ;;  %v3003_v43 = vpop.f32.mrf.mxu3 }
 0x224   :  { %v3014_v22 = vpop.f32.mrf.mxu0 }
 0x225   :  { %v3015_v5 = vadd.f32 %v3014_v22, %v3001_v35 }
 0x227   :  { %v3028_v39 = vadd.f32 %v3027_v18, %v3015_v5 }
 0x228   :  { %v3042_v3 = vpop.f32.mrf.mxu2 }
 0x229   :  { %v3041_v52 = vadd.f32 %v3040_v7, %v3028_v39  ;;  %v3053_v17 = vpop.f32.mrf.mxu3 }
 0x22b   :  { %v3054_v54 = vadd.f32 %v3053_v17, %v3041_v52 }
 0x22c   :  { %v3016_v40 = vpop.f32.mrf.mxu0 }
 0x22d   :  { %v3253_v21 = vadd.f32 %v3054_v54, %v7192_v23 }
 0x22f   :  { %v3261_v29 = vrot.slane %v3253_v21, 6 }
 0x231   :  { %v3264_v12 = vsel %vm47_vm1, %v3252_v24, %v3261_v29  ;;  %v3055_v57 = vpop.f32.mrf.mxu3 }
 0x239   :  { %v3079_v33 = vpop.f32.mrf.mxu1 }
 0x240   :  { %v3092_v34 = vpop.f32.mrf.mxu2 }
 0x241   :  { %v3105_v44 = vpop.f32.mrf.mxu3  ;;  %v3081_v16 = vpop.f32.mrf.mxu1 }
 0x244   :  { %v3066_v25 = vpop.f32.mrf.mxu0 }
 0x245   :  { %v3080_v26 = vadd.f32 %v3079_v33, %v3066_v25 }
 0x247   :  { %v3093_v31 = vadd.f32 %v3092_v34, %v3080_v26 }
 0x248   :  { %v3094_v45 = vpop.f32.mrf.mxu2 }
 0x249   :  { %v3107_v38 = vpop.f32.mrf.mxu3  ;;  %v3106_v51 = vadd.f32 %v3105_v44, %v3093_v31 }
 0x24c   :  { %v3068_v32 = vpop.f32.mrf.mxu0 }
 0x254   :  { %v3118_v50 = vpop.f32.mrf.mxu0 }
 0x255   :  { %v3119_v48 = vadd.f32 %v3118_v50, %v3106_v51 }
 0x257   :  { %v3254_v13 = vadd.f32 %v3119_v48, %v7395_v8 }
 0x259   :  { %v3131_v10 = vpop.f32.mrf.mxu1  ;;  %v3262_v15 = vrot.slane %v3254_v13, 4 }
 0x25c   :  { %v3120_v9 = vpop.f32.mrf.mxu0 }
 0x260   :  { %v3144_v11 = vpop.f32.mrf.mxu2 }
 0x261   :  { %v3145_v60 = vadd.f32 %v3144_v11, %v3131_v10  ;;  %v3157_v23 = vpop.f32.mrf.mxu3  ;;  %v3133_v62 = vpop.f32.mrf.mxu1 }
 0x263   :  { %v3158_v59 = vadd.f32 %v3157_v23, %v3145_v60 }
 0x268   :  { %v3146_v61 = vpop.f32.mrf.mxu2 }
 0x269   :  { %v3159_v2 = vpop.f32.mrf.mxu3  ;;  %v3183_v14 = vpop.f32.mrf.mxu1 }
 0x26c   :  { %v3170_v0 = vpop.f32.mrf.mxu0 }
 0x26d   :  { %v3171_v36 = vadd.f32 %v3170_v0, %v3158_v59 }
 0x26f   :  { %v3184_v42 = vadd.f32 %v3183_v14, %v3171_v36 }
 0x271   :  { %v3255_v19 = vadd.f32 %v3184_v42, %v7633_v1  ;;  %v3185_v20 = vpop.f32.mrf.mxu1 }
 0x273   :  { %v3263_v41 = vrot.slane %v3255_v19, 2 }
 0x274   :  { %v3172_v49 = vpop.f32.mrf.mxu0 }
 0x275   :  { %v3265_v53 = vsel %vm49_vm2, %v3262_v15, %v3263_v41 }
 0x276   :  { %v3266_v4 = vsel %vm51_vm3, %v3264_v12, %v3265_v53 }
 0x277   :  { %3268 = vst [vmem:[%s7854_s3] sm:$0xff] %v3266_v4 }
 0x280   :  { %v3196_v28 = vpop.f32.mrf.mxu2 }
 0x281   :  { %v3235_v6 = vpop.f32.mrf.mxu1  ;;  %v3209_v46 = vpop.f32.mrf.mxu3 }
 0x282   :  { %v3210_v58 = vadd.f32 %v3209_v46, %v3196_v28 }
 0x288   :  { %v3198_v27 = vpop.f32.mrf.mxu2 }
 0x289   :  { %v3237_v8 = vpop.f32.mrf.mxu1  ;;  %v3211_v47 = vpop.f32.mrf.mxu3 }
 0x28c   :  { %v3222_v56 = vpop.f32.mrf.mxu0 }
 0x28d   :  { %v3223_v1 = vadd.f32 %v3222_v56, %v3210_v58 }
 0x28f   :  { %v3236_v24 = vadd.f32 %v3235_v6, %v3223_v1 }
 0x290   :  { %v3248_v30 = vpop.f32.mrf.mxu2 }
 0x291   :  { %v3249_v18 = vadd.f32 %v3248_v30, %v3236_v24 }
 0x293   :  { %v3256_v35 = vadd.f32 %v3249_v18, %v7780_v63 }
 0x294   :  { %v3224_v37 = vpop.f32.mrf.mxu0 }
 0x295   :  { %3270 = vst.msk [vmem:[%s7854_s3 + $0x8] sm:$0x3] %vm3269_vm5, %v3256_v35 }
 0x298   :  { %v3250_v22 = vpop.f32.mrf.mxu2 }

</bundles_post_ra>
